<compile_context>
chip_gen: v7x
topology: tpu7x:2x2x1
jax: 0.10.0
libtpu: 0.0.40
codegen_flags: <defaults>
</compile_context>

<pallas_src>
import dataclasses
import functools

import jax
import jax.numpy as jnp
from jax.experimental import pallas as pl
from jax.experimental.pallas import tpu as pltpu

K_TIME = 5        # temporal kernel size of every conv stage
C_IN_PAD = 128    # lane-padded input / hidden channel width (stages 1-3 outputs)
C4_PAD = 256      # lane-padded stage-4 output width (200 -> 256)
NCLS_PAD = 128    # lane-padded logits width


# ------------------------------ kernel -------------------------------------- #

def _elu(x):
    # torch.nn.ELU(alpha=1.0); exp only on the branch that is actually used.
    return jnp.where(x > 0.0, x, jnp.exp(jnp.minimum(x, 0.0)) - 1.0)


def _conv_block(h, w_ref, b_ref, l_rows):
    """Valid temporal conv (im2col -> ONE MXU matmul) + folded-BN bias + ELU + MaxPool(2).

    h: (rows, c_in) f32 with Bblk batch segments stacked along rows; rows >= l_rows + 4.
    Rows beyond each segment's valid prefix are finite garbage and never feed a
    valid output window (segment lengths are chosen so windows stay in-segment).
    """
    slab = jnp.concatenate([h[j:j + l_rows, :] for j in range(K_TIME)], axis=1)
    y = jnp.dot(slab.astype(w_ref.dtype), w_ref[...],
                preferred_element_type=jnp.float32) + b_ref[...]
    y = _elu(y)
    c_out = y.shape[1]
    # MaxPool((2,1)), floor mode: segments start at even rows, so flat pairing is safe.
    return jnp.max(y.reshape(l_rows // 2, 2, c_out), axis=1)


def deepconvnet_kernel(x_ref, w1_ref, b1_ref, w2_ref, b2_ref, w3_ref, b3_ref,
                       w4_ref, b4_ref, wd_ref, bd_ref, g0_ref, o_ref,
                       *, bblk, segs, t4):
    # One block of bblk batch elements, fully fused; everything stays in VMEM/vregs.
    h = x_ref[...].astype(jnp.float32)                       # (bblk*segs[0], 128)
    h = _conv_block(h, w1_ref, b1_ref, bblk * segs[0] - 8)   # fused conv0+conv1 (+BN1)
    h = _conv_block(h, w2_ref, b2_ref, bblk * segs[1] - 8)
    h = _conv_block(h, w3_ref, b3_ref, bblk * segs[2] - 8)
    h = _conv_block(h, w4_ref, b4_ref, bblk * segs[3] - 8)   # (bblk*segs[4]-4, 256) f32

    # Dense over the (time, feature) flatten as a single contraction (K = t4*256):
    # acc[r] = sum_t h[r+t] @ wd[t]; each batch element's logits sit at row b*seg5.
    seg5 = segs[4]
    rsel = (bblk - 1) * seg5 + 1
    if t4 > 1:
        slab = jnp.concatenate([h[t:t + rsel, :] for t in range(t4)], axis=1)
    else:
        slab = h[0:rsel, :]
    acc = jnp.dot(slab.astype(wd_ref.dtype), wd_ref[...],
                  preferred_element_type=jnp.float32)        # (rsel, NCLS_PAD)
    # Tiny precomputed 0/1 matmul selects row b*seg5 for each batch element.
    logits = jnp.dot(g0_ref[...], acc,
                     preferred_element_type=jnp.float32) + bd_ref[...]  # (bblk, NCLS_PAD)

    # LogSoftmax(dim=1); padded class columns carry a -1e30 bias -> exp() == 0.
    m = jnp.max(logits, axis=1, keepdims=True)
    z = logits - m
    o_ref[0] = z - jnp.log(jnp.sum(jnp.exp(z), axis=1, keepdims=True))


# ----------------------------- wrapper -------------------------------------- #

@dataclasses.dataclass(frozen=True)
class DCNConfig:
    B: int
    T: int
    c_eeg: int
    n_classes: int
    bblk: int
    b_pad: int
    seg1: int
    segs: tuple
    t4: int


def make_config(B, T, c_eeg, n_classes, bblk=None):
    if bblk is None:
        bblk = min(B, 8)          # batch elements stacked into the matmul M dimension
    b_pad = -(-B // bblk) * bblk
    seg1 = -(-(T + 4) // 16) * 16  # per-batch segment length, multiple of 16, >= T+4
    segs = (seg1, seg1 // 2, seg1 // 4, seg1 // 8, seg1 // 16)
    v = T
    for _ in range(4):
        assert v >= K_TIME, "time dimension too small for DeepConvNet"
        v = (v - (K_TIME - 1)) // 2
    assert v >= 1
    return DCNConfig(B=B, T=T, c_eeg=c_eeg, n_classes=n_classes, bblk=bblk,
                     b_pad=b_pad, seg1=seg1, segs=segs, t4=v)


def _const_spec(a):
    nd = a.ndim
    return pl.BlockSpec(a.shape, lambda i, _nd=nd: (0,) * _nd)


def _cost_estimate(cfg, prep):
    grid = cfg.b_pad // cfg.bblk
    couts = (C_IN_PAD, C_IN_PAD, C_IN_PAD, C4_PAD)
    flops = 0
    trans = 0
    for s in range(4):
        l = cfg.bblk * cfg.segs[s] - 8
        flops += 2 * l * (K_TIME * C_IN_PAD) * couts[s]
        trans += l * couts[s]
    rsel = (cfg.bblk - 1) * cfg.segs[4] + 1
    flops += 2 * rsel * (cfg.t4 * C4_PAD) * NCLS_PAD + 2 * cfg.bblk * rsel * NCLS_PAD
    trans += cfg.bblk * NCLS_PAD
    weight_bytes = sum(int(a.size) * a.dtype.itemsize for a in prep)
    bytes_accessed = (cfg.b_pad * cfg.seg1 * C_IN_PAD * 2 + weight_bytes
                      + grid * cfg.bblk * NCLS_PAD * 4)
    return pl.CostEstimate(flops=int(grid * flops),
                           transcendentals=int(grid * trans),
                           bytes_accessed=int(bytes_accessed))


def run_deepconvnet(x, prep, cfg):
    """x: (B, time, EEG, 1) f32. Returns (B, n_classes) log-probabilities."""
    B = x.shape[0]
    xt = x[..., 0]
    if cfg.b_pad > B:
        xt = jnp.concatenate(
            [xt, jnp.zeros((cfg.b_pad - B,) + xt.shape[1:], xt.dtype)], axis=0)
    # zero-pad time to the segment length and EEG channels to a full lane tile
    xt = jnp.pad(xt, ((0, 0), (0, cfg.seg1 - cfg.T), (0, C_IN_PAD - cfg.c_eeg)))
    x_flat = xt.astype(jnp.bfloat16).reshape(cfg.b_pad * cfg.seg1, C_IN_PAD)

    grid = cfg.b_pad // cfg.bblk
    kernel = functools.partial(deepconvnet_kernel, bblk=cfg.bblk,
                               segs=cfg.segs, t4=cfg.t4)
    out = pl.pallas_call(
        kernel,
        out_shape=jax.ShapeDtypeStruct((grid, cfg.bblk, NCLS_PAD), jnp.float32),
        grid=(grid,),
        in_specs=[pl.BlockSpec((cfg.bblk * cfg.seg1, C_IN_PAD), lambda i: (i, 0))]
                 + [_const_spec(a) for a in prep],
        out_specs=pl.BlockSpec((1, cfg.bblk, NCLS_PAD), lambda i: (i, 0, 0)),
        compiler_params=pltpu.CompilerParams(dimension_semantics=("parallel",)),
        cost_estimate=_cost_estimate(cfg, prep),
    )(x_flat, *prep)
    return out.reshape(cfg.b_pad, NCLS_PAD)[:B, :cfg.n_classes]


# -------------------- parameter preparation (run once) ---------------------- #

def prepare_inference_params(p, cfg):
    """Fuse conv0+conv1, fold eval-mode BN, zero-pad to lane-dense shapes and lay
    weights out for im2col; also build the flattened dense weight and the 0/1
    row-selection matrix."""
    def fold_pad(w_kic, b_c, bn, cin_p, cout_p):
        scale, shift = bn                                    # (1, c_out) each
        w = w_kic * scale[0]                                 # BN scale -> weights
        b = b_c * scale[0] + shift[0]                        # conv bias + BN shift
        k, cin, cout = w.shape
        wp = jnp.zeros((k, cin_p, cout_p), jnp.float32).at[:, :cin, :cout].set(w)
        bp = jnp.zeros((1, cout_p), jnp.float32).at[0, :cout].set(b)
        return wp.reshape(k * cin_p, cout_p).astype(jnp.bfloat16), bp

    # conv0 (temporal, in=1) composed with conv1 (kernel (1, C_eeg), no bias):
    #   W_f[k, e, c] = sum_f w0[k, f] * w1[e, f, c];  b_f[c] = sum_{e,f} b0[f] * w1[e, f, c]
    w_f = jnp.einsum("kf,efc->kec", p["w0"], p["w1"])        # (K, C_eeg, 25)
    b_f = jnp.einsum("f,efc->c", p["b0"][0], p["w1"])        # (25,)
    w1e, b1e = fold_pad(w_f, b_f, p["bn1"], C_IN_PAD, C_IN_PAD)
    w2e, b2e = fold_pad(p["w2"], p["b2"][0], p["bn2"], C_IN_PAD, C_IN_PAD)
    w3e, b3e = fold_pad(p["w3"], p["b3"][0], p["bn3"], C_IN_PAD, C_IN_PAD)
    w4e, b4e = fold_pad(p["w4"], p["b4"][0], p["bn4"], C_IN_PAD, C4_PAD)

    # dense: torch flatten order is (time, feature); pad feature 200->256, class 4->128.
    c4 = p["w4"].shape[2]
    wd = p["w_dense"].reshape(cfg.t4, c4, cfg.n_classes)
    wdp = jnp.zeros((cfg.t4, C4_PAD, NCLS_PAD), jnp.float32)
    wdp = wdp.at[:, :c4, :cfg.n_classes].set(wd)
    wd2d = wdp.reshape(cfg.t4 * C4_PAD, NCLS_PAD).astype(jnp.bfloat16)
    bd = jnp.full((1, NCLS_PAD), -1e30, jnp.float32)
    bd = bd.at[0, :cfg.n_classes].set(p["b_dense"][0])

    # 0/1 matrix selecting each batch element's first (valid) last-stage row.
    seg5 = cfg.segs[4]
    rsel = (cfg.bblk - 1) * seg5 + 1
    g0 = jnp.zeros((cfg.bblk, rsel), jnp.float32)
    g0 = g0.at[jnp.arange(cfg.bblk), jnp.arange(cfg.bblk) * seg5].set(1.0)

    return (w1e, b1e, w2e, b2e, w3e, b3e, w4e, b4e, wd2d, bd, g0)


# ------------------------- parameters (synthetic) --------------------------- #

def _folded_bn(key, c):
    k1, k2, k3, k4 = jax.random.split(key, 4)
    gamma = 1.0 + 0.1 * jax.random.normal(k1, (c,))
    beta = 0.1 * jax.random.normal(k2, (c,))
    mean = 0.1 * jax.random.normal(k3, (c,))
    var = 1.0 + 0.1 * jax.random.uniform(k4, (c,))
    scale = gamma / jnp.sqrt(var + 1e-5)
    shift = beta - mean * scale
    return (scale.reshape(1, c).astype(jnp.float32),
            shift.reshape(1, c).astype(jnp.float32))


def init_params(key, c_eeg, dense_in, n_classes=4):
    ks = jax.random.split(key, 16)
    p = {}
    p["w0"] = (0.1 * jax.random.normal(ks[0], (K_TIME, 25))).astype(jnp.float32)
    p["b0"] = (0.01 * jax.random.normal(ks[1], (1, 25))).astype(jnp.float32)
    p["w1"] = (0.1 * jax.random.normal(ks[2], (c_eeg, 25, 25))).astype(jnp.float32)
    p["bn1"] = _folded_bn(ks[3], 25)
    p["w2"] = (0.1 * jax.random.normal(ks[4], (K_TIME, 25, 50))).astype(jnp.float32)
    p["b2"] = (0.01 * jax.random.normal(ks[5], (1, 50))).astype(jnp.float32)
    p["bn2"] = _folded_bn(ks[6], 50)
    p["w3"] = (0.1 * jax.random.normal(ks[7], (K_TIME, 50, 100))).astype(jnp.float32)
    p["b3"] = (0.01 * jax.random.normal(ks[8], (1, 100))).astype(jnp.float32)
    p["bn3"] = _folded_bn(ks[9], 100)
    p["w4"] = (0.1 * jax.random.normal(ks[10], (K_TIME, 100, 200))).astype(jnp.float32)
    p["b4"] = (0.01 * jax.random.normal(ks[11], (1, 200))).astype(jnp.float32)
    p["bn4"] = _folded_bn(ks[12], 200)
    p["w_dense"] = (0.05 * jax.random.normal(ks[13], (dense_in, n_classes))).astype(jnp.float32)
    p["b_dense"] = (0.01 * jax.random.normal(ks[14], (1, n_classes))).astype(jnp.float32)
    return p


# ---------------------------- pure-JAX reference ---------------------------- #

def reference_forward(x, p):
    """Eval-mode reference of the PyTorch DeepConvNet forward (f32, XLA ops)."""
    xt = x[..., 0].astype(jnp.float32)                       # (B, T, E)
    b = xt.shape[0]
    t0 = xt.shape[1] - (K_TIME - 1)
    h = sum(xt[:, k:k + t0, :, None] * p["w0"][k][None, None, None, :]
            for k in range(K_TIME)) + p["b0"][0]             # conv0 -> (B, T0, E, 25)
    h = jnp.einsum("btef,efc->btc", h, p["w1"])              # conv1 (no bias) -> (B, T0, 25)

    def bn_elu_pool(h, bn):
        scale, shift = bn
        h = h * scale[0] + shift[0]
        h = jnp.where(h > 0, h, jnp.exp(jnp.minimum(h, 0.0)) - 1.0)
        tp = h.shape[1] // 2
        return h[:, :2 * tp, :].reshape(h.shape[0], tp, 2, h.shape[2]).max(axis=2)

    def conv_t(h, w, bias):
        tt = h.shape[1] - (K_TIME - 1)
        slab = jnp.concatenate([h[:, k:k + tt, :] for k in range(K_TIME)], axis=2)
        w2 = w.reshape(K_TIME * w.shape[1], w.shape[2])
        return jnp.einsum("btk,ko->bto", slab, w2) + bias[0]

    h = bn_elu_pool(h, p["bn1"])
    h = bn_elu_pool(conv_t(h, p["w2"], p["b2"]), p["bn2"])
    h = bn_elu_pool(conv_t(h, p["w3"], p["b3"]), p["bn3"])
    h = bn_elu_pool(conv_t(h, p["w4"], p["b4"]), p["bn4"])
    logits = h.reshape(b, -1) @ p["w_dense"] + p["b_dense"][0]
    return jax.nn.log_softmax(logits, axis=1)


# ------------------------------ main ----------------------------------------- #

if __name__ == "__main__":
    key = jax.random.PRNGKey(0)
    kx, kp = jax.random.split(key)

    B, T, C_eeg, n_cls = 2, 80, 8, 4                # small but deep enough for 4 pools
    x = jax.random.normal(kx, (B, T, C_eeg, 1), dtype=jnp.float32)

    cfg = make_config(B, T, C_eeg, n_cls)
    params = init_params(kp, C_eeg, cfg.t4 * 200, n_classes=n_cls)
    prep = prepare_inference_params(params, cfg)    # hoisted: runs once, not per call

    fwd = jax.jit(lambda xb: run_deepconvnet(xb, prep, cfg))
    out = jax.block_until_ready(fwd(x))
    assert out.shape == (B, n_cls) and out.dtype == jnp.float32

    ref = jax.block_until_ready(reference_forward(x, params))
    err = float(jnp.max(jnp.abs(out - ref)))
    assert err < 0.2, f"mismatch vs reference: max|diff|={err:.4f}"
    print("KERNEL_OK")
</pallas_src>

<mosaic_0001>
module attributes {stable_mosaic.version = 11 : i64} {
  func.func @deepconvnet_kernel(%arg0: i32, %arg1: memref<192x128xbf16, #tpu.memory_space<vmem>>, %arg2: memref<640x128xbf16, #tpu.memory_space<vmem>>, %arg3: memref<1x128xf32, #tpu.memory_space<vmem>>, %arg4: memref<640x128xbf16, #tpu.memory_space<vmem>>, %arg5: memref<1x128xf32, #tpu.memory_space<vmem>>, %arg6: memref<640x128xbf16, #tpu.memory_space<vmem>>, %arg7: memref<1x128xf32, #tpu.memory_space<vmem>>, %arg8: memref<640x256xbf16, #tpu.memory_space<vmem>>, %arg9: memref<1x256xf32, #tpu.memory_space<vmem>>, %arg10: memref<256x128xbf16, #tpu.memory_space<vmem>>, %arg11: memref<1x128xf32, #tpu.memory_space<vmem>>, %arg12: memref<2x7xf32, #tpu.memory_space<vmem>>, %arg13: memref<1x2x128xf32, #tpu.memory_space<vmem>>) attributes {dimension_semantics = [#tpu.dimension_semantics<parallel>], iteration_bounds = array<i64: 1>, scalar_prefetch = 0 : i64, scratch_operands = 0 : i64, tpu.core_type = #tpu.core_type<tc>, window_params = [{transform_indices = @transform_0, window_bounds = array<i64: 192, 128>}, {pipeline_mode = #tpu.pipeline_mode<synchronous>, transform_indices = @transform_1, window_bounds = array<i64: 640, 128>}, {pipeline_mode = #tpu.pipeline_mode<synchronous>, transform_indices = @transform_2, window_bounds = array<i64: 1, 128>}, {pipeline_mode = #tpu.pipeline_mode<synchronous>, transform_indices = @transform_3, window_bounds = array<i64: 640, 128>}, {pipeline_mode = #tpu.pipeline_mode<synchronous>, transform_indices = @transform_4, window_bounds = array<i64: 1, 128>}, {pipeline_mode = #tpu.pipeline_mode<synchronous>, transform_indices = @transform_5, window_bounds = array<i64: 640, 128>}, {pipeline_mode = #tpu.pipeline_mode<synchronous>, transform_indices = @transform_6, window_bounds = array<i64: 1, 128>}, {pipeline_mode = #tpu.pipeline_mode<synchronous>, transform_indices = @transform_7, window_bounds = array<i64: 640, 256>}, {pipeline_mode = #tpu.pipeline_mode<synchronous>, transform_indices = @transform_8, window_bounds = array<i64: 1, 256>}, {pipeline_mode = #tpu.pipeline_mode<synchronous>, transform_indices = @transform_9, window_bounds = array<i64: 256, 128>}, {pipeline_mode = #tpu.pipeline_mode<synchronous>, transform_indices = @transform_10, window_bounds = array<i64: 1, 128>}, {pipeline_mode = #tpu.pipeline_mode<synchronous>, transform_indices = @transform_11, window_bounds = array<i64: 2, 7>}, {transform_indices = @transform_12, window_bounds = array<i64: 1, 2, 128>}]} {
    %c0 = arith.constant 0 : index
    %c0_0 = arith.constant 0 : index
    %0 = vector.load %arg1[%c0, %c0_0] : memref<192x128xbf16, #tpu.memory_space<vmem>>, vector<192x128xbf16>
    %1 = arith.extf %0 : vector<192x128xbf16> to vector<192x128xf32>
    %2 = vector.extract_strided_slice %1 {offsets = [0, 0], sizes = [184, 128], strides = [1, 1]} : vector<192x128xf32> to vector<184x128xf32>
    %3 = vector.extract_strided_slice %1 {offsets = [1, 0], sizes = [184, 128], strides = [1, 1]} : vector<192x128xf32> to vector<184x128xf32>
    %4 = vector.extract_strided_slice %1 {offsets = [2, 0], sizes = [184, 128], strides = [1, 1]} : vector<192x128xf32> to vector<184x128xf32>
    %5 = vector.extract_strided_slice %1 {offsets = [3, 0], sizes = [184, 128], strides = [1, 1]} : vector<192x128xf32> to vector<184x128xf32>
    %6 = vector.extract_strided_slice %1 {offsets = [4, 0], sizes = [184, 128], strides = [1, 1]} : vector<192x128xf32> to vector<184x128xf32>
    %7 = tpu.concatenate %2, %3, %4, %5, %6 in 1 : vector<184x128xf32>, vector<184x128xf32>, vector<184x128xf32>, vector<184x128xf32>, vector<184x128xf32> -> vector<184x640xf32>
    %8 = arith.truncf %7 : vector<184x640xf32> to vector<184x640xbf16>
    %c0_1 = arith.constant 0 : index
    %c0_2 = arith.constant 0 : index
    %9 = vector.load %arg2[%c0_1, %c0_2] : memref<640x128xbf16, #tpu.memory_space<vmem>>, vector<640x128xbf16>
    %cst = arith.constant dense<0.000000e+00> : vector<184x128xf32>
    %10 = tpu.matmul %8, %9, %cst {dimension_numbers = #tpu.dot_dimension_numbers<[1], [0], [0], [1], [0, 0, 1, 1], [], []>} : vector<184x640xbf16>, vector<640x128xbf16>, vector<184x128xf32> -> vector<184x128xf32>
    %c0_3 = arith.constant 0 : index
    %c0_4 = arith.constant 0 : index
    %11 = vector.load %arg3[%c0_3, %c0_4] : memref<1x128xf32, #tpu.memory_space<vmem>>, vector<1x128xf32>
    %12 = vector.broadcast %11 : vector<1x128xf32> to vector<184x128xf32>
    %13 = arith.addf %10, %12 : vector<184x128xf32>
    %cst_5 = arith.constant 0.000000e+00 : f32
    %14 = vector.broadcast %cst_5 : f32 to vector<184x128xf32>
    %15 = arith.cmpf ogt, %13, %14 : vector<184x128xf32>
    %cst_6 = arith.constant 0.000000e+00 : f32
    %16 = vector.broadcast %cst_6 : f32 to vector<184x128xf32>
    %17 = arith.minimumf %13, %16 : vector<184x128xf32>
    %18 = math.exp %17 : vector<184x128xf32>
    %cst_7 = arith.constant 1.000000e+00 : f32
    %19 = vector.broadcast %cst_7 : f32 to vector<184x128xf32>
    %20 = arith.subf %18, %19 : vector<184x128xf32>
    %21 = arith.select %15, %13, %20 : vector<184x128xi1>, vector<184x128xf32>
    %22 = vector.shape_cast %21 : vector<184x128xf32> to vector<92x2x128xf32>
    %cst_8 = arith.constant dense<0xFF800000> : vector<92x128xf32>
    %23 = vector.multi_reduction <maximumf>, %22, %cst_8 [1] : vector<92x2x128xf32> to vector<92x128xf32>
    %24 = vector.extract_strided_slice %23 {offsets = [0, 0], sizes = [88, 128], strides = [1, 1]} : vector<92x128xf32> to vector<88x128xf32>
    %25 = vector.extract_strided_slice %23 {offsets = [1, 0], sizes = [88, 128], strides = [1, 1]} : vector<92x128xf32> to vector<88x128xf32>
    %26 = vector.extract_strided_slice %23 {offsets = [2, 0], sizes = [88, 128], strides = [1, 1]} : vector<92x128xf32> to vector<88x128xf32>
    %27 = vector.extract_strided_slice %23 {offsets = [3, 0], sizes = [88, 128], strides = [1, 1]} : vector<92x128xf32> to vector<88x128xf32>
    %28 = vector.extract_strided_slice %23 {offsets = [4, 0], sizes = [88, 128], strides = [1, 1]} : vector<92x128xf32> to vector<88x128xf32>
    %29 = tpu.concatenate %24, %25, %26, %27, %28 in 1 : vector<88x128xf32>, vector<88x128xf32>, vector<88x128xf32>, vector<88x128xf32>, vector<88x128xf32> -> vector<88x640xf32>
    %30 = arith.truncf %29 : vector<88x640xf32> to vector<88x640xbf16>
    %c0_9 = arith.constant 0 : index
    %c0_10 = arith.constant 0 : index
    %31 = vector.load %arg4[%c0_9, %c0_10] : memref<640x128xbf16, #tpu.memory_space<vmem>>, vector<640x128xbf16>
    %cst_11 = arith.constant dense<0.000000e+00> : vector<88x128xf32>
    %32 = tpu.matmul %30, %31, %cst_11 {dimension_numbers = #tpu.dot_dimension_numbers<[1], [0], [0], [1], [0, 0, 1, 1], [], []>} : vector<88x640xbf16>, vector<640x128xbf16>, vector<88x128xf32> -> vector<88x128xf32>
    %c0_12 = arith.constant 0 : index
    %c0_13 = arith.constant 0 : index
    %33 = vector.load %arg5[%c0_12, %c0_13] : memref<1x128xf32, #tpu.memory_space<vmem>>, vector<1x128xf32>
    %34 = vector.broadcast %33 : vector<1x128xf32> to vector<88x128xf32>
    %35 = arith.addf %32, %34 : vector<88x128xf32>
    %cst_14 = arith.constant 0.000000e+00 : f32
    %36 = vector.broadcast %cst_14 : f32 to vector<88x128xf32>
    %37 = arith.cmpf ogt, %35, %36 : vector<88x128xf32>
    %cst_15 = arith.constant 0.000000e+00 : f32
    %38 = vector.broadcast %cst_15 : f32 to vector<88x128xf32>
    %39 = arith.minimumf %35, %38 : vector<88x128xf32>
    %40 = math.exp %39 : vector<88x128xf32>
    %cst_16 = arith.constant 1.000000e+00 : f32
    %41 = vector.broadcast %cst_16 : f32 to vector<88x128xf32>
    %42 = arith.subf %40, %41 : vector<88x128xf32>
    %43 = arith.select %37, %35, %42 : vector<88x128xi1>, vector<88x128xf32>
    %44 = vector.shape_cast %43 : vector<88x128xf32> to vector<44x2x128xf32>
    %cst_17 = arith.constant dense<0xFF800000> : vector<44x128xf32>
    %45 = vector.multi_reduction <maximumf>, %44, %cst_17 [1] : vector<44x2x128xf32> to vector<44x128xf32>
    %46 = vector.extract_strided_slice %45 {offsets = [0, 0], sizes = [40, 128], strides = [1, 1]} : vector<44x128xf32> to vector<40x128xf32>
    %47 = vector.extract_strided_slice %45 {offsets = [1, 0], sizes = [40, 128], strides = [1, 1]} : vector<44x128xf32> to vector<40x128xf32>
    %48 = vector.extract_strided_slice %45 {offsets = [2, 0], sizes = [40, 128], strides = [1, 1]} : vector<44x128xf32> to vector<40x128xf32>
    %49 = vector.extract_strided_slice %45 {offsets = [3, 0], sizes = [40, 128], strides = [1, 1]} : vector<44x128xf32> to vector<40x128xf32>
    %50 = vector.extract_strided_slice %45 {offsets = [4, 0], sizes = [40, 128], strides = [1, 1]} : vector<44x128xf32> to vector<40x128xf32>
    %51 = tpu.concatenate %46, %47, %48, %49, %50 in 1 : vector<40x128xf32>, vector<40x128xf32>, vector<40x128xf32>, vector<40x128xf32>, vector<40x128xf32> -> vector<40x640xf32>
    %52 = arith.truncf %51 : vector<40x640xf32> to vector<40x640xbf16>
    %c0_18 = arith.constant 0 : index
    %c0_19 = arith.constant 0 : index
    %53 = vector.load %arg6[%c0_18, %c0_19] : memref<640x128xbf16, #tpu.memory_space<vmem>>, vector<640x128xbf16>
    %cst_20 = arith.constant dense<0.000000e+00> : vector<40x128xf32>
    %54 = tpu.matmul %52, %53, %cst_20 {dimension_numbers = #tpu.dot_dimension_numbers<[1], [0], [0], [1], [0, 0, 1, 1], [], []>} : vector<40x640xbf16>, vector<640x128xbf16>, vector<40x128xf32> -> vector<40x128xf32>
    %c0_21 = arith.constant 0 : index
    %c0_22 = arith.constant 0 : index
    %55 = vector.load %arg7[%c0_21, %c0_22] : memref<1x128xf32, #tpu.memory_space<vmem>>, vector<1x128xf32>
    %56 = vector.broadcast %55 : vector<1x128xf32> to vector<40x128xf32>
    %57 = arith.addf %54, %56 : vector<40x128xf32>
    %cst_23 = arith.constant 0.000000e+00 : f32
    %58 = vector.broadcast %cst_23 : f32 to vector<40x128xf32>
    %59 = arith.cmpf ogt, %57, %58 : vector<40x128xf32>
    %cst_24 = arith.constant 0.000000e+00 : f32
    %60 = vector.broadcast %cst_24 : f32 to vector<40x128xf32>
    %61 = arith.minimumf %57, %60 : vector<40x128xf32>
    %62 = math.exp %61 : vector<40x128xf32>
    %cst_25 = arith.constant 1.000000e+00 : f32
    %63 = vector.broadcast %cst_25 : f32 to vector<40x128xf32>
    %64 = arith.subf %62, %63 : vector<40x128xf32>
    %65 = arith.select %59, %57, %64 : vector<40x128xi1>, vector<40x128xf32>
    %66 = vector.shape_cast %65 : vector<40x128xf32> to vector<20x2x128xf32>
    %cst_26 = arith.constant dense<0xFF800000> : vector<20x128xf32>
    %67 = vector.multi_reduction <maximumf>, %66, %cst_26 [1] : vector<20x2x128xf32> to vector<20x128xf32>
    %68 = vector.extract_strided_slice %67 {offsets = [0, 0], sizes = [16, 128], strides = [1, 1]} : vector<20x128xf32> to vector<16x128xf32>
    %69 = vector.extract_strided_slice %67 {offsets = [1, 0], sizes = [16, 128], strides = [1, 1]} : vector<20x128xf32> to vector<16x128xf32>
    %70 = vector.extract_strided_slice %67 {offsets = [2, 0], sizes = [16, 128], strides = [1, 1]} : vector<20x128xf32> to vector<16x128xf32>
    %71 = vector.extract_strided_slice %67 {offsets = [3, 0], sizes = [16, 128], strides = [1, 1]} : vector<20x128xf32> to vector<16x128xf32>
    %72 = vector.extract_strided_slice %67 {offsets = [4, 0], sizes = [16, 128], strides = [1, 1]} : vector<20x128xf32> to vector<16x128xf32>
    %73 = tpu.concatenate %68, %69, %70, %71, %72 in 1 : vector<16x128xf32>, vector<16x128xf32>, vector<16x128xf32>, vector<16x128xf32>, vector<16x128xf32> -> vector<16x640xf32>
    %74 = arith.truncf %73 : vector<16x640xf32> to vector<16x640xbf16>
    %c0_27 = arith.constant 0 : index
    %c0_28 = arith.constant 0 : index
    %75 = vector.load %arg8[%c0_27, %c0_28] : memref<640x256xbf16, #tpu.memory_space<vmem>>, vector<640x256xbf16>
    %cst_29 = arith.constant dense<0.000000e+00> : vector<16x256xf32>
    %76 = tpu.matmul %74, %75, %cst_29 {dimension_numbers = #tpu.dot_dimension_numbers<[1], [0], [0], [1], [0, 0, 1, 1], [], []>} : vector<16x640xbf16>, vector<640x256xbf16>, vector<16x256xf32> -> vector<16x256xf32>
    %c0_30 = arith.constant 0 : index
    %c0_31 = arith.constant 0 : index
    %77 = vector.load %arg9[%c0_30, %c0_31] : memref<1x256xf32, #tpu.memory_space<vmem>>, vector<1x256xf32>
    %78 = vector.broadcast %77 : vector<1x256xf32> to vector<16x256xf32>
    %79 = arith.addf %76, %78 : vector<16x256xf32>
    %cst_32 = arith.constant 0.000000e+00 : f32
    %80 = vector.broadcast %cst_32 : f32 to vector<16x256xf32>
    %81 = arith.cmpf ogt, %79, %80 : vector<16x256xf32>
    %cst_33 = arith.constant 0.000000e+00 : f32
    %82 = vector.broadcast %cst_33 : f32 to vector<16x256xf32>
    %83 = arith.minimumf %79, %82 : vector<16x256xf32>
    %84 = math.exp %83 : vector<16x256xf32>
    %cst_34 = arith.constant 1.000000e+00 : f32
    %85 = vector.broadcast %cst_34 : f32 to vector<16x256xf32>
    %86 = arith.subf %84, %85 : vector<16x256xf32>
    %87 = arith.select %81, %79, %86 : vector<16x256xi1>, vector<16x256xf32>
    %88 = vector.shape_cast %87 : vector<16x256xf32> to vector<8x2x256xf32>
    %cst_35 = arith.constant dense<0xFF800000> : vector<8x256xf32>
    %89 = vector.multi_reduction <maximumf>, %88, %cst_35 [1] : vector<8x2x256xf32> to vector<8x256xf32>
    %90 = vector.extract_strided_slice %89 {offsets = [0, 0], sizes = [7, 256], strides = [1, 1]} : vector<8x256xf32> to vector<7x256xf32>
    %91 = arith.truncf %90 : vector<7x256xf32> to vector<7x256xbf16>
    %c0_36 = arith.constant 0 : index
    %c0_37 = arith.constant 0 : index
    %92 = vector.load %arg10[%c0_36, %c0_37] : memref<256x128xbf16, #tpu.memory_space<vmem>>, vector<256x128xbf16>
    %cst_38 = arith.constant dense<0.000000e+00> : vector<7x128xf32>
    %93 = tpu.matmul %91, %92, %cst_38 {dimension_numbers = #tpu.dot_dimension_numbers<[1], [0], [0], [1], [0, 0, 1, 1], [], []>} : vector<7x256xbf16>, vector<256x128xbf16>, vector<7x128xf32> -> vector<7x128xf32>
    %c0_39 = arith.constant 0 : index
    %c0_40 = arith.constant 0 : index
    %94 = vector.load %arg12[%c0_39, %c0_40] : memref<2x7xf32, #tpu.memory_space<vmem>>, vector<2x7xf32>
    %cst_41 = arith.constant dense<0.000000e+00> : vector<2x128xf32>
    %95 = tpu.matmul %94, %93, %cst_41 {dimension_numbers = #tpu.dot_dimension_numbers<[1], [0], [0], [1], [0, 0, 1, 1], [], []>} : vector<2x7xf32>, vector<7x128xf32>, vector<2x128xf32> -> vector<2x128xf32>
    %c0_42 = arith.constant 0 : index
    %c0_43 = arith.constant 0 : index
    %96 = vector.load %arg11[%c0_42, %c0_43] : memref<1x128xf32, #tpu.memory_space<vmem>>, vector<1x128xf32>
    %97 = vector.broadcast %96 : vector<1x128xf32> to vector<2x128xf32>
    %98 = arith.addf %95, %97 : vector<2x128xf32>
    %cst_44 = arith.constant dense<0xFF800000> : vector<2xf32>
    %99 = vector.multi_reduction <maximumf>, %98, %cst_44 [1] : vector<2x128xf32> to vector<2xf32>
    %100 = vector.shape_cast %99 : vector<2xf32> to vector<2x1xf32>
    %101 = vector.broadcast %100 : vector<2x1xf32> to vector<2x128xf32>
    %102 = arith.subf %98, %101 : vector<2x128xf32>
    %103 = math.exp %102 : vector<2x128xf32>
    %cst_45 = arith.constant dense<0.000000e+00> : vector<2xf32>
    %104 = vector.multi_reduction <add>, %103, %cst_45 [1] : vector<2x128xf32> to vector<2xf32>
    %105 = vector.shape_cast %104 : vector<2xf32> to vector<2x1xf32>
    %106 = math.log %105 : vector<2x1xf32>
    %107 = vector.broadcast %106 : vector<2x1xf32> to vector<2x128xf32>
    %108 = arith.subf %102, %107 : vector<2x128xf32>
    %c0_46 = arith.constant 0 : index
    %c0_47 = arith.constant 0 : index
    %c0_48 = arith.constant 0 : index
    %109 = vector.load %arg13[%c0_46, %c0_47, %c0_48] : memref<1x2x128xf32, #tpu.memory_space<vmem>>, vector<1x2x128xf32>
    %110 = vector.shape_cast %109 : vector<1x2x128xf32> to vector<2x128xf32>
    %111 = vector.shape_cast %108 : vector<2x128xf32> to vector<1x2x128xf32>
    tpu.vector_store %arg13[%c0_46, %c0_47, %c0_48], %111 {strides = array<i32>} : memref<1x2x128xf32, #tpu.memory_space<vmem>>, vector<1x2x128xf32>,
    return
  }
  func.func @transform_0(%arg0: i32) -> (i32, i32) {
    %c0_i32 = arith.constant 0 : i32
    %c0_i32_0 = arith.constant 0 : i32
    return %arg0, %c0_i32 : i32, i32
  }
  func.func @transform_1(%arg0: i32) -> (i32, i32) {
    %c0_i32 = arith.constant 0 : i32
    %c0_i32_0 = arith.constant 0 : i32
    %c0_i32_1 = arith.constant 0 : i32
    return %c0_i32, %c0_i32_0 : i32, i32
  }
  func.func @transform_2(%arg0: i32) -> (i32, i32) {
    %c0_i32 = arith.constant 0 : i32
    %c0_i32_0 = arith.constant 0 : i32
    %c0_i32_1 = arith.constant 0 : i32
    return %c0_i32, %c0_i32_0 : i32, i32
  }
  func.func @transform_3(%arg0: i32) -> (i32, i32) {
    %c0_i32 = arith.constant 0 : i32
    %c0_i32_0 = arith.constant 0 : i32
    %c0_i32_1 = arith.constant 0 : i32
    return %c0_i32, %c0_i32_0 : i32, i32
  }
  func.func @transform_4(%arg0: i32) -> (i32, i32) {
    %c0_i32 = arith.constant 0 : i32
    %c0_i32_0 = arith.constant 0 : i32
    %c0_i32_1 = arith.constant 0 : i32
    return %c0_i32, %c0_i32_0 : i32, i32
  }
  func.func @transform_5(%arg0: i32) -> (i32, i32) {
    %c0_i32 = arith.constant 0 : i32
    %c0_i32_0 = arith.constant 0 : i32
    %c0_i32_1 = arith.constant 0 : i32
    return %c0_i32, %c0_i32_0 : i32, i32
  }
  func.func @transform_6(%arg0: i32) -> (i32, i32) {
    %c0_i32 = arith.constant 0 : i32
    %c0_i32_0 = arith.constant 0 : i32
    %c0_i32_1 = arith.constant 0 : i32
    return %c0_i32, %c0_i32_0 : i32, i32
  }
  func.func @transform_7(%arg0: i32) -> (i32, i32) {
    %c0_i32 = arith.constant 0 : i32
    %c0_i32_0 = arith.constant 0 : i32
    %c0_i32_1 = arith.constant 0 : i32
    return %c0_i32, %c0_i32_0 : i32, i32
  }
  func.func @transform_8(%arg0: i32) -> (i32, i32) {
    %c0_i32 = arith.constant 0 : i32
    %c0_i32_0 = arith.constant 0 : i32
    %c0_i32_1 = arith.constant 0 : i32
    return %c0_i32, %c0_i32_0 : i32, i32
  }
  func.func @transform_9(%arg0: i32) -> (i32, i32) {
    %c0_i32 = arith.constant 0 : i32
    %c0_i32_0 = arith.constant 0 : i32
    %c0_i32_1 = arith.constant 0 : i32
    return %c0_i32, %c0_i32_0 : i32, i32
  }
  func.func @transform_10(%arg0: i32) -> (i32, i32) {
    %c0_i32 = arith.constant 0 : i32
    %c0_i32_0 = arith.constant 0 : i32
    %c0_i32_1 = arith.constant 0 : i32
    return %c0_i32, %c0_i32_0 : i32, i32
  }
  func.func @transform_11(%arg0: i32) -> (i32, i32) {
    %c0_i32 = arith.constant 0 : i32
    %c0_i32_0 = arith.constant 0 : i32
    %c0_i32_1 = arith.constant 0 : i32
    return %c0_i32, %c0_i32_0 : i32, i32
  }
  func.func @transform_12(%arg0: i32) -> (i32, i32, i32) {
    %c0_i32 = arith.constant 0 : i32
    %c0_i32_0 = arith.constant 0 : i32
    %c0_i32_1 = arith.constant 0 : i32
    return %arg0, %c0_i32, %c0_i32_0 : i32, i32, i32
  }
}

</mosaic_0001>

<bundles_post_ra>
// kernel: _lambda_.1
= control target key start
LH: loop header
LB: loop body
LE: loop exit
PB: predicated region body
PF: predicated region fallthrough
CT: control target
= control target key end

     0   :  { %vm115_vm0 = vcmask 1046528   ;;  %vm257_vm1 = vcmask 1044480   ;;  %vm186_vm2 = vcmask 1045504   ;;  %vm328_vm3 = vcmask 1043456   ;;  %s11931_s0 = inlined_call_operand.vmem [shape: bf16[192,128], index: 0, kind: input, shape index: {}]   ;;  %s11932_s1 = inlined_call_operand.vmem [shape: bf16[640,128], index: 1, kind: input, shape index: {}]   ;;  %s11933_s2 = inlined_call_operand.vmem [shape: f32[1,128], index: 2, kind: input, shape index: {}]   ;;  %s11934_s3 = inlined_call_operand.vmem [shape: bf16[640,128], index: 3, kind: input, shape index: {}]   ;;  %s11935_s4 = inlined_call_operand.vmem [shape: f32[1,128], index: 4, kind: input, shape index: {}]   ;;  %s11936_s5 = inlined_call_operand.vmem [shape: bf16[640,128], index: 5, kind: input, shape index: {}]   ;;  %s11937_s6 = inlined_call_operand.vmem [shape: f32[1,128], index: 6, kind: input, shape index: {}]   ;;  %s11938_s7 = inlined_call_operand.vmem [shape: bf16[640,256], index: 7, kind: input, shape index: {}]   ;;  %s11939_s8 = inlined_call_operand.vmem [shape: f32[1,256], index: 8, kind: input, shape index: {}]   ;;  %s11940_s9 = inlined_call_operand.vmem [shape: bf16[256,128], index: 9, kind: input, shape index: {}]   ;;  %s11941_s10 = inlined_call_operand.vmem [shape: f32[1,128], index: 10, kind: input, shape index: {}]   ;;  %s11942_s11 = inlined_call_operand.vmem [shape: f32[2,7], index: 11, kind: input, shape index: {}]   ;;  %s11943_s12 = inlined_call_operand.hbm [shape: f32[1,2,128], index: 12, kind: output, shape index: {}]  }
   0x1   :  { %v7368_v0 = vld [vmem:[%s11932_s1 + $0x40] sm:$0xff]   ;;  %v7370_v2 = vld [vmem:[%s11932_s1 + $0x48] sm:$0xff]   ;;  %v7372_v4 = vld [vmem:[%s11932_s1 + $0x50] sm:$0xff]  }
   0x2   :  { %v7369_v1 = vld [vmem:[%s11932_s1] sm:$0xff]   ;;  %7335 = vmatprep.subr.bf16.mxu1 %v7368_v0  ;;  %6817 = vmatprep.subr.bf16.mxu0 %v7368_v0  ;;  %v7371_v3 = vld [vmem:[%s11932_s1 + $0x8] sm:$0xff]   ;;  %v7373_v5 = vld [vmem:[%s11932_s1 + $0x10] sm:$0xff]  }
   0x3   :  { %7343 = vmatpush3.bf16.msra.mxu1 %v7369_v1  ;;  %6818 = vmatpush3.bf16.msra.mxu0 %v7369_v1  ;;  %v7374_v6 = vld [vmem:[%s11932_s1 + $0x58] sm:$0xff]   ;;  %v7376_v8 = vld [vmem:[%s11932_s1 + $0x60] sm:$0xff]   ;;  %v7378_v10 = vld [vmem:[%s11932_s1 + $0x68] sm:$0xff]  }
   0x4   :  { %7336 = vmatprep.subr.bf16.mxu1 %v7370_v2  ;;  %6819 = vmatprep.subr.bf16.mxu0 %v7370_v2  ;;  %v7375_v7 = vld [vmem:[%s11932_s1 + $0x18] sm:$0xff]   ;;  %v7377_v9 = vld [vmem:[%s11932_s1 + $0x20] sm:$0xff]   ;;  %v7867_v11 = vld [vmem:[%s11931_s0 + $0x30] sm:$0xff]  }
   0x5   :  { %v7872_v12 = vld [vmem:[%s11931_s0 + $0x38] sm:$0xff]   ;;  %v7877_v13 = vld [vmem:[%s11931_s0] sm:$0xff]   ;;  %v7880_v14 = vunpack.c.l.bf16 %v7867_v11  ;;  %v7883_v15 = vunpack.c.h.bf16 %v7867_v11  ;;  %v7891_v17 = vld [vmem:[%s11931_s0 + $0x8] sm:$0xff]  }
   0x6   :  { %v7886_v16 = vunpack.c.l.bf16 %v7872_v12  ;;  %v7379_v18 = vld [vmem:[%s11932_s1 + $0x28] sm:$0xff]   ;;  %v7897_v19 = vunpack.c.l.bf16 %v7877_v13  ;;  %v7900_v20 = vunpack.c.h.bf16 %v7877_v13  ;;  %v7903_v21 = vunpack.c.l.bf16 %v7891_v17  ;;  %v7908_v22 = vld [vmem:[%s11931_s0 + $0x40] sm:$0xff]   ;;  %v7380_v23 = vld [vmem:[%s11932_s1 + $0x70] sm:$0xff]  }
   0x7   :  { %7344 = vmatpush3.bf16.msra.mxu1 %v7371_v3  ;;  %6820 = vmatpush3.bf16.msra.mxu0 %v7371_v3  ;;  %v139_v24 = vrot.slane %v7880_v14, 1  ;;  %v141_v25 = vrot.slane %v7883_v15, 1  ;;  %v7917_v27 = vunpack.c.h.bf16 %v7872_v12  ;;  %v7923_v31 = vunpack.c.l.bf16 %v7908_v22  ;;  %v7928_v32 = vld [vmem:[%s11931_s0 + $0x10] sm:$0xff]   ;;  %v7382_v39 = vld [vmem:[%s11932_s1 + $0x78] sm:$0xff]   ;;  %v7953_v45 = vld [vmem:[%s11931_s0 + $0x48] sm:$0xff]  }
   0x8   :  { %7337 = vmatprep.subr.bf16.mxu1 %v7372_v4  ;;  %6821 = vmatprep.subr.bf16.mxu0 %v7372_v4  ;;  %v143_v26 = vrot.slane %v7886_v16, 1  ;;  %v116_v28 = vrot.slane %v7897_v19, 1  ;;  %v117_v29 = vrot.slane %v7900_v20, 1  ;;  %v119_v30 = vrot.slane %v7903_v21, 1  ;;  %v7381_v35 = vld [vmem:[%s11932_s1 + $0x30] sm:$0xff]   ;;  %v7960_v48 = vld [vmem:[%s11931_s0 + $0x18] sm:$0xff]  }
   0x9   :  { %v142_v33 = vsel %vm115_vm0, %v139_v24, %v141_v25  ;;  %v145_v41 = vrot.slane %v7917_v27, 1  ;;  %v7944_v42 = vunpack.c.h.bf16 %v7891_v17  ;;  %v7947_v43 = vunpack.c.l.bf16 %v7928_v32  ;;  %v7383_v49 = vld [vmem:[%s11932_s1 + $0x38] sm:$0xff]   ;;  %v7386_v50 = vld [vmem:[%s11932_s1 + $0xc0] sm:$0xff]   ;;  %v7995_v0 = vld [vmem:[%s11931_s0 + $0x50] sm:$0xff]  }
   0xa   :  { %v144_v34 = vsel %vm115_vm0, %v141_v25, %v143_v26  ;;  %v118_v37 = vsel %vm115_vm0, %v116_v28, %v117_v29  ;;  %v120_v38 = vsel %vm115_vm0, %v117_v29, %v119_v30  ;;  %v147_v44 = vrot.slane %v7923_v31, 1  ;;  %v7396_v57 = vld [vmem:[%s11932_s1 + $0x100] sm:$0xff]   ;;  %v7390_v2 = vld [vmem:[%s11932_s1 + $0xc8] sm:$0xff]   ;;  %v7393_v28 = vld [vmem:[%s11932_s1 + $0xd0] sm:$0xff]  }
   0xb   :  { %7345 = vmatpush3.bf16.msra.mxu1 %v7373_v5  ;;  %6822 = vmatpush3.bf16.msra.mxu0 %v7373_v5  ;;  %v430_v36 = vpack.c.bf16 %v144_v34, %v142_v33  ;;  %v400_v40 = vpack.c.bf16 %v120_v38, %v118_v37  ;;  %v121_v46 = vrot.slane %v7944_v42, 1  ;;  %v123_v47 = vrot.slane %v7947_v43, 1  ;;  %v7387_v60 = vld [vmem:[%s11932_s1 + $0x80] sm:$0xff]   ;;  %v7394_v38 = vld [vmem:[%s11932_s1 + $0x90] sm:$0xff]  }
   0xc   :  { %7338 = vmatprep.subr.bf16.mxu1 %v7374_v6  ;;  %6823 = vmatprep.subr.bf16.mxu0 %v7374_v6  ;;  %v7969_v51 = vunpack.c.h.bf16 %v7908_v22  ;;  %v7972_v52 = vunpack.c.l.bf16 %v7953_v45  ;;  %v146_v53 = vsel %vm115_vm0, %v143_v26, %v145_v41  ;;  %v148_v54 = vsel %vm115_vm0, %v145_v41, %v147_v44  ;;  %v8005_v5 = vld [vmem:[%s11931_s0 + $0x20] sm:$0xff]   ;;  %v7402_v41 = vld [vmem:[%s11932_s1 + $0x110] sm:$0xff]  }
   0xd   :  { %866 = vmatprep.mubr.bf16.mxu1 %v430_v36  ;;  %818 = vmatprep.mubr.bf16.mxu0 %v400_v40  ;;  %v7977_v55 = vunpack.c.h.bf16 %v7928_v32  ;;  %v7980_v56 = vunpack.c.l.bf16 %v7960_v48  ;;  %v122_v58 = vsel %vm115_vm0, %v119_v30, %v121_v46  ;;  %v124_v59 = vsel %vm115_vm0, %v121_v46, %v123_v47 }
   0xe   :  { %v149_v61 = vrot.slane %v7969_v51, 1  ;;  %v435_v62 = vpack.c.bf16 %v148_v54, %v146_v53  ;;  %v151_v63 = vrot.slane %v7972_v52, 1  ;;  %v405_v1 = vpack.c.bf16 %v124_v59, %v122_v58  ;;  %v7406_v58 = vld [vmem:[%s11932_s1 + $0x118] sm:$0xff]  }
   0xf   :  { %7346 = vmatpush3.bf16.msra.mxu1 %v7375_v7  ;;  %6824 = vmatpush3.bf16.msra.mxu0 %v7375_v7  ;;  %v125_v3 = vrot.slane %v7977_v55, 1  ;;  %v127_v4 = vrot.slane %v7980_v56, 1  ;;  %v8008_v6 = vunpack.c.h.bf16 %v7953_v45  ;;  %v8013_v7 = vld [vmem:[%s11931_s0 + $0x58] sm:$0xf]  ;;  %v8037_v25 = vunpack.c.l.bf16 %v8005_v5 }
  0x10   :  { %7339 = vmatprep.subr.bf16.mxu1 %v7376_v8  ;;  %6825 = vmatprep.subr.bf16.mxu0 %v7376_v8  ;;  %v8018_v8 = vunpack.c.l.bf16 %v7995_v0  ;;  %v8040_v26 = vunpack.c.h.bf16 %v7995_v0  ;;  %v8048_v33 = vunpack.c.l.bf16 %v8013_v7 }
  0x11   :  { %v126_v29 = vsel %vm115_vm0, %v123_v47, %v125_v3  ;;  %v128_v30 = vsel %vm115_vm0, %v125_v3, %v127_v4  ;;  %v153_v34 = vrot.slane %v8008_v6, 1  ;;  %v258_v3 = vrot.slane %v7897_v19, 3 }
  0x12   :  { %v410_v47 = vpack.c.bf16 %v128_v30, %v126_v29  ;;  %v157_v53 = vrot.slane %v8040_v26, 1  ;;  %v263_v29 = vrot.slane %v7944_v42, 3  ;;  %v7413_v30 = vld [vmem:[%s11932_s1 + $0x128] sm:$0xff]  }
  0x13   :  { %7347 = vmatpush3.bf16.msra.mxu1 %v7377_v9  ;;  %6826 = vmatpush3.bf16.msra.mxu0 %v7377_v9  ;;  %v7399_v9 = vld [vmem:[%s11932_s1 + $0x108] sm:$0xff]  }
  0x14   :  { %7340 = vmatprep.subr.bf16.mxu1 %v7378_v10  ;;  %6827 = vmatprep.subr.bf16.mxu0 %v7378_v10  ;;  %v8024_v10 = vunpack.c.h.bf16 %v7960_v48 }
  0x16   :  { %v129_v40 = vrot.slane %v8024_v10, 1 }
  0x17   :  { %7348 = vmatpush3.bf16.msra.mxu1 %v7379_v18  ;;  %6828 = vmatpush3.bf16.msra.mxu0 %v7379_v18  ;;  %v8029_v18 = vld [vmem:[%s11931_s0 + $0x28] sm:$0xff]  }
  0x18   :  { %7341 = vmatprep.subr.bf16.mxu1 %v7380_v23  ;;  %6829 = vmatprep.subr.bf16.mxu0 %v7380_v23  ;;  %v152_v23 = vsel %vm115_vm0, %v149_v61, %v151_v63  ;;  %v8055_v36 = vunpack.c.l.bf16 %v8029_v18  ;;  %v8069_v46 = vunpack.c.h.bf16 %v8029_v18 }
  0x1b   :  { %7349 = vmatpush3.bf16.msra.mxu1 %v7381_v35  ;;  %6830 = vmatpush3.bf16.msra.mxu0 %v7381_v35  ;;  %v8052_v35 = vunpack.c.h.bf16 %v8005_v5 }
  0x1c   :  { %7342 = vmatprep.subr.bf16.mxu1 %v7382_v39  ;;  %6831 = vmatprep.subr.bf16.mxu0 %v7382_v39  ;;  %v155_v39 = vrot.slane %v8018_v8, 1 }
  0x1d   :  { %v133_v59 = vrot.slane %v8052_v35, 1 }
  0x1f   :  { %7350 = vmatpush3.bf16.msra.mxu1 %v7383_v49  ;;  %6832 = vmatpush3.bf16.msra.mxu0 %v7383_v49  ;;  %v7398_v49 = vld [vmem:[%s11932_s1 + $0xd8] sm:$0xff]  }
  0x20   :  { %6905 = vmatprep.subr.bf16.mxu1 %v7386_v50  ;;  %7234 = vmatprep.subr.bf16.mxu0 %v7396_v57  ;;  %v131_v50 = vrot.slane %v8037_v25, 1 }
  0x22   :  { %867 = vmatmul.mubr.bf16.vlgmr.msra.gmra.mrb[0].mxu1 %v7867_v11  ;;  %819 = vmatmul.mubr.bf16.vlgmr.msra.gmra.mrb[0].mxu0 %v7877_v13  ;;  %v7391_v11 = vld [vmem:[%s11932_s1 + $0x88] sm:$0xff]   ;;  %v150_v13 = vsel %vm115_vm0, %v147_v44, %v149_v61  ;;  %v66_v44 = vld [vmem:[%s11931_s0 + $0x5c] sm:$0xf]  ;;  %v154_v61 = vsel %vm115_vm0, %v151_v63, %v153_v34  ;;  %v7403_v63 = vld [vmem:[%s11932_s1 + $0xe0] sm:$0xff]  }
  0x23   :  { %874 = vmatprep.mubr.bf16.mxu1 %v435_v62  ;;  %6906 = vmatpush3.bf16.msra.mxu1 %v7387_v60  ;;  %v440_v37 = vpack.c.bf16 %v152_v23, %v150_v13  ;;  %v8076_v54 = vunpack.c.l.bf16 %v66_v44  ;;  %v135_v60 = vrot.slane %v8055_v36, 1  ;;  %v156_v62 = vsel %vm115_vm0, %v153_v34, %v155_v39  ;;  %v7404_v34 = vld [vmem:[%s11932_s1 + $0xa0] sm:$0xff]  }
  0x24   :  { %826 = vmatprep.mubr.bf16.mxu0 %v405_v1  ;;  %6907 = vmatprep.subr.bf16.mxu1 %v7390_v2  ;;  %v7400_v1 = vld [vmem:[%s11932_s1 + $0x98] sm:$0xff]   ;;  %v137_v2 = vrot.slane %v8069_v46, 1  ;;  %v261_v13 = vrot.slane %v7903_v21, 3  ;;  %v187_v23 = vrot.slane %v7897_v19, 2  ;;  %v445_v44 = vpack.c.bf16 %v156_v62, %v154_v61 }
  0x25   :  { %7235 = vmatpush3.bf16.msra.mxu0 %v7396_v57  ;;  %v159_v57 = vrot.slane %v8048_v33, 1  ;;  %v158_v62 = vsel %vm115_vm0, %v155_v39, %v157_v53  ;;  %v7412_v39 = vld [vmem:[%s11932_s1 + $0xf0] sm:$0xff]  }
  0x26   :  { %7236 = vmatprep.subr.bf16.mxu0 %v7399_v9 }
  0x27   :  { %6908 = vmatpush3.bf16.msra.mxu1 %v7391_v11  ;;  %v259_v11 = vrot.slane %v7900_v20, 3 }
  0x28   :  { %6909 = vmatprep.subr.bf16.mxu1 %v7393_v28  ;;  %v188_v28 = vrot.slane %v7900_v20, 2 }
  0x29   :  { %7237 = vmatpush3.bf16.msra.mxu0 %v7399_v9  ;;  %v161_v9 = vrot.slane %v8076_v54, 1 }
  0x2a   :  { %875 = vmatmul.mubr.bf16.gmra.mrb[4].mxu1 %v7872_v12  ;;  %827 = vmatmul.mubr.bf16.gmra.mrb[4].mxu0 %v7891_v17  ;;  %v130_v12 = vsel %vm115_vm0, %v127_v4, %v129_v40  ;;  %v132_v17 = vsel %vm115_vm0, %v129_v40, %v131_v50  ;;  %v190_v4 = vrot.slane %v7903_v21, 2  ;;  %v192_v40 = vrot.slane %v7944_v42, 2 }
  0x2b   :  { %882 = vmatprep.mubr.bf16.mxu1 %v440_v37  ;;  %834 = vmatprep.mubr.bf16.mxu0 %v410_v47  ;;  %v7409_v37 = vld [vmem:[%s11932_s1 + $0x120] sm:$0xff]   ;;  %v7408_v47 = vld [vmem:[%s11932_s1 + $0xe8] sm:$0xff]  }
  0x2c   :  { %6910 = vmatpush3.bf16.msra.mxu1 %v7394_v38  ;;  %7238 = vmatprep.subr.bf16.mxu0 %v7402_v41  ;;  %v265_v38 = vrot.slane %v7947_v43, 3 }
  0x2d   :  { %6911 = vmatprep.subr.bf16.mxu1 %v7398_v49  ;;  %7239 = vmatpush3.bf16.msra.mxu0 %v7402_v41  ;;  %v415_v41 = vpack.c.bf16 %v132_v17, %v130_v12  ;;  %v336_v49 = vrot.slane %v7947_v43, 4  ;;  %v7410_v12 = vld [vmem:[%s11932_s1 + $0xa8] sm:$0xff]  }
  0x2e   :  { %7240 = vmatprep.subr.bf16.mxu0 %v7406_v58 }
  0x30   :  { %6912 = vmatpush3.bf16.msra.mxu1 %v7400_v1  ;;  %v160_v1 = vsel %vm115_vm0, %v157_v53, %v159_v57  ;;  %v11945_v53 = vrot.slane %v7980_v56, 3 }
  0x31   :  { %6913 = vmatprep.subr.bf16.mxu1 %v7403_v63  ;;  %7241 = vmatpush3.bf16.msra.mxu0 %v7406_v58  ;;  %v450_v58 = vpack.c.bf16 %v160_v1, %v158_v62  ;;  %v7417_v63 = vld [vmem:[%s11932_s1 + $0x130] sm:$0xff]   ;;  %v8173_v62 = vsel %vm115_vm0, %v137_v2, %v139_v24  ;;  %v7416_v1 = vld [vmem:[%s11932_s1 + $0xf8] sm:$0xff]   ;;  %v162_v24 = vsel %vm115_vm0, %v159_v57, %v161_v9 }
  0x32   :  { %883 = vmatmul.mubr.bf16.gmra.mrb[8].mxu1 %v7908_v22  ;;  %835 = vmatmul.mubr.bf16.gmra.mrb[8].mxu0 %v7928_v32  ;;  %v134_v22 = vsel %vm115_vm0, %v131_v50, %v133_v59  ;;  %v136_v32 = vsel %vm115_vm0, %v133_v59, %v135_v60  ;;  %v6551_v50 = vcombine.low %v8013_v7, %v8013_v7  ;;  %v340_v59 = vrot.slane %v7980_v56, 4 }
  0x33   :  { %890 = vmatprep.mubr.bf16.mxu1 %v445_v44  ;;  %842 = vmatprep.mubr.bf16.mxu0 %v415_v41  ;;  %v338_v44 = vrot.slane %v7977_v55, 4  ;;  %v342_v41 = vrot.slane %v8024_v10, 4  ;;  %v420_v61 = vpack.c.bf16 %v136_v32, %v134_v22  ;;  %v8183_v22 = vsel %vm257_vm1, %v258_v3, %v259_v11  ;;  %v7419_v3 = vld [vmem:[%s11932_s1 + $0x138] sm:$0xff]  }
  0x34   :  { %6914 = vmatpush3.bf16.msra.mxu1 %v7404_v34  ;;  %7242 = vmatprep.subr.bf16.mxu0 %v7409_v37  ;;  %v7414_v34 = vld [vmem:[%s11932_s1 + $0xb0] sm:$0xff]   ;;  %v8208_v57 = vsel %vm186_vm2, %v187_v23, %v188_v28  ;;  %v8215_v9 = vsel %vm186_vm2, %v188_v28, %v190_v4  ;;  %v7418_v23 = vld [vmem:[%s11932_s1 + $0xb8] sm:$0xff]   ;;  %v12048_v28 = vrot.slane %v7897_v19, 4 }
  0x35   :  { %6915 = vmatprep.subr.bf16.mxu1 %v7408_v47  ;;  %7243 = vmatpush3.bf16.msra.mxu0 %v7409_v37  ;;  %v344_v37 = vrot.slane %v8037_v25, 4  ;;  %v8166_v47 = vsel %vm115_vm0, %v135_v60, %v137_v2  ;;  %v8196_v2 = vsel %vm257_vm1, %v259_v11, %v261_v13  ;;  %v12051_v11 = vrot.slane %v7944_v42, 4 }
  0x36   :  { %7244 = vmatprep.subr.bf16.mxu0 %v7413_v30  ;;  %v8332_v42 = vsel %vm328_vm3, %v340_v59, %v342_v41 }
  0x38   :  { %6916 = vmatpush3.bf16.msra.mxu1 %v7410_v12  ;;  %v11944_v12 = vrot.slane %v7880_v14, 3 }
  0x39   :  { %6917 = vmatprep.subr.bf16.mxu1 %v7412_v39  ;;  %7245 = vmatpush3.bf16.msra.mxu0 %v7413_v30  ;;  %v425_v30 = vpack.c.bf16 %v8173_v62, %v8166_v47  ;;  %v12047_v39 = vrot.slane %v7900_v20, 4  ;;  %v455_v20 = vpack.c.bf16 %v162_v24, %v162_v24  ;;  %v291_v24 = vrot.slane %v7969_v51, 3 }
  0x3a   :  { %891 = vmatmul.mubr.bf16.gmra.mrb[12].mxu1 %v7953_v45  ;;  %843 = vmatmul.mubr.bf16.gmra.mrb[12].mxu0 %v7960_v48  ;;  %v12049_v48 = vrot.slane %v7903_v21, 4  ;;  %v8292_v45 = vsel %vm328_vm3, %v338_v44, %v340_v59  ;;  %v212_v59 = vrot.slane %v7883_v15, 2 }
  0x3b   :  { %v8231_v32 = vsel %vm328_vm3, %v12048_v28, %v12047_v39  ;;  %898 = vmatprep.mubr.bf16.mxu1 %v450_v58  ;;  %850 = vmatprep.mubr.bf16.mxu0 %v420_v61  ;;  %v12050_v47 = vmov %v12047_v39  ;;  %v12053_v28 = vmov %v12051_v11  ;;  %v12054_v58 = vrot.slane %v7947_v43, 2 }
  0x3c   :  { %v8240_v62 = vsel %vm328_vm3, %v12050_v47, %v12049_v48  ;;  %v12052_v19 = vmov %v12049_v48  ;;  %v8254_v61 = vsel %vm328_vm3, %v12053_v28, %v336_v49  ;;  %6918 = vmatpush3.bf16.msra.mxu1 %v7414_v34  ;;  %7246 = vmatprep.subr.bf16.mxu0 %v7417_v63  ;;  %v402_v48 = vpack.c.bf16 %v8196_v2, %v8183_v22 }
  0x3d   :  { %v8247_v39 = vsel %vm328_vm3, %v12052_v19, %v12051_v11  ;;  %v401_v47 = vpack.c.bf16 %v8215_v9, %v8208_v57  ;;  %v11948_v11 = vrot.slane %v8052_v35, 4  ;;  %6919 = vmatprep.subr.bf16.mxu1 %v7416_v1  ;;  %7247 = vmatpush3.bf16.msra.mxu0 %v7417_v63  ;;  %v8267_v19 = vsel %vm257_vm1, %v261_v13, %v263_v29 }
  0x3e   :  { %v8274_v34 = vsel %vm257_vm1, %v263_v29, %v265_v38  ;;  %7248 = vmatprep.subr.bf16.mxu0 %v7419_v3  ;;  %v403_v63 = vpack.c.bf16 %v8240_v62, %v8231_v32  ;;  %v408_v1 = vpack.c.bf16 %v8254_v61, %v8247_v39  ;;  %v11947_v13 = vrot.slane %v7880_v14, 4 }
  0x3f   :  { %v8287_v29 = vsel %vm328_vm3, %v336_v49, %v338_v44  ;;  %v8303_v49 = vsel %vm186_vm2, %v190_v4, %v192_v40  ;;  %v8310_v44 = vsel %vm186_vm2, %v192_v40, %v12054_v58  ;;  %v11946_v32 = vrot.slane %v7880_v14, 2 }
  0x40   :  { %6920 = vmatpush3.bf16.msra.mxu1 %v7418_v23  ;;  %v12055_v23 = vrot.slane %v7977_v55, 3  ;;  %v283_v40 = vrot.slane %v7883_v15, 3  ;;  %v285_v58 = vrot.slane %v7886_v16, 3  ;;  %v364_v22 = vrot.slane %v7972_v52, 4 }
  0x41   :  { %7249 = vmatpush3.bf16.msra.mxu0 %v7419_v3  ;;  %v8344_v3 = vsel %vm328_vm3, %v342_v41, %v344_v37  ;;  %v214_v41 = vrot.slane %v7886_v16, 2  ;;  %v366_v2 = vrot.slane %v8008_v6, 4  ;;  %v228_v62 = vrot.slane %v8040_v26, 2 }
  0x42   :  { %v8318_v60 = vsel %vm257_vm1, %v265_v38, %v12055_v23  ;;  %v12056_v21 = vmov %v12055_v23  ;;  %899 = vmatmul.mubr.bf16.gmra.mrb[16].mxu1 %v7995_v0  ;;  %851 = vmatmul.mubr.bf16.gmra.mrb[16].mxu0 %v8005_v5  ;;  %v8353_v0 = vsel %vm328_vm3, %v344_v37, %v11948_v11  ;;  %v8358_v5 = vsel %vm257_vm1, %v11944_v12, %v283_v40 }
  0x43   :  { %v8325_v4 = vsel %vm257_vm1, %v12056_v21, %v11945_v53  ;;  %906 = vmatprep.mubr.bf16.mxu1 %v455_v20  ;;  %858 = vmatprep.mubr.bf16.mxu0 %v425_v30  ;;  %v354_v23 = vrot.slane %v7883_v15, 4  ;;  %v8363_v21 = vsel %vm257_vm1, %v283_v40, %v285_v58  ;;  %v8368_v30 = vsel %vm186_vm2, %v11946_v32, %v212_v59 }
  0x44   :  { %v356_v37 = vrot.slane %v7886_v16, 4  ;;  %v358_v20 = vrot.slane %v7917_v27, 4  ;;  %v8375_v53 = vsel %vm186_vm2, %v212_v59, %v214_v41  ;;  %v360_v40 = vrot.slane %v7923_v31, 4 }
  0x45   :  { %v8380_v15 = vsel %vm328_vm3, %v11947_v13, %v354_v23  ;;  %v287_v12 = vrot.slane %v7917_v27, 3  ;;  %v289_v13 = vrot.slane %v7923_v31, 3  ;;  %v216_v11 = vrot.slane %v7917_v27, 2 }
  0x46   :  { %v8386_v16 = vsel %vm328_vm3, %v354_v23, %v356_v37  ;;  %v8389_v28 = vsel %vm328_vm3, %v356_v37, %v358_v20  ;;  %v8395_v17 = vsel %vm328_vm3, %v358_v20, %v360_v40  ;;  %v218_v37 = vrot.slane %v7923_v31, 2 }
  0x47   :  { %v8402_v23 = vsel %vm257_vm1, %v285_v58, %v287_v12  ;;  %v8407_v38 = vsel %vm257_vm1, %v287_v12, %v289_v13  ;;  %v8410_v20 = vsel %vm186_vm2, %v214_v41, %v216_v11  ;;  %v293_v59 = vrot.slane %v7972_v52, 3 }
  0x48   :  { %v220_v27 = vrot.slane %v7969_v51, 2  ;;  %v8421_v58 = vsel %vm186_vm2, %v216_v11, %v218_v37  ;;  %v8424_v12 = vsel %vm257_vm1, %v289_v13, %v291_v24  ;;  %v222_v41 = vrot.slane %v7972_v52, 2 }
  0x49   :  { %v362_v11 = vrot.slane %v7969_v51, 4  ;;  %v295_v51 = vrot.slane %v8008_v6, 3  ;;  %v297_v52 = vrot.slane %v8018_v8, 3  ;;  %v224_v13 = vrot.slane %v8008_v6, 2 }
  0x4a   :  { %907 = vmatmul.mubr.bf16.gmra.mrb[20].mxu1 %v6551_v50  ;;  %859 = vmatmul.mubr.bf16.gmra.mrb[20].mxu0 %v8029_v18  ;;  %v8433_v18 = vsel %vm257_vm1, %v291_v24, %v293_v59  ;;  %v8436_v50 = vsel %vm186_vm2, %v218_v37, %v220_v27  ;;  %v8442_v31 = vsel %vm186_vm2, %v220_v27, %v222_v41  ;;  %v372_v61 = vrot.slane %v8048_v33, 4 }
  0x4b   :  { %946 = vmatprep.mubr.bf16.mxu1 %v402_v48  ;;  %7250 = vmatprep.mubr.bf16.mxu0 %v403_v63  ;;  %v8449_v24 = vsel %vm328_vm3, %v360_v40, %v362_v11  ;;  %v11949_v63 = vrot.slane %v8018_v8, 4  ;;  %v8454_v37 = vsel %vm328_vm3, %v362_v11, %v364_v22  ;;  %v8457_v27 = vsel %vm328_vm3, %v364_v22, %v366_v2 }
  0x4c   :  { %v8469_v7 = vsel %vm257_vm1, %v293_v59, %v295_v51  ;;  %v226_v11 = vrot.slane %v8018_v8, 2  ;;  %v8475_v32 = vsel %vm257_vm1, %v295_v51, %v297_v52  ;;  %v8478_v6 = vsel %vm186_vm2, %v222_v41, %v224_v13 }
  0x4d   :  { %v8466_v40 = vsel %vm328_vm3, %v366_v2, %v11949_v63  ;;  %v299_v48 = vrot.slane %v8040_v26, 3  ;;  %v301_v59 = vrot.slane %v8048_v33, 3  ;;  %v370_v2 = vrot.slane %v8040_v26, 4 }
  0x4e   :  { %v8484_v63 = vsel %vm186_vm2, %v224_v13, %v226_v11  ;;  %v230_v13 = vrot.slane %v8048_v33, 2  ;;  %v12057_v22 = vpack.c.bf16 %v8274_v34, %v8267_v19  ;;  %v12058_v57 = vpack.c.bf16 %v8292_v45, %v8287_v29 }
  0x4f   :  { %v446_v41 = vpack.c.bf16 %v8484_v63, %v8478_v6  ;;  %v8497_v51 = vsel %vm257_vm1, %v297_v52, %v299_v48  ;;  %v8508_v9 = vsel %vm257_vm1, %v299_v48, %v301_v59  ;;  %v8511_v39 = vsel %vm186_vm2, %v226_v11, %v228_v62 }
  0x50   :  { %v12059_v26 = vrot.slane %v8055_v36, 4  ;;  %v452_v45 = vpack.c.bf16 %v8508_v9, %v8497_v51  ;;  %v8523_v34 = vsel %vm186_vm2, %v228_v62, %v230_v13  ;;  %v303_v29 = vrot.slane %v8076_v54, 3 }
  0x51   :  { %v451_v48 = vpack.c.bf16 %v8523_v34, %v8511_v39  ;;  %v232_v33 = vrot.slane %v8076_v54, 2  ;;  %v406_v52 = vpack.c.bf16 %v8310_v44, %v8303_v49  ;;  %v418_v11 = vpack.c.bf16 %v8344_v3, %v8332_v42 }
  0x52   :  { %947 = vmatmul.mubr.bf16.vlgmr.msra.gmra.mrb[24].mxu1 %v401_v47  ;;  %7251 = vmatmul.mubr.bf16.vlgmr.msra.gmra.mrb[24].mxu0 %v408_v1  ;;  %v374_v47 = vrot.slane %v8076_v54, 4  ;;  %v12060_v1 = vrot.slane %v8052_v35, 4  ;;  %v412_v62 = vpack.c.bf16 %v8325_v4, %v8318_v60  ;;  %v12061_v54 = vrot.slane %v7977_v55, 2 }
  0x53   :  { %954 = vmatprep.mubr.bf16.mxu1 %v12057_v22  ;;  %7254 = vmatprep.mubr.bf16.mxu0 %v12058_v57  ;;  %v8534_v22 = vsel %vm257_vm1, %v301_v59, %v303_v29  ;;  %v12063_v44 = vrot.slane %v7980_v56, 2  ;;  %v12065_v4 = vrot.slane %v8069_v46, 4  ;;  %v12066_v3 = vrot.slane %v8055_v36, 4 }
  0x54   :  { %v349_v19 = vsel %vm328_vm3, %v12060_v1, %v12059_v26  ;;  %v8540_v26 = vsel %vm186_vm2, %v230_v13, %v232_v33  ;;  %v12062_v1 = vrot.slane %v7947_v43, 2  ;;  %v12064_v42 = vmov %v12061_v54 }
  0x55   :  { %v423_v57 = vpack.c.bf16 %v349_v19, %v8353_v0  ;;  %v199_v60 = vsel %vm186_vm2, %v12064_v42, %v12063_v44  ;;  %v351_v0 = vsel %vm328_vm3, %v12066_v3, %v12065_v4  ;;  %v12067_v59 = vrot.slane %v7880_v14, 4 }
  0x56   :  { %v197_v49 = vsel %vm186_vm2, %v12062_v1, %v12061_v54  ;;  %v12068_v43 = vmov %v12065_v4  ;;  %v12069_v19 = vrot.slane %v8024_v10, 3  ;;  %v12070_v29 = vrot.slane %v7980_v56, 3 }
  0x57   :  { %v353_v13 = vsel %vm328_vm3, %v12068_v43, %v12067_v59  ;;  %v12071_v33 = vrot.slane %v8037_v25, 3  ;;  %v12073_v1 = vrot.slane %v8024_v10, 2  ;;  %v12074_v4 = vrot.slane %v8037_v25, 2 }
  0x58   :  { %v272_v55 = vsel %vm257_vm1, %v12070_v29, %v12069_v19  ;;  %v12079_v56 = vrot.slane %v8055_v36, 3  ;;  %v12089_v25 = vrot.slane %v7880_v14, 3 }
  0x59   :  { %v201_v42 = vsel %vm186_vm2, %v12063_v44, %v12073_v1  ;;  %v12075_v3 = vmov %v12073_v1 }
  0x5a   :  { %955 = vmatmul.mubr.bf16.gmra.mrb[28].mxu1 %v406_v52  ;;  %7255 = vmatmul.mubr.bf16.gmra.mrb[28].mxu0 %v418_v11  ;;  %v12072_v52 = vmov %v12069_v19  ;;  %v203_v59 = vsel %vm186_vm2, %v12075_v3, %v12074_v4 }
  0x5b   :  { %962 = vmatprep.mubr.bf16.mxu1 %v412_v62  ;;  %7258 = vmatprep.mubr.bf16.mxu0 %v423_v57  ;;  %v274_v11 = vsel %vm257_vm1, %v12072_v52, %v12071_v33  ;;  %v411_v62 = vpack.c.bf16 %v199_v60, %v197_v49  ;;  %v428_v57 = vpack.c.bf16 %v353_v13, %v351_v0  ;;  %v12077_v60 = vrot.slane %v8052_v35, 3 }
  0x5c   :  { %v417_v54 = vpack.c.bf16 %v274_v11, %v272_v55  ;;  %v12076_v49 = vpack.c.bf16 %v8386_v16, %v8380_v15  ;;  %v12078_v0 = vmov %v12071_v33  ;;  %v416_v29 = vpack.c.bf16 %v203_v59, %v201_v42 }
  0x5d   :  { %v276_v43 = vsel %vm257_vm1, %v12078_v0, %v12077_v60  ;;  %v12080_v13 = vmov %v12077_v60  ;;  %v12081_v55 = vpack.c.bf16 %v8395_v17, %v8389_v28  ;;  %v12082_v15 = vrot.slane %v8052_v35, 2 }
  0x5e   :  { %v278_v19 = vsel %vm257_vm1, %v12080_v13, %v12079_v56  ;;  %v12083_v16 = vmov %v12074_v4  ;;  %v12084_v52 = vrot.slane %v8055_v36, 2  ;;  %v12087_v17 = vrot.slane %v8069_v46, 3 }
  0x5f   :  { %v422_v10 = vpack.c.bf16 %v278_v19, %v276_v43  ;;  %v205_v33 = vsel %vm186_vm2, %v12083_v16, %v12082_v15  ;;  %v12085_v11 = vmov %v12082_v15  ;;  %v12088_v28 = vmov %v12079_v56 }
  0x60   :  { %v12090_v1 = vmov %v12087_v17  ;;  %v12091_v35 = vrot.slane %v8018_v8, 4  ;;  %v373_v4 = vsel %vm328_vm3, %v370_v2, %v372_v61  ;;  %v12092_v59 = vpack.c.bf16 %v8466_v40, %v8457_v27 }
  0x61   :  { %v282_v44 = vsel %vm257_vm1, %v12090_v1, %v12089_v25  ;;  %v12094_v60 = vmov %v12084_v52  ;;  %v12095_v8 = vrot.slane %v7880_v14, 2  ;;  %v375_v56 = vsel %vm328_vm3, %v372_v61, %v374_v47 }
  0x62   :  { %963 = vmatmul.mubr.bf16.gmra.mrb[32].mxu1 %v411_v62  ;;  %7259 = vmatmul.mubr.bf16.gmra.mrb[32].mxu0 %v428_v57  ;;  %v207_v62 = vsel %vm186_vm2, %v12085_v11, %v12084_v52  ;;  %v12086_v57 = vpack.c.bf16 %v8454_v37, %v8449_v24  ;;  %v371_v42 = vsel %vm328_vm3, %v12091_v35, %v370_v2 }
  0x63   :  { %970 = vmatprep.mubr.bf16.mxu1 %v417_v54  ;;  %7262 = vmatprep.mubr.bf16.mxu0 %v12076_v49  ;;  %v280_v54 = vsel %vm257_vm1, %v12088_v28, %v12087_v17  ;;  %v421_v24 = vpack.c.bf16 %v207_v62, %v205_v33  ;;  %v453_v3 = vpack.c.bf16 %v373_v4, %v371_v42  ;;  %v12093_v49 = vrot.slane %v8069_v46, 2 }
  0x64   :  { %v427_v37 = vpack.c.bf16 %v282_v44, %v280_v54  ;;  %v458_v19 = vpack.c.bf16 %v375_v56, %v375_v56  ;;  %v12097_v27 = vpack.c.bf16 %v8363_v21, %v8358_v5  ;;  %v12098_v36 = vpack.c.bf16 %v8375_v53, %v8368_v30 }
  0x65   :  { %v209_v0 = vsel %vm186_vm2, %v12094_v60, %v12093_v49  ;;  %v12096_v43 = vmov %v12093_v49  ;;  %v12099_v14 = vpack.c.bf16 %v8407_v38, %v8402_v23  ;;  %v12100_v46 = vpack.c.bf16 %v8421_v58, %v8410_v20 }
  0x66   :  { %v211_v2 = vsel %vm186_vm2, %v12096_v43, %v12095_v8  ;;  %v12101_v40 = vpack.c.bf16 %v8433_v18, %v8424_v12 }
  0x67   :  { %v426_v13 = vpack.c.bf16 %v211_v2, %v209_v0 }
  0x6a   :  { %971 = vmatmul.mubr.bf16.gmra.mrb[36].mxu1 %v416_v29  ;;  %7263 = vmatmul.mubr.bf16.gmra.mrb[36].mxu0 %v12081_v55 }
  0x6b   :  { %978 = vmatprep.mubr.bf16.mxu1 %v422_v10  ;;  %7266 = vmatprep.mubr.bf16.mxu0 %v12086_v57 }
  0x72   :  { %979 = vmatmul.mubr.bf16.gmra.mrb[40].mxu1 %v421_v24  ;;  %7267 = vmatmul.mubr.bf16.gmra.mrb[40].mxu0 %v12092_v59 }
  0x73   :  { %986 = vmatprep.mubr.bf16.mxu1 %v427_v37  ;;  %7270 = vmatprep.mubr.bf16.mxu0 %v453_v3 }
  0x7a   :  { %987 = vmatmul.mubr.bf16.gmra.mrb[44].mxu1 %v426_v13  ;;  %7271 = vmatmul.mubr.bf16.gmra.mrb[44].mxu0 %v458_v19 }
  0x7b   :  { %994 = vmatprep.mubr.bf16.mxu1 %v12097_v27 }
  0x82   :  { %995 = vmatmul.mubr.bf16.gmra.mrb[48].mxu1 %v12098_v36 }
  0x83   :  { %1002 = vmatprep.mubr.bf16.mxu1 %v12099_v14 }
  0x8a   :  { %1003 = vmatmul.mubr.bf16.gmra.mrb[52].mxu1 %v12100_v46 }
  0x8b   :  { %1010 = vmatprep.mubr.bf16.mxu1 %v12101_v40 }
  0x8c   :  { %17 = vsyncpa [#allocation3], 0  ;;  %v12102_v5 = vpack.c.bf16 %v8442_v31, %v8436_v50  ;;  %v12103_v53 = vpack.c.bf16 %v8475_v32, %v8469_v7  ;;  %v457_v38 = vpack.c.bf16 %v8534_v22, %v8534_v22  ;;  %v456_v32 = vpack.c.bf16 %v8540_v26, %v8540_v26  ;;  %v7420_v21 = vld [vmem:[%s11934_s3 + $0x40] sm:$0xff]   ;;  %v7422_v23 = vld [vmem:[%s11934_s3 + $0x48] sm:$0xff]  }
  0x8d   :  { %7013 = vmatprep.subr.bf16.mxu1 %v7420_v21  ;;  %v7421_v30 = vld [vmem:[%s11934_s3] sm:$0xff]   ;;  %v7423_v20 = vld [vmem:[%s11934_s3 + $0x8] sm:$0xff]   ;;  %v7424_v55 = vld [vmem:[%s11934_s3 + $0x50] sm:$0xff]   ;;  %vm1814_vm5 = vcmask 1041408   ;;  %vm2547_vm7 = vcmask 1041409   ;;  %vm2549_vm10 = vcmask 1042434  }
  0x8e   :  { %7014 = vmatpush3.bf16.msra.mxu1 %v7421_v30  ;;  %v8688_v12 = vld [vmem:[%s11933_s2] ss:$0 sm:$0xff]  ;;  %v7428_v22 = vld [vmem:[%s11934_s3 + $0xc8] sm:$0xff]   ;;  %v7425_v33 = vld [vmem:[%s11934_s3 + $0x10] sm:$0xff]   ;;  %vm2551_vm11 = vcmask 1043459  }
  0x8f   :  { %7015 = vmatprep.subr.bf16.mxu1 %v7422_v23  ;;  %v7426_v51 = vld [vmem:[%s11934_s3 + $0xc0] sm:$0xff]   ;;  %v7429_v26 = vld [vmem:[%s11934_s3 + $0x88] sm:$0xff]   ;;  %v7431_v8 = vld [vmem:[%s11934_s3 + $0xd0] sm:$0xff]  }
  0x90   :  { %v7427_v61 = vld [vmem:[%s11934_s3 + $0x80] sm:$0xff]   ;;  %7065 = vmatprep.subr.bf16.mxu0 %v7426_v51  ;;  %v7430_v13 = vld [vmem:[%s11934_s3 + $0x58] sm:$0xff]   ;;  %v7433_v19 = vld [vmem:[%s11934_s3 + $0x90] sm:$0xff]  }
  0x91   :  { %7066 = vmatpush3.bf16.msra.mxu0 %v7427_v61  ;;  %v7432_v36 = vld [vmem:[%s11934_s3 + $0x18] sm:$0xff]  }
  0x92   :  { %1011 = vmatmul.mubr.bf16.gmra.mrb[56].mxu1 %v12102_v5  ;;  %7067 = vmatprep.subr.bf16.mxu0 %v7428_v22 }
  0x93   :  { %1018 = vmatprep.mubr.bf16.mxu1 %v12103_v53  ;;  %7016 = vmatpush3.bf16.msra.mxu1 %v7423_v20 }
  0x94   :  { %7017 = vmatprep.subr.bf16.mxu1 %v7424_v55 }
  0x95   :  { %7068 = vmatpush3.bf16.msra.mxu0 %v7429_v26 }
  0x96   :  { %7069 = vmatprep.subr.bf16.mxu0 %v7431_v8 }
  0x97   :  { %7018 = vmatpush3.bf16.msra.mxu1 %v7425_v33 }
  0x98   :  { %7019 = vmatprep.subr.bf16.mxu1 %v7430_v13  ;;  %v7443_v13 = vld [vmem:[%s11934_s3 + $0xa8] sm:$0xff]  }
  0x99   :  { %7070 = vmatpush3.bf16.msra.mxu0 %v7433_v19 }
  0x9a   :  { %1019 = vmatmul.mubr.bf16.gmra.mrb[60].mxu1 %v446_v41 }
  0x9b   :  { %1026 = vmatprep.mubr.bf16.mxu1 %v452_v45  ;;  %7020 = vmatpush3.bf16.msra.mxu1 %v7432_v36 }
  0xa2   :  { %1027 = vmatmul.mubr.bf16.gmra.mrb[64].mxu1 %v451_v48 }
  0xa3   :  { %1034 = vmatprep.mubr.bf16.mxu1 %v457_v38 }
  0xaa   :  { %1035 = vmatmul.mubr.bf16.gmra.mrb[68].mxu1 %v456_v32 }
  0xf5   :  { %v6869_v31 = vpop.f32.mrb[0].mxu1  ;;  %v6833_v58 = vpop.f32.mrb[0].mxu0 }
  0xf6   :  { %v6870_v7 = vpop.f32.mrb[1].mxu1  ;;  %v6834_v18 = vpop.f32.mrb[1].mxu0 }
  0xf7   :  { %v6871_v50 = vadd.f32 %v6870_v7, %v6869_v31  ;;  %v6872_v63 = vpop.f32.mrb[2].mxu1  ;;  %v8690_v6 = vadd.f32 %v6834_v18, %v6833_v58  ;;  %v6836_v41 = vpop.f32.mrb[2].mxu0  ;;  %v7434_v18 = vld [vmem:[%s11934_s3 + $0xd8] sm:$0xff]  }
  0xf8   :  { %v6873_v9 = vpop.f32.mrb[3].mxu1  ;;  %v6837_v39 = vpop.f32.mrb[3].mxu0  ;;  %7071 = vmatprep.subr.bf16.mxu0 %v7434_v18 }
  0xf9   :  { %v8699_v47 = vadd.f32 %v6871_v50, %v8688_v12  ;;  %v6874_v45 = vadd.f32 %v6873_v9, %v6872_v63  ;;  %v8701_v34 = vadd.f32 %v6837_v39, %v6836_v41  ;;  %v7435_v41 = vld [vmem:[%s11934_s3 + $0x98] sm:$0xff]   ;;  %v7436_v39 = vld [vmem:[%s11934_s3 + $0x60] sm:$0xff]  }
  0xfa   :  { %7072 = vmatpush3.bf16.msra.mxu0 %v7435_v41  ;;  %7021 = vmatprep.subr.bf16.mxu1 %v7436_v39  ;;  %v7445_v39 = vld [vmem:[%s11934_s3 + $0x30] sm:$0xff]  }
  0xfb   :  { %12104 = vst [vmem:[#allocation5_spill] sm:$0xff] %v8699_v47  ;;  %v8704_v48 = vadd.f32 %v6874_v45, %v8688_v12  ;;  %v824_v41 = vadd.f32 %v8701_v34, %v8688_v12 }
  0xfd   :  { %12105 = vst [vmem:[#allocation6_spill] sm:$0xff] %v8704_v48  ;;  %v6875_v29 = vpop.f32.mrb[4].mxu1  ;;  %v6839_v10 = vpop.f32.mrb[4].mxu0 }
  0xfe   :  { %v6876_v15 = vpop.f32.mrb[5].mxu1  ;;  %v6840_v16 = vpop.f32.mrb[5].mxu0 }
  0xff   :  { %v6877_v52 = vadd.f32 %v6876_v15, %v6875_v29  ;;  %v6878_v11 = vpop.f32.mrb[6].mxu1  ;;  %v8718_v62 = vadd.f32 %v6840_v16, %v6839_v10  ;;  %v6842_v57 = vpop.f32.mrb[6].mxu0  ;;  %v7437_v29 = vld [vmem:[%s11934_s3 + $0x20] sm:$0xff]  }
 0x100   :  { %v6879_v17 = vpop.f32.mrb[7].mxu1  ;;  %v6843_v28 = vpop.f32.mrb[7].mxu0  ;;  %v7438_v15 = vld [vmem:[%s11934_s3 + $0xe0] sm:$0xff]   ;;  %7022 = vmatpush3.bf16.msra.mxu1 %v7437_v29 }
 0x101   :  { %v8721_v54 = vadd.f32 %v6877_v52, %v8688_v12  ;;  %v6880_v25 = vadd.f32 %v6879_v17, %v6878_v11  ;;  %v8723_v1 = vadd.f32 %v6843_v28, %v6842_v57  ;;  %v7439_v11 = vld [vmem:[%s11934_s3 + $0xa0] sm:$0xff]   ;;  %7073 = vmatprep.subr.bf16.mxu0 %v7438_v15  ;;  %v7440_v57 = vld [vmem:[%s11934_s3 + $0x68] sm:$0xff]  }
 0x102   :  { %7074 = vmatpush3.bf16.msra.mxu0 %v7439_v11  ;;  %7023 = vmatprep.subr.bf16.mxu1 %v7440_v57 }
 0x103   :  { %12106 = vst [vmem:[#allocation7_spill] sm:$0xff] %v8721_v54  ;;  %v8726_v44 = vadd.f32 %v6880_v25, %v8688_v12  ;;  %v7441_v25 = vld [vmem:[%s11934_s3 + $0x28] sm:$0xff]  }
 0x104   :  { %7024 = vmatpush3.bf16.msra.mxu1 %v7441_v25 }
 0x105   :  { %12107 = vst [vmem:[#allocation8_spill] sm:$0xff] %v8726_v44  ;;  %v6881_v35 = vpop.f32.mrb[8].mxu1  ;;  %v6845_v42 = vpop.f32.mrb[8].mxu0 }
 0x106   :  { %v6882_v4 = vpop.f32.mrb[9].mxu1  ;;  %v6846_v24 = vpop.f32.mrb[9].mxu0 }
 0x107   :  { %v6883_v37 = vadd.f32 %v6882_v4, %v6881_v35  ;;  %v6884_v3 = vpop.f32.mrb[10].mxu1  ;;  %v8728_v59 = vadd.f32 %v6846_v24, %v6845_v42  ;;  %v6848_v49 = vpop.f32.mrb[10].mxu0  ;;  %v7442_v35 = vld [vmem:[%s11934_s3 + $0xe8] sm:$0xff]  }
 0x108   :  { %v6885_v60 = vpop.f32.mrb[11].mxu1  ;;  %v6849_v0 = vpop.f32.mrb[11].mxu0  ;;  %7075 = vmatprep.subr.bf16.mxu0 %v7442_v35 }
 0x109   :  { %v8734_v43 = vadd.f32 %v6883_v37, %v8688_v12  ;;  %v6886_v2 = vadd.f32 %v6885_v60, %v6884_v3  ;;  %v8736_v56 = vadd.f32 %v6849_v0, %v6848_v49  ;;  %7076 = vmatpush3.bf16.msra.mxu0 %v7443_v13 }
 0x10b   :  { %12108 = vst [vmem:[#allocation9_spill] sm:$0xff] %v8734_v43  ;;  %v8745_v27 = vadd.f32 %v6886_v2, %v8688_v12 }
 0x10d   :  { %12109 = vst [vmem:[#allocation10_spill] sm:$0xff] %v8745_v27  ;;  %v6887_v14 = vpop.f32.mrb[12].mxu1  ;;  %v6851_v46 = vpop.f32.mrb[12].mxu0 }
 0x10e   :  { %v6888_v40 = vpop.f32.mrb[13].mxu1  ;;  %v6852_v5 = vpop.f32.mrb[13].mxu0 }
 0x10f   :  { %v6889_v53 = vadd.f32 %v6888_v40, %v6887_v14  ;;  %v6890_v38 = vpop.f32.mrb[14].mxu1  ;;  %v8750_v32 = vadd.f32 %v6852_v5, %v6851_v46  ;;  %v6854_v21 = vpop.f32.mrb[14].mxu0  ;;  %v7444_v46 = vld [vmem:[%s11934_s3 + $0x70] sm:$0xff]  }
 0x110   :  { %v6891_v30 = vpop.f32.mrb[15].mxu1  ;;  %v6855_v23 = vpop.f32.mrb[15].mxu0  ;;  %7025 = vmatprep.subr.bf16.mxu1 %v7444_v46 }
 0x111   :  { %v8753_v20 = vadd.f32 %v6889_v53, %v8688_v12  ;;  %v6892_v31 = vadd.f32 %v6891_v30, %v6890_v38  ;;  %v8755_v58 = vadd.f32 %v6855_v23, %v6854_v21  ;;  %v821_v30 = vadd.f32 %v8690_v6, %v8688_v12  ;;  %7026 = vmatpush3.bf16.msra.mxu1 %v7445_v39 }
 0x113   :  { %12110 = vst [vmem:[#allocation11_spill] sm:$0xff] %v8753_v20  ;;  %v8758_v7 = vadd.f32 %v6892_v31, %v8688_v12 }
 0x115   :  { %12111 = vst [vmem:[#allocation12_spill] sm:$0xff] %v8758_v7  ;;  %v6893_v50 = vpop.f32.mrb[16].mxu1  ;;  %v6857_v63 = vpop.f32.mrb[16].mxu0 }
 0x116   :  { %v6894_v51 = vpop.f32.mrb[17].mxu1  ;;  %v6858_v9 = vpop.f32.mrb[17].mxu0 }
 0x117   :  { %v6895_v61 = vadd.f32 %v6894_v51, %v6893_v50  ;;  %v6896_v45 = vpop.f32.mrb[18].mxu1  ;;  %v8769_v22 = vadd.f32 %v6858_v9, %v6857_v63  ;;  %v6860_v26 = vpop.f32.mrb[18].mxu0 }
 0x118   :  { %v6897_v10 = vpop.f32.mrb[19].mxu1  ;;  %v6861_v55 = vpop.f32.mrb[19].mxu0 }
 0x119   :  { %v8778_v16 = vadd.f32 %v6895_v61, %v8688_v12  ;;  %v6898_v33 = vadd.f32 %v6897_v10, %v6896_v45  ;;  %v6862_v52 = vadd.f32 %v6861_v55, %v6860_v26  ;;  %v7446_v61 = vld [vmem:[%s11934_s3 + $0xf0] sm:$0xff]  }
 0x11a   :  { %7077 = vmatprep.subr.bf16.mxu0 %v7446_v61 }
 0x11b   :  { %12112 = vst [vmem:[#allocation13_spill] sm:$0xff] %v8778_v16  ;;  %v8787_v17 = vadd.f32 %v6898_v33, %v8688_v12  ;;  %v8790_v28 = vadd.f32 %v6862_v52, %v8688_v12  ;;  %v829_v33 = vadd.f32 %v8718_v62, %v8688_v12  ;;  %v7447_v62 = vld [vmem:[%s11934_s3 + $0xb0] sm:$0xff]  }
 0x11c   :  { %7078 = vmatpush3.bf16.msra.mxu0 %v7447_v62 }
 0x11d   :  { %12113 = vst [vmem:[#allocation14_spill] sm:$0xff] %v8787_v17  ;;  %v6899_v42 = vpop.f32.mrb[20].mxu1  ;;  %v6863_v4 = vpop.f32.mrb[20].mxu0 }
 0x11e   :  { %v6900_v24 = vpop.f32.mrb[21].mxu1  ;;  %v6864_v37 = vpop.f32.mrb[21].mxu0 }
 0x11f   :  { %v6901_v3 = vadd.f32 %v6900_v24, %v6899_v42  ;;  %v6902_v49 = vpop.f32.mrb[22].mxu1  ;;  %v6865_v60 = vadd.f32 %v6864_v37, %v6863_v4  ;;  %v6866_v0 = vpop.f32.mrb[22].mxu0  ;;  %v832_v42 = vadd.f32 %v8723_v1, %v8688_v12  ;;  %v7448_v1 = vld [vmem:[%s11934_s3 + $0x78] sm:$0xff]  }
 0x120   :  { %v6903_v8 = vpop.f32.mrb[23].mxu1  ;;  %v6867_v2 = vpop.f32.mrb[23].mxu0  ;;  %7027 = vmatprep.subr.bf16.mxu1 %v7448_v1 }
 0x121   :  { %v8802_v19 = vadd.f32 %v6901_v3, %v8688_v12  ;;  %v8805_v36 = vadd.f32 %v6865_v60, %v8688_v12  ;;  %v6868_v14 = vadd.f32 %v6867_v2, %v6866_v0  ;;  %v7761_v60 = vmov 1983009808  }
 0x122   :  { %v1333_v0 = vunpack.c.l.s4 %v7761_v60  ;;  %v1335_v8 = vlaneseq }
 0x123   :  { %12114 = vst [vmem:[#allocation15_spill] sm:$0xff] %v8802_v19  ;;  %v8811_v40 = vadd.f32 %v6868_v14, %v8688_v12 }
 0x125   :  { %v6921_v5 = vpop.f32.mrb[24].mxu1  ;;  %v7252_v53 = vpop.f32.mrb[24].mxu0 }
 0x126   :  { %v6922_v38 = vpop.f32.mrb[25].mxu1  ;;  %v1076_v21 = vpop.f32.mrb[25].mxu0 }
 0x127   :  { %v6923_v23 = vadd.f32 %v6922_v38, %v6921_v5  ;;  %v6924_v31 = vpop.f32.mrb[26].mxu1  ;;  %v7253_v18 = vpop.f32.mrb[26].mxu0 }
 0x128   :  { %v6925_v50 = vpop.f32.mrb[27].mxu1  ;;  %v1079_v63 = vpop.f32.mrb[27].mxu0 }
 0x129   :  { %v6926_v51 = vadd.f32 %v6925_v50, %v6924_v31  ;;  %v949_v9 = vadd.f32 %v6923_v23, %v821_v30  ;;  %v837_v30 = vadd.f32 %v8728_v59, %v8688_v12  ;;  %v8853_v23 = vshrl.u32 %v1335_v8, 7 }
 0x12b   :  { %v8823_v45 = vadd.f32 %v1076_v21, %v949_v9  ;;  %v952_v6 = vadd.f32 %v6926_v51, %v824_v41  ;;  %12115 = vst [vmem:[#allocation16_spill] sm:$0xff] %v8853_v23  ;;  %v840_v9 = vadd.f32 %v8736_v56, %v8688_v12 }
 0x12d   :  { %v1193_v26 = vmin.f32 %v8823_v45, 0.0  ;;  %v8826_v29 = vadd.f32 %v1079_v63, %v952_v6  ;;  %v6927_v34 = vpop.f32.mrb[28].mxu1  ;;  %v8828_v10 = vpop.f32.mrb[28].mxu0  ;;  %vm1170_vm4 = vcmp.gt.f32.partialorder %v8823_v45, 0.0 }
 0x12e   :  { %v6928_v55 = vpop.f32.mrb[29].mxu1  ;;  %v1092_v15 = vpop.f32.mrb[29].mxu0 }
 0x12f   :  { %v1216_v52 = vmul.f32 1.442695, %v1193_v26  ;;  %v1194_v11 = vmin.f32 %v8826_v29, 0.0  ;;  %v6929_v57 = vadd.f32 %v6928_v55, %v6927_v34  ;;  %v6930_v25 = vpop.f32.mrb[30].mxu1  ;;  %v8833_v35 = vpop.f32.mrb[30].mxu0  ;;  %vm1171_vm6 = vcmp.gt.f32.partialorder %v8826_v29, 0.0 }
 0x130   :  { %v6931_v4 = vpop.f32.mrb[31].mxu1  ;;  %v1095_v24 = vpop.f32.mrb[31].mxu0 }
 0x131   :  { %7647 = vpow2.f32 %v1216_v52  ;;  %v1218_v37 = vmul.f32 1.442695, %v1194_v11  ;;  %v957_v3 = vadd.f32 %v6929_v57, %v829_v33  ;;  %v6932_v49 = vadd.f32 %v6931_v4, %v6930_v25 }
 0x133   :  { %7649 = vpow2.f32 %v1218_v37  ;;  %v8840_v2 = vadd.f32 %v7252_v53, %v957_v3  ;;  %v960_v13 = vadd.f32 %v6932_v49, %v832_v42  ;;  %v1334_v53 = vunpack.c.0.s8 %v1333_v0 }
 0x135   :  { %v8845_v14 = vadd.f32 %v7253_v18, %v960_v13  ;;  %v6933_v46 = vpop.f32.mrb[32].mxu1  ;;  %v8847_v5 = vpop.f32.mrb[32].mxu0  ;;  %v1195_v18 = vmin.f32 %v8840_v2, 0.0  ;;  %v8864_v26 = vsub.s32 %v1334_v53, %v8853_v23  ;;  %vm1172_vm8 = vcmp.gt.f32.partialorder %v8840_v2, 0.0 }
 0x136   :  { %v6934_v38 = vpop.f32.mrb[33].mxu1  ;;  %v8849_v21 = vpop.f32.mrb[33].mxu0 }
 0x137   :  { %v6935_v31 = vadd.f32 %v6934_v38, %v6933_v46  ;;  %v6936_v50 = vpop.f32.mrb[34].mxu1  ;;  %v8855_v63 = vpop.f32.mrb[34].mxu0  ;;  %v1196_v6 = vmin.f32 %v8845_v14, 0.0  ;;  %12116 = vst [vmem:[#allocation17_spill] sm:$0xff] %v8864_v26  ;;  %v1220_v52 = vmul.f32 1.442695, %v1195_v18 }
 0x138   :  { %v6937_v41 = vpop.f32.mrb[35].mxu1  ;;  %v8858_v51 = vpop.f32.mrb[35].mxu0  ;;  %v7449_v46 = vld [vmem:[%s11934_s3 + $0x38] sm:$0xff]   ;;  %vm1173_vm9 = vcmp.gt.f32.partialorder %v8845_v14, 0.0 }
 0x139   :  { %v6938_v39 = vadd.f32 %v6937_v41, %v6936_v50  ;;  %v965_v61 = vadd.f32 %v6935_v31, %v837_v30  ;;  %v1222_v37 = vmul.f32 1.442695, %v1196_v6  ;;  %7651 = vpow2.f32 %v1220_v52  ;;  %7028 = vmatpush3.bf16.msra.mxu1 %v7449_v46 }
 0x13b   :  { %v7648_v59 = vpop.eup %7647  ;;  %v8866_v34 = vadd.f32 %v1092_v15, %v965_v61  ;;  %v968_v55 = vadd.f32 %v6938_v39, %v840_v9  ;;  %7653 = vpow2.f32 %v1222_v37 }
 0x13c   :  { %v6593_v33 = vadd.f32 -1.0, %v7648_v59 }
 0x13d   :  { %v7650_v11 = vpop.eup %7649  ;;  %v8869_v57 = vadd.f32 %v1095_v24, %v968_v55  ;;  %v6939_v56 = vpop.f32.mrb[36].mxu1  ;;  %v1197_v3 = vmin.f32 %v8866_v34, 0.0  ;;  %vm1174_vm12 = vcmp.gt.f32.partialorder %v8866_v34, 0.0 }
 0x13e   :  { %v8871_v25 = vpop.f32.mrb[36].mxu0  ;;  %v1285_v42 = vsel %vm1170_vm4, %v8823_v45, %v6593_v33  ;;  %v6594_v4 = vadd.f32 -1.0, %v7650_v11  ;;  %v6940_v15 = vpop.f32.mrb[37].mxu1 }
 0x13f   :  { %12117 = vst [vmem:[#allocation18_spill] sm:$0xff] %v8871_v25  ;;  %v8875_v49 = vpop.f32.mrb[37].mxu0  ;;  %v1331_v60 = vcombine.high %v1285_v42, %v1285_v42  ;;  %v1338_v0 = vrot.slane %v1285_v42, %v8864_v26  ;;  %v8879_v62 = vpop.f32.mrb[38].mxu1  ;;  %v8884_v45 = vadd.f32 %v6940_v15, %v6939_v56  ;;  %v1224_v41 = vmul.f32 1.442695, %v1197_v3 }
 0x140   :  { %12118 = vst [vmem:[#allocation19_spill] sm:$0xff] %v8875_v49  ;;  %v8881_v24 = vpop.f32.mrb[38].mxu0  ;;  %v1286_v8 = vsel %vm1171_vm6, %v8826_v29, %v6594_v4  ;;  %v8886_v13 = vpop.f32.mrb[39].mxu1  ;;  %v7450_v29 = vld [vmem:[%s11934_s3 + $0xf8] sm:$0xff]   ;;  %vm1175_vm13 = vcmp.gt.f32.partialorder %v8869_v57, 0.0 }
 0x141   :  { %12119 = vst [vmem:[#allocation20_spill] sm:$0xff] %v8881_v24  ;;  %v8888_v1 = vpop.f32.mrb[39].mxu0  ;;  %v1345_v38 = vrot.slane %v1331_v60, %v8864_v26  ;;  %v1346_v30 = vcombine.high %v1338_v0, %v1338_v0  ;;  %v1815_v53 = vsel %vm1814_vm5, %v1338_v0, -inf  ;;  %v1348_v31 = vcombine.high %v1286_v8, %v1286_v8  ;;  %7079 = vmatprep.subr.bf16.mxu0 %v7450_v29 }
 0x142   :  { %12120 = vst [vmem:[#allocation21_spill] sm:$0xff] %v8888_v1  ;;  %v1816_v50 = vrot.slane %v1815_v53, 4  ;;  %v1355_v18 = vrot.slane %v1286_v8, %v8864_v26  ;;  %7655 = vpow2.f32 %v1224_v41 }
 0x143   :  { %v1347_v9 = vcombine.high %v1345_v38, %v1345_v38  ;;  %v1822_v39 = vsel %vm1814_vm5, %v1346_v30, -inf  ;;  %v1829_v61 = vsel %vm1814_vm5, %v1345_v38, -inf  ;;  %v1362_v6 = vrot.slane %v1348_v31, %v8864_v26 }
 0x144   :  { %v1817_v59 = vmax.f32 %v1815_v53, %v1816_v50  ;;  %v1823_v55 = vrot.slane %v1822_v39, 4  ;;  %v1830_v33 = vrot.slane %v1829_v61, 4  ;;  %v1363_v52 = vcombine.high %v1355_v18, %v1355_v18 }
 0x145   :  { %v1836_v11 = vsel %vm1814_vm5, %v1347_v9, -inf  ;;  %v1364_v56 = vcombine.high %v1362_v6, %v1362_v6  ;;  %v1843_v42 = vsel %vm1814_vm5, %v1355_v18, -inf  ;;  %v1857_v4 = vsel %vm1814_vm5, %v1362_v6, -inf  ;;  %v8905_v37 = vpop.f32.mrb[40].mxu1 }
 0x146   :  { %v1818_v3 = vrot.slane %v1817_v59, 2  ;;  %v1824_v15 = vmax.f32 %v1822_v39, %v1823_v55  ;;  %v1831_v60 = vmax.f32 %v1829_v61, %v1830_v33  ;;  %v1837_v0 = vrot.slane %v1836_v11, 4  ;;  %v8907_v8 = vpop.f32.mrb[41].mxu1  ;;  %v7652_v33 = vpop.eup %7651 }
 0x147   :  { %v1844_v46 = vrot.slane %v1843_v42, 4  ;;  %v1850_v38 = vsel %vm1814_vm5, %v1363_v52, -inf  ;;  %v1858_v30 = vrot.slane %v1857_v4, 4  ;;  %v1864_v53 = vsel %vm1814_vm5, %v1364_v56, -inf  ;;  %v8911_v31 = vpop.f32.mrb[42].mxu1  ;;  %v7654_v56 = vpop.eup %7653 }
 0x148   :  { %v1825_v29 = vrot.slane %v1824_v15, 2  ;;  %v1832_v50 = vrot.slane %v1831_v60, 2  ;;  %v1838_v18 = vmax.f32 %v1836_v11, %v1837_v0  ;;  %v8913_v9 = vpop.f32.mrb[43].mxu1  ;;  %v1819_v6 = vmax.f32 %v1817_v59, %v1818_v3 }
 0x149   :  { %v1845_v39 = vmax.f32 %v1843_v42, %v1844_v46  ;;  %v1851_v61 = vrot.slane %v1850_v38, 4  ;;  %v1865_v55 = vrot.slane %v1864_v53, 4  ;;  %v1859_v52 = vmax.f32 %v1857_v4, %v1858_v30 }
 0x14a   :  { %v1826_v23 = vmax.f32 %v1824_v15, %v1825_v29  ;;  %v1833_v19 = vmax.f32 %v1831_v60, %v1832_v50  ;;  %v1839_v17 = vrot.slane %v1838_v18, 2  ;;  %v8917_v11 = vadd.f32 %v8750_v32, %v8688_v12 }
 0x14b   :  { %v1852_v16 = vmax.f32 %v1850_v38, %v1851_v61  ;;  %v1866_v7 = vmax.f32 %v1864_v53, %v1865_v55  ;;  %v1820_v41 = vrot.slane %v1819_v6, 1  ;;  %v1846_v0 = vrot.slane %v1845_v39, 2 }
 0x14c   :  { %v1827_v20 = vrot.slane %v1826_v23, 1  ;;  %v1198_v59 = vmin.f32 %v8869_v57, 0.0  ;;  %v1834_v3 = vrot.slane %v1833_v19, 1  ;;  %v8922_v15 = vmax.f32 %v1838_v18, %v1839_v17  ;;  %v7656_v27 = vpop.eup %7655 }
 0x14d   :  { %v8920_v42 = vpop.f32.mrb[44].mxu1  ;;  %v1860_v60 = vrot.slane %v1859_v52, 2  ;;  %v6595_v4 = vadd.f32 -1.0, %v7652_v33  ;;  %v8928_v38 = vadd.f32 %v8755_v58, %v8688_v12  ;;  %v1853_v30 = vrot.slane %v1852_v16, 2 }
 0x14e   :  { %v8924_v46 = vpop.f32.mrb[45].mxu1  ;;  %v1867_v32 = vrot.slane %v1866_v7, 2  ;;  %v8935_v29 = vadd.f32 %v8769_v22, %v8688_v12  ;;  %v8937_v17 = vmax.f32 %v1826_v23, %v1827_v20  ;;  %v6596_v18 = vadd.f32 -1.0, %v7654_v56 }
 0x14f   :  { %v8931_v53 = vpop.f32.mrb[46].mxu1  ;;  %v1287_v50 = vsel %vm1172_vm8, %v8840_v2, %v6595_v4  ;;  %v1821_v55 = vmax.f32 %v1819_v6, %v1820_v41  ;;  %v8942_v58 = vmax.f32 %v1845_v39, %v1846_v0  ;;  %v1226_v33 = vmul.f32 1.442695, %v1198_v59 }
 0x150   :  { %12121 = vst [vmem:[#allocation22_spill] sm:$0xff] %v8937_v17  ;;  %v8940_v61 = vpop.f32.mrb[47].mxu1  ;;  %v8945_v43 = vmax.f32 %v1833_v19, %v1834_v3  ;;  %v1841_v24 = vrot.slane %v8922_v15, 1  ;;  %v8948_v12 = vmax.f32 %v1859_v52, %v1860_v60  ;;  %v1365_v20 = vcombine.high %v1287_v50, %v1287_v50 }
 0x151   :  { %v8950_v22 = vmax.f32 %v1852_v16, %v1853_v30  ;;  %v8952_v2 = vmax.f32 %v1866_v7, %v1867_v32  ;;  %v1372_v23 = vrot.slane %v1287_v50, %v8864_v26  ;;  %v1288_v6 = vsel %vm1173_vm9, %v8845_v14, %v6596_v18 }
 0x152   :  { %12122 = vst [vmem:[#allocation23_spill] sm:$0xff] %v8945_v43  ;;  %v2548_v39 = vsel %vm2547_vm7, %v8937_v17, %v1821_v55  ;;  %v1379_v19 = vrot.slane %v1365_v20, %v8864_v26  ;;  %v1382_v56 = vcombine.high %v1288_v6, %v1288_v6  ;;  %v1389_v41 = vrot.slane %v1288_v6, %v8864_v26 }
 0x153   :  { %v1380_v0 = vcombine.high %v1372_v23, %v1372_v23  ;;  %v1871_v52 = vsel %vm1814_vm5, %v1372_v23, -inf  ;;  %v6597_v59 = vadd.f32 -1.0, %v7656_v27  ;;  %7657 = vpow2.f32 %v1226_v33 }
 0x154   :  { %v1381_v7 = vcombine.high %v1379_v19, %v1379_v19  ;;  %v1872_v3 = vrot.slane %v1871_v52, 4  ;;  %v1885_v14 = vsel %vm1814_vm5, %v1379_v19, -inf  ;;  %v1396_v60 = vrot.slane %v1382_v56, %v8864_v26 }
 0x155   :  { %v8961_v16 = vpop.f32.mrb[48].mxu1  ;;  %v1878_v30 = vsel %vm1814_vm5, %v1380_v0, -inf  ;;  %v1886_v32 = vrot.slane %v1885_v14, 4  ;;  %v1397_v50 = vcombine.high %v1389_v41, %v1389_v41  ;;  %v1899_v18 = vsel %vm1814_vm5, %v1389_v41, -inf }
 0x156   :  { %v8965_v4 = vpop.f32.mrb[49].mxu1  ;;  %v1873_v27 = vmax.f32 %v1871_v52, %v1872_v3  ;;  %v1879_v33 = vrot.slane %v1878_v30, 4  ;;  %v1892_v20 = vsel %vm1814_vm5, %v1381_v7, -inf  ;;  %v1398_v23 = vcombine.high %v1396_v60, %v1396_v60 }
 0x157   :  { %v8969_v55 = vpop.f32.mrb[50].mxu1  ;;  %v1887_v19 = vmax.f32 %v1885_v14, %v1886_v32  ;;  %v1893_v17 = vrot.slane %v1892_v20, 4  ;;  %v1900_v56 = vrot.slane %v1899_v18, 4  ;;  %v1906_v25 = vsel %vm1814_vm5, %v1397_v50, -inf  ;;  %v7451_v14 = vld [vmem:[%s11934_s3 + $0xb8] sm:$0xff]  }
 0x158   :  { %12123 = vst [vmem:[#allocation24_spill] sm:$0xff] %v8969_v55  ;;  %v8972_v6 = vpop.f32.mrb[51].mxu1  ;;  %v1874_v44 = vrot.slane %v1873_v27, 2  ;;  %v1880_v0 = vmax.f32 %v1878_v30, %v1879_v33  ;;  %v1907_v54 = vrot.slane %v1906_v25, 4  ;;  %v1913_v1 = vsel %vm1814_vm5, %v1396_v60, -inf  ;;  %7080 = vmatpush3.bf16.msra.mxu0 %v7451_v14 }
 0x159   :  { %12124 = vst [vmem:[#allocation25_spill] sm:$0xff] %v8972_v6  ;;  %v1888_v41 = vrot.slane %v1887_v19, 2  ;;  %v1894_v48 = vmax.f32 %v1892_v20, %v1893_v17  ;;  %v1901_v49 = vmax.f32 %v1899_v18, %v1900_v56  ;;  %v1914_v52 = vrot.slane %v1913_v1, 4 }
 0x15a   :  { %v1848_v3 = vrot.slane %v8942_v58, 1  ;;  %v1862_v7 = vrot.slane %v8948_v12, 1  ;;  %v1875_v47 = vmax.f32 %v1873_v27, %v1874_v44  ;;  %v1881_v6 = vrot.slane %v1880_v0, 2 }
 0x15b   :  { %v8982_v32 = vmax.f32 %v8922_v15, %v1841_v24  ;;  %v2550_v60 = vsel %vm2549_vm10, %v8945_v43, %v2548_v39  ;;  %v1855_v17 = vrot.slane %v8950_v22, 1  ;;  %v1869_v50 = vrot.slane %v8952_v2, 1 }
 0x15c   :  { %v1889_v44 = vmax.f32 %v1887_v19, %v1888_v41  ;;  %v1908_v18 = vmax.f32 %v1906_v25, %v1907_v54  ;;  %v1920_v27 = vsel %vm1814_vm5, %v1398_v23, -inf  ;;  %v1895_v15 = vrot.slane %v1894_v48, 2 }
 0x15d   :  { %12125 = vst [vmem:[#allocation26_spill] sm:$0xff] %v8982_v32  ;;  %v8988_v30 = vpop.f32.mrb[52].mxu1  ;;  %v7658_v24 = vpop.eup %7657  ;;  %v1902_v39 = vrot.slane %v1901_v49, 2  ;;  %v1915_v20 = vmax.f32 %v1913_v1, %v1914_v52  ;;  %v1289_v56 = vsel %vm1174_vm12, %v8866_v34, %v6597_v59  ;;  %v9002_v54 = vmax.f32 %v8948_v12, %v1862_v7 }
 0x15e   :  { %12126 = vst [vmem:[#allocation27_spill] sm:$0xff] %v8988_v30  ;;  %v8993_v33 = vpop.f32.mrb[53].mxu1  ;;  %v8999_v30 = vmax.f32 %v8942_v58, %v1848_v3  ;;  %v1876_v25 = vrot.slane %v1875_v47, 1  ;;  %v9004_v23 = vmax.f32 %v1880_v0, %v1881_v6  ;;  %v9010_v41 = vsel %vm2551_vm11, %v8982_v32, %v2550_v60 }
 0x15f   :  { %v8996_v55 = vpop.f32.mrb[54].mxu1  ;;  %12128 = vst [vmem:[#allocation29_spill] sm:$0xff] %v9002_v54  ;;  %12129 = vst [vmem:[#allocation30_spill] sm:$0xff] %v9010_v41  ;;  %v9015_v34 = vsel %vm2547_vm7, %v8982_v32, %v8945_v43  ;;  %v9018_v1 = vmax.f32 %v8950_v22, %v1855_v17  ;;  %v1921_v58 = vrot.slane %v1920_v27, 4  ;;  %v9021_v12 = vmax.f32 %v8952_v2, %v1869_v50 }
 0x160   :  { %12127 = vst [vmem:[#allocation28_spill] sm:$0xff] %v8999_v30  ;;  %v9006_v19 = vpop.f32.mrb[55].mxu1  ;;  %12130 = vst [vmem:[#allocation31_spill] sm:$0xff] %v9015_v34  ;;  %v1890_v59 = vrot.slane %v1889_v44, 1  ;;  %v1909_v6 = vrot.slane %v1908_v18, 2  ;;  %v1399_v0 = vcombine.high %v1289_v56, %v1289_v56  ;;  %v1896_v52 = vmax.f32 %v1894_v48, %v1895_v15 }
 0x161   :  { %12131 = vst [vmem:[#allocation32_spill] sm:$0xff] %v9018_v1  ;;  %12132 = vst [vmem:[#allocation33_spill] sm:$0xff] %v9021_v12  ;;  %v1903_v3 = vmax.f32 %v1901_v49, %v1902_v39  ;;  %v1916_v7 = vrot.slane %v1915_v20, 2  ;;  %v1406_v14 = vrot.slane %v1289_v56, %v8864_v26  ;;  %v9024_v60 = vmax.f32 %v1875_v47, %v1876_v25 }
 0x162   :  { %v1883_v41 = vrot.slane %v9004_v23, 1  ;;  %v1413_v34 = vrot.slane %v1399_v0, %v8864_v26  ;;  %v6598_v22 = vadd.f32 -1.0, %v7658_v24  ;;  %v1922_v17 = vmax.f32 %v1920_v27, %v1921_v58 }
 0x163   :  { %12133 = vst [vmem:[#allocation34_spill] sm:$0xff] %v9024_v60  ;;  %v1414_v54 = vcombine.high %v1406_v14, %v1406_v14  ;;  %v1927_v2 = vsel %vm1814_vm5, %v1406_v14, -inf  ;;  %v973_v50 = vadd.f32 %v8884_v45, %v8917_v11  ;;  %v1910_v12 = vmax.f32 %v1908_v18, %v1909_v6 }
 0x164   :  { %v1415_v48 = vcombine.high %v1413_v34, %v1413_v34  ;;  %v1928_v49 = vrot.slane %v1927_v2, 4  ;;  %v1941_v15 = vsel %vm1814_vm5, %v1413_v34, -inf  ;;  %v1290_v56 = vsel %vm1175_vm13, %v8869_v57, %v6598_v22 }
 0x165   :  { %v1934_v47 = vsel %vm1814_vm5, %v1414_v54, -inf  ;;  %v1942_v39 = vrot.slane %v1941_v15, 4  ;;  %v9037_v27 = vadd.f32 %v8828_v10, %v973_v50  ;;  %v1416_v45 = vcombine.high %v1290_v56, %v1290_v56 }
 0x166   :  { %v1929_v24 = vmax.f32 %v1927_v2, %v1928_v49  ;;  %v1935_v25 = vrot.slane %v1934_v47, 4  ;;  %v1948_v58 = vsel %vm1814_vm5, %v1415_v48, -inf  ;;  %v9040_v11 = vmax.f32 %v1889_v44, %v1890_v59 }
 0x167   :  { %v1917_v18 = vmax.f32 %v1915_v20, %v1916_v7  ;;  %v1923_v6 = vrot.slane %v1922_v17, 2  ;;  %v1423_v34 = vrot.slane %v1290_v56, %v8864_v26  ;;  %v1897_v54 = vrot.slane %v1896_v52, 1 }
 0x168   :  { %12134 = vst [vmem:[#allocation35_spill] sm:$0xff] %v9040_v11  ;;  %v1943_v0 = vmax.f32 %v1941_v15, %v1942_v39  ;;  %v1949_v14 = vrot.slane %v1948_v58, 4  ;;  %v1430_v60 = vrot.slane %v1416_v45, %v8864_v26  ;;  %v1904_v57 = vrot.slane %v1903_v3, 1  ;;  %v9050_v11 = vpop.f32.mrb[56].mxu1 }
 0x169   :  { %v1930_v22 = vrot.slane %v1929_v24, 2  ;;  %v1431_v10 = vcombine.high %v1423_v34, %v1423_v34  ;;  %v1955_v2 = vsel %vm1814_vm5, %v1423_v34, -inf  ;;  %v1911_v50 = vrot.slane %v1910_v12, 1 }
 0x16a   :  { %v1936_v49 = vmax.f32 %v1934_v47, %v1935_v25  ;;  %v1432_v48 = vcombine.high %v1430_v60, %v1430_v60  ;;  %v1956_v1 = vrot.slane %v1955_v2, 4  ;;  %v1918_v44 = vrot.slane %v1917_v18, 1 }
 0x16b   :  { %v9045_v59 = vmax.f32 %v1922_v17, %v1923_v6  ;;  %v1962_v20 = vsel %vm1814_vm5, %v1431_v10, -inf  ;;  %v1969_v7 = vsel %vm1814_vm5, %v1430_v60, -inf  ;;  %v1944_v15 = vrot.slane %v1943_v0, 2  ;;  %v9058_v60 = vpop.f32.mrb[57].mxu1 }
 0x16c   :  { %v1950_v39 = vmax.f32 %v1948_v58, %v1949_v14  ;;  %v1963_v56 = vrot.slane %v1962_v20, 4  ;;  %v1199_v45 = vmin.f32 %v9037_v27, 0.0  ;;  %v1931_v30 = vmax.f32 %v1929_v24, %v1930_v22  ;;  %v9060_v58 = vpop.f32.mrb[40].mxu0  ;;  %v9066_v22 = vpop.f32.mrb[58].mxu1 }
 0x16d   :  { %v1957_v34 = vmax.f32 %v1955_v2, %v1956_v1  ;;  %v1970_v32 = vrot.slane %v1969_v7, 4  ;;  %v1976_v47 = vsel %vm1814_vm5, %v1432_v48, -inf  ;;  %v9054_v25 = vmax.f32 %v9004_v23, %v1883_v41  ;;  %12137 = vst [vmem:[#allocation38_spill] sm:$0xff] %v9060_v58  ;;  %v9068_v2 = vpop.f32.mrb[41].mxu0  ;;  %v9072_v48 = vpop.f32.mrb[59].mxu1 }
 0x16e   :  { %v9056_v17 = vmax.f32 %v1896_v52, %v1897_v54  ;;  %v1937_v6 = vrot.slane %v1936_v49, 2  ;;  %v1964_v10 = vmax.f32 %v1962_v20, %v1963_v56  ;;  %v9062_v14 = vmax.f32 %v1903_v3, %v1904_v57  ;;  %12140 = vst [vmem:[#allocation41_spill] sm:$0xff] %v9068_v2 }
 0x16f   :  { %12135 = vst [vmem:[#allocation36_spill] sm:$0xff] %v9054_v25  ;;  %v9064_v43 = vmax.f32 %v1910_v12, %v1911_v50  ;;  %v1971_v24 = vmax.f32 %v1969_v7, %v1970_v32  ;;  %v1977_v1 = vrot.slane %v1976_v47, 4  ;;  %v9070_v23 = vmax.f32 %v1917_v18, %v1918_v44 }
 0x170   :  { %12136 = vst [vmem:[#allocation37_spill] sm:$0xff] %v9056_v17  ;;  %12138 = vst [vmem:[#allocation39_spill] sm:$0xff] %v9062_v14  ;;  %v1945_v41 = vmax.f32 %v1943_v0, %v1944_v15  ;;  %v1951_v52 = vrot.slane %v1950_v39, 2  ;;  %v1228_v54 = vmul.f32 1.442695, %v1199_v45  ;;  %v1932_v56 = vrot.slane %v1931_v30, 1 }
 0x171   :  { %12139 = vst [vmem:[#allocation40_spill] sm:$0xff] %v9064_v43  ;;  %12141 = vst [vmem:[#allocation42_spill] sm:$0xff] %v9070_v23  ;;  %v1958_v3 = vrot.slane %v1957_v34, 2  ;;  %v6944_v12 = vadd.f32 %v8886_v13, %v8879_v62  ;;  %v1938_v32 = vmax.f32 %v1936_v49, %v1937_v6  ;;  %v1965_v57 = vrot.slane %v1964_v10, 2 }
 0x172   :  { %7659 = vpow2.f32 %v1228_v54  ;;  %v6947_v50 = vadd.f32 %v8907_v8, %v8905_v37  ;;  %v1972_v18 = vrot.slane %v1971_v24, 2  ;;  %v1978_v44 = vmax.f32 %v1976_v47, %v1977_v1 }
 0x173   :  { %v976_v0 = vadd.f32 %v6944_v12, %v8928_v38  ;;  %v6950_v7 = vadd.f32 %v8913_v9, %v8911_v31  ;;  %v1946_v15 = vrot.slane %v1945_v41, 1  ;;  %v1952_v45 = vmax.f32 %v1950_v39, %v1951_v52 }
 0x174   :  { %v981_v20 = vadd.f32 %v6947_v50, %v8935_v29  ;;  %v6953_v62 = vadd.f32 %v8924_v46, %v8920_v42  ;;  %v9085_v13 = vmax.f32 %v1931_v30, %v1932_v56  ;;  %v1959_v49 = vmax.f32 %v1957_v34, %v1958_v3  ;;  %v12145_v56 = vld [vmem:[#allocation25_spill] sm:$0xff] }
 0x175   :  { %v9088_v6 = vadd.f32 %v8833_v35, %v976_v0  ;;  %v984_v37 = vadd.f32 %v6950_v7, %v8790_v28  ;;  %v1966_v8 = vmax.f32 %v1964_v10, %v1965_v57  ;;  %vm1176_vm14 = vcmp.gt.f32.partialorder %v9037_v27, 0.0  ;;  %v9118_v57 = vpop.f32.mrb[42].mxu0  ;;  %v12153_v0 = vld [vmem:[#allocation19_spill] sm:$0xff] }
 0x176   :  { %12142 = vst [vmem:[#allocation43_spill] sm:$0xff] %v9085_v13  ;;  %v9093_v31 = vadd.f32 %v8849_v21, %v981_v20  ;;  %v989_v9 = vadd.f32 %v6953_v62, %v8805_v36  ;;  %v6956_v38 = vadd.f32 %v8940_v61, %v8931_v53  ;;  %v1939_v42 = vrot.slane %v1938_v32, 1 }
 0x177   :  { %v1973_v46 = vmax.f32 %v1971_v24, %v1972_v18  ;;  %v1979_v29 = vrot.slane %v1978_v44, 2  ;;  %v1200_v30 = vmin.f32 %v9088_v6, 0.0  ;;  %v9099_v35 = vmax.f32 %v1945_v41, %v1946_v15  ;;  %v12154_v15 = vld [vmem:[#allocation6_spill] sm:$0xff] }
 0x178   :  { %v1953_v39 = vrot.slane %v1952_v45, 1  ;;  %v1201_v28 = vmin.f32 %v9093_v31, 0.0  ;;  %v9103_v34 = vadd.f32 %v8858_v51, %v984_v37  ;;  %v1960_v21 = vrot.slane %v1959_v49, 1  ;;  %v12155_v37 = vld [vmem:[#allocation27_spill] sm:$0xff] }
 0x179   :  { %12143 = vst [vmem:[#allocation44_spill] sm:$0xff] %v9099_v35  ;;  %v1230_v47 = vmul.f32 1.442695, %v1200_v30  ;;  %v9106_v36 = vadd.f32 %v8847_v5, %v989_v9  ;;  %v992_v53 = vadd.f32 %v6956_v38, %v8811_v40  ;;  %v1967_v61 = vrot.slane %v1966_v8, 1  ;;  %v12144_v5 = vld [vmem:[#allocation24_spill] sm:$0xff]  ;;  %v12146_v40 = vld [vmem:[#allocation5_spill] sm:$0xff] }
 0x17a   :  { %v1232_v10 = vmul.f32 1.442695, %v1201_v28  ;;  %v1202_v24 = vmin.f32 %v9103_v34, 0.0  ;;  %v6959_v1 = vadd.f32 %v8965_v4, %v8961_v16  ;;  %v1974_v41 = vrot.slane %v1973_v46, 1  ;;  %12147 = vst [vmem:[#allocation24_spill] sm:$0xff] %v9118_v57  ;;  %v9136_v38 = vpop.f32.mrb[60].mxu1 }
 0x17b   :  { %v1980_v52 = vmax.f32 %v1978_v44, %v1979_v29  ;;  %7661 = vpow2.f32 %v1230_v47  ;;  %v9113_v51 = vadd.f32 %v8855_v63, %v992_v53  ;;  %v6962_v3 = vadd.f32 %v12145_v56, %v12144_v5  ;;  %v9126_v44 = vpop.f32.mrb[43].mxu0  ;;  %v12157_v28 = vld [vmem:[#allocation21_spill] sm:$0xff]  ;;  %v12158_v47 = vld [vmem:[#allocation7_spill] sm:$0xff]  ;;  %v12159_v53 = vld [vmem:[#allocation8_spill] sm:$0xff] }
 0x17c   :  { %v7660_v54 = vpop.eup %7659  ;;  %7663 = vpow2.f32 %v1232_v10  ;;  %v1234_v20 = vmul.f32 1.442695, %v1202_v24  ;;  %v997_v12 = vadd.f32 %v6959_v1, %v12146_v40  ;;  %v9120_v50 = vmax.f32 %v1938_v32, %v1939_v42  ;;  %12151 = vst [vmem:[#allocation46_spill] sm:$0xff] %v9126_v44  ;;  %v9145_v42 = vpop.f32.mrb[61].mxu1 }
 0x17d   :  { %v9122_v18 = vmax.f32 %v1952_v45, %v1953_v39  ;;  %v9124_v16 = vmax.f32 %v1959_v49, %v1960_v21  ;;  %v6599_v4 = vadd.f32 -1.0, %v7660_v54  ;;  %v9128_v63 = vmax.f32 %v1966_v8, %v1967_v61  ;;  %v9149_v39 = vpop.f32.mrb[62].mxu1 }
 0x17e   :  { %12148 = vst [vmem:[#allocation25_spill] sm:$0xff] %v9120_v50  ;;  %v9131_v7 = vadd.f32 %v12153_v0, %v997_v12  ;;  %v1000_v62 = vadd.f32 %v6962_v3, %v12154_v15  ;;  %v6965_v9 = vadd.f32 %v8993_v33, %v12155_v37  ;;  %v9138_v32 = vmax.f32 %v1973_v46, %v1974_v41 }
 0x17f   :  { %12149 = vst [vmem:[#allocation5_spill] sm:$0xff] %v9122_v18  ;;  %12150 = vst [vmem:[#allocation45_spill] sm:$0xff] %v9124_v16  ;;  %v1981_v45 = vrot.slane %v1980_v52, 1  ;;  %v1291_v49 = vsel %vm1176_vm14, %v9037_v27, %v6599_v4  ;;  %v6968_v8 = vadd.f32 %v9006_v19, %v8996_v55  ;;  %7665 = vpow2.f32 %v1234_v20  ;;  %v9159_v55 = vpop.f32.mrb[63].mxu1  ;;  %v12161_v20 = vld [vmem:[#allocation18_spill] sm:$0xff] }
 0x180   :  { %12152 = vst [vmem:[#allocation47_spill] sm:$0xff] %v9128_v63  ;;  %12156 = vst [vmem:[#allocation19_spill] sm:$0xff] %v9138_v32  ;;  %v1433_v29 = vcombine.high %v1291_v49, %v1291_v49  ;;  %v1440_v30 = vrot.slane %v1291_v49, %v8864_v26  ;;  %v1203_v33 = vmin.f32 %v9106_v36, 0.0  ;;  %v1204_v46 = vmin.f32 %v9113_v51, 0.0 }
 0x181   :  { %v9153_v21 = vadd.f32 %v12157_v28, %v1000_v62  ;;  %v1005_v27 = vadd.f32 %v6965_v9, %v12158_v47  ;;  %v9157_v61 = vadd.f32 %v6968_v8, %v12159_v53  ;;  %v1205_v1 = vmin.f32 %v9131_v7, 0.0 }
 0x182   :  { %v1447_v19 = vrot.slane %v1433_v29, %v8864_v26  ;;  %v1448_v10 = vcombine.high %v1440_v30, %v1440_v30  ;;  %v1983_v24 = vsel %vm1814_vm5, %v1440_v30, -inf  ;;  %v9167_v41 = vsel %vm2547_vm7, %v9128_v63, %v9124_v16 }
 0x183   :  { %12160 = vst [vmem:[#allocation6_spill] sm:$0xff] %v9167_v41  ;;  %v1984_v54 = vrot.slane %v1983_v24, 4  ;;  %vm1177_vm15 = vcmp.gt.f32.partialorder %v9088_v6, 0.0  ;;  %v9171_v5 = vadd.f32 %v12161_v20, %v1005_v27  ;;  %v1236_v12 = vmul.f32 1.442695, %v1203_v33 }
 0x184   :  { %v1449_v56 = vcombine.high %v1447_v19, %v1447_v19  ;;  %v1990_v3 = vsel %vm1814_vm5, %v1448_v10, -inf  ;;  %v1997_v40 = vsel %vm1814_vm5, %v1447_v19, -inf  ;;  %v1206_v37 = vmin.f32 %v9153_v21, 0.0 }
 0x185   :  { %v7662_v4 = vpop.eup %7661  ;;  %v1985_v0 = vmax.f32 %v1983_v24, %v1984_v54  ;;  %v1991_v15 = vrot.slane %v1990_v3, 4  ;;  %v1998_v62 = vrot.slane %v1997_v40, 4  ;;  %v1238_v29 = vmul.f32 1.442695, %v1204_v46 }
 0x186   :  { %v7664_v9 = vpop.eup %7663  ;;  %v2004_v49 = vsel %vm1814_vm5, %v1449_v56, -inf  ;;  %v6600_v8 = vadd.f32 -1.0, %v7662_v4  ;;  %v1240_v30 = vmul.f32 1.442695, %v1205_v1  ;;  %v9177_v10 = vmax.f32 %v1980_v52, %v1981_v45  ;;  %v9185_v52 = vpop.f32.mrb[64].mxu1 }
 0x187   :  { %v1986_v28 = vrot.slane %v1985_v0, 2  ;;  %v1992_v47 = vmax.f32 %v1990_v3, %v1991_v15  ;;  %v1999_v27 = vmax.f32 %v1997_v40, %v1998_v62  ;;  %v2005_v53 = vrot.slane %v2004_v49, 4  ;;  %12163 = vst [vmem:[#allocation21_spill] sm:$0xff] %v9185_v52 }
 0x188   :  { %12162 = vst [vmem:[#allocation27_spill] sm:$0xff] %v9177_v10  ;;  %v1292_v33 = vsel %vm1177_vm15, %v9088_v6, %v6600_v8  ;;  %vm1178_vm1 = vcmp.gt.f32.partialorder %v9093_v31, 0.0  ;;  %v6601_v19 = vadd.f32 -1.0, %v7664_v9  ;;  %7667 = vpow2.f32 %v1236_v12 }
 0x189   :  { %v1993_v24 = vrot.slane %v1992_v47, 2  ;;  %v2006_v54 = vmax.f32 %v2004_v49, %v2005_v53  ;;  %v1242_v20 = vmul.f32 1.442695, %v1206_v37  ;;  %v7666_v56 = vpop.eup %7665  ;;  %v1450_v46 = vcombine.high %v1292_v33, %v1292_v33 }
 0x18a   :  { %v1457_v1 = vrot.slane %v1292_v33, %v8864_v26  ;;  %v1293_v3 = vsel %vm1178_vm1, %v9093_v31, %v6601_v19  ;;  %7669 = vpow2.f32 %v1238_v29  ;;  %v1987_v45 = vmax.f32 %v1985_v0, %v1986_v28 }
 0x18b   :  { %v1994_v40 = vmax.f32 %v1992_v47, %v1993_v24  ;;  %v2000_v4 = vrot.slane %v1999_v27, 2  ;;  %7671 = vpow2.f32 %v1240_v30  ;;  %v1464_v6 = vrot.slane %v1450_v46, %v8864_v26 }
 0x18c   :  { %v1465_v15 = vcombine.high %v1457_v1, %v1457_v1  ;;  %v2011_v62 = vsel %vm1814_vm5, %v1457_v1, -inf  ;;  %v1207_v12 = vmin.f32 %v9171_v5, 0.0  ;;  %v2007_v37 = vrot.slane %v2006_v54, 2 }
 0x18d   :  { %v1467_v9 = vcombine.high %v1293_v3, %v1293_v3  ;;  %v6602_v49 = vadd.f32 -1.0, %v7666_v56  ;;  %7673 = vpow2.f32 %v1242_v20  ;;  %v1466_v8 = vcombine.high %v1464_v6, %v1464_v6 }
 0x18e   :  { %v2012_v31 = vrot.slane %v2011_v62, 4  ;;  %v2018_v29 = vsel %vm1814_vm5, %v1465_v15, -inf  ;;  %v2025_v0 = vsel %vm1814_vm5, %v1464_v6, -inf  ;;  %v1988_v28 = vrot.slane %v1987_v45, 1 }
 0x18f   :  { %v1995_v47 = vrot.slane %v1994_v40, 1  ;;  %v2001_v30 = vmax.f32 %v1999_v27, %v2000_v4  ;;  %v2019_v53 = vrot.slane %v2018_v29, 4  ;;  %v2026_v19 = vrot.slane %v2025_v0, 4 }
 0x190   :  { %v2013_v33 = vmax.f32 %v2011_v62, %v2012_v31  ;;  %v2032_v24 = vsel %vm1814_vm5, %v1466_v8, -inf  ;;  %v1474_v46 = vrot.slane %v1293_v3, %v8864_v26  ;;  %v2008_v1 = vmax.f32 %v2006_v54, %v2007_v37 }
 0x191   :  { %v2020_v41 = vmax.f32 %v2018_v29, %v2019_v53  ;;  %v2033_v56 = vrot.slane %v2032_v24, 4  ;;  %v1481_v20 = vrot.slane %v1467_v9, %v8864_v26  ;;  %vm1179_vm2 = vcmp.gt.f32.partialorder %v9103_v34, 0.0 }
 0x192   :  { %v2014_v15 = vrot.slane %v2013_v33, 2  ;;  %v2027_v52 = vmax.f32 %v2025_v0, %v2026_v19  ;;  %v1482_v6 = vcombine.high %v1474_v46, %v1474_v46  ;;  %v2039_v10 = vsel %vm1814_vm5, %v1474_v46, -inf  ;;  %v7668_v27 = vpop.eup %7667 }
 0x193   :  { %v2021_v4 = vrot.slane %v2020_v41, 2  ;;  %v2034_v62 = vmax.f32 %v2032_v24, %v2033_v56  ;;  %v1483_v31 = vcombine.high %v1481_v20, %v1481_v20  ;;  %v2040_v32 = vrot.slane %v2039_v10, 4 }
 0x194   :  { %v7670_v8 = vpop.eup %7669  ;;  %v2015_v63 = vmax.f32 %v2013_v33, %v2014_v15  ;;  %v2028_v3 = vrot.slane %v2027_v52, 2  ;;  %v2046_v54 = vsel %vm1814_vm5, %v1482_v6, -inf  ;;  %v2053_v37 = vsel %vm1814_vm5, %v1481_v20, -inf }
 0x195   :  { %v9199_v9 = vpop.eup %7671  ;;  %v2022_v29 = vmax.f32 %v2020_v41, %v2021_v4  ;;  %v2035_v53 = vrot.slane %v2034_v62, 2  ;;  %v2041_v0 = vmax.f32 %v2039_v10, %v2040_v32  ;;  %v2047_v19 = vrot.slane %v2046_v54, 4 }
 0x196   :  { %vm1180_vm3 = vcmp.gt.f32.partialorder %v9106_v36, 0.0  ;;  %v2002_v46 = vrot.slane %v2001_v30, 1  ;;  %v2029_v57 = vmax.f32 %v2027_v52, %v2028_v3  ;;  %v2054_v24 = vrot.slane %v2053_v37, 4 }
 0x197   :  { %v2060_v56 = vsel %vm1814_vm5, %v1483_v31, -inf  ;;  %v9203_v16 = vpop.eup %7673  ;;  %v2009_v33 = vrot.slane %v2008_v1, 1  ;;  %v2042_v15 = vrot.slane %v2041_v0, 2  ;;  %v2048_v6 = vmax.f32 %v2046_v54, %v2047_v19 }
 0x198   :  { %v9205_v58 = vmul.f32 1.442695, %v1207_v12  ;;  %v2016_v20 = vrot.slane %v2015_v63, 1  ;;  %v2023_v44 = vrot.slane %v2022_v29, 1  ;;  %v2055_v41 = vmax.f32 %v2053_v37, %v2054_v24 }
 0x199   :  { %v2061_v4 = vrot.slane %v2060_v56, 4  ;;  %v9207_v32 = vmax.f32 %v1987_v45, %v1988_v28  ;;  %v9209_v10 = vmax.f32 %v1994_v40, %v1995_v47  ;;  %v2030_v18 = vrot.slane %v2029_v57, 1 }
 0x19a   :  { %v9211_v52 = vmax.f32 %v2034_v62, %v2035_v53  ;;  %v9213_v3 = vmax.f32 %v2001_v30, %v2002_v46  ;;  %v2043_v31 = vmax.f32 %v2041_v0, %v2042_v15  ;;  %v1294_v12 = vsel %vm1179_vm2, %v9103_v34, %v6602_v49 }
 0x19b   :  { %12164 = vst [vmem:[#allocation7_spill] sm:$0xff] %v9207_v32  ;;  %12165 = vst [vmem:[#allocation8_spill] sm:$0xff] %v9209_v10  ;;  %v2062_v2 = vmax.f32 %v2060_v56, %v2061_v4  ;;  %v9218_v54 = vmax.f32 %v2008_v1, %v2009_v33  ;;  %v2049_v19 = vrot.slane %v2048_v6, 2  ;;  %v1484_v37 = vcombine.high %v1294_v12, %v1294_v12 }
 0x19c   :  { %12166 = vst [vmem:[#allocation18_spill] sm:$0xff] %v9213_v3  ;;  %v1491_v45 = vrot.slane %v1294_v12, %v8864_v26  ;;  %v9221_v28 = vmax.f32 %v2015_v63, %v2016_v20  ;;  %v9223_v40 = vmax.f32 %v2022_v29, %v2023_v44  ;;  %v2056_v47 = vrot.slane %v2055_v41, 2 }
 0x19d   :  { %12167 = vst [vmem:[#allocation48_spill] sm:$0xff] %v9218_v54  ;;  %v6603_v62 = vadd.f32 -1.0, %v7668_v27  ;;  %v9225_v30 = vmax.f32 %v2029_v57, %v2030_v18  ;;  %v1498_v0 = vrot.slane %v1484_v37, %v8864_v26  ;;  %v2044_v34 = vrot.slane %v2043_v31, 1 }
 0x19e   :  { %12168 = vst [vmem:[#allocation49_spill] sm:$0xff] %v9221_v28  ;;  %12169 = vst [vmem:[#allocation50_spill] sm:$0xff] %v9223_v40  ;;  %v1499_v46 = vcombine.high %v1491_v45, %v1491_v45  ;;  %v2063_v49 = vrot.slane %v2062_v2, 2  ;;  %v2067_v1 = vsel %vm1814_vm5, %v1491_v45, -inf  ;;  %v2050_v24 = vmax.f32 %v2048_v6, %v2049_v19 }
 0x19f   :  { %12170 = vst [vmem:[#allocation51_spill] sm:$0xff] %v9225_v30  ;;  %v1295_v63 = vsel %vm1180_vm3, %v9106_v36, %v6603_v62  ;;  %v1500_v44 = vcombine.high %v1498_v0, %v1498_v0  ;;  %v2068_v29 = vrot.slane %v2067_v1, 4  ;;  %vm1181_vm4 = vcmp.gt.f32.partialorder %v9113_v51, 0.0 }
 0x1a0   :  { %v2074_v27 = vsel %vm1814_vm5, %v1499_v46, -inf  ;;  %v2057_v57 = vmax.f32 %v2055_v41, %v2056_v47  ;;  %v2081_v56 = vsel %vm1814_vm5, %v1498_v0, -inf  ;;  %v6604_v33 = vadd.f32 -1.0, %v7670_v8 }
 0x1a1   :  { %v2075_v18 = vrot.slane %v2074_v27, 4  ;;  %v2069_v15 = vmax.f32 %v2067_v1, %v2068_v29  ;;  %v2082_v20 = vrot.slane %v2081_v56, 4  ;;  %v2088_v4 = vsel %vm1814_vm5, %v1500_v44, -inf }
 0x1a2   :  { %v1501_v12 = vcombine.high %v1295_v63, %v1295_v63  ;;  %v2064_v37 = vmax.f32 %v2062_v2, %v2063_v49  ;;  %v2089_v36 = vrot.slane %v2088_v4, 4  ;;  %v1508_v6 = vrot.slane %v1295_v63, %v8864_v26  ;;  %v9246_v63 = vpop.f32.mrb[44].mxu0 }
 0x1a3   :  { %v2076_v45 = vmax.f32 %v2074_v27, %v2075_v18  ;;  %v9238_v19 = vmax.f32 %v2043_v31, %v2044_v34  ;;  %v2070_v62 = vrot.slane %v2069_v15, 2  ;;  %v2083_v46 = vmax.f32 %v2081_v56, %v2082_v20  ;;  %v9244_v34 = vpop.f32.mrb[65].mxu1  ;;  %12173 = vst [vmem:[#allocation54_spill] sm:$0xff] %v9246_v63 }
 0x1a4   :  { %v1515_v41 = vrot.slane %v1501_v12, %v8864_v26  ;;  %v2090_v53 = vmax.f32 %v2088_v4, %v2089_v36  ;;  %v1516_v0 = vcombine.high %v1508_v6, %v1508_v6  ;;  %v2095_v8 = vsel %vm1814_vm5, %v1508_v6, -inf  ;;  %12172 = vst [vmem:[#allocation53_spill] sm:$0xff] %v9244_v34  ;;  %v9248_v12 = vpop.f32.mrb[66].mxu1  ;;  %v9250_v36 = vpop.f32.mrb[45].mxu0 }
 0x1a5   :  { %12171 = vst [vmem:[#allocation52_spill] sm:$0xff] %v9238_v19  ;;  %v2077_v47 = vrot.slane %v2076_v45, 2  ;;  %v2051_v1 = vrot.slane %v2050_v24, 1  ;;  %v2071_v29 = vmax.f32 %v2069_v15, %v2070_v62  ;;  %v2096_v32 = vrot.slane %v2095_v8, 4  ;;  %12174 = vst [vmem:[#allocation55_spill] sm:$0xff] %v9248_v12  ;;  %v7273_v34 = vpop.f32.mrb[46].mxu0 }
 0x1a6   :  { %v1517_v44 = vcombine.high %v1515_v41, %v1515_v41  ;;  %v2058_v2 = vrot.slane %v2057_v57, 1  ;;  %v2065_v49 = vrot.slane %v2064_v37, 1  ;;  %v2102_v27 = vsel %vm1814_vm5, %v1516_v0, -inf  ;;  %12175 = vst [vmem:[#allocation56_spill] sm:$0xff] %v9250_v36  ;;  %v9256_v0 = vpop.f32.mrb[67].mxu1 }
 0x1a7   :  { %v2109_v31 = vsel %vm1814_vm5, %v1515_v41, -inf  ;;  %v2078_v18 = vmax.f32 %v2076_v45, %v2077_v47  ;;  %v2084_v56 = vrot.slane %v2083_v46, 2  ;;  %v2097_v20 = vmax.f32 %v2095_v8, %v2096_v32  ;;  %12176 = vst [vmem:[#allocation57_spill] sm:$0xff] %v9256_v0  ;;  %v9261_v8 = vpop.f32.mrb[47].mxu0 }
 0x1a8   :  { %v2103_v4 = vrot.slane %v2102_v27, 4  ;;  %v2091_v15 = vrot.slane %v2090_v53, 2  ;;  %v2110_v6 = vrot.slane %v2109_v31, 4  ;;  %v2116_v62 = vsel %vm1814_vm5, %v1517_v44, -inf }
 0x1a9   :  { %v1296_v41 = vsel %vm1181_vm4, %v9113_v51, %v6604_v33  ;;  %v9258_v63 = vmax.f32 %v2050_v24, %v2051_v1  ;;  %v2072_v45 = vrot.slane %v2071_v29, 1  ;;  %v2098_v32 = vrot.slane %v2097_v20, 2 }
 0x1aa   :  { %v2104_v47 = vmax.f32 %v2102_v27, %v2103_v4  ;;  %vm1182_vm6 = vcmp.gt.f32.partialorder %v9131_v7, 0.0  ;;  %v9263_v36 = vmax.f32 %v2057_v57, %v2058_v2  ;;  %v9265_v12 = vmax.f32 %v2064_v37, %v2065_v49  ;;  %v9271_v2 = vpop.f32.mrb[68].mxu1 }
 0x1ab   :  { %12177 = vst [vmem:[#allocation58_spill] sm:$0xff] %v9258_v63  ;;  %v2111_v44 = vmax.f32 %v2109_v31, %v2110_v6  ;;  %v2117_v19 = vrot.slane %v2116_v62, 4  ;;  %v2079_v30 = vrot.slane %v2078_v18, 1  ;;  %v2085_v51 = vmax.f32 %v2083_v46, %v2084_v56  ;;  %v9275_v56 = vpop.f32.mrb[69].mxu1 }
 0x1ac   :  { %12178 = vst [vmem:[#allocation59_spill] sm:$0xff] %v9263_v36  ;;  %12179 = vst [vmem:[#allocation60_spill] sm:$0xff] %v9265_v12  ;;  %v2105_v33 = vrot.slane %v2104_v47, 2  ;;  %v1518_v0 = vcombine.high %v1296_v41, %v1296_v41  ;;  %v2092_v34 = vmax.f32 %v2090_v53, %v2091_v15  ;;  %v1525_v63 = vrot.slane %v1296_v41, %v8864_v26  ;;  %v6990_v6 = vpop.f32.mrb[70].mxu1 }
 0x1ad   :  { %v2112_v24 = vrot.slane %v2111_v44, 2  ;;  %v2118_v1 = vmax.f32 %v2116_v62, %v2117_v19  ;;  %v9268_v27 = vmax.f32 %v2071_v29, %v2072_v45  ;;  %v2099_v4 = vmax.f32 %v2097_v20, %v2098_v32  ;;  %v6991_v45 = vpop.f32.mrb[71].mxu1 }
 0x1ae   :  { %v2106_v40 = vmax.f32 %v2104_v47, %v2105_v33  ;;  %v1532_v57 = vrot.slane %v1518_v0, %v8864_v26  ;;  %v1533_v49 = vcombine.high %v1525_v63, %v1525_v63  ;;  %v2123_v31 = vsel %vm1814_vm5, %v1525_v63, -inf }
 0x1af   :  { %12180 = vst [vmem:[#allocation61_spill] sm:$0xff] %v9268_v27  ;;  %v2119_v37 = vrot.slane %v2118_v1, 2  ;;  %v6605_v46 = vadd.f32 -1.0, %v9199_v9  ;;  %v9277_v53 = vmax.f32 %v2078_v18, %v2079_v30  ;;  %v2086_v19 = vrot.slane %v2085_v51, 1 }
 0x1b0   :  { %v1534_v15 = vcombine.high %v1532_v57, %v1532_v57  ;;  %v2124_v29 = vrot.slane %v2123_v31, 4  ;;  %v2093_v20 = vrot.slane %v2092_v34, 1  ;;  %v2113_v62 = vmax.f32 %v2111_v44, %v2112_v24 }
 0x1b1   :  { %12181 = vst [vmem:[#allocation62_spill] sm:$0xff] %v9277_v53  ;;  %v2130_v41 = vsel %vm1814_vm5, %v1533_v49, -inf  ;;  %v2137_v0 = vsel %vm1814_vm5, %v1532_v57, -inf  ;;  %vm1183_vm8 = vcmp.gt.f32.partialorder %v9153_v21, 0.0  ;;  %v2120_v63 = vmax.f32 %v2118_v1, %v2119_v37 }
 0x1b2   :  { %v2125_v32 = vmax.f32 %v2123_v31, %v2124_v29  ;;  %v2131_v9 = vrot.slane %v2130_v41, 4  ;;  %v2138_v47 = vrot.slane %v2137_v0, 4  ;;  %v2100_v33 = vrot.slane %v2099_v4, 1 }
 0x1b3   :  { %v2107_v30 = vrot.slane %v2106_v40, 1  ;;  %v2144_v18 = vsel %vm1814_vm5, %v1534_v15, -inf  ;;  %v1297_v6 = vsel %vm1182_vm6, %v9131_v7, %v6605_v46  ;;  %v9286_v57 = vmax.f32 %v2085_v51, %v2086_v19 }
 0x1b4   :  { %v2126_v44 = vrot.slane %v2125_v32, 2  ;;  %v2132_v24 = vmax.f32 %v2130_v41, %v2131_v9  ;;  %v2139_v49 = vmax.f32 %v2137_v0, %v2138_v47  ;;  %v2145_v53 = vrot.slane %v2144_v18, 4 }
 0x1b5   :  { %12182 = vst [vmem:[#allocation63_spill] sm:$0xff] %v9286_v57  ;;  %v9288_v27 = vmax.f32 %v2092_v34, %v2093_v20  ;;  %v1535_v1 = vcombine.high %v1297_v6, %v1297_v6  ;;  %v1542_v37 = vrot.slane %v1297_v6, %v8864_v26  ;;  %v2114_v31 = vrot.slane %v2113_v62, 1 }
 0x1b6   :  { %v2121_v29 = vrot.slane %v2120_v63, 1  ;;  %v2133_v45 = vrot.slane %v2132_v24, 2  ;;  %v6606_v15 = vadd.f32 -1.0, %v9203_v16  ;;  %v9292_v12 = vmax.f32 %v2099_v4, %v2100_v33 }
 0x1b7   :  { %12183 = vst [vmem:[#allocation64_spill] sm:$0xff] %v9288_v27  ;;  %v1549_v7 = vrot.slane %v1535_v1, %v8864_v26  ;;  %v1550_v46 = vcombine.high %v1542_v37, %v1542_v37  ;;  %v2151_v41 = vsel %vm1814_vm5, %v1542_v37, -inf  ;;  %v9296_v0 = vmax.f32 %v2106_v40, %v2107_v30 }
 0x1b8   :  { %12184 = vst [vmem:[#allocation65_spill] sm:$0xff] %v9292_v12  ;;  %v2127_v51 = vmax.f32 %v2125_v32, %v2126_v44  ;;  %v2140_v34 = vrot.slane %v2139_v49, 2  ;;  %v2146_v19 = vmax.f32 %v2144_v18, %v2145_v53  ;;  %v2152_v9 = vrot.slane %v2151_v41, 4 }
 0x1b9   :  { %12185 = vst [vmem:[#allocation66_spill] sm:$0xff] %v9296_v0  ;;  %v1551_v20 = vcombine.high %v1549_v7, %v1549_v7  ;;  %v2158_v47 = vsel %vm1814_vm5, %v1550_v46, -inf  ;;  %v2165_v6 = vsel %vm1814_vm5, %v1549_v7, -inf  ;;  %v9300_v27 = vmax.f32 %v2113_v62, %v2114_v31 }
 0x1ba   :  { %v9302_v16 = vmax.f32 %v2120_v63, %v2121_v29  ;;  %v2134_v4 = vmax.f32 %v2132_v24, %v2133_v45  ;;  %v1298_v33 = vsel %vm1183_vm8, %v9153_v21, %v6606_v15  ;;  %v2153_v40 = vmax.f32 %v2151_v41, %v2152_v9  ;;  %v12188_v21 = vld [vmem:[#allocation20_spill] sm:$0xff] }
 0x1bb   :  { %12186 = vst [vmem:[#allocation67_spill] sm:$0xff] %v9300_v27  ;;  %v2159_v30 = vrot.slane %v2158_v47, 4  ;;  %v2166_v32 = vrot.slane %v2165_v6, 4  ;;  %v2172_v53 = vsel %vm1814_vm5, %v1551_v20, -inf  ;;  %v2128_v18 = vrot.slane %v2127_v51, 1 }
 0x1bc   :  { %12187 = vst [vmem:[#allocation68_spill] sm:$0xff] %v9302_v16  ;;  %v2141_v44 = vmax.f32 %v2139_v49, %v2140_v34  ;;  %v2147_v1 = vrot.slane %v2146_v19, 2  ;;  %v2173_v37 = vrot.slane %v2172_v53, 4  ;;  %v2154_v46 = vrot.slane %v2153_v40, 2 }
 0x1bd   :  { %v2160_v7 = vmax.f32 %v2158_v47, %v2159_v30  ;;  %v2167_v62 = vmax.f32 %v2165_v6, %v2166_v32  ;;  %v1552_v31 = vcombine.high %v1298_v33, %v1298_v33  ;;  %v1559_v24 = vrot.slane %v1298_v33, %v8864_v26 }
 0x1be   :  { %v2174_v63 = vmax.f32 %v2172_v53, %v2173_v37  ;;  %7675 = vpow2.f32 %v9205_v58  ;;  %v9312_v29 = vadd.f32 %v12188_v21, %v9157_v61  ;;  %v2135_v45 = vrot.slane %v2134_v4, 1 }
 0x1bf   :  { %v2161_v15 = vrot.slane %v2160_v7, 2  ;;  %v2168_v41 = vrot.slane %v2167_v62, 2  ;;  %v1566_v49 = vrot.slane %v1552_v31, %v8864_v26  ;;  %v2155_v34 = vmax.f32 %v2153_v40, %v2154_v46 }
 0x1c0   :  { %v2175_v20 = vrot.slane %v2174_v63, 2  ;;  %v1567_v9 = vcombine.high %v1559_v24, %v1559_v24  ;;  %v2179_v47 = vsel %vm1814_vm5, %v1559_v24, -inf  ;;  %v9316_v6 = vmax.f32 %v2127_v51, %v2128_v18 }
 0x1c1   :  { %v2162_v30 = vmax.f32 %v2160_v7, %v2161_v15  ;;  %v2169_v33 = vmax.f32 %v2167_v62, %v2168_v41  ;;  %v1568_v32 = vcombine.high %v1566_v49, %v1566_v49  ;;  %v2180_v53 = vrot.slane %v2179_v47, 4 }
 0x1c2   :  { %12189 = vst [vmem:[#allocation20_spill] sm:$0xff] %v9316_v6  ;;  %v2176_v58 = vmax.f32 %v2174_v63, %v2175_v20  ;;  %v2186_v61 = vsel %vm1814_vm5, %v1567_v9, -inf  ;;  %v2193_v37 = vsel %vm1814_vm5, %v1566_v49, -inf  ;;  %vm1184_vm9 = vcmp.gt.f32.partialorder %v9171_v5, 0.0 }
 0x1c3   :  { %v9321_v21 = vmax.f32 %v2134_v4, %v2135_v45  ;;  %v2142_v40 = vrot.slane %v2141_v44, 1  ;;  %v9323_v46 = vmax.f32 %v2146_v19, %v2147_v1  ;;  %v2187_v31 = vrot.slane %v2186_v61, 4  ;;  %v12197_v19 = vld [vmem:[#allocation23_spill] sm:$0xff] }
 0x1c4   :  { %v2156_v24 = vrot.slane %v2155_v34, 1  ;;  %v2181_v51 = vmax.f32 %v2179_v47, %v2180_v53  ;;  %v2194_v18 = vrot.slane %v2193_v37, 4  ;;  %v2200_v7 = vsel %vm1814_vm5, %v1568_v32, -inf }
 0x1c5   :  { %12190 = vst [vmem:[#allocation69_spill] sm:$0xff] %v9321_v21  ;;  %vm2553_vm12 = vcmask 1044484   ;;  %v2163_v62 = vrot.slane %v2162_v30, 1  ;;  %v2170_v63 = vrot.slane %v2169_v33, 1  ;;  %v2188_v15 = vmax.f32 %v2186_v61, %v2187_v31 }
 0x1c6   :  { %v2201_v41 = vrot.slane %v2200_v7, 4  ;;  %v2177_v20 = vrot.slane %v2176_v58, 1  ;;  %v2182_v49 = vrot.slane %v2181_v51, 2  ;;  %v2195_v9 = vmax.f32 %v2193_v37, %v2194_v18 }
 0x1c7   :  { %v1208_v4 = vmin.f32 %v9312_v29, 0.0  ;;  %v9327_v45 = vmax.f32 %v2141_v44, %v2142_v40  ;;  %v2189_v1 = vrot.slane %v2188_v15, 2  ;;  %v9330_v53 = vmax.f32 %v2155_v34, %v2156_v24  ;;  %v12196_v40 = vld [vmem:[#allocation22_spill] sm:$0xff] }
 0x1c8   :  { %v2202_v12 = vmax.f32 %v2200_v7, %v2201_v41  ;;  %v7676_v47 = vpop.eup %7675  ;;  %v2183_v32 = vmax.f32 %v2181_v51, %v2182_v49  ;;  %v2196_v21 = vrot.slane %v2195_v9, 2  ;;  %v9332_v6 = vmax.f32 %v2162_v30, %v2163_v62  ;;  %v12200_v24 = vld [vmem:[#allocation26_spill] sm:$0xff] }
 0x1c9   :  { %12191 = vst [vmem:[#allocation70_spill] sm:$0xff] %v9327_v45  ;;  %12192 = vst [vmem:[#allocation71_spill] sm:$0xff] %v9330_v53  ;;  %v1246_v57 = vmul.f32 1.442695, %v1208_v4  ;;  %v9334_v61 = vmax.f32 %v2169_v33, %v2170_v63  ;;  %v2190_v31 = vmax.f32 %v2188_v15, %v2189_v1  ;;  %v6607_v37 = vadd.f32 -1.0, %v7676_v47  ;;  %v12201_v15 = vld [vmem:[#allocation28_spill] sm:$0xff] }
 0x1ca   :  { %12193 = vst [vmem:[#allocation72_spill] sm:$0xff] %v9332_v6  ;;  %v9336_v18 = vmax.f32 %v2176_v58, %v2177_v20  ;;  %v2203_v44 = vrot.slane %v2202_v12, 2  ;;  %v2643_v7 = vsel %vm2547_vm7, %v12197_v19, %v12196_v40  ;;  %v2184_v41 = vrot.slane %v2183_v32, 1  ;;  %v12204_v47 = vld [vmem:[#allocation32_spill] sm:$0xff]  ;;  %v12209_v6 = vld [vmem:[#allocation33_spill] sm:$0xff] }
 0x1cb   :  { %12194 = vst [vmem:[#allocation73_spill] sm:$0xff] %v9334_v61  ;;  %7677 = vpow2.f32 %v1246_v57  ;;  %v1299_v34 = vsel %vm1184_vm9, %v9171_v5, %v6607_v37  ;;  %v12198_v30 = vrot.slane %v9045_v59, 1  ;;  %v2644_v58 = vsel %vm2549_vm10, %v12200_v24, %v2643_v7  ;;  %v12202_v5 = vld [vmem:[#allocation35_spill] sm:$0xff] }
 0x1cc   :  { %12195 = vst [vmem:[#allocation74_spill] sm:$0xff] %v9336_v18  ;;  %v2197_v51 = vmax.f32 %v2195_v9, %v2196_v21  ;;  %v1569_v62 = vcombine.high %v1299_v34, %v1299_v34  ;;  %v1576_v57 = vrot.slane %v1299_v34, %v8864_v26  ;;  %vm2555_vm13 = vcmask 1045509  }
 0x1cd   :  { %v9347_v33 = vmax.f32 %v9045_v59, %v12198_v30  ;;  %v2191_v63 = vrot.slane %v2190_v31, 1  ;;  %vm2557_vm14 = vcmask 1046534   ;;  %v2645_v20 = vsel %vm2551_vm11, %v12201_v15, %v2644_v58 }
 0x1ce   :  { %v2650_v49 = vsel %vm2547_vm7, %v12202_v5, %v9054_v25  ;;  %v9357_v4 = vmax.f32 %v2202_v12, %v2203_v44  ;;  %v1583_v59 = vrot.slane %v1569_v62, %v8864_v26  ;;  %v1584_v19 = vcombine.high %v1576_v57, %v1576_v57 }
 0x1cf   :  { %12199 = vst [vmem:[#allocation22_spill] sm:$0xff] %v9347_v33  ;;  %v2207_v21 = vsel %vm1814_vm5, %v1576_v57, -inf  ;;  %vm2559_vm15 = vcmask 1047559   ;;  %v9361_v9 = vmax.f32 %v2183_v32, %v2184_v41  ;;  %vm1185_vm1 = vcmp.gt.f32.partialorder %v9312_v29, 0.0  ;;  %v12206_v57 = vld [vmem:[#allocation29_spill] sm:$0xff] }
 0x1d0   :  { %v2208_v1 = vrot.slane %v2207_v21, 4  ;;  %v2646_v37 = vsel %vm2553_vm12, %v12204_v47, %v2645_v20  ;;  %v2651_v40 = vsel %vm2549_vm10, %v9056_v17, %v2650_v49  ;;  %v2198_v7 = vrot.slane %v2197_v51, 1  ;;  %v12207_v49 = vld [vmem:[#allocation30_spill] sm:$0xff] }
 0x1d1   :  { %12203 = vst [vmem:[#allocation23_spill] sm:$0xff] %v9361_v9  ;;  %v1585_v12 = vcombine.high %v1583_v59, %v1583_v59  ;;  %v2214_v44 = vsel %vm1814_vm5, %v1584_v19, -inf  ;;  %v2221_v34 = vsel %vm1814_vm5, %v1583_v59, -inf  ;;  %v9370_v30 = vmax.f32 %v2190_v31, %v2191_v63  ;;  %v9383_v31 = vld [vmem:[%s11934_s3 + $0x100] sm:$0xff]  }
 0x1d2   :  { %v2209_v58 = vmax.f32 %v2207_v21, %v2208_v1  ;;  %v2215_v32 = vrot.slane %v2214_v44, 4  ;;  %v2222_v41 = vrot.slane %v2221_v34, 4  ;;  %v2647_v9 = vsel %vm2555_vm13, %v12206_v57, %v2646_v37  ;;  %7274 = vmatprep.subr.bf16.mxu1 %v9383_v31 }
 0x1d3   :  { %12205 = vst [vmem:[#allocation26_spill] sm:$0xff] %v9370_v30  ;;  %v2228_v62 = vsel %vm1814_vm5, %v1585_v12, -inf  ;;  %v2652_v20 = vsel %vm2551_vm11, %v9062_v14, %v2651_v40  ;;  %v2554_v18 = vsel %vm2553_vm12, %v12201_v15, %v12207_v49  ;;  %v12208_v30 = vld [vmem:[#allocation34_spill] sm:$0xff]  ;;  %v2648_v12 = vsel %vm2557_vm14, %v12209_v6, %v2647_v9 }
 0x1d4   :  { %v2210_v63 = vrot.slane %v2209_v58, 2  ;;  %v2216_v59 = vmax.f32 %v2214_v44, %v2215_v32  ;;  %v2223_v19 = vmax.f32 %v2221_v34, %v2222_v41  ;;  %v2229_v21 = vrot.slane %v2228_v62, 4 }
 0x1d5   :  { %v7678_v1 = vpop.eup %7677  ;;  %v2653_v37 = vsel %vm2553_vm12, %v9064_v43, %v2652_v20  ;;  %v2556_v40 = vsel %vm2555_vm13, %v12204_v47, %v2554_v18  ;;  %v2561_v49 = vsel %vm2547_vm7, %v9054_v25, %v12208_v30  ;;  %v9402_v53 = vmax.f32 %v2197_v51, %v2198_v7 }
 0x1d6   :  { %v9394_v61 = vmax.f32 %v2209_v58, %v2210_v63  ;;  %v2217_v44 = vrot.slane %v2216_v59, 2  ;;  %v2224_v34 = vrot.slane %v2223_v19, 2  ;;  %v2230_v32 = vmax.f32 %v2228_v62, %v2229_v21 }
 0x1d7   :  { %v6608_v41 = vadd.f32 -1.0, %v7678_v1  ;;  %v2654_v20 = vsel %vm2555_vm13, %v9070_v23, %v2653_v37  ;;  %v2562_v18 = vsel %vm2549_vm10, %v12202_v5, %v2561_v49  ;;  %12210 = vst [vmem:[#allocation30_spill] sm:$0xff] %v9402_v53  ;;  %v2558_v63 = vsel %vm2557_vm14, %v12206_v57, %v2556_v40 }
 0x1d8   :  { %v9404_v45 = vmax.f32 %v2216_v59, %v2217_v44  ;;  %v9406_v16 = vmax.f32 %v2223_v19, %v2224_v34  ;;  %v2231_v58 = vrot.slane %v2230_v32, 2  ;;  %v2655_v9 = vsel %vm2557_vm14, %v9347_v33, %v2654_v20 }
 0x1d9   :  { %v1300_v62 = vsel %vm1185_vm1, %v9312_v29, %v6608_v41  ;;  %v2563_v21 = vsel %vm2551_vm11, %v9056_v17, %v2562_v18  ;;  %v2212_v51 = vrot.slane %v9394_v61, 1  ;;  %v2649_v59 = vsel %vm2559_vm15, %v12208_v30, %v2648_v12 }
 0x1da   :  { %v9418_v7 = vmax.f32 %v2230_v32, %v2231_v58  ;;  %v2821_v29 = vsel %vm2547_vm7, %v12201_v15, %v12200_v24  ;;  %v1586_v19 = vcombine.high %v1300_v62, %v1300_v62  ;;  %v1593_v1 = vrot.slane %v1300_v62, %v8864_v26 }
 0x1db   :  { %v2656_v37 = vsel %vm2559_vm15, %v9085_v13, %v2655_v9  ;;  %v2564_v40 = vsel %vm2553_vm12, %v9062_v14, %v2563_v21  ;;  %v2219_v49 = vrot.slane %v9404_v45, 1  ;;  %v2226_v44 = vrot.slane %v9406_v16, 1 }
 0x1dc   :  { %v2999_v34 = vpack.c.bf16 %v2656_v37, %v2649_v59  ;;  %v2560_v12 = vsel %vm2559_vm15, %v12209_v6, %v2558_v63  ;;  %v1600_v32 = vrot.slane %v1586_v19, %v8864_v26  ;;  %v1601_v24 = vcombine.high %v1593_v1, %v1593_v1 }
 0x1dd   :  { %v2235_v41 = vsel %vm1814_vm5, %v1593_v1, -inf  ;;  %v2565_v20 = vsel %vm2555_vm13, %v9064_v43, %v2564_v40  ;;  %v2233_v18 = vrot.slane %v9418_v7, 1  ;;  %v2822_v9 = vsel %vm2549_vm10, %v12204_v47, %v2821_v29 }
 0x1de   :  { %v2236_v58 = vrot.slane %v2235_v41, 4  ;;  %3387 = vmatprep.mubr.bf16.mxu1 %v2999_v34  ;;  %v2566_v62 = vsel %vm2557_vm14, %v9070_v23, %v2565_v20  ;;  %v1602_v21 = vcombine.high %v1600_v32, %v1600_v32  ;;  %v2242_v63 = vsel %vm1814_vm5, %v1601_v24, -inf  ;;  %v7453_v34 = vld [vmem:[%s11934_s3 + $0x108] sm:$0xff]   ;;  %v12211_v24 = vld [vmem:[#allocation31_spill] sm:$0xff] }
 0x1df   :  { %v2249_v59 = vsel %vm1814_vm5, %v1600_v32, -inf  ;;  %v2567_v19 = vsel %vm2559_vm15, %v9347_v33, %v2566_v62  ;;  %v2243_v37 = vrot.slane %v2242_v63, 4  ;;  %v2823_v29 = vsel %vm2551_vm11, %v12206_v57, %v2822_v9 }
 0x1e0   :  { %v2237_v1 = vmax.f32 %v2235_v41, %v2236_v58  ;;  %v2250_v40 = vrot.slane %v2249_v59, 4  ;;  %v2998_v53 = vpack.c.bf16 %v2567_v19, %v2560_v12  ;;  %v2256_v20 = vsel %vm1814_vm5, %v1602_v21, -inf }
 0x1e1   :  { %v2828_v32 = vsel %vm2547_vm7, %v9062_v14, %v9056_v17  ;;  %v2733_v41 = vsel %vm2549_vm10, %v12201_v15, %v12211_v24  ;;  %v2244_v62 = vmax.f32 %v2242_v63, %v2243_v37  ;;  %v2257_v19 = vrot.slane %v2256_v20, 4 }
 0x1e2   :  { %v2238_v58 = vrot.slane %v2237_v1, 2  ;;  %v2251_v12 = vmax.f32 %v2249_v59, %v2250_v40  ;;  %3388 = vmatmul.mubr.bf16.vlgmr.msra.gmra.mrb[72].mxu1 %v2998_v53  ;;  %v2824_v27 = vsel %vm2553_vm12, %v12209_v6, %v2823_v29  ;;  %v2829_v21 = vsel %vm2549_vm10, %v9064_v43, %v2828_v32  ;;  %v7454_v53 = vld [vmem:[%s11934_s3 + $0x110] sm:$0xff]  }
 0x1e3   :  { %v2734_v9 = vsel %vm2551_vm11, %v12204_v47, %v2733_v41  ;;  %v2739_v0 = vsel %vm2547_vm7, %v9056_v17, %v12202_v5  ;;  %7275 = vmatpush3.bf16.msra.mxu1 %v9383_v31  ;;  %v2245_v63 = vrot.slane %v2244_v62, 2  ;;  %v2258_v37 = vmax.f32 %v2256_v20, %v2257_v19 }
 0x1e4   :  { %v2239_v24 = vmax.f32 %v2237_v1, %v2238_v58  ;;  %v2252_v59 = vrot.slane %v2251_v12, 2  ;;  %7276 = vmatprep.subr.bf16.mxu1 %v7453_v34  ;;  %v2825_v40 = vsel %vm2555_vm13, %v12208_v30, %v2824_v27  ;;  %v2830_v29 = vsel %vm2551_vm11, %v9070_v23, %v2829_v21 }
 0x1e5   :  { %v2735_v32 = vsel %vm2553_vm12, %v12206_v57, %v2734_v9  ;;  %v2740_v31 = vsel %vm2549_vm10, %v9062_v14, %v2739_v0  ;;  %v12212_v1 = vrot.slane %v9357_v4, 1  ;;  %v2246_v41 = vmax.f32 %v2244_v62, %v2245_v63 }
 0x1e6   :  { %v2253_v58 = vmax.f32 %v2251_v12, %v2252_v59  ;;  %v2259_v19 = vrot.slane %v2258_v37, 2  ;;  %v9486_v17 = vmax.f32 %v9394_v61, %v2212_v51  ;;  %v2831_v27 = vsel %vm2553_vm12, %v9347_v33, %v2830_v29  ;;  %v7455_v51 = vld [vmem:[%s11934_s3 + $0x118] sm:$0xff]  }
 0x1e7   :  { %v9483_v20 = vmax.f32 %v9357_v4, %v12212_v1  ;;  %v2736_v21 = vsel %vm2555_vm13, %v12209_v6, %v2735_v32  ;;  %v2741_v0 = vsel %vm2551_vm11, %v9064_v43, %v2740_v31  ;;  %7277 = vmatpush3.bf16.msra.mxu1 %v7453_v34  ;;  %v9495_v9 = vmax.f32 %v9404_v45, %v2219_v49 }
 0x1e8   :  { %v9498_v4 = vmax.f32 %v9406_v16, %v2226_v44  ;;  %v9501_v62 = vmax.f32 %v9418_v7, %v2233_v18  ;;  %v2826_v61 = vsel %vm2557_vm14, %v9054_v25, %v2825_v40  ;;  %7278 = vmatprep.subr.bf16.mxu1 %v7454_v53  ;;  %v2240_v12 = vrot.slane %v2239_v24, 1 }
 0x1e9   :  { %v2247_v63 = vrot.slane %v2246_v41, 1  ;;  %v2832_v45 = vsel %vm2555_vm13, %v9085_v13, %v2831_v27  ;;  %v2742_v16 = vsel %vm2553_vm12, %v9070_v23, %v2741_v0  ;;  %v2254_v49 = vrot.slane %v2253_v58, 1 }
 0x1ea   :  { %v9512_v44 = vmax.f32 %v2258_v37, %v2259_v19  ;;  %v2833_v7 = vsel %vm2557_vm14, %v9120_v50, %v2832_v45  ;;  %v2737_v18 = vsel %vm2557_vm14, %v12208_v30, %v2736_v21  ;;  %v2827_v34 = vsel %vm2559_vm15, %v12202_v5, %v2826_v61  ;;  %v12213_v21 = vld [vmem:[#allocation9_spill] sm:$0xff] }
 0x1eb   :  { %v2834_v59 = vsel %vm2559_vm15, %v9099_v35, %v2833_v7  ;;  %v2743_v40 = vsel %vm2555_vm13, %v9347_v33, %v2742_v16  ;;  %v6971_v29 = vadd.f32 %v9058_v60, %v9050_v11  ;;  %7279 = vmatpush3.bf16.msra.mxu1 %v7454_v53  ;;  %v6974_v31 = vadd.f32 %v9072_v48, %v9066_v22  ;;  %v7456_v53 = vld [vmem:[%s11934_s3 + $0x120] sm:$0xff]   ;;  %v12214_v48 = vld [vmem:[#allocation10_spill] sm:$0xff] }
 0x1ec   :  { %v3001_v37 = vpack.c.bf16 %v2834_v59, %v2827_v34  ;;  %v2744_v32 = vsel %vm2557_vm14, %v9085_v13, %v2743_v40  ;;  %v6977_v1 = vadd.f32 %v9145_v42, %v9136_v38  ;;  %7280 = vmatprep.subr.bf16.mxu1 %v7455_v51  ;;  %v2738_v19 = vsel %vm2559_vm15, %v9054_v25, %v2737_v18  ;;  %v12215_v42 = vld [vmem:[#allocation11_spill] sm:$0xff]  ;;  %v12216_v45 = vld [vmem:[#allocation41_spill] sm:$0xff]  ;;  %v12217_v7 = vld [vmem:[#allocation12_spill] sm:$0xff] }
 0x1ed   :  { %v2745_v27 = vsel %vm2559_vm15, %v9120_v50, %v2744_v32  ;;  %v1013_v11 = vadd.f32 %v6971_v29, %v12213_v21  ;;  %v6980_v60 = vadd.f32 %v9159_v55, %v9149_v39  ;;  %v1016_v38 = vadd.f32 %v6974_v31, %v12214_v48  ;;  %v12218_v39 = vld [vmem:[#allocation5_spill] sm:$0xff]  ;;  %v12219_v40 = vld [vmem:[#allocation46_spill] sm:$0xff] }
 0x1ee   :  { %3467 = vmatprep.mubr.bf16.mxu0 %v3001_v37  ;;  %v3000_v22 = vpack.c.bf16 %v2745_v27, %v2738_v19  ;;  %v1021_v0 = vadd.f32 %v6977_v1, %v12215_v42  ;;  %v2657_v61 = vsel %vm2547_vm7, %v9099_v35, %v9120_v50  ;;  %v2664_v34 = vsel %vm2547_vm7, %v9213_v3, %v9209_v10  ;;  %v12220_v37 = vld [vmem:[#allocation38_spill] sm:$0xff]  ;;  %v12221_v31 = vld [vmem:[#allocation45_spill] sm:$0xff]  ;;  %v12222_v27 = vld [vmem:[#allocation24_spill] sm:$0xff] }
 0x1ef   :  { %v9548_v16 = vadd.f32 %v12216_v45, %v1013_v11  ;;  %v1024_v18 = vadd.f32 %v6980_v60, %v12217_v7  ;;  %v2658_v55 = vsel %vm2549_vm10, %v12218_v39, %v2657_v61  ;;  %7281 = vmatpush3.bf16.msra.mxu1 %v7455_v51  ;;  %v9556_v59 = vmax.f32 %v2239_v24, %v2240_v12  ;;  %v12223_v11 = vld [vmem:[#allocation47_spill] sm:$0xff] }
 0x1f0   :  { %3468 = vmatmul.mubr.bf16.vlgmr.msra.gmra.mrb[48].mxu0 %v3000_v22  ;;  %v9559_v29 = vadd.f32 %v12219_v40, %v1016_v38  ;;  %v9562_v32 = vadd.f32 %v12220_v37, %v1021_v0  ;;  %v2659_v1 = vsel %vm2551_vm11, %v12221_v31, %v2658_v55  ;;  %v2665_v24 = vsel %vm2549_vm10, %v9218_v54, %v2664_v34  ;;  %v7457_v38 = vld [vmem:[%s11934_s3 + $0x128] sm:$0xff]   ;;  %v12224_v45 = vld [vmem:[#allocation19_spill] sm:$0xff] }
 0x1f1   :  { %v1209_v19 = vmin.f32 %v9548_v16, 0.0  ;;  %v9568_v21 = vadd.f32 %v12222_v27, %v1024_v18  ;;  %v2660_v51 = vsel %vm2553_vm12, %v12223_v11, %v2659_v1  ;;  %7282 = vmatprep.subr.bf16.mxu1 %v7456_v53  ;;  %v9574_v12 = vmax.f32 %v2246_v41, %v2247_v63  ;;  %v12227_v34 = vld [vmem:[#allocation27_spill] sm:$0xff]  ;;  %v12228_v37 = vld [vmem:[#allocation50_spill] sm:$0xff] }
 0x1f2   :  { %v9576_v60 = vmax.f32 %v2253_v58, %v2254_v49  ;;  %v1210_v22 = vmin.f32 %v9559_v29, 0.0  ;;  %v1211_v48 = vmin.f32 %v9562_v32, 0.0  ;;  %v2661_v7 = vsel %vm2555_vm13, %v12224_v45, %v2660_v51  ;;  %v12229_v1 = vld [vmem:[#allocation51_spill] sm:$0xff] }
 0x1f3   :  { %v1248_v0 = vmul.f32 1.442695, %v1209_v19  ;;  %v1212_v61 = vmin.f32 %v9568_v21, 0.0  ;;  %7283 = vmatpush3.bf16.msra.mxu1 %v7456_v53  ;;  %v12225_v63 = vrot.slane %v9211_v52, 1  ;;  %v2666_v18 = vsel %vm2551_vm11, %v9221_v28, %v2665_v24  ;;  %v12230_v27 = vld [vmem:[#allocation7_spill] sm:$0xff] }
 0x1f4   :  { %v1250_v41 = vmul.f32 1.442695, %v1210_v22  ;;  %v1252_v58 = vmul.f32 1.442695, %v1211_v48  ;;  %7284 = vmatprep.subr.bf16.mxu1 %v7457_v38  ;;  %v2662_v40 = vsel %vm2557_vm14, %v12227_v34, %v2661_v7  ;;  %v2667_v53 = vsel %vm2553_vm12, %v12228_v37, %v2666_v18  ;;  %v7458_v24 = vld [vmem:[%s11934_s3 + $0x130] sm:$0xff]   ;;  %v12231_v7 = vld [vmem:[#allocation52_spill] sm:$0xff] }
 0x1f5   :  { %v9590_v49 = vmax.f32 %v9211_v52, %v12225_v63  ;;  %7679 = vpow2.f32 %v1248_v0  ;;  %v9594_v55 = vmul.f32 1.442695, %v1212_v61  ;;  %v2668_v19 = vsel %vm2555_vm13, %v12229_v1, %v2667_v53 }
 0x1f6   :  { %7681 = vpow2.f32 %v1250_v41  ;;  %v2568_v52 = vsel %vm2547_vm7, %v9120_v50, %v9085_v13  ;;  %v2575_v51 = vsel %vm2547_vm7, %v9209_v10, %v12230_v27  ;;  %v2663_v61 = vsel %vm2559_vm15, %v12230_v27, %v2662_v40 }
 0x1f7   :  { %12226 = vst [vmem:[#allocation31_spill] sm:$0xff] %v9590_v49  ;;  %7683 = vpow2.f32 %v1252_v58  ;;  %v2669_v22 = vsel %vm2557_vm14, %v9590_v49, %v2668_v19  ;;  %v2569_v48 = vsel %vm2549_vm10, %v9099_v35, %v2568_v52  ;;  %v2576_v0 = vsel %vm2549_vm10, %v9213_v3, %v2575_v51  ;;  %7285 = vmatpush3.bf16.msra.mxu1 %v7457_v38 }
 0x1f8   :  { %v2670_v41 = vsel %vm2559_vm15, %v12231_v7, %v2669_v22  ;;  %v2570_v63 = vsel %vm2551_vm11, %v12218_v39, %v2569_v48  ;;  %v2577_v58 = vsel %vm2551_vm11, %v9218_v54, %v2576_v0  ;;  %7286 = vmatprep.subr.bf16.mxu1 %v7458_v24  ;;  %vm1186_vm2 = vcmp.gt.f32.partialorder %v9548_v16, 0.0 }
 0x1f9   :  { %v3004_v18 = vpack.c.bf16 %v2670_v41, %v2663_v61  ;;  %v2571_v53 = vsel %vm2553_vm12, %v12221_v31, %v2570_v63  ;;  %v2578_v38 = vsel %vm2553_vm12, %v9221_v28, %v2577_v58  ;;  %v2835_v40 = vsel %vm2547_vm7, %v12221_v31, %v12218_v39 }
 0x1fa   :  { %v2572_v19 = vsel %vm2555_vm13, %v12223_v11, %v2571_v53  ;;  %v2579_v52 = vsel %vm2555_vm13, %v12228_v37, %v2578_v38  ;;  %v2836_v51 = vsel %vm2549_vm10, %v12223_v11, %v2835_v40  ;;  %v2842_v22 = vsel %vm2547_vm7, %v9221_v28, %v9218_v54 }
 0x1fb   :  { %3395 = vmatprep.mubr.bf16.mxu1 %v3004_v18  ;;  %v2573_v48 = vsel %vm2557_vm14, %v12224_v45, %v2572_v19  ;;  %v2580_v0 = vsel %vm2557_vm14, %v12229_v1, %v2579_v52  ;;  %v2837_v61 = vsel %vm2551_vm11, %v12224_v45, %v2836_v51  ;;  %v2843_v41 = vsel %vm2549_vm10, %v12228_v37, %v2842_v22 }
 0x1fc   :  { %v2574_v63 = vsel %vm2559_vm15, %v12227_v34, %v2573_v48  ;;  %v2581_v58 = vsel %vm2559_vm15, %v9590_v49, %v2580_v0  ;;  %v2838_v18 = vsel %vm2553_vm12, %v12227_v34, %v2837_v61  ;;  %v2844_v53 = vsel %vm2551_vm11, %v12229_v1, %v2843_v41  ;;  %7287 = vmatpush3.bf16.msra.mxu1 %v7458_v24  ;;  %v12232_v41 = vld [vmem:[#allocation58_spill] sm:$0xff] }
 0x1fd   :  { %v3003_v38 = vpack.c.bf16 %v2581_v58, %v2574_v63  ;;  %v2839_v40 = vsel %vm2555_vm13, %v12230_v27, %v2838_v18  ;;  %v2845_v19 = vsel %vm2553_vm12, %v9590_v49, %v2844_v53  ;;  %v2746_v52 = vsel %vm2547_vm7, %v12218_v39, %v9099_v35 }
 0x1fe   :  { %v2840_v51 = vsel %vm2557_vm14, %v9209_v10, %v2839_v40  ;;  %v2846_v22 = vsel %vm2555_vm13, %v12231_v7, %v2845_v19  ;;  %v2747_v24 = vsel %vm2549_vm10, %v12221_v31, %v2746_v52  ;;  %v2753_v48 = vsel %vm2547_vm7, %v9218_v54, %v9213_v3 }
 0x1ff   :  { %v7680_v0 = vpop.eup %7679  ;;  %3396 = vmatmul.mubr.bf16.gmra.mrb[76].mxu1 %v3003_v38  ;;  %v2841_v61 = vsel %vm2559_vm15, %v9213_v3, %v2840_v51  ;;  %v2847_v63 = vsel %vm2557_vm14, %v12232_v41, %v2846_v22  ;;  %v2748_v58 = vsel %vm2551_vm11, %v12223_v11, %v2747_v24  ;;  %v2754_v18 = vsel %vm2549_vm10, %v9221_v28, %v2753_v48  ;;  %v7459_v24 = vld [vmem:[%s11934_s3 + $0x138] sm:$0xff]  }
 0x200   :  { %v7682_v53 = vpop.eup %7681  ;;  %v6609_v31 = vadd.f32 -1.0, %v7680_v0  ;;  %v2848_v40 = vsel %vm2559_vm15, %v9263_v36, %v2847_v63  ;;  %v2749_v38 = vsel %vm2553_vm12, %v12224_v45, %v2748_v58  ;;  %v2755_v19 = vsel %vm2551_vm11, %v12228_v37, %v2754_v18  ;;  %7288 = vmatprep.subr.bf16.mxu1 %v7459_v24 }
 0x201   :  { %v7684_v52 = vpop.eup %7683  ;;  %vm1187_vm3 = vcmp.gt.f32.partialorder %v9559_v29, 0.0  ;;  %v6610_v51 = vadd.f32 -1.0, %v7682_v53  ;;  %v3006_v22 = vpack.c.bf16 %v2848_v40, %v2841_v61  ;;  %v2750_v11 = vsel %vm2555_vm13, %v12227_v34, %v2749_v38  ;;  %7289 = vmatpush3.bf16.msra.mxu1 %v7459_v24 }
 0x202   :  { %v1301_v48 = vsel %vm1186_vm2, %v9548_v16, %v6609_v31  ;;  %vm1188_vm4 = vcmp.gt.f32.partialorder %v9562_v32, 0.0  ;;  %v6611_v0 = vadd.f32 -1.0, %v7684_v52  ;;  %v9700_v63 = vsel %vm2553_vm12, %v12229_v1, %v2755_v19 }
 0x203   :  { %v1603_v58 = vcombine.high %v1301_v48, %v1301_v48  ;;  %v1610_v61 = vrot.slane %v1301_v48, %v8864_v26  ;;  %v1302_v18 = vsel %vm1187_vm3, %v9559_v29, %v6610_v51  ;;  %7685 = vpow2.f32 %v9594_v55  ;;  %3475 = vmatprep.mubr.bf16.mxu0 %v3006_v22 }
 0x204   :  { %v1620_v53 = vcombine.high %v1302_v18, %v1302_v18  ;;  %v1627_v40 = vrot.slane %v1302_v18, %v8864_v26  ;;  %v9707_v16 = vsel %vm1188_vm4, %v9562_v32, %v6611_v0  ;;  %v2751_v31 = vsel %vm2557_vm14, %v12230_v27, %v2750_v11 }
 0x205   :  { %v1617_v38 = vrot.slane %v1603_v58, %v8864_v26  ;;  %v1618_v19 = vcombine.high %v1610_v61, %v1610_v61  ;;  %v2263_v52 = vsel %vm1814_vm5, %v1610_v61, -inf  ;;  %v1637_v29 = vcombine.high %v9707_v16, %v9707_v16 }
 0x206   :  { %v2264_v55 = vrot.slane %v2263_v52, 4  ;;  %v1634_v51 = vrot.slane %v1620_v53, %v8864_v26  ;;  %v1635_v22 = vcombine.high %v1627_v40, %v1627_v40  ;;  %v2291_v48 = vsel %vm1814_vm5, %v1627_v40, -inf }
 0x207   :  { %v1619_v32 = vcombine.high %v1617_v38, %v1617_v38  ;;  %v2270_v0 = vsel %vm1814_vm5, %v1618_v19, -inf  ;;  %v2277_v11 = vsel %vm1814_vm5, %v1617_v38, -inf  ;;  %v2292_v24 = vrot.slane %v2291_v48, 4 }
 0x208   :  { %v2265_v18 = vmax.f32 %v2263_v52, %v2264_v55  ;;  %v2271_v58 = vrot.slane %v2270_v0, 4  ;;  %v2278_v42 = vrot.slane %v2277_v11, 4  ;;  %v1636_v54 = vcombine.high %v1634_v51, %v1634_v51 }
 0x209   :  { %v2284_v61 = vsel %vm1814_vm5, %v1619_v32, -inf  ;;  %v2293_v3 = vmax.f32 %v2291_v48, %v2292_v24  ;;  %v2298_v1 = vsel %vm1814_vm5, %v1635_v22, -inf  ;;  %v2305_v53 = vsel %vm1814_vm5, %v1634_v51, -inf }
 0x20a   :  { %v2266_v39 = vrot.slane %v2265_v18, 2  ;;  %v2272_v27 = vmax.f32 %v2270_v0, %v2271_v58  ;;  %v2279_v40 = vmax.f32 %v2277_v11, %v2278_v42  ;;  %v2285_v35 = vrot.slane %v2284_v61, 4 }
 0x20b   :  { %v2294_v37 = vrot.slane %v2293_v3, 2  ;;  %v2299_v19 = vrot.slane %v2298_v1, 4  ;;  %v2306_v28 = vrot.slane %v2305_v53, 4  ;;  %v2312_v38 = vsel %vm1814_vm5, %v1636_v54, -inf }
 0x20c   :  { %vm1189_vm6 = vcmp.gt.f32.partialorder %v9568_v21, 0.0  ;;  %v2267_v52 = vmax.f32 %v2265_v18, %v2266_v39  ;;  %v2273_v55 = vrot.slane %v2272_v27, 2  ;;  %v2280_v34 = vrot.slane %v2279_v40, 2 }
 0x20d   :  { %v2286_v32 = vmax.f32 %v2284_v61, %v2285_v35  ;;  %v7686_v48 = vpop.eup %7685  ;;  %v2295_v24 = vmax.f32 %v2293_v3, %v2294_v37  ;;  %v2300_v22 = vmax.f32 %v2298_v1, %v2299_v19  ;;  %v2307_v50 = vmax.f32 %v2305_v53, %v2306_v28 }
 0x20e   :  { %v2313_v51 = vrot.slane %v2312_v38, 4  ;;  %v2268_v13 = vrot.slane %v2267_v52, 1  ;;  %v2274_v0 = vmax.f32 %v2272_v27, %v2273_v55  ;;  %v2281_v42 = vmax.f32 %v2279_v40, %v2280_v34 }
 0x20f   :  { %v2287_v11 = vrot.slane %v2286_v32, 2  ;;  %v2296_v58 = vrot.slane %v2295_v24, 1  ;;  %v2301_v45 = vrot.slane %v2300_v22, 2  ;;  %v2308_v33 = vrot.slane %v2307_v50, 2 }
 0x210   :  { %v2314_v5 = vmax.f32 %v2312_v38, %v2313_v51  ;;  %v2275_v54 = vrot.slane %v2274_v0, 1  ;;  %v2282_v25 = vrot.slane %v2281_v42, 1  ;;  %v6612_v39 = vadd.f32 -1.0, %v7686_v48 }
 0x211   :  { %v2288_v23 = vmax.f32 %v2286_v32, %v2287_v11  ;;  %v2302_v18 = vmax.f32 %v2300_v22, %v2301_v45  ;;  %v2309_v30 = vmax.f32 %v2307_v50, %v2308_v33  ;;  %v2757_v3 = vsel %vm2555_vm13, %v9590_v49, %v9700_v63  ;;  %v12233_v11 = vld [vmem:[#allocation21_spill] sm:$0xff] }
 0x212   :  { %v2315_v35 = vrot.slane %v2314_v5, 2  ;;  %v9727_v28 = vmax.f32 %v2267_v52, %v2268_v13  ;;  %v1644_v34 = vrot.slane %v9707_v16, %v8864_v26  ;;  %v9733_v1 = vsel %vm2559_vm15, %v9209_v10, %v2751_v31 }
 0x213   :  { %v2289_v37 = vrot.slane %v2288_v23, 1  ;;  %v9735_v27 = vmax.f32 %v2274_v0, %v2275_v54  ;;  %v9737_v61 = vmax.f32 %v2295_v24, %v2296_v58  ;;  %v2303_v50 = vrot.slane %v2302_v18, 1  ;;  %v12234_v58 = vld [vmem:[#allocation53_spill] sm:$0xff] }
 0x214   :  { %v1651_v33 = vrot.slane %v1637_v29, %v8864_v26  ;;  %v9740_v45 = vmax.f32 %v2281_v42, %v2282_v25  ;;  %v1652_v63 = vcombine.high %v1644_v34, %v1644_v34  ;;  %v2319_v13 = vsel %vm1814_vm5, %v1644_v34, -inf }
 0x215   :  { %v1304_v16 = vsel %vm1189_vm6, %v9568_v21, %v6612_v39  ;;  %v9746_v53 = vmax.f32 %v2288_v23, %v2289_v37  ;;  %v2310_v31 = vrot.slane %v2309_v30, 1  ;;  %v2316_v40 = vmax.f32 %v2314_v5, %v2315_v35 }
 0x216   :  { %v1653_v19 = vcombine.high %v1651_v33, %v1651_v33  ;;  %v2320_v38 = vrot.slane %v2319_v13, 4  ;;  %v2326_v52 = vsel %vm1814_vm5, %v1652_v63, -inf  ;;  %v2333_v55 = vsel %vm1814_vm5, %v1651_v33, -inf }
 0x217   :  { %v1654_v29 = vcombine.high %v1304_v16, %v1304_v16  ;;  %v9750_v25 = vmax.f32 %v2302_v18, %v2303_v50  ;;  %v2327_v32 = vrot.slane %v2326_v52, 4  ;;  %v2334_v48 = vrot.slane %v2333_v55, 4 }
 0x218   :  { %v2340_v24 = vsel %vm1814_vm5, %v1653_v19, -inf  ;;  %v2321_v22 = vmax.f32 %v2319_v13, %v2320_v38  ;;  %v1661_v23 = vrot.slane %v1304_v16, %v8864_v26  ;;  %v2317_v5 = vrot.slane %v2316_v40, 1 }
 0x219   :  { %v2341_v51 = vrot.slane %v2340_v24, 4  ;;  %v1668_v21 = vrot.slane %v1654_v29, %v8864_v26  ;;  %v2328_v0 = vmax.f32 %v2326_v52, %v2327_v32  ;;  %v2335_v42 = vmax.f32 %v2333_v55, %v2334_v48 }
 0x21a   :  { %v6983_v54 = vadd.f32 %v12234_v58, %v12233_v11  ;;  %v2322_v39 = vrot.slane %v2321_v22, 2  ;;  %v1669_v18 = vcombine.high %v1661_v23, %v1661_v23  ;;  %v2347_v33 = vsel %vm1814_vm5, %v1661_v23, -inf }
 0x21b   :  { %v2342_v35 = vmax.f32 %v2340_v24, %v2341_v51  ;;  %v1670_v37 = vcombine.high %v1668_v21, %v1668_v21  ;;  %v2329_v34 = vrot.slane %v2328_v0, 2  ;;  %v2336_v50 = vrot.slane %v2335_v42, 2 }
 0x21c   :  { %v2361_v63 = vsel %vm1814_vm5, %v1668_v21, -inf  ;;  %v2323_v13 = vmax.f32 %v2321_v22, %v2322_v39  ;;  %v2348_v19 = vrot.slane %v2347_v33, 4  ;;  %v2354_v38 = vsel %vm1814_vm5, %v1669_v18, -inf }
 0x21d   :  { %v2343_v16 = vrot.slane %v2342_v35, 2  ;;  %v2330_v52 = vmax.f32 %v2328_v0, %v2329_v34  ;;  %v2337_v55 = vmax.f32 %v2335_v42, %v2336_v50  ;;  %v2355_v29 = vrot.slane %v2354_v38, 4 }
 0x21e   :  { %v2362_v32 = vrot.slane %v2361_v63, 4  ;;  %v2324_v48 = vrot.slane %v2323_v13, 1  ;;  %v2349_v24 = vmax.f32 %v2347_v33, %v2348_v19  ;;  %v2368_v51 = vsel %vm1814_vm5, %v1670_v37, -inf }
 0x21f   :  { %v2344_v11 = vmax.f32 %v2342_v35, %v2343_v16  ;;  %v9761_v58 = vmax.f32 %v2309_v30, %v2310_v31  ;;  %v2356_v49 = vmax.f32 %v2354_v38, %v2355_v29  ;;  %v2758_v22 = vsel %vm2557_vm14, %v12231_v7, %v2757_v3  ;;  %v12236_v29 = vld [vmem:[#allocation55_spill] sm:$0xff] }
 0x220   :  { %v2363_v23 = vmax.f32 %v2361_v63, %v2362_v32  ;;  %v9765_v21 = vmax.f32 %v2316_v40, %v2317_v5  ;;  %v2331_v39 = vrot.slane %v2330_v52, 1  ;;  %v2350_v18 = vrot.slane %v2349_v24, 2  ;;  %v12235_v40 = vld [vmem:[#allocation13_spill] sm:$0xff] }
 0x221   :  { %v2369_v0 = vrot.slane %v2368_v51, 4  ;;  %v9767_v42 = vmax.f32 %v2323_v13, %v2324_v48  ;;  %v2338_v34 = vrot.slane %v2337_v55, 1  ;;  %v2357_v50 = vrot.slane %v2356_v49, 2  ;;  %v12237_v13 = vld [vmem:[#allocation57_spill] sm:$0xff] }
 0x222   :  { %v2364_v35 = vrot.slane %v2363_v23, 2  ;;  %v2345_v33 = vrot.slane %v2344_v11, 1  ;;  %v2351_v16 = vmax.f32 %v2349_v24, %v2350_v18  ;;  %v2759_v30 = vsel %vm2559_vm15, %v12232_v41, %v2758_v22 }
 0x223   :  { %v2370_v37 = vmax.f32 %v2368_v51, %v2369_v0  ;;  %v2358_v31 = vmax.f32 %v2356_v49, %v2357_v50  ;;  %v3005_v3 = vpack.c.bf16 %v2759_v30, %v9733_v1  ;;  %v1029_v5 = vadd.f32 %v6983_v54, %v12235_v40  ;;  %v12238_v49 = vld [vmem:[#allocation56_spill] sm:$0xff]  ;;  %v12239_v54 = vld [vmem:[#allocation14_spill] sm:$0xff]  ;;  %v12240_v0 = vld [vmem:[#allocation15_spill] sm:$0xff] }
 0x224   :  { %v2365_v63 = vmax.f32 %v2363_v23, %v2364_v35  ;;  %v2352_v19 = vrot.slane %v2351_v16, 1  ;;  %v6986_v32 = vadd.f32 %v12237_v13, %v12236_v29  ;;  %v6989_v48 = vadd.f32 %v9275_v56, %v9271_v2  ;;  %v12246_v40 = vld [vmem:[#allocation66_spill] sm:$0xff]  ;;  %v12249_v13 = vld [vmem:[#allocation61_spill] sm:$0xff] }
 0x225   :  { %v2371_v38 = vrot.slane %v2370_v37, 2  ;;  %v9777_v10 = vmax.f32 %v2330_v52, %v2331_v39  ;;  %v9779_v24 = vmax.f32 %v2337_v55, %v2338_v34  ;;  %v2359_v51 = vrot.slane %v2358_v31, 1  ;;  %3476 = vmatmul.mubr.bf16.gmra.mrb[52].mxu0 %v3005_v3  ;;  %v12244_v34 = vld [vmem:[#allocation54_spill] sm:$0xff] }
 0x226   :  { %v9782_v23 = vadd.f32 %v12238_v49, %v1029_v5  ;;  %v2366_v1 = vrot.slane %v2365_v63, 1  ;;  %v1032_v18 = vadd.f32 %v6986_v32, %v12239_v54  ;;  %v1037_v50 = vadd.f32 %v6989_v48, %v12240_v0  ;;  %v12247_v5 = vld [vmem:[#allocation67_spill] sm:$0xff]  ;;  %v12250_v48 = vld [vmem:[#allocation68_spill] sm:$0xff] }
 0x227   :  { %v9784_v22 = vmax.f32 %v2370_v37, %v2371_v38  ;;  %v9788_v35 = vmax.f32 %v2344_v11, %v2345_v33  ;;  %v9790_v30 = vmax.f32 %v2351_v16, %v2352_v19  ;;  %v12242_v56 = vrot.slane %v9323_v46, 1  ;;  %v12245_v16 = vld [vmem:[#allocation60_spill] sm:$0xff] }
 0x228   :  { %v1213_v2 = vmin.f32 %v9782_v23, 0.0  ;;  %v9798_v55 = vmax.f32 %v2358_v31, %v2359_v51  ;;  %v9801_v39 = vadd.f32 %v9261_v8, %v1032_v18  ;;  %v9804_v37 = vadd.f32 %v12244_v34, %v1037_v50  ;;  %v12252_v0 = vld [vmem:[#allocation20_spill] sm:$0xff]  ;;  %v12254_v34 = vld [vmem:[#allocation69_spill] sm:$0xff] }
 0x229   :  { %12241 = vst [vmem:[#allocation9_spill] sm:$0xff] %v9788_v35  ;;  %v9796_v52 = vmax.f32 %v9323_v46, %v12242_v56  ;;  %v2671_v11 = vsel %vm2547_vm7, %v9263_v36, %v12232_v41  ;;  %v2678_v46 = vsel %vm2547_vm7, %v12247_v5, %v12246_v40  ;;  %v2582_v8 = vsel %vm2547_vm7, %v12232_v41, %v12231_v7  ;;  %v12259_v41 = vld [vmem:[#allocation72_spill] sm:$0xff] }
 0x22a   :  { %12243 = vst [vmem:[#allocation10_spill] sm:$0xff] %v9798_v55  ;;  %v1256_v33 = vmul.f32 1.442695, %v1213_v2  ;;  %v2672_v3 = vsel %vm2549_vm10, %v12245_v16, %v2671_v11  ;;  %v9817_v31 = vmax.f32 %v2365_v63, %v2366_v1  ;;  %v1214_v38 = vmin.f32 %v9801_v39, 0.0  ;;  %v12251_v63 = vld [vmem:[#allocation62_spill] sm:$0xff]  ;;  %v12253_v2 = vld [vmem:[#allocation63_spill] sm:$0xff] }
 0x22b   :  { %v1215_v29 = vmin.f32 %v9804_v37, 0.0  ;;  %v2673_v32 = vsel %vm2551_vm11, %v12249_v13, %v2672_v3  ;;  %v2679_v51 = vsel %vm2549_vm10, %v12250_v48, %v2678_v46  ;;  %v2583_v49 = vsel %vm2549_vm10, %v9263_v36, %v2582_v8  ;;  %v12255_v3 = vld [vmem:[#allocation65_spill] sm:$0xff]  ;;  %v12256_v8 = vld [vmem:[#allocation64_spill] sm:$0xff] }
 0x22c   :  { %12248 = vst [vmem:[#allocation11_spill] sm:$0xff] %v9817_v31  ;;  %7687 = vpow2.f32 %v1256_v33  ;;  %v1258_v54 = vmul.f32 1.442695, %v1214_v38  ;;  %v2674_v1 = vsel %vm2553_vm12, %v12251_v63, %v2673_v32  ;;  %v2680_v50 = vsel %vm2551_vm11, %v12252_v0, %v2679_v51 }
 0x22d   :  { %v1260_v18 = vmul.f32 1.442695, %v1215_v29  ;;  %v2675_v56 = vsel %vm2555_vm13, %v12253_v2, %v2674_v1  ;;  %v2681_v11 = vsel %vm2553_vm12, %v12254_v34, %v2680_v50  ;;  %v2584_v33 = vsel %vm2551_vm11, %v12245_v16, %v2583_v49  ;;  %v12257_v29 = vld [vmem:[#allocation70_spill] sm:$0xff]  ;;  %v12258_v50 = vld [vmem:[#allocation71_spill] sm:$0xff] }
 0x22e   :  { %v2589_v46 = vsel %vm2547_vm7, %v12246_v40, %v12255_v3  ;;  %7689 = vpow2.f32 %v1258_v54  ;;  %v2676_v38 = vsel %vm2557_vm14, %v12256_v8, %v2675_v56  ;;  %v2682_v32 = vsel %vm2555_vm13, %v12257_v29, %v2681_v11 }
 0x22f   :  { %v2585_v51 = vsel %vm2553_vm12, %v12249_v13, %v2584_v33  ;;  %vm1190_vm8 = vcmp.gt.f32.partialorder %v9782_v23, 0.0  ;;  %7691 = vpow2.f32 %v1260_v18  ;;  %v2677_v49 = vsel %vm2559_vm15, %v12255_v3, %v2676_v38 }
 0x230   :  { %v2683_v1 = vsel %vm2557_vm14, %v9796_v52, %v2682_v32  ;;  %v2586_v54 = vsel %vm2555_vm13, %v12251_v63, %v2585_v51  ;;  %v2590_v33 = vsel %vm2549_vm10, %v12247_v5, %v2589_v46  ;;  %v2849_v18 = vsel %vm2547_vm7, %v12249_v13, %v12245_v16 }
 0x231   :  { %v2684_v56 = vsel %vm2559_vm15, %v12258_v50, %v2683_v1  ;;  %v2587_v11 = vsel %vm2557_vm14, %v12253_v2, %v2586_v54  ;;  %v2591_v51 = vsel %vm2551_vm11, %v12250_v48, %v2590_v33  ;;  %v2850_v1 = vsel %vm2549_vm10, %v12251_v63, %v2849_v18 }
 0x232   :  { %v3009_v38 = vpack.c.bf16 %v2684_v56, %v2677_v49  ;;  %v2588_v32 = vsel %vm2559_vm15, %v12256_v8, %v2587_v11  ;;  %vm1191_vm9 = vcmp.gt.f32.partialorder %v9801_v39, 0.0  ;;  %v2592_v54 = vsel %vm2553_vm12, %v12252_v0, %v2591_v51 }
 0x233   :  { %v2851_v46 = vsel %vm2551_vm11, %v12253_v2, %v2850_v1  ;;  %v2856_v49 = vsel %vm2547_vm7, %v12252_v0, %v12250_v48  ;;  %v2760_v56 = vsel %vm2547_vm7, %v12245_v16, %v9263_v36  ;;  %vm1192_vm1 = vcmp.gt.f32.partialorder %v9804_v37, 0.0 }
 0x234   :  { %3403 = vmatprep.mubr.bf16.mxu1 %v3009_v38  ;;  %v2593_v11 = vsel %vm2555_vm13, %v12254_v34, %v2592_v54  ;;  %v2852_v33 = vsel %vm2553_vm12, %v12256_v8, %v2851_v46  ;;  %v2857_v18 = vsel %vm2549_vm10, %v12254_v34, %v2856_v49  ;;  %v2761_v51 = vsel %vm2549_vm10, %v12249_v13, %v2760_v56 }
 0x235   :  { %v2594_v1 = vsel %vm2557_vm14, %v12257_v29, %v2593_v11  ;;  %v2853_v19 = vsel %vm2555_vm13, %v12255_v3, %v2852_v33  ;;  %v2858_v38 = vsel %vm2551_vm11, %v12257_v29, %v2857_v18  ;;  %v2762_v54 = vsel %vm2551_vm11, %v12251_v63, %v2761_v51 }
 0x236   :  { %v7688_v16 = vpop.eup %7687  ;;  %v2595_v46 = vsel %vm2559_vm15, %v9796_v52, %v2594_v1  ;;  %v2854_v49 = vsel %vm2557_vm14, %v12246_v40, %v2853_v19  ;;  %v2859_v56 = vsel %vm2553_vm12, %v9796_v52, %v2858_v38  ;;  %v2763_v11 = vsel %vm2553_vm12, %v12253_v2, %v2762_v54 }
 0x237   :  { %v6613_v33 = vadd.f32 -1.0, %v7688_v16  ;;  %v3008_v36 = vpack.c.bf16 %v2595_v46, %v2588_v32  ;;  %v2855_v18 = vsel %vm2559_vm15, %v12247_v5, %v2854_v49  ;;  %v2860_v51 = vsel %vm2555_vm13, %v12258_v50, %v2859_v56  ;;  %v12261_v49 = vld [vmem:[#allocation73_spill] sm:$0xff] }
 0x238   :  { %v2861_v1 = vsel %vm2557_vm14, %v12259_v41, %v2860_v51  ;;  %v2764_v19 = vsel %vm2555_vm13, %v12256_v8, %v2763_v11  ;;  %v2767_v38 = vsel %vm2547_vm7, %v12250_v48, %v12247_v5  ;;  %v12260_v54 = vrot.slane %v9512_v44, 1  ;;  %v7690_v32 = vpop.eup %7689 }
 0x239   :  { %v1305_v46 = vsel %vm1190_vm8, %v9782_v23, %v6613_v33  ;;  %3404 = vmatmul.mubr.bf16.gmra.mrb[80].mxu1 %v3008_v36  ;;  %v2862_v56 = vsel %vm2559_vm15, %v12261_v49, %v2861_v1  ;;  %v2765_v11 = vsel %vm2557_vm14, %v12255_v3, %v2764_v19  ;;  %v2768_v51 = vsel %vm2549_vm10, %v12252_v0, %v2767_v38  ;;  %v7692_v48 = vpop.eup %7691 }
 0x23a   :  { %v9919_v16 = vmax.f32 %v9512_v44, %v12260_v54  ;;  %v1671_v5 = vcombine.high %v1305_v46, %v1305_v46  ;;  %v1678_v44 = vrot.slane %v1305_v46, %v8864_v26  ;;  %v6614_v54 = vadd.f32 -1.0, %v7690_v32 }
 0x23b   :  { %v3011_v8 = vpack.c.bf16 %v2862_v56, %v2855_v18  ;;  %v6615_v2 = vadd.f32 -1.0, %v7692_v48  ;;  %v9933_v23 = vsel %vm2559_vm15, %v12246_v40, %v2765_v11  ;;  %v9937_v36 = vsel %vm2551_vm11, %v12254_v34, %v2768_v51 }
 0x23c   :  { %v9942_v33 = vsel %vm2547_vm7, %v12261_v49, %v12259_v41  ;;  %v1685_v1 = vrot.slane %v1671_v5, %v8864_v26  ;;  %v1686_v19 = vcombine.high %v1678_v44, %v1678_v44  ;;  %v2375_v38 = vsel %vm1814_vm5, %v1678_v44, -inf }
 0x23d   :  { %v1306_v48 = vsel %vm1191_vm9, %v9801_v39, %v6614_v54  ;;  %3483 = vmatprep.mubr.bf16.mxu0 %v3011_v8  ;;  %v2376_v18 = vrot.slane %v2375_v38, 4  ;;  %v1307_v56 = vsel %vm1192_vm1, %v9804_v37, %v6615_v2 }
 0x23e   :  { %v1688_v32 = vcombine.high %v1306_v48, %v1306_v48  ;;  %v1695_v46 = vrot.slane %v1306_v48, %v8864_v26  ;;  %v1687_v11 = vcombine.high %v1685_v1, %v1685_v1  ;;  %v2382_v51 = vsel %vm1814_vm5, %v1686_v19, -inf }
 0x23f   :  { %v2389_v5 = vsel %vm1814_vm5, %v1685_v1, -inf  ;;  %v1705_v40 = vcombine.high %v1307_v56, %v1307_v56  ;;  %v2377_v44 = vmax.f32 %v2375_v38, %v2376_v18  ;;  %v2383_v3 = vrot.slane %v2382_v51, 4 }
 0x240   :  { %v2390_v34 = vrot.slane %v2389_v5, 4  ;;  %v1702_v39 = vrot.slane %v1688_v32, %v8864_v26  ;;  %v2396_v8 = vsel %vm1814_vm5, %v1687_v11, -inf  ;;  %v1703_v54 = vcombine.high %v1695_v46, %v1695_v46 }
 0x241   :  { %v2403_v48 = vsel %vm1814_vm5, %v1695_v46, -inf  ;;  %v1712_v0 = vrot.slane %v1307_v56, %v8864_v26  ;;  %v2378_v63 = vrot.slane %v2377_v44, 2  ;;  %v2384_v37 = vmax.f32 %v2382_v51, %v2383_v3 }
 0x242   :  { %v2391_v2 = vmax.f32 %v2389_v5, %v2390_v34  ;;  %v2397_v13 = vrot.slane %v2396_v8, 4  ;;  %v1704_v19 = vcombine.high %v1702_v39, %v1702_v39  ;;  %v2404_v7 = vrot.slane %v2403_v48, 4 }
 0x243   :  { %v2410_v1 = vsel %vm1814_vm5, %v1703_v54, -inf  ;;  %v2417_v38 = vsel %vm1814_vm5, %v1702_v39, -inf  ;;  %v2379_v18 = vmax.f32 %v2377_v44, %v2378_v63  ;;  %v2385_v6 = vrot.slane %v2384_v37, 2 }
 0x244   :  { %v2392_v32 = vrot.slane %v2391_v2, 2  ;;  %v2398_v43 = vmax.f32 %v2396_v8, %v2397_v13  ;;  %v2405_v11 = vmax.f32 %v2403_v48, %v2404_v7  ;;  %v2411_v14 = vrot.slane %v2410_v1, 4 }
 0x245   :  { %v2418_v57 = vrot.slane %v2417_v38, 4  ;;  %v2424_v46 = vsel %vm1814_vm5, %v1704_v19, -inf  ;;  %v2380_v56 = vrot.slane %v2379_v18, 1  ;;  %v2386_v47 = vmax.f32 %v2384_v37, %v2385_v6 }
 0x246   :  { %v2393_v3 = vmax.f32 %v2391_v2, %v2392_v32  ;;  %v2399_v34 = vrot.slane %v2398_v43, 2  ;;  %v2406_v51 = vrot.slane %v2405_v11, 2  ;;  %v2412_v5 = vmax.f32 %v2410_v1, %v2411_v14 }
 0x247   :  { %v2419_v15 = vmax.f32 %v2417_v38, %v2418_v57  ;;  %v2425_v31 = vrot.slane %v2424_v46, 4  ;;  %v9962_v54 = vmax.f32 %v2379_v18, %v2380_v56  ;;  %v2387_v39 = vrot.slane %v2386_v47, 1 }
 0x248   :  { %v2394_v63 = vrot.slane %v2393_v3, 1  ;;  %v2400_v44 = vmax.f32 %v2398_v43, %v2399_v34  ;;  %v2407_v55 = vmax.f32 %v2405_v11, %v2406_v51  ;;  %v2413_v13 = vrot.slane %v2412_v5, 2  ;;  %v12273_v43 = vld [vmem:[#allocation39_spill] sm:$0xff] }
 0x249   :  { %v2420_v7 = vrot.slane %v2419_v15, 2  ;;  %v2426_v8 = vmax.f32 %v2424_v46, %v2425_v31  ;;  %v9964_v48 = vmax.f32 %v2386_v47, %v2387_v39  ;;  %v9969_v37 = vrot.slane %v1705_v40, %v8864_v26  ;;  %v12274_v26 = vld [vmem:[#allocation40_spill] sm:$0xff] }
 0x24a   :  { %v9966_v19 = vmax.f32 %v2393_v3, %v2394_v63  ;;  %v2401_v6 = vrot.slane %v2400_v44, 1  ;;  %v2408_v14 = vrot.slane %v2407_v55, 1  ;;  %v2414_v57 = vmax.f32 %v2412_v5, %v2413_v13  ;;  %v12263_v3 = vld [vmem:[#allocation74_spill] sm:$0xff] }
 0x24b   :  { %12262 = vst [vmem:[#allocation41_spill] sm:$0xff] %v9964_v48  ;;  %v2421_v2 = vmax.f32 %v2419_v15, %v2420_v7  ;;  %v2427_v1 = vrot.slane %v2426_v8, 2  ;;  %v1720_v18 = vcombine.high %v1712_v0, %v1712_v0  ;;  %v2431_v31 = vsel %vm1814_vm5, %v1712_v0, -inf }
 0x24c   :  { %v9971_v38 = vmax.f32 %v2400_v44, %v2401_v6  ;;  %v9976_v47 = vmax.f32 %v2407_v55, %v2408_v14  ;;  %v2415_v32 = vrot.slane %v2414_v57, 1  ;;  %v2432_v56 = vrot.slane %v2431_v31, 4  ;;  %v12264_v44 = vld [vmem:[#allocation23_spill] sm:$0xff] }
 0x24d   :  { %v2422_v11 = vrot.slane %v2421_v2, 1  ;;  %v2428_v46 = vmax.f32 %v2426_v8, %v2427_v1  ;;  %v9979_v40 = vsel %vm1814_vm5, %v1720_v18, -inf  ;;  %v2770_v15 = vsel %vm2553_vm12, %v12257_v29, %v9937_v36  ;;  %v12265_v8 = vld [vmem:[#allocation26_spill] sm:$0xff] }
 0x24e   :  { %v2686_v34 = vsel %vm2549_vm10, %v12263_v3, %v9942_v33  ;;  %v9987_v51 = vmax.f32 %v2414_v57, %v2415_v32  ;;  %v2439_v5 = vrot.slane %v9979_v40, 4  ;;  %v9992_v39 = vmax.f32 %v2431_v31, %v2432_v56  ;;  %v12266_v1 = vld [vmem:[#allocation30_spill] sm:$0xff] }
 0x24f   :  { %v9989_v0 = vmax.f32 %v2421_v2, %v2422_v11  ;;  %v2429_v55 = vrot.slane %v2428_v46, 1  ;;  %v2771_v63 = vsel %vm2555_vm13, %v9796_v52, %v2770_v15  ;;  %v2687_v13 = vsel %vm2551_vm11, %v12264_v44, %v2686_v34 }
 0x250   :  { %v2692_v36 = vsel %vm2547_vm7, %v9498_v4, %v9495_v9  ;;  %v2772_v7 = vsel %vm2557_vm14, %v12258_v50, %v2771_v63  ;;  %v2688_v6 = vsel %vm2553_vm12, %v12265_v8, %v2687_v13  ;;  %v2434_v57 = vrot.slane %v9992_v39, 2 }
 0x251   :  { %v10001_v33 = vmax.f32 %v2428_v46, %v2429_v55  ;;  %v2693_v14 = vsel %vm2549_vm10, %v9501_v62, %v2692_v36  ;;  %v2773_v2 = vsel %vm2559_vm15, %v12259_v41, %v2772_v7  ;;  %v2689_v18 = vsel %vm2555_vm13, %v12266_v1, %v2688_v6 }
 0x252   :  { %v2694_v31 = vsel %vm2551_vm11, %v9556_v59, %v2693_v14  ;;  %v3010_v32 = vpack.c.bf16 %v2773_v2, %v9933_v23  ;;  %v2690_v11 = vsel %vm2557_vm14, %v9483_v20, %v2689_v18  ;;  %v2596_v56 = vsel %vm2547_vm7, %v12259_v41, %v12258_v50 }
 0x253   :  { %v2695_v46 = vsel %vm2553_vm12, %v9574_v12, %v2694_v31  ;;  %v2691_v15 = vsel %vm2559_vm15, %v9486_v17, %v2690_v11  ;;  %v2597_v55 = vsel %vm2549_vm10, %v12261_v49, %v2596_v56  ;;  %v2603_v23 = vsel %vm2547_vm7, %v9495_v9, %v9486_v17 }
 0x254   :  { %v2696_v34 = vsel %vm2555_vm13, %v9576_v60, %v2695_v46  ;;  %3484 = vmatmul.mubr.bf16.gmra.mrb[56].mxu0 %v3010_v32  ;;  %v2598_v13 = vsel %vm2551_vm11, %v12263_v3, %v2597_v55  ;;  %v2604_v36 = vsel %vm2549_vm10, %v9498_v4, %v2603_v23  ;;  %v2863_v7 = vsel %vm2547_vm7, %v12264_v44, %v12263_v3 }
 0x255   :  { %v2697_v63 = vsel %vm2557_vm14, %v9919_v16, %v2696_v34  ;;  %v2599_v14 = vsel %vm2553_vm12, %v12264_v44, %v2598_v13  ;;  %v2605_v2 = vsel %vm2551_vm11, %v9501_v62, %v2604_v36  ;;  %v2864_v18 = vsel %vm2549_vm10, %v12265_v8, %v2863_v7 }
 0x256   :  { %v2698_v6 = vsel %vm2559_vm15, %v9727_v28, %v2697_v63  ;;  %v2600_v32 = vsel %vm2555_vm13, %v12265_v8, %v2599_v14  ;;  %v2606_v11 = vsel %vm2553_vm12, %v9556_v59, %v2605_v2  ;;  %v2865_v46 = vsel %vm2551_vm11, %v12266_v1, %v2864_v18 }
 0x257   :  { %v3014_v31 = vpack.c.bf16 %v2698_v6, %v2691_v15  ;;  %v2601_v56 = vsel %vm2557_vm14, %v12266_v1, %v2600_v32  ;;  %v2607_v34 = vsel %vm2555_vm13, %v9574_v12, %v2606_v11  ;;  %v2866_v55 = vsel %vm2553_vm12, %v9483_v20, %v2865_v46 }
 0x258   :  { %v2870_v15 = vsel %vm2547_vm7, %v9556_v59, %v9501_v62  ;;  %v2602_v23 = vsel %vm2559_vm15, %v9483_v20, %v2601_v56  ;;  %v2608_v63 = vsel %vm2557_vm14, %v9576_v60, %v2607_v34  ;;  %v2867_v13 = vsel %vm2555_vm13, %v9486_v17, %v2866_v55 }
 0x259   :  { %3411 = vmatprep.mubr.bf16.mxu1 %v3014_v31  ;;  %v2871_v36 = vsel %vm2549_vm10, %v9574_v12, %v2870_v15  ;;  %v2609_v7 = vsel %vm2559_vm15, %v9919_v16, %v2608_v63  ;;  %v2868_v6 = vsel %vm2557_vm14, %v9495_v9, %v2867_v13  ;;  %v2774_v2 = vsel %vm2547_vm7, %v12263_v3, %v12261_v49 }
 0x25a   :  { %v2872_v14 = vsel %vm2551_vm11, %v9576_v60, %v2871_v36  ;;  %v3013_v18 = vpack.c.bf16 %v2609_v7, %v2602_v23  ;;  %v2869_v31 = vsel %vm2559_vm15, %v9498_v4, %v2868_v6  ;;  %v2775_v11 = vsel %vm2549_vm10, %v12264_v44, %v2774_v2 }
 0x25b   :  { %v2873_v32 = vsel %vm2553_vm12, %v9919_v16, %v2872_v14  ;;  %v2776_v56 = vsel %vm2551_vm11, %v12265_v8, %v2775_v11  ;;  %v2781_v34 = vsel %vm2547_vm7, %v9501_v62, %v9498_v4  ;;  %v12267_v55 = vrot.slane %v9784_v22, 1 }
 0x25c   :  { %v2874_v46 = vsel %vm2555_vm13, %v9727_v28, %v2873_v32  ;;  %3412 = vmatmul.mubr.bf16.gmra.mrb[84].mxu1 %v3013_v18  ;;  %v2777_v63 = vsel %vm2553_vm12, %v12266_v1, %v2776_v56  ;;  %v2782_v13 = vsel %vm2549_vm10, %v9556_v59, %v2781_v34  ;;  %v2699_v36 = vsel %vm2547_vm7, %v9740_v45, %v9735_v27 }
 0x25d   :  { %v10098_v15 = vmax.f32 %v9784_v22, %v12267_v55  ;;  %v2875_v23 = vsel %vm2557_vm14, %v9735_v27, %v2874_v46  ;;  %v2778_v22 = vsel %vm2555_vm13, %v9483_v20, %v2777_v63  ;;  %v2783_v6 = vsel %vm2551_vm11, %v9574_v12, %v2782_v13 }
 0x25e   :  { %v2876_v7 = vsel %vm2559_vm15, %v9740_v45, %v2875_v23  ;;  %v2700_v14 = vsel %vm2549_vm10, %v9746_v53, %v2699_v36  ;;  %v2779_v18 = vsel %vm2557_vm14, %v9486_v17, %v2778_v22  ;;  %v2784_v32 = vsel %vm2553_vm12, %v9576_v60, %v2783_v6 }
 0x25f   :  { %v3016_v2 = vpack.c.bf16 %v2876_v7, %v2869_v31  ;;  %v2701_v11 = vsel %vm2551_vm11, %v9737_v61, %v2700_v14  ;;  %v2780_v46 = vsel %vm2559_vm15, %v9495_v9, %v2779_v18  ;;  %v2785_v56 = vsel %vm2555_vm13, %v9919_v16, %v2784_v32  ;;  %v12268_v18 = vld [vmem:[#allocation10_spill] sm:$0xff] }
 0x260   :  { %v2702_v34 = vsel %vm2553_vm12, %v9750_v25, %v2701_v11  ;;  %v2706_v31 = vsel %vm2547_vm7, %v9779_v24, %v9777_v10  ;;  %v2786_v55 = vsel %vm2557_vm14, %v9727_v28, %v2785_v56  ;;  %v2610_v13 = vsel %vm2547_vm7, %v9735_v27, %v9727_v28  ;;  %v12269_v56 = vld [vmem:[#allocation11_spill] sm:$0xff] }
 0x261   :  { %3491 = vmatprep.mubr.bf16.mxu0 %v3016_v2  ;;  %v2703_v23 = vsel %vm2555_vm13, %v9761_v58, %v2702_v34  ;;  %v2707_v63 = vsel %vm2549_vm10, %v9788_v35, %v2706_v31  ;;  %v2787_v36 = vsel %vm2559_vm15, %v9735_v27, %v2786_v55  ;;  %v2611_v6 = vsel %vm2549_vm10, %v9740_v45, %v2610_v13 }
 0x262   :  { %v2704_v7 = vsel %vm2557_vm14, %v9765_v21, %v2703_v23  ;;  %v2708_v22 = vsel %vm2551_vm11, %v9790_v30, %v2707_v63  ;;  %v3015_v14 = vpack.c.bf16 %v2787_v36, %v2780_v46  ;;  %v2612_v11 = vsel %vm2551_vm11, %v9746_v53, %v2611_v6 }
 0x263   :  { %v2705_v2 = vsel %vm2559_vm15, %v9767_v42, %v2704_v7  ;;  %v2709_v32 = vsel %vm2553_vm12, %v12268_v18, %v2708_v22  ;;  %v2613_v31 = vsel %vm2553_vm12, %v9737_v61, %v2612_v11  ;;  %v2617_v55 = vsel %vm2547_vm7, %v9777_v10, %v9767_v42 }
 0x264   :  { %v2710_v34 = vsel %vm2555_vm13, %v12269_v56, %v2709_v32  ;;  %v2877_v46 = vsel %vm2547_vm7, %v9737_v61, %v9746_v53  ;;  %3492 = vmatmul.mubr.bf16.gmra.mrb[60].mxu0 %v3015_v14  ;;  %v2614_v63 = vsel %vm2555_vm13, %v9750_v25, %v2613_v31  ;;  %v2618_v13 = vsel %vm2549_vm10, %v9779_v24, %v2617_v55 }
 0x265   :  { %v2711_v23 = vsel %vm2557_vm14, %v10098_v15, %v2710_v34  ;;  %v2878_v36 = vsel %vm2549_vm10, %v9750_v25, %v2877_v46  ;;  %v2615_v22 = vsel %vm2557_vm14, %v9761_v58, %v2614_v63  ;;  %v2619_v6 = vsel %vm2551_vm11, %v9788_v35, %v2618_v13 }
 0x266   :  { %v2712_v7 = vsel %vm2559_vm15, %v9962_v54, %v2711_v23  ;;  %v2879_v14 = vsel %vm2551_vm11, %v9761_v58, %v2878_v36  ;;  %v2616_v11 = vsel %vm2559_vm15, %v9765_v21, %v2615_v22  ;;  %v2620_v34 = vsel %vm2553_vm12, %v9790_v30, %v2619_v6 }
 0x267   :  { %v3019_v32 = vpack.c.bf16 %v2712_v7, %v2705_v2  ;;  %v2880_v31 = vsel %vm2553_vm12, %v9765_v21, %v2879_v14  ;;  %v2621_v55 = vsel %vm2555_vm13, %v12268_v18, %v2620_v34  ;;  %v2884_v23 = vsel %vm2547_vm7, %v9790_v30, %v9788_v35 }
 0x268   :  { %v2881_v46 = vsel %vm2555_vm13, %v9767_v42, %v2880_v31  ;;  %v2788_v2 = vsel %vm2547_vm7, %v9746_v53, %v9740_v45  ;;  %v2622_v63 = vsel %vm2557_vm14, %v12269_v56, %v2621_v55  ;;  %v2885_v36 = vsel %vm2549_vm10, %v12268_v18, %v2884_v23 }
 0x269   :  { %3419 = vmatprep.mubr.bf16.mxu1 %v3019_v32  ;;  %v2882_v13 = vsel %vm2557_vm14, %v9777_v10, %v2881_v46  ;;  %v2789_v7 = vsel %vm2549_vm10, %v9737_v61, %v2788_v2  ;;  %v2623_v22 = vsel %vm2559_vm15, %v10098_v15, %v2622_v63  ;;  %v2886_v14 = vsel %vm2551_vm11, %v12269_v56, %v2885_v36 }
 0x26a   :  { %v2883_v6 = vsel %vm2559_vm15, %v9779_v24, %v2882_v13  ;;  %v2790_v32 = vsel %vm2551_vm11, %v9750_v25, %v2789_v7  ;;  %v3018_v34 = vpack.c.bf16 %v2623_v22, %v2616_v11  ;;  %v2887_v31 = vsel %vm2553_vm12, %v10098_v15, %v2886_v14 }
 0x26b   :  { %v2791_v55 = vsel %vm2553_vm12, %v9761_v58, %v2790_v32  ;;  %v2795_v46 = vsel %vm2547_vm7, %v9788_v35, %v9779_v24  ;;  %v2888_v23 = vsel %vm2555_vm13, %v9962_v54, %v2887_v31  ;;  %v2435_v11 = vmax.f32 %v9992_v39, %v2434_v57 }
 0x26c   :  { %v2792_v2 = vsel %vm2555_vm13, %v9765_v21, %v2791_v55  ;;  %v2796_v63 = vsel %vm2549_vm10, %v9790_v30, %v2795_v46  ;;  %3420 = vmatmul.mubr.bf16.gmra.mrb[88].mxu1 %v3018_v34  ;;  %v2889_v13 = vsel %vm2557_vm14, %v9964_v48, %v2888_v23  ;;  %v2713_v22 = vsel %vm2547_vm7, %v9966_v19, %v9964_v48 }
 0x26d   :  { %v2793_v36 = vsel %vm2557_vm14, %v9767_v42, %v2792_v2  ;;  %v2797_v7 = vsel %vm2551_vm11, %v12268_v18, %v2796_v63  ;;  %v2890_v14 = vsel %vm2559_vm15, %v9966_v19, %v2889_v13  ;;  %v2436_v32 = vrot.slane %v2435_v11, 1 }
 0x26e   :  { %v2794_v39 = vsel %vm2559_vm15, %v9777_v10, %v2793_v36  ;;  %v2798_v57 = vsel %vm2553_vm12, %v12269_v56, %v2797_v7  ;;  %v3021_v34 = vpack.c.bf16 %v2890_v14, %v2883_v6  ;;  %v2714_v55 = vsel %vm2549_vm10, %v9971_v38, %v2713_v22 }
 0x26f   :  { %v2799_v31 = vsel %vm2555_vm13, %v10098_v15, %v2798_v57  ;;  %v2624_v46 = vsel %vm2547_vm7, %v9964_v48, %v9962_v54  ;;  %v10253_v2 = vmax.f32 %v2435_v11, %v2436_v32  ;;  %v2715_v63 = vsel %vm2551_vm11, %v9976_v47, %v2714_v55 }
 0x270   :  { %v2800_v23 = vsel %vm2557_vm14, %v9962_v54, %v2799_v31  ;;  %v2625_v6 = vsel %vm2549_vm10, %v9966_v19, %v2624_v46  ;;  %3499 = vmatprep.mubr.bf16.mxu0 %v3021_v34  ;;  %v2716_v36 = vsel %vm2553_vm12, %v9987_v51, %v2715_v63  ;;  %v2440_v11 = vmax.f32 %v9979_v40, %v2439_v5  ;;  %v12271_v63 = vld [vmem:[#allocation32_spill] sm:$0xff] }
 0x271   :  { %v2801_v13 = vsel %vm2559_vm15, %v9964_v48, %v2800_v23  ;;  %v2626_v7 = vsel %vm2551_vm11, %v9971_v38, %v2625_v6  ;;  %v2717_v14 = vsel %vm2555_vm13, %v9989_v0, %v2716_v36  ;;  %v2445_v32 = vsel %vm1814_vm5, %v9969_v37, -inf  ;;  %v12270_v23 = vld [vmem:[#allocation28_spill] sm:$0xff] }
 0x272   :  { %v3020_v22 = vpack.c.bf16 %v2801_v13, %v2794_v39  ;;  %v2627_v57 = vsel %vm2553_vm12, %v9976_v47, %v2626_v7  ;;  %v2718_v34 = vsel %vm2557_vm14, %v10001_v33, %v2717_v14  ;;  %v2441_v55 = vrot.slane %v2440_v11, 2 }
 0x273   :  { %v2628_v31 = vsel %vm2555_vm13, %v9987_v51, %v2627_v57  ;;  %v2446_v46 = vrot.slane %v2445_v32, 4  ;;  %v2719_v40 = vsel %vm2559_vm15, %v10253_v2, %v2718_v34  ;;  %v2891_v39 = vsel %vm2547_vm7, %v9976_v47, %v9971_v38  ;;  %v12272_v34 = vld [vmem:[#allocation29_spill] sm:$0xff] }
 0x274   :  { %3500 = vmatmul.mubr.bf16.gmra.mrb[64].mxu0 %v3020_v22  ;;  %v2629_v5 = vsel %vm2557_vm14, %v9989_v0, %v2628_v31  ;;  %v2910_v6 = vsel %vm2547_vm7, %v12271_v63, %v12270_v23  ;;  %v3024_v13 = vpack.c.bf16 %v2719_v40, %v2719_v40  ;;  %v2442_v7 = vmax.f32 %v2440_v11, %v2441_v55  ;;  %v12276_v55 = vld [vmem:[#allocation34_spill] sm:$0xff] }
 0x275   :  { %v2630_v36 = vsel %vm2559_vm15, %v10001_v33, %v2629_v5  ;;  %v2447_v22 = vmax.f32 %v2445_v32, %v2446_v46  ;;  %v2892_v57 = vsel %vm2549_vm10, %v9987_v51, %v2891_v39  ;;  %v2911_v31 = vsel %vm2549_vm10, %v12272_v34, %v2910_v6  ;;  %v12275_v5 = vld [vmem:[#allocation33_spill] sm:$0xff]  ;;  %v12277_v39 = vld [vmem:[#allocation42_spill] sm:$0xff] }
 0x276   :  { %v3023_v14 = vpack.c.bf16 %v2630_v36, %v2630_v36  ;;  %v2917_v35 = vsel %vm2547_vm7, %v12274_v26, %v12273_v43  ;;  %3427 = vmatprep.mubr.bf16.mxu1 %v3024_v13  ;;  %v2443_v48 = vrot.slane %v2442_v7, 1  ;;  %v2893_v40 = vsel %vm2551_vm11, %v9989_v0, %v2892_v57  ;;  %v12278_v36 = vld [vmem:[#allocation36_spill] sm:$0xff]  ;;  %v12279_v57 = vld [vmem:[#allocation35_spill] sm:$0xff] }
 0x277   :  { %v2448_v23 = vrot.slane %v2447_v22, 2  ;;  %v2912_v11 = vsel %vm2551_vm11, %v12275_v5, %v2911_v31  ;;  %v2894_v32 = vsel %vm2553_vm12, %v10001_v33, %v2893_v40  ;;  %v2918_v63 = vsel %vm2549_vm10, %v12277_v39, %v2917_v35  ;;  %v12280_v31 = vld [vmem:[#allocation22_spill] sm:$0xff]  ;;  %v12285_v39 = vld [vmem:[#allocation25_spill] sm:$0xff] }
 0x278   :  { %3428 = vmatmul.mubr.bf16.gmra.mrb[92].mxu1 %v3023_v14  ;;  %v2913_v46 = vsel %vm2553_vm12, %v12276_v55, %v2912_v11  ;;  %v2802_v26 = vsel %vm2547_vm7, %v9971_v38, %v9966_v19  ;;  %v10310_v43 = vmax.f32 %v2442_v7, %v2443_v48  ;;  %v2895_v13 = vsel %vm2555_vm13, %v10253_v2, %v2894_v32  ;;  %v12281_v5 = vld [vmem:[#allocation6_spill] sm:$0xff]  ;;  %v12282_v11 = vld [vmem:[#allocation19_spill] sm:$0xff] }
 0x279   :  { %v2449_v6 = vmax.f32 %v2447_v22, %v2448_v23  ;;  %v2914_v14 = vsel %vm2555_vm13, %v12278_v36, %v2913_v46  ;;  %v2919_v40 = vsel %vm2551_vm11, %v12280_v31, %v2918_v63  ;;  %v2803_v35 = vsel %vm2549_vm10, %v9976_v47, %v2802_v26  ;;  %v12283_v23 = vld [vmem:[#allocation37_spill] sm:$0xff]  ;;  %v12284_v55 = vld [vmem:[#allocation43_spill] sm:$0xff]  ;;  %v12288_v31 = vld [vmem:[#allocation50_spill] sm:$0xff] }
 0x27a   :  { %v2915_v34 = vsel %vm2557_vm14, %v12279_v57, %v2914_v14  ;;  %v2925_v48 = vsel %vm2549_vm10, %v12282_v11, %v12281_v5  ;;  %v2896_v22 = vsel %vm2557_vm14, %v10310_v43, %v2895_v13  ;;  %v2920_v46 = vsel %vm2553_vm12, %v12284_v55, %v2919_v40  ;;  %v12286_v36 = vld [vmem:[#allocation27_spill] sm:$0xff]  ;;  %v12287_v57 = vld [vmem:[#allocation49_spill] sm:$0xff]  ;;  %v12289_v11 = vld [vmem:[#allocation44_spill] sm:$0xff] }
 0x27b   :  { %v2450_v7 = vrot.slane %v2449_v6, 1  ;;  %v2916_v32 = vsel %vm2559_vm15, %v12283_v23, %v2915_v34  ;;  %v2921_v63 = vsel %vm2555_vm13, %v12285_v39, %v2920_v46  ;;  %v2804_v26 = vsel %vm2551_vm11, %v9987_v51, %v2803_v35  ;;  %v12290_v23 = vld [vmem:[#allocation7_spill] sm:$0xff]  ;;  %v12291_v46 = vld [vmem:[#allocation5_spill] sm:$0xff]  ;;  %v12292_v39 = vld [vmem:[#allocation8_spill] sm:$0xff] }
 0x27c   :  { %v2926_v14 = vsel %vm2551_vm11, %v12286_v36, %v2925_v48  ;;  %v2931_v5 = vsel %vm2547_vm7, %v12288_v31, %v12287_v57  ;;  %v2922_v34 = vsel %vm2557_vm14, %v12289_v11, %v2921_v63  ;;  %v2805_v40 = vsel %vm2553_vm12, %v9989_v0, %v2804_v26 }
 0x27d   :  { %v10340_v13 = vmax.f32 %v2449_v6, %v2450_v7  ;;  %v2927_v55 = vsel %vm2553_vm12, %v12290_v23, %v2926_v14  ;;  %v2923_v35 = vsel %vm2559_vm15, %v12291_v46, %v2922_v34  ;;  %v2806_v48 = vsel %vm2555_vm13, %v10001_v33, %v2805_v40  ;;  %v12293_v6 = vld [vmem:[#allocation51_spill] sm:$0xff]  ;;  %v12294_v14 = vld [vmem:[#allocation18_spill] sm:$0xff]  ;;  %v12295_v40 = vld [vmem:[#allocation48_spill] sm:$0xff] }
 0x27e   :  { %v2928_v36 = vsel %vm2555_vm13, %v12292_v39, %v2927_v55  ;;  %v2932_v7 = vsel %vm2549_vm10, %v12293_v6, %v2931_v5  ;;  %v3002_v57 = vpack.c.bf16 %v2923_v35, %v2916_v32  ;;  %v2807_v26 = vsel %vm2557_vm14, %v10253_v2, %v2806_v48  ;;  %v12296_v55 = vld [vmem:[#allocation31_spill] sm:$0xff]  ;;  %v12298_v35 = vld [vmem:[#allocation61_spill] sm:$0xff]  ;;  %v12299_v48 = vld [vmem:[#allocation62_spill] sm:$0xff] }
 0x27f   :  { %v2897_v63 = vsel %vm2559_vm15, %v10340_v13, %v2896_v22  ;;  %v2929_v31 = vsel %vm2557_vm14, %v12294_v14, %v2928_v36  ;;  %v2808_v34 = vsel %vm2559_vm15, %v10310_v43, %v2807_v26  ;;  %v2933_v5 = vsel %vm2551_vm11, %v12296_v55, %v2932_v7  ;;  %v12297_v22 = vld [vmem:[#allocation52_spill] sm:$0xff]  ;;  %v12301_v6 = vld [vmem:[#allocation69_spill] sm:$0xff]  ;;  %v12302_v26 = vld [vmem:[#allocation58_spill] sm:$0xff] }
 0x280   :  { %v3026_v11 = vpack.c.bf16 %v2897_v63, %v2897_v63  ;;  %v2930_v23 = vsel %vm2559_vm15, %v12295_v40, %v2929_v31  ;;  %7290 = vmatprep.mubr.bf16.mxu1 %v3002_v57  ;;  %v3025_v46 = vpack.c.bf16 %v2808_v34, %v2808_v34  ;;  %v2934_v32 = vsel %vm2553_vm12, %v12297_v22, %v2933_v5  ;;  %v12300_v36 = vld [vmem:[#allocation20_spill] sm:$0xff]  ;;  %v12303_v31 = vld [vmem:[#allocation63_spill] sm:$0xff] }
 0x281   :  { %v2938_v39 = vsel %vm2547_vm7, %v12299_v48, %v12298_v35  ;;  %v2945_v63 = vsel %vm2547_vm7, %v12301_v6, %v12300_v36  ;;  %v2935_v14 = vsel %vm2555_vm13, %v12302_v26, %v2934_v32  ;;  %v2952_v34 = vsel %vm2547_vm7, %v12265_v8, %v12264_v44  ;;  %v12304_v40 = vld [vmem:[#allocation59_spill] sm:$0xff]  ;;  %v12305_v5 = vld [vmem:[#allocation64_spill] sm:$0xff]  ;;  %v12307_v48 = vld [vmem:[#allocation65_spill] sm:$0xff] }
 0x282   :  { %3507 = vmatprep.mubr.bf16.mxu0 %v3026_v11  ;;  %v2939_v7 = vsel %vm2549_vm10, %v12303_v31, %v2938_v39  ;;  %v2946_v57 = vsel %vm2549_vm10, %v12257_v29, %v2945_v63  ;;  %v2936_v55 = vsel %vm2557_vm14, %v12304_v40, %v2935_v14  ;;  %v2953_v32 = vsel %vm2549_vm10, %v12266_v1, %v2952_v34  ;;  %v12306_v35 = vld [vmem:[#allocation60_spill] sm:$0xff]  ;;  %v12308_v36 = vld [vmem:[#allocation66_spill] sm:$0xff]  ;;  %v12309_v63 = vld [vmem:[#allocation67_spill] sm:$0xff] }
 0x283   :  { %3508 = vmatmul.mubr.bf16.gmra.mrb[68].mxu0 %v3025_v46  ;;  %v2940_v11 = vsel %vm2551_vm11, %v12305_v5, %v2939_v7  ;;  %v2947_v22 = vsel %vm2551_vm11, %v9796_v52, %v2946_v57  ;;  %v2937_v29 = vsel %vm2559_vm15, %v12306_v35, %v2936_v55  ;;  %v2954_v8 = vsel %vm2551_vm11, %v9483_v20, %v2953_v32  ;;  %v12312_v40 = vld [vmem:[#allocation41_spill] sm:$0xff] }
 0x284   :  { %v2941_v39 = vsel %vm2553_vm12, %v12307_v48, %v2940_v11  ;;  %v2948_v44 = vsel %vm2553_vm12, %v12258_v50, %v2947_v22  ;;  %v3007_v46 = vpack.c.bf16 %v2937_v29, %v2930_v23  ;;  %v2955_v1 = vsel %vm2553_vm12, %v9486_v17, %v2954_v8  ;;  %v12310_v23 = vld [vmem:[#allocation68_spill] sm:$0xff] }
 0x285   :  { %v2942_v6 = vsel %vm2555_vm13, %v12308_v36, %v2941_v39  ;;  %v2949_v52 = vsel %vm2555_vm13, %v12259_v41, %v2948_v44  ;;  %v2956_v50 = vsel %vm2555_vm13, %v9495_v9, %v2955_v1  ;;  %v2959_v20 = vsel %vm2547_vm7, %v9574_v12, %v9556_v59 }
 0x286   :  { %v2943_v26 = vsel %vm2557_vm14, %v12309_v63, %v2942_v6  ;;  %v2950_v14 = vsel %vm2557_vm14, %v12261_v49, %v2949_v52  ;;  %7291 = vmatmul.mubr.bf16.vlgmr.msra.gmra.mrb[96].mxu1 %v3007_v46  ;;  %v2957_v31 = vsel %vm2557_vm14, %v9498_v4, %v2956_v50  ;;  %v2960_v49 = vsel %vm2549_vm10, %v9576_v60, %v2959_v20  ;;  %v10487_v20 = vld [vmem:[%s11935_s4] ss:$0 sm:$0xff] }
 0x287   :  { %v2944_v41 = vsel %vm2559_vm15, %v12310_v23, %v2943_v26  ;;  %v2951_v17 = vsel %vm2559_vm15, %v12263_v3, %v2950_v14  ;;  %v2958_v9 = vsel %vm2559_vm15, %v9501_v62, %v2957_v31  ;;  %v2961_v59 = vsel %vm2551_vm11, %v9919_v16, %v2960_v49 }
 0x288   :  { %v3012_v7 = vpack.c.bf16 %v2951_v17, %v2944_v41  ;;  %v2966_v12 = vsel %vm2547_vm7, %v9750_v25, %v9737_v61  ;;  %v2962_v3 = vsel %vm2553_vm12, %v9727_v28, %v2961_v59  ;;  %v2973_v60 = vsel %vm2547_vm7, %v12268_v18, %v9790_v30 }
 0x289   :  { %v2967_v4 = vsel %vm2549_vm10, %v9761_v58, %v2966_v12  ;;  %v12311_v62 = vcombine.high %v9969_v37, %v9969_v37  ;;  %v2963_v16 = vsel %vm2555_vm13, %v9735_v27, %v2962_v3  ;;  %v2974_v28 = vsel %vm2549_vm10, %v12269_v56, %v2973_v60 }
 0x28a   :  { %7294 = vmatprep.mubr.bf16.mxu1 %v3012_v7  ;;  %v2968_v61 = vsel %vm2551_vm11, %v9765_v21, %v2967_v4  ;;  %v2964_v58 = vsel %vm2557_vm14, %v9740_v45, %v2963_v16  ;;  %v2975_v37 = vsel %vm2551_vm11, %v10098_v15, %v2974_v28  ;;  %v2980_v27 = vsel %vm2547_vm7, %v9987_v51, %v9976_v47  ;;  %v12313_v51 = vld [vmem:[#allocation9_spill] sm:$0xff] }
 0x28b   :  { %v2452_v57 = vsel %vm1814_vm5, %v12311_v62, -inf  ;;  %v2969_v30 = vsel %vm2553_vm12, %v9767_v42, %v2968_v61  ;;  %v2965_v21 = vsel %vm2559_vm15, %v9746_v53, %v2964_v58  ;;  %v2976_v56 = vsel %vm2553_vm12, %v9962_v54, %v2975_v37 }
 0x28c   :  { %v2453_v25 = vrot.slane %v2452_v57, 4  ;;  %v2970_v18 = vsel %vm2555_vm13, %v9777_v10, %v2969_v30  ;;  %v3017_v34 = vpack.c.bf16 %v2965_v21, %v2958_v9  ;;  %v2977_v15 = vsel %vm2555_vm13, %v12312_v40, %v2976_v56 }
 0x28d   :  { %v2971_v42 = vsel %vm2557_vm14, %v9779_v24, %v2970_v18  ;;  %v2981_v47 = vsel %vm2549_vm10, %v9989_v0, %v2980_v27  ;;  %v2978_v10 = vsel %vm2557_vm14, %v9966_v19, %v2977_v15 }
 0x28e   :  { %v2454_v45 = vmax.f32 %v2452_v57, %v2453_v25  ;;  %v2972_v53 = vsel %vm2559_vm15, %v12313_v51, %v2971_v42  ;;  %v2982_v54 = vsel %vm2551_vm11, %v10001_v33, %v2981_v47  ;;  %7295 = vmatmul.mubr.bf16.gmra.mrb[100].mxu1 %v3017_v34  ;;  %v2979_v24 = vsel %vm2559_vm15, %v9971_v38, %v2978_v10 }
 0x28f   :  { %v2983_v5 = vsel %vm2553_vm12, %v10253_v2, %v2982_v54  ;;  %v3022_v11 = vpack.c.bf16 %v2979_v24, %v2972_v53 }
 0x290   :  { %v2455_v55 = vrot.slane %v2454_v45, 2  ;;  %v2984_v0 = vsel %vm2555_vm13, %v10310_v43, %v2983_v5 }
 0x291   :  { %v2985_v32 = vsel %vm2557_vm14, %v10340_v13, %v2984_v0  ;;  %7298 = vmatprep.mubr.bf16.mxu1 %v3022_v11 }
 0x292   :  { %v2456_v22 = vmax.f32 %v2454_v45, %v2455_v55 }
 0x294   :  { %v2457_v19 = vrot.slane %v2456_v22, 1 }
 0x296   :  { %v2458_v35 = vmax.f32 %v2456_v22, %v2457_v19  ;;  %v7460_v22 = vld [vmem:[%s11936_s5 + $0x40] sm:$0xff]  }
 0x297   :  { %7131 = vmatprep.subr.bf16.mxu1 %v7460_v22  ;;  %v7488_v22 = vld [vmem:[%s11936_s5 + $0xb0] sm:$0xff]  }
 0x298   :  { %v2986_v33 = vsel %vm2559_vm15, %v2458_v35, %v2985_v32  ;;  %v7461_v32 = vld [vmem:[%s11936_s5] sm:$0xff]  }
 0x299   :  { %v3027_v29 = vpack.c.bf16 %v2986_v33, %v2986_v33  ;;  %7132 = vmatpush3.bf16.msra.mxu1 %v7461_v32 }
 0x29b   :  { %7299 = vmatmul.mubr.bf16.gmra.mrb[104].mxu1 %v3027_v29 }
 0x2b5   :  { %v7029_v48 = vpop.f32.mrb[72].mxu1 }
 0x2b6   :  { %v7030_v38 = vpop.f32.mrb[73].mxu1 }
 0x2b7   :  { %v7031_v39 = vadd.f32 %v7030_v38, %v7029_v48  ;;  %v7032_v44 = vpop.f32.mrb[74].mxu1  ;;  %v7462_v48 = vld [vmem:[%s11936_s5 + $0xc0] sm:$0xff]  }
 0x2b8   :  { %v7033_v2 = vpop.f32.mrb[75].mxu1  ;;  %7165 = vmatprep.subr.bf16.mxu0 %v7462_v48 }
 0x2b9   :  { %v7034_v8 = vadd.f32 %v7033_v2, %v7032_v44  ;;  %v3390_v41 = vadd.f32 %v7031_v39, %v10487_v20  ;;  %v7463_v44 = vld [vmem:[%s11936_s5 + $0x48] sm:$0xff]   ;;  %v7464_v2 = vld [vmem:[%s11936_s5 + $0x80] sm:$0xff]  }
 0x2ba   :  { %7133 = vmatprep.subr.bf16.mxu1 %v7463_v44  ;;  %7166 = vmatpush3.bf16.msra.mxu0 %v7464_v2 }
 0x2bb   :  { %v3393_v17 = vadd.f32 %v7034_v8, %v10487_v20  ;;  %v7465_v8 = vld [vmem:[%s11936_s5 + $0x8] sm:$0xff]  }
 0x2bc   :  { %7134 = vmatpush3.bf16.msra.mxu1 %v7465_v8 }
 0x2c3   :  { %v7081_v46 = vpop.f32.mrb[48].mxu0 }
 0x2c4   :  { %v7082_v36 = vpop.f32.mrb[49].mxu0 }
 0x2c5   :  { %v7083_v6 = vadd.f32 %v7082_v36, %v7081_v46  ;;  %v7084_v43 = vpop.f32.mrb[50].mxu0  ;;  %v7466_v36 = vld [vmem:[%s11936_s5 + $0xc8] sm:$0xff]  }
 0x2c6   :  { %v7085_v52 = vpop.f32.mrb[51].mxu0  ;;  %7167 = vmatprep.subr.bf16.mxu0 %v7466_v36 }
 0x2c7   :  { %v7086_v1 = vadd.f32 %v7085_v52, %v7084_v43  ;;  %v10491_v31 = vadd.f32 %v7083_v6, %v3390_v41  ;;  %v7467_v43 = vld [vmem:[%s11936_s5 + $0x50] sm:$0xff]   ;;  %v7468_v52 = vld [vmem:[%s11936_s5 + $0x88] sm:$0xff]   ;;  %v7471_v41 = vld [vmem:[%s11936_s5 + $0x58] sm:$0xff]  }
 0x2c8   :  { %7135 = vmatprep.subr.bf16.mxu1 %v7467_v43  ;;  %7168 = vmatpush3.bf16.msra.mxu0 %v7468_v52 }
 0x2c9   :  { %v10493_v49 = vadd.f32 %v7086_v1, %v3393_v17  ;;  %v7472_v17 = vld [vmem:[%s11936_s5 + $0x90] sm:$0xff]  }
 0x2d2   :  { %v7035_v13 = vpop.f32.mrb[76].mxu1 }
 0x2d3   :  { %v7036_v63 = vpop.f32.mrb[77].mxu1 }
 0x2d4   :  { %v7037_v26 = vadd.f32 %v7036_v63, %v7035_v13  ;;  %v7038_v14 = vpop.f32.mrb[78].mxu1  ;;  %v7469_v13 = vld [vmem:[%s11936_s5 + $0x10] sm:$0xff]  }
 0x2d5   :  { %v7039_v50 = vpop.f32.mrb[79].mxu1  ;;  %7136 = vmatpush3.bf16.msra.mxu1 %v7469_v13 }
 0x2d6   :  { %v7040_v23 = vadd.f32 %v7039_v50, %v7038_v14  ;;  %v3398_v7 = vadd.f32 %v7037_v26, %v10487_v20  ;;  %v7470_v50 = vld [vmem:[%s11936_s5 + $0xd0] sm:$0xff]   ;;  %7137 = vmatprep.subr.bf16.mxu1 %v7471_v41 }
 0x2d7   :  { %7169 = vmatprep.subr.bf16.mxu0 %v7470_v50 }
 0x2d8   :  { %v3401_v12 = vadd.f32 %v7040_v23, %v10487_v20  ;;  %7170 = vmatpush3.bf16.msra.mxu0 %v7472_v17 }
 0x2f8   :  { %v7087_v9 = vpop.f32.mrb[52].mxu0 }
 0x2f9   :  { %v7088_v59 = vpop.f32.mrb[53].mxu0 }
 0x2fa   :  { %v7089_v3 = vadd.f32 %v7088_v59, %v7087_v9  ;;  %v7090_v4 = vpop.f32.mrb[54].mxu0 }
 0x2fb   :  { %v7091_v60 = vpop.f32.mrb[55].mxu0 }
 0x2fc   :  { %v7092_v62 = vadd.f32 %v7091_v60, %v7090_v4  ;;  %v10497_v57 = vadd.f32 %v7089_v3, %v3398_v7  ;;  %v7473_v7 = vld [vmem:[%s11936_s5 + $0x18] sm:$0xff]   ;;  %v7475_v4 = vld [vmem:[%s11936_s5 + $0x60] sm:$0xff]  }
 0x2fd   :  { %7138 = vmatpush3.bf16.msra.mxu1 %v7473_v7  ;;  %v7476_v60 = vld [vmem:[%s11936_s5 + $0x98] sm:$0xff]  }
 0x2fe   :  { %v10499_v16 = vadd.f32 %v7092_v62, %v3401_v12  ;;  %v7474_v12 = vld [vmem:[%s11936_s5 + $0xd8] sm:$0xff]   ;;  %7139 = vmatprep.subr.bf16.mxu1 %v7475_v4 }
 0x2ff   :  { %7171 = vmatprep.subr.bf16.mxu0 %v7474_v12 }
 0x300   :  { %7172 = vmatpush3.bf16.msra.mxu0 %v7476_v60 }
 0x30c   :  { %v7041_v61 = vpop.f32.mrb[80].mxu1 }
 0x30d   :  { %v7042_v28 = vpop.f32.mrb[81].mxu1 }
 0x30e   :  { %v7043_v25 = vadd.f32 %v7042_v28, %v7041_v61  ;;  %v7044_v58 = vpop.f32.mrb[82].mxu1 }
 0x30f   :  { %v7045_v30 = vpop.f32.mrb[83].mxu1 }
 0x310   :  { %v7046_v37 = vadd.f32 %v7045_v30, %v7044_v58  ;;  %v3406_v27 = vadd.f32 %v7043_v25, %v10487_v20  ;;  %v7477_v25 = vld [vmem:[%s11936_s5 + $0x20] sm:$0xff]  }
 0x311   :  { %7140 = vmatpush3.bf16.msra.mxu1 %v7477_v25 }
 0x312   :  { %v3409_v56 = vadd.f32 %v7046_v37, %v10487_v20 }
 0x327   :  { %v7093_v21 = vpop.f32.mrb[56].mxu0 }
 0x328   :  { %v7094_v18 = vpop.f32.mrb[57].mxu0 }
 0x329   :  { %v7095_v45 = vadd.f32 %v7094_v18, %v7093_v21  ;;  %v7096_v34 = vpop.f32.mrb[58].mxu0  ;;  %v7478_v21 = vld [vmem:[%s11936_s5 + $0xe0] sm:$0xff]  }
 0x32a   :  { %v7097_v42 = vpop.f32.mrb[59].mxu0  ;;  %7173 = vmatprep.subr.bf16.mxu0 %v7478_v21 }
 0x32b   :  { %v7098_v40 = vadd.f32 %v7097_v42, %v7096_v34  ;;  %v10503_v15 = vadd.f32 %v7095_v45, %v3406_v27  ;;  %v7480_v45 = vld [vmem:[%s11936_s5 + $0xa0] sm:$0xff]  }
 0x32c   :  { %7174 = vmatpush3.bf16.msra.mxu0 %v7480_v45 }
 0x32d   :  { %v10505_v47 = vadd.f32 %v7098_v40, %v3409_v56  ;;  %v7479_v56 = vld [vmem:[%s11936_s5 + $0x68] sm:$0xff]  }
 0x32e   :  { %7141 = vmatprep.subr.bf16.mxu1 %v7479_v56 }
 0x32f   :  { %v7047_v51 = vpop.f32.mrb[84].mxu1 }
 0x330   :  { %v7048_v53 = vpop.f32.mrb[85].mxu1 }
 0x331   :  { %v7049_v10 = vadd.f32 %v7048_v53, %v7047_v51  ;;  %v7050_v55 = vpop.f32.mrb[86].mxu1  ;;  %v7481_v51 = vld [vmem:[%s11936_s5 + $0x28] sm:$0xff]  }
 0x332   :  { %v7051_v54 = vpop.f32.mrb[87].mxu1  ;;  %7142 = vmatpush3.bf16.msra.mxu1 %v7481_v51 }
 0x333   :  { %v7052_v24 = vadd.f32 %v7051_v54, %v7050_v55  ;;  %v3414_v5 = vadd.f32 %v7049_v10, %v10487_v20  ;;  %v7482_v10 = vld [vmem:[%s11936_s5 + $0xe8] sm:$0xff]   ;;  %v7483_v55 = vld [vmem:[%s11936_s5 + $0x70] sm:$0xff]  }
 0x334   :  { %v7484_v54 = vld [vmem:[%s11936_s5 + $0xa8] sm:$0xff]   ;;  %7175 = vmatprep.subr.bf16.mxu0 %v7482_v10  ;;  %7143 = vmatprep.subr.bf16.mxu1 %v7483_v55 }
 0x335   :  { %v3417_v19 = vadd.f32 %v7052_v24, %v10487_v20  ;;  %v7485_v24 = vld [vmem:[%s11936_s5 + $0x30] sm:$0xff]   ;;  %7176 = vmatpush3.bf16.msra.mxu0 %v7484_v54  ;;  %v12314_v10 = vld [vmem:[#allocation17_spill] sm:$0xff] }
 0x336   :  { %7144 = vmatpush3.bf16.msra.mxu1 %v7485_v24 }
 0x337   :  { %v7099_v11 = vpop.f32.mrb[60].mxu0 }
 0x338   :  { %v7100_v0 = vpop.f32.mrb[61].mxu0 }
 0x339   :  { %v7101_v35 = vadd.f32 %v7100_v0, %v7099_v11  ;;  %v7102_v33 = vpop.f32.mrb[62].mxu0  ;;  %v7487_v11 = vld [vmem:[%s11936_s5 + $0x78] sm:$0xff]  }
 0x33a   :  { %v7103_v29 = vpop.f32.mrb[63].mxu0  ;;  %v7489_v0 = vld [vmem:[%s11936_s5 + $0x38] sm:$0xff]   ;;  %7145 = vmatprep.subr.bf16.mxu1 %v7487_v11 }
 0x33b   :  { %v7104_v38 = vadd.f32 %v7103_v29, %v7102_v33  ;;  %v10518_v39 = vadd.f32 %v7101_v35, %v3414_v5  ;;  %v7486_v5 = vld [vmem:[%s11936_s5 + $0xf0] sm:$0xff]   ;;  %7146 = vmatpush3.bf16.msra.mxu1 %v7489_v0  ;;  %v7490_v33 = vld [vmem:[%s11936_s5 + $0xf8] sm:$0xff]  }
 0x33c   :  { %7177 = vmatprep.subr.bf16.mxu0 %v7486_v5 }
 0x33d   :  { %v10529_v46 = vadd.f32 %v7104_v38, %v3417_v19  ;;  %7178 = vmatpush3.bf16.msra.mxu0 %v7488_v22  ;;  %v7491_v38 = vld [vmem:[%s11936_s5 + $0xb8] sm:$0xff]  }
 0x33e   :  { %7179 = vmatprep.subr.bf16.mxu0 %v7490_v33 }
 0x33f   :  { %v7053_v6 = vpop.f32.mrb[88].mxu1 }
 0x340   :  { %v7054_v1 = vpop.f32.mrb[89].mxu1 }
 0x341   :  { %v7055_v63 = vadd.f32 %v7054_v1, %v7053_v6  ;;  %v7056_v26 = vpop.f32.mrb[90].mxu1  ;;  %7180 = vmatpush3.bf16.msra.mxu0 %v7491_v38 }
 0x342   :  { %v7057_v14 = vpop.f32.mrb[91].mxu1 }
 0x343   :  { %v7058_v23 = vadd.f32 %v7057_v14, %v7056_v26  ;;  %v3422_v9 = vadd.f32 %v7055_v63, %v10487_v20 }
 0x345   :  { %v3425_v62 = vadd.f32 %v7058_v23, %v10487_v20 }
 0x347   :  { %v7105_v59 = vpop.f32.mrb[64].mxu0 }
 0x348   :  { %v7106_v3 = vpop.f32.mrb[65].mxu0 }
 0x349   :  { %v7107_v61 = vadd.f32 %v7106_v3, %v7105_v59  ;;  %v7108_v28 = vpop.f32.mrb[66].mxu0 }
 0x34a   :  { %v7109_v58 = vpop.f32.mrb[67].mxu0 }
 0x34b   :  { %v7110_v30 = vadd.f32 %v7109_v58, %v7108_v28  ;;  %v7059_v37 = vpop.f32.mrb[92].mxu1  ;;  %v10569_v27 = vadd.f32 %v7107_v61, %v3422_v9 }
 0x34c   :  { %v7060_v18 = vpop.f32.mrb[93].mxu1 }
 0x34d   :  { %v7061_v34 = vadd.f32 %v7060_v18, %v7059_v37  ;;  %v7062_v42 = vpop.f32.mrb[94].mxu1  ;;  %v10580_v40 = vadd.f32 %v7110_v30, %v3425_v62 }
 0x34e   :  { %v7063_v53 = vpop.f32.mrb[95].mxu1 }
 0x34f   :  { %v3430_v32 = vadd.f32 %v7061_v34, %v10487_v20  ;;  %v12039_v20 = vmov 0.0  }
 0x350   :  { %7302 = vmatprep.subr.bf16.mxu1 %v12039_v20 }
 0x356   :  { %v7111_v19 = vpop.f32.mrb[68].mxu0 }
 0x357   :  { %v7112_v35 = vpop.f32.mrb[69].mxu0 }
 0x358   :  { %v7113_v29 = vadd.f32 %v7112_v35, %v7111_v19  ;;  %v7114_v48 = vpop.f32.mrb[70].mxu0 }
 0x359   :  { %v7115_v44 = vpop.f32.mrb[71].mxu0  ;;  %v7292_v2 = vpop.f32.mrb[96].mxu1 }
 0x35a   :  { %v3510_v8 = vadd.f32 %v7113_v29, %v3430_v32  ;;  %v3558_v36 = vadd.f32 %v7292_v2, %v10497_v57  ;;  %v3549_v6 = vpop.f32.mrb[97].mxu1 }
 0x35b   :  { %v3550_v43 = vadd.f32 %v3549_v6, %v10491_v31  ;;  %v7293_v52 = vpop.f32.mrb[98].mxu1 }
 0x35c   :  { %v3608_v1 = vmin.f32 %v3558_v36, 0.0  ;;  %v3561_v13 = vadd.f32 %v7293_v52, %v10499_v16  ;;  %v3552_v63 = vpop.f32.mrb[99].mxu1  ;;  %vm3597_vm2 = vcmp.gt.f32.partialorder %v3558_v36, 0.0 }
 0x35d   :  { %v3606_v26 = vmin.f32 %v3550_v43, 0.0  ;;  %v10621_v14 = vadd.f32 %v3552_v63, %v10493_v49  ;;  %vm3595_vm3 = vcmp.gt.f32.partialorder %v3550_v43, 0.0 }
 0x35e   :  { %v3621_v50 = vmul.f32 1.442695, %v3608_v1  ;;  %v3609_v23 = vmin.f32 %v3561_v13, 0.0  ;;  %vm3598_vm4 = vcmp.gt.f32.partialorder %v3561_v13, 0.0 }
 0x35f   :  { %v3617_v41 = vmul.f32 1.442695, %v3606_v26  ;;  %v3607_v9 = vmin.f32 %v10621_v14, 0.0  ;;  %vm3596_vm6 = vcmp.gt.f32.partialorder %v10621_v14, 0.0 }
 0x360   :  { %7693 = vpow2.f32 %v3621_v50  ;;  %v3623_v17 = vmul.f32 1.442695, %v3609_v23 }
 0x361   :  { %7695 = vpow2.f32 %v3617_v41  ;;  %v7296_v7 = vpop.f32.mrb[100].mxu1 }
 0x362   :  { %7697 = vpow2.f32 %v3623_v17  ;;  %v10624_v57 = vadd.f32 %v7296_v7, %v10518_v39  ;;  %v3565_v31 = vpop.f32.mrb[101].mxu1  ;;  %v3619_v39 = vmul.f32 1.442695, %v3607_v9 }
 0x363   :  { %v10628_v16 = vadd.f32 %v3565_v31, %v10503_v15  ;;  %v7297_v59 = vpop.f32.mrb[102].mxu1 }
 0x364   :  { %v3612_v49 = vmin.f32 %v10624_v57, 0.0  ;;  %v10632_v12 = vadd.f32 %v7297_v59, %v10529_v46  ;;  %v3568_v3 = vpop.f32.mrb[103].mxu1  ;;  %7699 = vpow2.f32 %v3619_v39  ;;  %vm3601_vm8 = vcmp.gt.f32.partialorder %v10624_v57, 0.0 }
 0x365   :  { %v3610_v4 = vmin.f32 %v10628_v16, 0.0  ;;  %v10636_v60 = vadd.f32 %v3568_v3, %v10505_v47  ;;  %vm3599_vm9 = vcmp.gt.f32.partialorder %v10628_v16, 0.0 }
 0x366   :  { %v3613_v62 = vmin.f32 %v10632_v12, 0.0  ;;  %v3629_v61 = vmul.f32 1.442695, %v3612_v49  ;;  %vm3602_vm1 = vcmp.gt.f32.partialorder %v10632_v12, 0.0 }
 0x367   :  { %v3625_v28 = vmul.f32 1.442695, %v3610_v4  ;;  %v3611_v15 = vmin.f32 %v10636_v60, 0.0 }
 0x368   :  { %v3631_v46 = vmul.f32 1.442695, %v3613_v62  ;;  %7701 = vpow2.f32 %v3629_v61 }
 0x369   :  { %7703 = vpow2.f32 %v3625_v28  ;;  %v3627_v24 = vmul.f32 1.442695, %v3611_v15 }
 0x36a   :  { %v7694_v25 = vpop.eup %7693  ;;  %7705 = vpow2.f32 %v3631_v46 }
 0x36b   :  { %v7696_v58 = vpop.eup %7695  ;;  %v6659_v30 = vadd.f32 -1.0, %v7694_v25  ;;  %7707 = vpow2.f32 %v3627_v24 }
 0x36c   :  { %v7698_v21 = vpop.eup %7697  ;;  %v6657_v18 = vadd.f32 -1.0, %v7696_v58 }
 0x36d   :  { %v3652_v45 = vsel %vm3597_vm2, %v3558_v36, %v6659_v30  ;;  %v6660_v34 = vadd.f32 -1.0, %v7698_v21  ;;  %vm3600_vm2 = vcmp.gt.f32.partialorder %v10636_v60, 0.0 }
 0x36e   :  { %v7300_v37 = vpop.f32.mrb[104].mxu1  ;;  %v3706_v53 = vcombine.high %v3652_v45, %v3652_v45  ;;  %v3713_v55 = vrot.slane %v3652_v45, %v12314_v10  ;;  %v3650_v54 = vsel %vm3595_vm3, %v3550_v43, %v6657_v18  ;;  %v7700_v23 = vpop.eup %7699 }
 0x36f   :  { %v10640_v47 = vadd.f32 %v7300_v37, %v3510_v8  ;;  %v3581_v56 = vpop.f32.mrb[105].mxu1  ;;  %v3672_v11 = vcombine.high %v3650_v54, %v3650_v54  ;;  %v3679_v22 = vrot.slane %v3650_v54, %v12314_v10  ;;  %v10651_v0 = vsel %vm3598_vm4, %v3561_v13, %v6660_v34 }
 0x370   :  { %v10643_v42 = vadd.f32 %v3581_v56, %v10569_v27  ;;  %v7301_v51 = vpop.f32.mrb[106].mxu1  ;;  %v3720_v32 = vrot.slane %v3706_v53, %v12314_v10  ;;  %v3721_v27 = vcombine.high %v3713_v55, %v3713_v55  ;;  %v3959_v19 = vsel %vm1814_vm5, %v3713_v55, -inf }
 0x371   :  { %v10647_v5 = vpop.f32.mrb[107].mxu1  ;;  %v3723_v35 = vcombine.high %v10651_v0, %v10651_v0  ;;  %v3960_v33 = vrot.slane %v3959_v19, 4  ;;  %v3686_v29 = vrot.slane %v3672_v11, %v12314_v10  ;;  %v3687_v48 = vcombine.high %v3679_v22, %v3679_v22 }
 0x372   :  { %v3903_v38 = vsel %vm1814_vm5, %v3679_v22, -inf  ;;  %v3722_v44 = vcombine.high %v3720_v32, %v3720_v32  ;;  %v3966_v2 = vsel %vm1814_vm5, %v3721_v27, -inf  ;;  %v3973_v8 = vsel %vm1814_vm5, %v3720_v32, -inf  ;;  %v10664_v9 = vpop.eup %7701 }
 0x373   :  { %v3904_v36 = vrot.slane %v3903_v38, 4  ;;  %v3961_v6 = vmax.f32 %v3959_v19, %v3960_v33  ;;  %v3967_v43 = vrot.slane %v3966_v2, 4  ;;  %v3974_v52 = vrot.slane %v3973_v8, 4  ;;  %v10667_v39 = vpop.eup %7703 }
 0x374   :  { %v3688_v1 = vcombine.high %v3686_v29, %v3686_v29  ;;  %v3980_v13 = vsel %vm1814_vm5, %v3722_v44, -inf  ;;  %v3910_v26 = vsel %vm1814_vm5, %v3687_v48, -inf  ;;  %v3917_v50 = vsel %vm1814_vm5, %v3686_v29, -inf  ;;  %v10670_v37 = vpop.eup %7705 }
 0x375   :  { %v3905_v63 = vmax.f32 %v3903_v38, %v3904_v36  ;;  %v3962_v41 = vrot.slane %v3961_v6, 2  ;;  %v3968_v17 = vmax.f32 %v3966_v2, %v3967_v43  ;;  %v3975_v7 = vmax.f32 %v3973_v8, %v3974_v52 }
 0x376   :  { %v3981_v31 = vrot.slane %v3980_v13, 4  ;;  %v3911_v49 = vrot.slane %v3910_v26, 4  ;;  %v3918_v3 = vrot.slane %v3917_v50, 4  ;;  %v3924_v4 = vsel %vm1814_vm5, %v3688_v1, -inf }
 0x377   :  { %v3906_v59 = vrot.slane %v3905_v63, 2  ;;  %v3963_v62 = vmax.f32 %v3961_v6, %v3962_v41  ;;  %v3969_v61 = vrot.slane %v3968_v17, 2  ;;  %v3976_v28 = vrot.slane %v3975_v7, 2 }
 0x378   :  { %v3982_v25 = vmax.f32 %v3980_v13, %v3981_v31  ;;  %v3912_v58 = vmax.f32 %v3910_v26, %v3911_v49  ;;  %v3919_v30 = vmax.f32 %v3917_v50, %v3918_v3  ;;  %v3925_v46 = vrot.slane %v3924_v4, 4 }
 0x379   :  { %v3907_v15 = vmax.f32 %v3905_v63, %v3906_v59  ;;  %v3964_v21 = vrot.slane %v3963_v62, 1  ;;  %v3970_v18 = vmax.f32 %v3968_v17, %v3969_v61  ;;  %v3977_v56 = vmax.f32 %v3975_v7, %v3976_v28 }
 0x37a   :  { %v3983_v45 = vrot.slane %v3982_v25, 2  ;;  %v3913_v51 = vrot.slane %v3912_v58, 2  ;;  %v3920_v53 = vrot.slane %v3919_v30, 2  ;;  %v3926_v55 = vmax.f32 %v3924_v4, %v3925_v46 }
 0x37b   :  { %v3908_v34 = vrot.slane %v3907_v15, 1  ;;  %v3971_v54 = vrot.slane %v3970_v18, 1  ;;  %v3978_v11 = vrot.slane %v3977_v56, 1  ;;  %v6658_v33 = vadd.f32 -1.0, %v7700_v23 }
 0x37c   :  { %v3984_v22 = vmax.f32 %v3982_v25, %v3983_v45  ;;  %v3914_v32 = vmax.f32 %v3912_v58, %v3913_v51  ;;  %v3921_v27 = vmax.f32 %v3919_v30, %v3920_v53  ;;  %v3927_v19 = vrot.slane %v3926_v55, 2 }
 0x37d   :  { %v10672_v29 = vmax.f32 %v3963_v62, %v3964_v21  ;;  %v10674_v48 = vmax.f32 %v3970_v18, %v3971_v54  ;;  %v3909_v38 = vmax.f32 %v3907_v15, %v3908_v34  ;;  %v3730_v44 = vrot.slane %v10651_v0, %v12314_v10  ;;  %v10706_v15 = vpop.eup %7707 }
 0x37e   :  { %v3915_v2 = vrot.slane %v3914_v32, 1  ;;  %v3922_v8 = vrot.slane %v3921_v27, 1  ;;  %v3928_v36 = vmax.f32 %v3926_v55, %v3927_v19  ;;  %v3737_v6 = vrot.slane %v3723_v35, %v12314_v10 }
 0x37f   :  { %v10679_v43 = vmax.f32 %v3977_v56, %v3978_v11  ;;  %v3985_v24 = vrot.slane %v3984_v22, 1  ;;  %v3738_v52 = vcombine.high %v3730_v44, %v3730_v44  ;;  %v3987_v1 = vsel %vm1814_vm5, %v3730_v44, -inf }
 0x380   :  { %v10682_v13 = vmax.f32 %v3914_v32, %v3915_v2  ;;  %v10684_v63 = vmax.f32 %v3921_v27, %v3922_v8  ;;  %v3929_v26 = vrot.slane %v3928_v36, 1  ;;  %v3739_v50 = vcombine.high %v3737_v6, %v3737_v6 }
 0x381   :  { %v3988_v23 = vrot.slane %v3987_v1, 4  ;;  %v3994_v0 = vsel %vm1814_vm5, %v3738_v52, -inf  ;;  %v4001_v41 = vsel %vm1814_vm5, %v3737_v6, -inf  ;;  %v3651_v35 = vsel %vm3596_vm6, %v10621_v14, %v6658_v33 }
 0x382   :  { %v10691_v17 = vmax.f32 %v3928_v36, %v3929_v26  ;;  %v4251_v7 = vsel %vm2547_vm7, %v10682_v13, %v3909_v38  ;;  %v3995_v31 = vrot.slane %v3994_v0, 4  ;;  %v4002_v59 = vrot.slane %v4001_v41, 4 }
 0x383   :  { %v4252_v49 = vsel %vm2549_vm10, %v10684_v63, %v4251_v7  ;;  %v3989_v3 = vmax.f32 %v3987_v1, %v3988_v23  ;;  %v4008_v4 = vsel %vm1814_vm5, %v3739_v50, -inf  ;;  %v3689_v62 = vcombine.high %v3651_v35, %v3651_v35 }
 0x384   :  { %v10698_v61 = vmax.f32 %v3984_v22, %v3985_v24  ;;  %v10703_v14 = vsel %vm2547_vm7, %v10674_v48, %v10672_v29  ;;  %v3996_v28 = vmax.f32 %v3994_v0, %v3995_v31  ;;  %v4003_v25 = vmax.f32 %v4001_v41, %v4002_v59 }
 0x385   :  { %v3990_v58 = vrot.slane %v3989_v3, 2  ;;  %v4009_v30 = vrot.slane %v4008_v4, 4  ;;  %v3696_v46 = vrot.slane %v3651_v35, %v12314_v10  ;;  %v3703_v21 = vrot.slane %v3689_v62, %v12314_v10 }
 0x386   :  { %v10712_v18 = vsel %vm2551_vm11, %v10691_v17, %v4252_v49  ;;  %v3997_v56 = vrot.slane %v3996_v28, 2  ;;  %v4004_v45 = vrot.slane %v4003_v25, 2  ;;  %v6663_v34 = vadd.f32 -1.0, %v10664_v9 }
 0x387   :  { %v3991_v51 = vmax.f32 %v3989_v3, %v3990_v58  ;;  %v4010_v53 = vmax.f32 %v4008_v4, %v4009_v30  ;;  %v3704_v55 = vcombine.high %v3696_v46, %v3696_v46  ;;  %v3705_v54 = vcombine.high %v3703_v21, %v3703_v21 }
 0x388   :  { %v3998_v11 = vmax.f32 %v3996_v28, %v3997_v56  ;;  %v4005_v22 = vmax.f32 %v4003_v25, %v4004_v45  ;;  %v3931_v32 = vsel %vm1814_vm5, %v3696_v46, -inf  ;;  %v3945_v27 = vsel %vm1814_vm5, %v3703_v21, -inf }
 0x389   :  { %v3992_v19 = vrot.slane %v3991_v51, 1  ;;  %v4011_v33 = vrot.slane %v4010_v53, 2  ;;  %v3932_v38 = vrot.slane %v3931_v32, 4  ;;  %v3938_v44 = vsel %vm1814_vm5, %v3704_v55, -inf }
 0x38a   :  { %v3999_v2 = vrot.slane %v3998_v11, 1  ;;  %v4006_v8 = vrot.slane %v4005_v22, 1  ;;  %v3939_v9 = vrot.slane %v3938_v44, 4  ;;  %v3946_v36 = vrot.slane %v3945_v27, 4 }
 0x38b   :  { %v10722_v6 = vsel %vm2547_vm7, %v10691_v17, %v10684_v63  ;;  %v4012_v24 = vmax.f32 %v4010_v53, %v4011_v33  ;;  %v3933_v52 = vmax.f32 %v3931_v32, %v3932_v38  ;;  %v3952_v1 = vsel %vm1814_vm5, %v3705_v54, -inf }
 0x38c   :  { %v10725_v26 = vmax.f32 %v3991_v51, %v3992_v19  ;;  %v3940_v50 = vmax.f32 %v3938_v44, %v3939_v9  ;;  %v3947_v23 = vmax.f32 %v3945_v27, %v3946_v36  ;;  %v6661_v0 = vadd.f32 -1.0, %v10667_v39 }
 0x38d   :  { %v10728_v41 = vmax.f32 %v3998_v11, %v3999_v2  ;;  %v3934_v35 = vrot.slane %v3933_v52, 2  ;;  %v3953_v7 = vrot.slane %v3952_v1, 4  ;;  %v3656_v31 = vsel %vm3601_vm8, %v10624_v57, %v6663_v34 }
 0x38e   :  { %v10733_v59 = vmax.f32 %v4005_v22, %v4006_v8  ;;  %v3941_v49 = vrot.slane %v3940_v50, 2  ;;  %v3948_v3 = vrot.slane %v3947_v23, 2  ;;  %v3774_v4 = vcombine.high %v3656_v31, %v3656_v31 }
 0x38f   :  { %v4013_v62 = vrot.slane %v4012_v24, 1  ;;  %v3935_v28 = vmax.f32 %v3933_v52, %v3934_v35  ;;  %v3954_v25 = vmax.f32 %v3952_v1, %v3953_v7  ;;  %v3781_v58 = vrot.slane %v3656_v31, %v12314_v10 }
 0x390   :  { %v3942_v30 = vmax.f32 %v3940_v50, %v3941_v49  ;;  %v3949_v39 = vmax.f32 %v3947_v23, %v3948_v3  ;;  %v3788_v46 = vrot.slane %v3774_v4, %v12314_v10  ;;  %v3654_v21 = vsel %vm3599_vm9, %v10628_v16, %v6661_v0 }
 0x391   :  { %v3936_v56 = vrot.slane %v3935_v28, 1  ;;  %v3955_v57 = vrot.slane %v3954_v25, 2  ;;  %v3789_v45 = vcombine.high %v3781_v58, %v3781_v58  ;;  %v4071_v34 = vsel %vm1814_vm5, %v3781_v58, -inf }
 0x392   :  { %v3943_v51 = vrot.slane %v3942_v30, 1  ;;  %v3950_v53 = vrot.slane %v3949_v39, 1  ;;  %v3790_v55 = vcombine.high %v3788_v46, %v3788_v46  ;;  %v4072_v54 = vrot.slane %v4071_v34, 4 }
 0x393   :  { %v10744_v11 = vsel %vm2547_vm7, %v10728_v41, %v10725_v26  ;;  %v3956_v22 = vmax.f32 %v3954_v25, %v3955_v57  ;;  %v4078_v32 = vsel %vm1814_vm5, %v3789_v45, -inf  ;;  %v4085_v27 = vsel %vm1814_vm5, %v3788_v46, -inf }
 0x394   :  { %12315 = vst [vmem:[#allocation12_spill] sm:$0xff] %v10744_v11  ;;  %v10748_v16 = vmax.f32 %v4012_v24, %v4013_v62  ;;  %v10750_v19 = vmax.f32 %v3935_v28, %v3936_v56  ;;  %v4073_v33 = vmax.f32 %v4071_v34, %v4072_v54  ;;  %v4079_v38 = vrot.slane %v4078_v32, 4 }
 0x395   :  { %v10752_v44 = vmax.f32 %v3942_v30, %v3943_v51  ;;  %v4086_v2 = vrot.slane %v4085_v27, 4  ;;  %v4092_v8 = vsel %vm1814_vm5, %v3790_v55, -inf  ;;  %v3740_v9 = vcombine.high %v3654_v21, %v3654_v21 }
 0x396   :  { %v10756_v36 = vmax.f32 %v3949_v39, %v3950_v53  ;;  %v4074_v52 = vrot.slane %v4073_v33, 2  ;;  %v4080_v1 = vmax.f32 %v4078_v32, %v4079_v38  ;;  %v4093_v50 = vrot.slane %v4092_v8, 4 }
 0x397   :  { %v3957_v23 = vrot.slane %v3956_v22, 1  ;;  %v4087_v24 = vmax.f32 %v4085_v27, %v4086_v2  ;;  %v3747_v0 = vrot.slane %v3654_v21, %v12314_v10  ;;  %v3754_v35 = vrot.slane %v3740_v9, %v12314_v10 }
 0x398   :  { %v4075_v7 = vmax.f32 %v4073_v33, %v4074_v52  ;;  %v4081_v31 = vrot.slane %v4080_v1, 2  ;;  %v4094_v49 = vmax.f32 %v4092_v8, %v4093_v50  ;;  %v6664_v3 = vadd.f32 -1.0, %v10670_v37 }
 0x399   :  { %v4088_v4 = vrot.slane %v4087_v24, 2  ;;  %v3755_v62 = vcombine.high %v3747_v0, %v3747_v0  ;;  %v3756_v28 = vcombine.high %v3754_v35, %v3754_v35  ;;  %v4015_v25 = vsel %vm1814_vm5, %v3747_v0, -inf }
 0x39a   :  { %v4076_v58 = vrot.slane %v4075_v7, 1  ;;  %v4082_v30 = vmax.f32 %v4080_v1, %v4081_v31  ;;  %v4095_v39 = vrot.slane %v4094_v49, 2  ;;  %v4016_v46 = vrot.slane %v4015_v25, 4 }
 0x39b   :  { %v4089_v56 = vmax.f32 %v4087_v24, %v4088_v4  ;;  %v4022_v57 = vsel %vm1814_vm5, %v3755_v62, -inf  ;;  %v4029_v21 = vsel %vm1814_vm5, %v3754_v35, -inf  ;;  %v4036_v45 = vsel %vm1814_vm5, %v3756_v28, -inf }
 0x39c   :  { %v10768_v37 = vsel %vm2547_vm7, %v10752_v44, %v10750_v19  ;;  %v4083_v34 = vrot.slane %v4082_v30, 1  ;;  %v4096_v51 = vmax.f32 %v4094_v49, %v4095_v39  ;;  %v4017_v53 = vmax.f32 %v4015_v25, %v4016_v46 }
 0x39d   :  { %12316 = vst [vmem:[#allocation46_spill] sm:$0xff] %v10768_v37  ;;  %v10770_v55 = vmax.f32 %v3956_v22, %v3957_v23  ;;  %v4023_v54 = vrot.slane %v4022_v57, 4  ;;  %v4030_v32 = vrot.slane %v4029_v21, 4  ;;  %v4037_v27 = vrot.slane %v4036_v45, 4 }
 0x39e   :  { %v10773_v33 = vmax.f32 %v4075_v7, %v4076_v58  ;;  %v4090_v38 = vrot.slane %v4089_v56, 1  ;;  %v4018_v2 = vrot.slane %v4017_v53, 2  ;;  %v3657_v8 = vsel %vm3602_vm1, %v10632_v12, %v6664_v3 }
 0x39f   :  { %v10778_v9 = vmax.f32 %v4082_v30, %v4083_v34  ;;  %v4024_v52 = vmax.f32 %v4022_v57, %v4023_v54  ;;  %v4031_v1 = vmax.f32 %v4029_v21, %v4030_v32  ;;  %v4038_v50 = vmax.f32 %v4036_v45, %v4037_v27 }
 0x3a0   :  { %v4097_v22 = vrot.slane %v4096_v51, 1  ;;  %v4019_v23 = vmax.f32 %v4017_v53, %v4018_v2  ;;  %v3791_v24 = vcombine.high %v3657_v8, %v3657_v8  ;;  %v3798_v0 = vrot.slane %v3657_v8, %v12314_v10 }
 0x3a1   :  { %v4025_v35 = vrot.slane %v4024_v52, 2  ;;  %v4032_v31 = vrot.slane %v4031_v1, 2  ;;  %v4039_v7 = vrot.slane %v4038_v50, 2  ;;  %v6662_v49 = vadd.f32 -1.0, %v10706_v15 }
 0x3a2   :  { %v4020_v4 = vrot.slane %v4019_v23, 1  ;;  %v3805_v62 = vrot.slane %v3791_v24, %v12314_v10  ;;  %v3806_v28 = vcombine.high %v3798_v0, %v3798_v0  ;;  %v4099_v12 = vsel %vm1814_vm5, %v3798_v0, -inf }
 0x3a3   :  { %v4026_v3 = vmax.f32 %v4024_v52, %v4025_v35  ;;  %v4033_v25 = vmax.f32 %v4031_v1, %v4032_v31  ;;  %v4040_v58 = vmax.f32 %v4038_v50, %v4039_v7  ;;  %v4100_v30 = vrot.slane %v4099_v12, 4 }
 0x3a4   :  { %v10784_v39 = vmax.f32 %v4089_v56, %v4090_v38  ;;  %v3807_v46 = vcombine.high %v3805_v62, %v3805_v62  ;;  %v4106_v57 = vsel %vm1814_vm5, %v3806_v28, -inf  ;;  %v4113_v21 = vsel %vm1814_vm5, %v3805_v62, -inf }
 0x3a5   :  { %v10788_v45 = vmax.f32 %v4096_v51, %v4097_v22  ;;  %v4027_v15 = vrot.slane %v4026_v3, 1  ;;  %v4034_v34 = vrot.slane %v4033_v25, 1  ;;  %v4101_v53 = vmax.f32 %v4099_v12, %v4100_v30 }
 0x3a6   :  { %v4107_v54 = vrot.slane %v4106_v57, 4  ;;  %v4114_v32 = vrot.slane %v4113_v21, 4  ;;  %v4120_v27 = vsel %vm1814_vm5, %v3807_v46, -inf  ;;  %v3655_v2 = vsel %vm3600_vm2, %v10636_v60, %v6662_v49 }
 0x3a7   :  { %v10794_v56 = vmax.f32 %v4019_v23, %v4020_v4  ;;  %v10796_v38 = vmax.f32 %v4026_v3, %v4027_v15  ;;  %v4041_v8 = vrot.slane %v4040_v58, 1  ;;  %v4102_v52 = vrot.slane %v4101_v53, 2 }
 0x3a8   :  { %v4108_v1 = vmax.f32 %v4106_v57, %v4107_v54  ;;  %v4115_v51 = vmax.f32 %v4113_v21, %v4114_v32  ;;  %v4121_v50 = vrot.slane %v4120_v27, 4  ;;  %v3757_v22 = vcombine.high %v3655_v2, %v3655_v2 }
 0x3a9   :  { %v10798_v24 = vmax.f32 %v4033_v25, %v4034_v34  ;;  %v4103_v0 = vmax.f32 %v4101_v53, %v4102_v52  ;;  %v3764_v35 = vrot.slane %v3655_v2, %v12314_v10  ;;  %v3616_v31 = vmin.f32 %v10640_v47, 0.0 }
 0x3aa   :  { %v4109_v7 = vrot.slane %v4108_v1, 2  ;;  %v4116_v62 = vrot.slane %v4115_v51, 2  ;;  %v4122_v60 = vmax.f32 %v4120_v27, %v4121_v50  ;;  %v3771_v23 = vrot.slane %v3757_v22, %v12314_v10 }
 0x3ab   :  { %v4104_v49 = vrot.slane %v4103_v0, 1  ;;  %v3772_v4 = vcombine.high %v3764_v35, %v3764_v35  ;;  %v4043_v28 = vsel %vm1814_vm5, %v3764_v35, -inf  ;;  %v3637_v12 = vmul.f32 1.442695, %v3616_v31 }
 0x3ac   :  { %v4110_v3 = vmax.f32 %v4108_v1, %v4109_v7  ;;  %v4117_v30 = vmax.f32 %v4115_v51, %v4116_v62  ;;  %v4123_v46 = vrot.slane %v4122_v60, 2  ;;  %v3773_v25 = vcombine.high %v3771_v23, %v3771_v23 }
 0x3ad   :  { %v10804_v57 = vmax.f32 %v4040_v58, %v4041_v8  ;;  %v4044_v21 = vrot.slane %v4043_v28, 4  ;;  %v4050_v15 = vsel %vm1814_vm5, %v3772_v4, -inf  ;;  %v4057_v34 = vsel %vm1814_vm5, %v3771_v23, -inf }
 0x3ae   :  { %v4111_v53 = vrot.slane %v4110_v3, 1  ;;  %v4118_v54 = vrot.slane %v4117_v30, 1  ;;  %v4124_v32 = vmax.f32 %v4122_v60, %v4123_v46  ;;  %v4051_v27 = vrot.slane %v4050_v15, 4 }
 0x3af   :  { %v4045_v2 = vmax.f32 %v4043_v28, %v4044_v21  ;;  %v4058_v52 = vrot.slane %v4057_v34, 4  ;;  %v4064_v50 = vsel %vm1814_vm5, %v3773_v25, -inf  ;;  %7709 = vpow2.f32 %v3637_v12 }
 0x3b0   :  { %v10809_v1 = vmax.f32 %v4103_v0, %v4104_v49  ;;  %v10811_v51 = vmax.f32 %v4110_v3, %v4111_v53  ;;  %v4125_v58 = vrot.slane %v4124_v32, 1  ;;  %v4052_v8 = vmax.f32 %v4050_v15, %v4051_v27 }
 0x3b1   :  { %v4046_v22 = vrot.slane %v4045_v2, 2  ;;  %v4059_v35 = vmax.f32 %v4057_v34, %v4058_v52  ;;  %v4065_v31 = vrot.slane %v4064_v50, 4  ;;  %v3614_v7 = vmin.f32 %v10643_v42, 0.0 }
 0x3b2   :  { %v10814_v62 = vmax.f32 %v4117_v30, %v4118_v54  ;;  %v4053_v60 = vrot.slane %v4052_v8, 2  ;;  %v10818_v23 = vadd.f32 %v10647_v5, %v10580_v40  ;;  %v4292_v0 = vsel %vm2547_vm7, %v10684_v63, %v10682_v13 }
 0x3b3   :  { %v4047_v49 = vmax.f32 %v4045_v2, %v4046_v22  ;;  %v4060_v4 = vrot.slane %v4059_v35, 2  ;;  %v4066_v28 = vmax.f32 %v4064_v50, %v4065_v31  ;;  %vm3605_vm3 = vcmp.gt.f32.partialorder %v10640_v47, 0.0 }
 0x3b4   :  { %v3633_v12 = vmul.f32 1.442695, %v3614_v7  ;;  %v10824_v3 = vmax.f32 %v4124_v32, %v4125_v58  ;;  %v4054_v46 = vmax.f32 %v4052_v8, %v4053_v60  ;;  %v3615_v30 = vmin.f32 %v10818_v23, 0.0 }
 0x3b5   :  { %v4293_v25 = vsel %vm2549_vm10, %v10691_v17, %v4292_v0  ;;  %v4048_v40 = vrot.slane %v4047_v49, 1  ;;  %v4061_v5 = vmax.f32 %v4059_v35, %v4060_v4  ;;  %v4067_v21 = vrot.slane %v4066_v28, 2 }
 0x3b6   :  { %7711 = vpow2.f32 %v3633_v12  ;;  %v4055_v15 = vrot.slane %v4054_v46, 1  ;;  %v3635_v13 = vmul.f32 1.442695, %v3615_v30  ;;  %v4294_v63 = vsel %vm2551_vm11, %v10750_v19, %v4293_v25 }
 0x3b7   :  { %v4299_v34 = vsel %vm2547_vm7, %v10679_v43, %v10674_v48  ;;  %v10834_v53 = vmax.f32 %v4047_v49, %v4048_v40  ;;  %v4062_v54 = vrot.slane %v4061_v5, 1  ;;  %v4068_v32 = vmax.f32 %v4066_v28, %v4067_v21 }
 0x3b8   :  { %v4295_v27 = vsel %vm2553_vm12, %v10752_v44, %v4294_v63  ;;  %v10838_v2 = vmax.f32 %v4054_v46, %v4055_v15  ;;  %7713 = vpow2.f32 %v3635_v13  ;;  %v4300_v50 = vsel %vm2549_vm10, %v10698_v61, %v4299_v34 }
 0x3b9   :  { %v4296_v52 = vsel %vm2555_vm13, %v10756_v36, %v4295_v27  ;;  %v7710_v58 = vpop.eup %7709  ;;  %v10844_v8 = vmax.f32 %v4061_v5, %v4062_v54  ;;  %v4069_v22 = vrot.slane %v4068_v32, 1  ;;  %vm3603_vm4 = vcmp.gt.f32.partialorder %v10643_v42, 0.0 }
 0x3ba   :  { %v4297_v35 = vsel %vm2557_vm14, %v10770_v55, %v4296_v52  ;;  %v4301_v31 = vsel %vm2551_vm11, %v10725_v26, %v4300_v50  ;;  %v6667_v7 = vadd.f32 -1.0, %v7710_v58  ;;  %v4254_v49 = vsel %vm2553_vm12, %v10750_v19, %v10712_v18 }
 0x3bb   :  { %v4298_v60 = vsel %vm2559_vm15, %v10672_v29, %v4297_v35  ;;  %v4302_v0 = vsel %vm2553_vm12, %v10728_v41, %v4301_v31  ;;  %v10858_v4 = vmax.f32 %v4068_v32, %v4069_v22  ;;  %v4255_v12 = vsel %vm2555_vm13, %v10752_v44, %v4254_v49 }
 0x3bc   :  { %v4303_v28 = vsel %vm2555_vm13, %v10733_v59, %v4302_v0  ;;  %v4259_v46 = vsel %vm2549_vm10, %v10679_v43, %v10703_v14  ;;  %v3660_v30 = vsel %vm3605_vm3, %v10640_v47, %v6667_v7  ;;  %vm3604_vm6 = vcmp.gt.f32.partialorder %v10818_v23, 0.0 }
 0x3bd   :  { %v4304_v18 = vsel %vm2557_vm14, %v10748_v16, %v4303_v28  ;;  %v4256_v25 = vsel %vm2557_vm14, %v10756_v36, %v4255_v12  ;;  %v4260_v40 = vsel %vm2551_vm11, %v10698_v61, %v4259_v46  ;;  %v3842_v5 = vcombine.high %v3660_v30, %v3660_v30 }
 0x3be   :  { %v3849_v21 = vrot.slane %v3660_v30, %v12314_v10  ;;  %v4305_v14 = vsel %vm2559_vm15, %v10794_v56, %v4304_v18  ;;  %v10882_v47 = vsel %vm2559_vm15, %v10770_v55, %v4256_v25  ;;  %v4261_v13 = vsel %vm2553_vm12, %v10725_v26, %v4260_v40 }
 0x3bf   :  { %v4456_v15 = vpack.c.bf16 %v4305_v14, %v4298_v60  ;;  %v4374_v63 = vsel %vm2547_vm7, %v10750_v19, %v10691_v17  ;;  %v10892_v34 = vsel %vm2547_vm7, %v10725_v26, %v10698_v61  ;;  %v3856_v32 = vrot.slane %v3842_v5, %v12314_v10 }
 0x3c0   :  { %v7712_v54 = vpop.eup %7711  ;;  %v3857_v27 = vcombine.high %v3849_v21, %v3849_v21  ;;  %v4183_v52 = vsel %vm1814_vm5, %v3849_v21, -inf  ;;  %v4262_v50 = vsel %vm2555_vm13, %v10728_v41, %v4261_v13  ;;  %v10902_v35 = vsel %vm2549_vm10, %v10752_v44, %v4374_v63 }
 0x3c1   :  { %v4184_v58 = vrot.slane %v4183_v52, 4  ;;  %v6665_v22 = vadd.f32 -1.0, %v7712_v54  ;;  %4829 = vmatprep.mubr.bf16.mxu1 %v4456_v15  ;;  %v4263_v17 = vsel %vm2557_vm14, %v10733_v59, %v4262_v50  ;;  %v3858_v31 = vcombine.high %v3856_v32, %v3856_v32 }
 0x3c2   :  { %v4190_v7 = vsel %vm1814_vm5, %v3857_v27, -inf  ;;  %v4197_v60 = vsel %vm1814_vm5, %v3856_v32, -inf  ;;  %v10908_v0 = vsel %vm2559_vm15, %v10748_v16, %v4263_v17  ;;  %v7714_v49 = vpop.eup %7713  ;;  %vm7763_vm8 = vmmov 0  }
 0x3c3   :  { %v4185_v28 = vmax.f32 %v4183_v52, %v4184_v58  ;;  %v4191_v12 = vrot.slane %v4190_v7, 4  ;;  %v4198_v46 = vrot.slane %v4197_v60, 4  ;;  %v3658_v30 = vsel %vm3603_vm4, %v10643_v42, %v6665_v22 }
 0x3c4   :  { %v10914_v18 = vsel %vm1814_vm5, %v3858_v31, -inf  ;;  %v3808_v25 = vcombine.high %v3658_v30, %v3658_v30  ;;  %v3815_v40 = vrot.slane %v3658_v30, %v12314_v10  ;;  %v6666_v5 = vadd.f32 -1.0, %v7714_v49 }
 0x3c5   :  { %12317 = vst [vmem:[#allocation38_spill] sm:$0xff] %v10914_v18  ;;  %v4186_v21 = vrot.slane %v4185_v28, 2  ;;  %v10917_v14 = vmax.f32 %v4190_v7, %v4191_v12  ;;  %v10919_v15 = vmax.f32 %v4197_v60, %v4198_v46 }
 0x3c6   :  { %v3822_v63 = vrot.slane %v3808_v25, %v12314_v10  ;;  %v3823_v54 = vcombine.high %v3815_v40, %v3815_v40  ;;  %v4127_v32 = vsel %vm1814_vm5, %v3815_v40, -inf  ;;  %v3659_v42 = vsel %vm3604_vm6, %v10818_v23, %v6666_v5 }
 0x3c7   :  { %12318 = vst [vmem:[#allocation45_spill] sm:$0xff] %v10917_v14  ;;  %12319 = vst [vmem:[#allocation24_spill] sm:$0xff] %v10919_v15  ;;  %v10927_v27 = vmax.f32 %v4185_v28, %v4186_v21  ;;  %v4128_v50 = vrot.slane %v4127_v32, 4  ;;  %v3825_v58 = vcombine.high %v3659_v42, %v3659_v42  ;;  %v3832_v7 = vrot.slane %v3659_v42, %v12314_v10 }
 0x3c8   :  { %v3824_v22 = vcombine.high %v3822_v63, %v3822_v63  ;;  %v4134_v17 = vsel %vm1814_vm5, %v3823_v54, -inf  ;;  %v4141_v31 = vsel %vm1814_vm5, %v3822_v63, -inf }
 0x3c9   :  { %v4129_v49 = vmax.f32 %v4127_v32, %v4128_v50  ;;  %v4135_v12 = vrot.slane %v4134_v17, 4  ;;  %v4142_v46 = vrot.slane %v4141_v31, 4  ;;  %v3839_v28 = vrot.slane %v3825_v58, %v12314_v10 }
 0x3ca   :  { %v4148_v23 = vsel %vm1814_vm5, %v3824_v22, -inf  ;;  %v3840_v30 = vcombine.high %v3832_v7, %v3832_v7  ;;  %v4155_v25 = vsel %vm1814_vm5, %v3832_v7, -inf }
 0x3cb   :  { %v4130_v40 = vrot.slane %v4129_v49, 2  ;;  %v4136_v5 = vmax.f32 %v4134_v17, %v4135_v12  ;;  %v4143_v21 = vmax.f32 %v4141_v31, %v4142_v46  ;;  %v4149_v54 = vrot.slane %v4148_v23, 4 }
 0x3cc   :  { %v3841_v13 = vcombine.high %v3839_v28, %v3839_v28  ;;  %v4156_v63 = vrot.slane %v4155_v25, 4  ;;  %v4162_v42 = vsel %vm1814_vm5, %v3840_v30, -inf  ;;  %v4169_v52 = vsel %vm1814_vm5, %v3839_v28, -inf }
 0x3cd   :  { %v4131_v32 = vmax.f32 %v4129_v49, %v4130_v40  ;;  %v4137_v50 = vrot.slane %v4136_v5, 2  ;;  %v4144_v60 = vrot.slane %v4143_v21, 2  ;;  %v4150_v20 = vmax.f32 %v4148_v23, %v4149_v54 }
 0x3ce   :  { %v4157_v22 = vmax.f32 %v4155_v25, %v4156_v63  ;;  %v4163_v18 = vrot.slane %v4162_v42, 4  ;;  %v4170_v58 = vrot.slane %v4169_v52, 4  ;;  %v4176_v10 = vsel %vm1814_vm5, %v3841_v13, -inf  ;;  %v7492_v13 = vld [vmem:[%s11936_s5 + $0x100] sm:$0xff]  }
 0x3cf   :  { %v4132_v7 = vrot.slane %v4131_v32, 1  ;;  %v4138_v11 = vmax.f32 %v4136_v5, %v4137_v50  ;;  %v4145_v17 = vmax.f32 %v4143_v21, %v4144_v60  ;;  %v4151_v31 = vrot.slane %v4150_v20, 2 }
 0x3d0   :  { %v4158_v12 = vrot.slane %v4157_v22, 2  ;;  %v4164_v46 = vmax.f32 %v4162_v42, %v4163_v18  ;;  %v4171_v37 = vmax.f32 %v4169_v52, %v4170_v58  ;;  %v4177_v15 = vrot.slane %v4176_v10, 4 }
 0x3d1   :  { %v10940_v30 = vmax.f32 %v4131_v32, %v4132_v7  ;;  %v4139_v28 = vrot.slane %v4138_v11, 1  ;;  %v4146_v49 = vrot.slane %v4145_v17, 1  ;;  %v4152_v40 = vmax.f32 %v4150_v20, %v4151_v31 }
 0x3d2   :  { %v4159_v14 = vmax.f32 %v4157_v22, %v4158_v12  ;;  %v4165_v23 = vrot.slane %v4164_v46, 2  ;;  %v4172_v25 = vrot.slane %v4171_v37, 2  ;;  %v4178_v54 = vmax.f32 %v4176_v10, %v4177_v15  ;;  %v7493_v22 = vld [vmem:[%s11936_s5 + $0x108] sm:$0xff]  }
 0x3d3   :  { %v10945_v5 = vmax.f32 %v4138_v11, %v4139_v28  ;;  %v10947_v60 = vmax.f32 %v4145_v17, %v4146_v49  ;;  %v4153_v18 = vrot.slane %v4152_v40, 1  ;;  %v4455_v52 = vpack.c.bf16 %v10908_v0, %v10882_v47 }
 0x3d4   :  { %v4160_v21 = vrot.slane %v4159_v14, 1  ;;  %v4166_v63 = vmax.f32 %v4164_v46, %v4165_v23  ;;  %v4173_v42 = vmax.f32 %v4171_v37, %v4172_v25  ;;  %v4179_v20 = vrot.slane %v4178_v54, 2 }
 0x3d5   :  { %v10951_v32 = vmax.f32 %v4152_v40, %v4153_v18  ;;  %4830 = vmatmul.mubr.bf16.vlgmr.msra.gmra.mrb[108].mxu1 %v4455_v52  ;;  %v4376_v10 = vsel %vm2551_vm11, %v10756_v36, %v10902_v35  ;;  %v4382_v11 = vsel %vm2549_vm10, %v10728_v41, %v10892_v34  ;;  %v4334_v15 = vsel %vm2549_vm10, %v10750_v19, %v10722_v6 }
 0x3d6   :  { %v10962_v47 = vmax.f32 %v4159_v14, %v4160_v21  ;;  %v4167_v0 = vrot.slane %v4166_v63, 1  ;;  %v4174_v37 = vrot.slane %v4173_v42, 1  ;;  %v4180_v50 = vmax.f32 %v4178_v54, %v4179_v20  ;;  %7303 = vmatpush3.bf16.msra.mxu1 %v7492_v13  ;;  %v7494_v54 = vld [vmem:[%s11936_s5 + $0x110] sm:$0xff]  }
 0x3d7   :  { %v4377_v35 = vsel %vm2553_vm12, %v10770_v55, %v4376_v10  ;;  %v4383_v34 = vsel %vm2551_vm11, %v10733_v59, %v4382_v11  ;;  %v4335_v58 = vsel %vm2551_vm11, %v10752_v44, %v4334_v15  ;;  %v4340_v6 = vsel %vm2547_vm7, %v10698_v61, %v10679_v43 }
 0x3d8   :  { %v12320_v19 = vmov 0.0   ;;  %v10977_v14 = vmax.f32 %v4166_v63, %v4167_v0  ;;  %v10979_v7 = vmax.f32 %v4173_v42, %v4174_v37  ;;  %v4181_v17 = vrot.slane %v4180_v50, 1 }
 0x3d9   :  { %7304 = vmatprep.subr.bf16.mxu1 %v12320_v19  ;;  %v4378_v31 = vsel %vm2555_vm13, %v10672_v29, %v4377_v35  ;;  %v4384_v44 = vsel %vm2553_vm12, %v10748_v16, %v4383_v34  ;;  %v4336_v46 = vsel %vm2553_vm12, %v10756_v36, %v4335_v58  ;;  %v4341_v28 = vsel %vm2549_vm10, %v10725_v26, %v4340_v6 }
 0x3da   :  { %v4379_v12 = vsel %vm2557_vm14, %v10674_v48, %v4378_v31  ;;  %v10991_v49 = vmax.f32 %v4180_v50, %v4181_v17  ;;  %v4385_v23 = vsel %vm2555_vm13, %v10794_v56, %v4384_v44  ;;  %v4337_v25 = vsel %vm2555_vm13, %v10770_v55, %v4336_v46  ;;  %7305 = vmatpush3.bf16.msra.mxu1 %v7493_v22  ;;  %v7495_v17 = vld [vmem:[%s11936_s5 + $0x118] sm:$0xff]  }
 0x3db   :  { %v4380_v40 = vsel %vm2559_vm15, %v10679_v43, %v4379_v12  ;;  %v4386_v13 = vsel %vm2557_vm14, %v10796_v38, %v4385_v23  ;;  %v4338_v26 = vsel %vm2557_vm14, %v10672_v29, %v4337_v25  ;;  %v4342_v18 = vsel %vm2551_vm11, %v10728_v41, %v4341_v28  ;;  %7306 = vmatprep.subr.bf16.mxu1 %v12320_v19 }
 0x3dc   :  { %v4306_v52 = vsel %vm2547_vm7, %v10798_v24, %v10796_v38  ;;  %v4387_v21 = vsel %vm2559_vm15, %v10798_v24, %v4386_v13  ;;  %v4339_v63 = vsel %vm2559_vm15, %v10674_v48, %v4338_v26  ;;  %v4343_v42 = vsel %vm2553_vm12, %v10733_v59, %v4342_v18 }
 0x3dd   :  { %v4307_v20 = vsel %vm2549_vm10, %v10804_v57, %v4306_v52  ;;  %v4458_v10 = vpack.c.bf16 %v4387_v21, %v4380_v40  ;;  %v4344_v41 = vsel %vm2555_vm13, %v10748_v16, %v4343_v42  ;;  %v4313_v15 = vsel %vm2547_vm7, %v10784_v39, %v10778_v9 }
 0x3de   :  { %v4308_v11 = vsel %vm2551_vm11, %v10834_v53, %v4307_v20  ;;  %v4345_v0 = vsel %vm2557_vm14, %v10794_v56, %v4344_v41  ;;  %v4314_v50 = vsel %vm2549_vm10, %v10788_v45, %v4313_v15  ;;  %v4265_v22 = vsel %vm2547_vm7, %v10796_v38, %v10794_v56  ;;  %7307 = vmatpush3.bf16.msra.mxu1 %v7494_v54  ;;  %v7496_v20 = vld [vmem:[%s11936_s5 + $0x120] sm:$0xff]  }
 0x3df   :  { %v4309_v37 = vsel %vm2553_vm12, %v10838_v2, %v4308_v11  ;;  %4885 = vmatprep.mubr.bf16.mxu0 %v4458_v10  ;;  %v4346_v35 = vsel %vm2559_vm15, %v10796_v38, %v4345_v0  ;;  %v4315_v58 = vsel %vm2551_vm11, %v10809_v1, %v4314_v50  ;;  %v4266_v6 = vsel %vm2549_vm10, %v10798_v24, %v4265_v22 }
 0x3e0   :  { %v4310_v34 = vsel %vm2555_vm13, %v10844_v8, %v4309_v37  ;;  %v4457_v31 = vpack.c.bf16 %v4346_v35, %v4339_v63  ;;  %v4316_v44 = vsel %vm2553_vm12, %v10811_v51, %v4315_v58  ;;  %v4267_v46 = vsel %vm2551_vm11, %v10804_v57, %v4266_v6  ;;  %7308 = vmatprep.subr.bf16.mxu1 %v12320_v19 }
 0x3e1   :  { %v4311_v12 = vsel %vm2557_vm14, %v10858_v4, %v4310_v34  ;;  %v4317_v40 = vsel %vm2555_vm13, %v10814_v62, %v4316_v44  ;;  %v4268_v23 = vsel %vm2553_vm12, %v10834_v53, %v4267_v46  ;;  %v4272_v25 = vsel %vm2547_vm7, %v10778_v9, %v10773_v33  ;;  %v7497_v46 = vld [vmem:[%s11936_s5 + $0x128] sm:$0xff]  }
 0x3e2   :  { %v4312_v28 = vsel %vm2559_vm15, %v10773_v33, %v4311_v12  ;;  %4886 = vmatmul.mubr.bf16.vlgmr.msra.gmra.mrb[72].mxu0 %v4457_v31  ;;  %v4318_v54 = vsel %vm2557_vm14, %v10824_v3, %v4317_v40  ;;  %v4269_v13 = vsel %vm2555_vm13, %v10838_v2, %v4268_v23  ;;  %v4273_v26 = vsel %vm2549_vm10, %v10784_v39, %v4272_v25 }
 0x3e3   :  { %v4388_v18 = vsel %vm2547_vm7, %v10834_v53, %v10804_v57  ;;  %v4319_v52 = vsel %vm2559_vm15, %v10940_v30, %v4318_v54  ;;  %v4270_v21 = vsel %vm2557_vm14, %v10844_v8, %v4269_v13  ;;  %v4274_v63 = vsel %vm2551_vm11, %v10788_v45, %v4273_v26  ;;  %7309 = vmatpush3.bf16.msra.mxu1 %v7495_v17 }
 0x3e4   :  { %v4389_v42 = vsel %vm2549_vm10, %v10838_v2, %v4388_v18  ;;  %v4461_v10 = vpack.c.bf16 %v4319_v52, %v4312_v28  ;;  %v4271_v41 = vsel %vm2559_vm15, %v10858_v4, %v4270_v21  ;;  %v4275_v11 = vsel %vm2553_vm12, %v10809_v1, %v4274_v63  ;;  %7310 = vmatprep.subr.bf16.mxu1 %v12320_v19 }
 0x3e5   :  { %v4390_v15 = vsel %vm2551_vm11, %v10844_v8, %v4389_v42  ;;  %v4276_v0 = vsel %vm2555_vm13, %v10811_v51, %v4275_v11  ;;  %v4395_v50 = vsel %vm2547_vm7, %v10809_v1, %v10788_v45  ;;  %v4347_v22 = vsel %vm2547_vm7, %v10804_v57, %v10798_v24 }
 0x3e6   :  { %v4391_v37 = vsel %vm2553_vm12, %v10858_v4, %v4390_v15  ;;  %4837 = vmatprep.mubr.bf16.mxu1 %v4461_v10  ;;  %v4277_v35 = vsel %vm2557_vm14, %v10814_v62, %v4276_v0  ;;  %v4396_v58 = vsel %vm2549_vm10, %v10811_v51, %v4395_v50  ;;  %v4348_v6 = vsel %vm2549_vm10, %v10834_v53, %v4347_v22  ;;  %v7498_v15 = vld [vmem:[%s11936_s5 + $0x130] sm:$0xff]  }
 0x3e7   :  { %v4392_v34 = vsel %vm2555_vm13, %v10773_v33, %v4391_v37  ;;  %v4278_v17 = vsel %vm2559_vm15, %v10824_v3, %v4277_v35  ;;  %v4397_v12 = vsel %vm2551_vm11, %v10814_v62, %v4396_v58  ;;  %v4349_v44 = vsel %vm2551_vm11, %v10838_v2, %v4348_v6  ;;  %7311 = vmatpush3.bf16.msra.mxu1 %v7496_v20  ;;  %v12322_v6 = vld [vmem:[#allocation45_spill] sm:$0xff] }
 0x3e8   :  { %v4393_v31 = vsel %vm2557_vm14, %v10778_v9, %v4392_v34  ;;  %v4460_v28 = vpack.c.bf16 %v4278_v17, %v4271_v41  ;;  %v4398_v23 = vsel %vm2553_vm12, %v10824_v3, %v4397_v12  ;;  %v4350_v25 = vsel %vm2553_vm12, %v10844_v8, %v4349_v44  ;;  %7312 = vmatprep.subr.bf16.mxu1 %v12320_v19 }
 0x3e9   :  { %v4394_v40 = vsel %vm2559_vm15, %v10784_v39, %v4393_v31  ;;  %v4399_v54 = vsel %vm2555_vm13, %v10940_v30, %v4398_v23  ;;  %v4351_v13 = vsel %vm2555_vm13, %v10858_v4, %v4350_v25  ;;  %v4354_v26 = vsel %vm2547_vm7, %v10788_v45, %v10784_v39 }
 0x3ea   :  { %v12321_v18 = vrot.slane %v10927_v27, 1  ;;  %4838 = vmatmul.mubr.bf16.gmra.mrb[112].mxu1 %v4460_v28  ;;  %v4400_v21 = vsel %vm2557_vm14, %v10945_v5, %v4399_v54  ;;  %v4352_v63 = vsel %vm2557_vm14, %v10773_v33, %v4351_v13  ;;  %v4355_v42 = vsel %vm2549_vm10, %v10809_v1, %v4354_v26  ;;  %v12324_v28 = vld [vmem:[#allocation24_spill] sm:$0xff] }
 0x3eb   :  { %v4320_v20 = vsel %vm2547_vm7, %v10947_v60, %v10945_v5  ;;  %v4401_v10 = vsel %vm2559_vm15, %v10947_v60, %v4400_v21  ;;  %v4356_v41 = vsel %vm2551_vm11, %v10811_v51, %v4355_v42  ;;  %7313 = vmatpush3.bf16.msra.mxu1 %v7497_v46  ;;  %v4279_v22 = vsel %vm2547_vm7, %v10945_v5, %v10940_v30  ;;  %v7499_v26 = vld [vmem:[%s11936_s5 + $0x138] sm:$0xff]  }
 0x3ec   :  { %v11136_v52 = vmax.f32 %v10927_v27, %v12321_v18  ;;  %v4353_v27 = vsel %vm2559_vm15, %v10778_v9, %v4352_v63  ;;  %v4321_v11 = vsel %vm2549_vm10, %v10951_v32, %v4320_v20  ;;  %v4463_v0 = vpack.c.bf16 %v4401_v10, %v4394_v40  ;;  %7314 = vmatprep.subr.bf16.mxu1 %v12320_v19 }
 0x3ed   :  { %v4357_v37 = vsel %vm2553_vm12, %v10814_v62, %v4356_v41  ;;  %v4322_v50 = vsel %vm2551_vm11, %v10962_v47, %v4321_v11  ;;  %v4280_v58 = vsel %vm2549_vm10, %v10947_v60, %v4279_v22  ;;  %v12323_v17 = vrot.slane %v12322_v6, 2 }
 0x3ee   :  { %v4358_v35 = vsel %vm2555_vm13, %v10824_v3, %v4357_v37  ;;  %v4323_v34 = vsel %vm2553_vm12, %v10977_v14, %v4322_v50  ;;  %4893 = vmatprep.mubr.bf16.mxu0 %v4463_v0  ;;  %v4281_v46 = vsel %vm2551_vm11, %v10951_v32, %v4280_v58  ;;  %v4200_v40 = vrot.slane %v12324_v28, 2 }
 0x3ef   :  { %v4194_v31 = vmax.f32 %v12322_v6, %v12323_v17  ;;  %v4359_v12 = vsel %vm2557_vm14, %v10940_v30, %v4358_v35  ;;  %v4324_v44 = vsel %vm2555_vm13, %v10979_v7, %v4323_v34  ;;  %v4282_v54 = vsel %vm2553_vm12, %v10962_v47, %v4281_v46  ;;  %7315 = vmatpush3.bf16.msra.mxu1 %v7498_v15  ;;  %v12325_v17 = vld [vmem:[#allocation46_spill] sm:$0xff] }
 0x3f0   :  { %v4360_v23 = vsel %vm2559_vm15, %v10945_v5, %v4359_v12  ;;  %v4325_v25 = vsel %vm2557_vm14, %v10991_v49, %v4324_v44  ;;  %v4283_v63 = vsel %vm2555_vm13, %v10977_v14, %v4282_v54  ;;  %v4201_v42 = vmax.f32 %v12324_v28, %v4200_v40  ;;  %7316 = vmatprep.subr.bf16.mxu1 %v12320_v19  ;;  %v12326_v28 = vld [vmem:[#allocation12_spill] sm:$0xff] }
 0x3f1   :  { %v4195_v13 = vrot.slane %v4194_v31, 1  ;;  %v4462_v18 = vpack.c.bf16 %v4360_v23, %v4353_v27  ;;  %v4326_v21 = vsel %vm2559_vm15, %v11136_v52, %v4325_v25  ;;  %v4284_v10 = vsel %vm2557_vm14, %v10979_v7, %v4283_v63 }
 0x3f2   :  { %v4466_v20 = vpack.c.bf16 %v4326_v21, %v4326_v21  ;;  %v4402_v27 = vsel %vm2547_vm7, %v10962_v47, %v10951_v32  ;;  %v4285_v11 = vsel %vm2559_vm15, %v10991_v49, %v4284_v10  ;;  %v4202_v15 = vrot.slane %v4201_v42, 1  ;;  %v12327_v10 = vld [vmem:[#allocation38_spill] sm:$0xff] }
 0x3f3   :  { %v11199_v41 = vmax.f32 %v4194_v31, %v4195_v13  ;;  %4894 = vmatmul.mubr.bf16.gmra.mrb[76].mxu0 %v4462_v18  ;;  %v4403_v0 = vsel %vm2549_vm10, %v10977_v14, %v4402_v27  ;;  %v4361_v37 = vsel %vm2547_vm7, %v10951_v32, %v10947_v60  ;;  %v4465_v50 = vpack.c.bf16 %v4285_v11, %v4285_v11 }
 0x3f4   :  { %4845 = vmatprep.mubr.bf16.mxu1 %v4466_v20  ;;  %v4404_v22 = vsel %vm2551_vm11, %v10979_v7, %v4403_v0  ;;  %v4362_v35 = vsel %vm2549_vm10, %v10962_v47, %v4361_v37  ;;  %7317 = vmatpush3.bf16.msra.mxu1 %v7499_v26  ;;  %v4203_v34 = vmax.f32 %v4201_v42, %v4202_v15 }
 0x3f5   :  { %v4405_v58 = vsel %vm2553_vm12, %v10991_v49, %v4404_v22  ;;  %v4363_v6 = vsel %vm2551_vm11, %v10977_v14, %v4362_v35  ;;  %v4416_v31 = vsel %vm2549_vm10, %v10756_v36, %v12325_v17  ;;  %4846 = vmatmul.mubr.bf16.gmra.mrb[116].mxu1 %v4465_v50  ;;  %v4423_v40 = vsel %vm2549_vm10, %v10733_v59, %v12326_v28  ;;  %v7508_v22 = vld [vmem:[%s11938_s7 + $0x24] ss:$8 sps:$4 sm:$0xff]   ;;  %v7506_v35 = vld [vmem:[%s11938_s7 + $0x20] ss:$8 sps:$4 sm:$0xff]   ;;  %v7523_v28 = vld [vmem:[%s11938_s7 + $0x74] ss:$8 sps:$4 sm:$0xff]  }
 0x3f6   :  { %v4406_v12 = vsel %vm2555_vm13, %v11136_v52, %v4405_v58  ;;  %v4364_v44 = vsel %vm2553_vm12, %v10979_v7, %v4363_v6  ;;  %v4417_v46 = vsel %vm2551_vm11, %v10770_v55, %v4416_v31  ;;  %7318 = vmatprep.mubr.msk.bf16.mxu1 %vm7763_vm8, %v12320_v19  ;;  %v4424_v55 = vsel %vm2551_vm11, %v10748_v16, %v4423_v40  ;;  %v7509_v58 = vld [vmem:[%s11938_s7 + $0x30] ss:$8 sps:$4 sm:$0xff]   ;;  %v7514_v6 = vld [vmem:[%s11938_s7 + $0x44] ss:$8 sps:$4 sm:$0xff]   ;;  %v7512_v17 = vld [vmem:[%s11938_s7 + $0x40] ss:$8 sps:$4 sm:$0xff]  }
 0x3f7   :  { %v4407_v23 = vsel %vm2557_vm14, %v11199_v41, %v4406_v12  ;;  %v4365_v36 = vsel %vm2555_vm13, %v10991_v49, %v4364_v44  ;;  %v4418_v25 = vsel %vm2553_vm12, %v10672_v29, %v4417_v46  ;;  %v4425_v26 = vsel %vm2553_vm12, %v10794_v56, %v4424_v55  ;;  %v7517_v31 = vld [vmem:[%s11938_s7 + $0x54] ss:$8 sps:$4 sm:$0xff]   ;;  %v7515_v12 = vld [vmem:[%s11938_s7 + $0x50] ss:$8 sps:$4 sm:$0xff]   ;;  %v7520_v44 = vld [vmem:[%s11938_s7 + $0x64] ss:$8 sps:$4 sm:$0xff]  }
 0x3f8   :  { %v4408_v54 = vsel %vm2559_vm15, %v4203_v34, %v4407_v23  ;;  %v4366_v59 = vsel %vm2557_vm14, %v11136_v52, %v4365_v36  ;;  %v4419_v13 = vsel %vm2555_vm13, %v10674_v48, %v4418_v25  ;;  %v4426_v16 = vsel %vm2555_vm13, %v10796_v38, %v4425_v26  ;;  %v7518_v46 = vld [vmem:[%s11938_s7 + $0x60] ss:$8 sps:$4 sm:$0xff]   ;;  %v7521_v40 = vld [vmem:[%s11938_s7 + $0x70] ss:$8 sps:$4 sm:$0xff]   ;;  %v7526_v23 = vld [vmem:[%s11938_s7 + $0x84] ss:$8 sps:$4 sm:$0xff]  }
 0x3f9   :  { %v4468_v18 = vpack.c.bf16 %v4408_v54, %v4408_v54  ;;  %v4367_v21 = vsel %vm2559_vm15, %v11199_v41, %v4366_v59  ;;  %v4420_v29 = vsel %vm2557_vm14, %v10679_v43, %v4419_v13  ;;  %v4427_v48 = vsel %vm2557_vm14, %v10798_v24, %v4426_v16  ;;  %v7524_v36 = vld [vmem:[%s11938_s7 + $0x80] ss:$8 sps:$4 sm:$0xff]   ;;  %v7529_v25 = vld [vmem:[%s11938_s7 + $0x94] ss:$8 sps:$4 sm:$0xff]   ;;  %v7527_v55 = vld [vmem:[%s11938_s7 + $0x90] ss:$8 sps:$4 sm:$0xff]  }
 0x3fa   :  { %v4467_v63 = vpack.c.bf16 %v4367_v21, %v4367_v21  ;;  %v4421_v42 = vsel %vm2559_vm15, %v10698_v61, %v4420_v29  ;;  %v4429_v56 = vsel %vm2547_vm7, %v10838_v2, %v10834_v53  ;;  %v4428_v20 = vsel %vm2559_vm15, %v10804_v57, %v4427_v48  ;;  %v7532_v54 = vld [vmem:[%s11938_s7 + $0xa4] ss:$8 sps:$4 sm:$0xff]   ;;  %v7530_v59 = vld [vmem:[%s11938_s7 + $0xa0] ss:$8 sps:$4 sm:$0xff]   ;;  %v7535_v13 = vld [vmem:[%s11938_s7 + $0xb4] ss:$8 sps:$4 sm:$0xff]  }
 0x3fb   :  { %4901 = vmatprep.mubr.bf16.mxu0 %v4468_v18  ;;  %v4430_v43 = vsel %vm2549_vm10, %v10844_v8, %v4429_v56  ;;  %v4436_v38 = vsel %vm2547_vm7, %v10811_v51, %v10809_v1  ;;  %v12328_v61 = vrot.slane %v12327_v10, 4  ;;  %v4459_v24 = vpack.c.bf16 %v4428_v20, %v4421_v42  ;;  %v7533_v26 = vld [vmem:[%s11938_s7 + $0xb0] ss:$8 sps:$4 sm:$0xff]   ;;  %v7538_v18 = vld [vmem:[%s11938_s7 + $0xc4] ss:$8 sps:$4 sm:$0xff]  }
 0x3fc   :  { %4902 = vmatmul.mubr.bf16.gmra.mrb[80].mxu0 %v4467_v63  ;;  %v4431_v53 = vsel %vm2551_vm11, %v10858_v4, %v4430_v43  ;;  %v4437_v2 = vsel %vm2549_vm10, %v10814_v62, %v4436_v38  ;;  %v4443_v57 = vsel %vm2547_vm7, %v10977_v14, %v10962_v47  ;;  %v7536_v21 = vld [vmem:[%s11938_s7 + $0xc0] ss:$8 sps:$4 sm:$0xff]   ;;  %v7541_v29 = vld [vmem:[%s11938_s7 + $0xd4] ss:$8 sps:$4 sm:$0xff]   ;;  %v7539_v16 = vld [vmem:[%s11938_s7 + $0xd0] ss:$8 sps:$4 sm:$0xff]  }
 0x3fd   :  { %v4206_v27 = vmax.f32 %v12327_v10, %v12328_v61  ;;  %v4432_v8 = vsel %vm2553_vm12, %v10773_v33, %v4431_v53  ;;  %v4438_v1 = vsel %vm2551_vm11, %v10824_v3, %v4437_v2  ;;  %v4444_v11 = vsel %vm2549_vm10, %v10979_v7, %v4443_v57  ;;  %7319 = vmatmul.mubr.bf16.vlgmr.msra.gmra.mrb[120].mxu1 %v4459_v24  ;;  %v7544_v63 = vld [vmem:[%s11938_s7 + $0xe4] ss:$8 sps:$4 sm:$0xff]   ;;  %v7542_v42 = vld [vmem:[%s11938_s7 + $0xe0] ss:$8 sps:$4 sm:$0xff]   ;;  %v7547_v48 = vld [vmem:[%s11938_s7 + $0xf4] ss:$8 sps:$4 sm:$0xff]  }
 0x3fe   :  { %v4433_v4 = vsel %vm2555_vm13, %v10778_v9, %v4432_v8  ;;  %v4439_v62 = vsel %vm2553_vm12, %v10940_v30, %v4438_v1  ;;  %v4445_v47 = vsel %vm2551_vm11, %v10991_v49, %v4444_v11  ;;  %7322 = vmatprep.mubr.msk.bf16.mxu1 %vm7763_vm8, %v12320_v19  ;;  %v7545_v56 = vld [vmem:[%s11938_s7 + $0xf0] ss:$8 sps:$4 sm:$0xff]   ;;  %v7550_v20 = vld [vmem:[%s11938_s7 + $0x104] ss:$8 sps:$4 sm:$0xff]   ;;  %v6668_v53 = vld [vmem:[%s11937_s6] ss:$0 sm:$0xff] }
 0x3ff   :  { %v4207_v51 = vrot.slane %v4206_v27, 2  ;;  %v4434_v33 = vsel %vm2557_vm14, %v10784_v39, %v4433_v4  ;;  %v4440_v3 = vsel %vm2555_vm13, %v10945_v5, %v4439_v62  ;;  %v4446_v7 = vsel %vm2553_vm12, %v11136_v52, %v4445_v47  ;;  %v7505_v52 = vld [vmem:[%s11938_s7 + $0x14] ss:$8 sps:$4 sm:$0xff]  }
 0x400   :  { %v4435_v9 = vsel %vm2559_vm15, %v10788_v45, %v4434_v33  ;;  %v4441_v30 = vsel %vm2557_vm14, %v10947_v60, %v4440_v3  ;;  %v4447_v49 = vsel %vm2555_vm13, %v11199_v41, %v4446_v7  ;;  %v7500_v60 = vld [vmem:[%s11938_s7] ss:$8 sps:$4 sm:$0xff]   ;;  %v7503_v41 = vld [vmem:[%s11938_s7 + $0x10] ss:$8 sps:$4 sm:$0xff]  }
 0x401   :  { %v4208_v14 = vmax.f32 %v4206_v27, %v4207_v51  ;;  %v4442_v15 = vsel %vm2559_vm15, %v10951_v32, %v4441_v30  ;;  %v4448_v0 = vsel %vm2557_vm14, %v4203_v34, %v4447_v49  ;;  %v7502_v32 = vld [vmem:[%s11938_s7 + $0x4] ss:$8 sps:$4 sm:$0xff]   ;;  %v7511_v34 = vld [vmem:[%s11938_s7 + $0x34] ss:$8 sps:$4 sm:$0xff]  }
 0x402   :  { %v4464_v5 = vpack.c.bf16 %v4442_v15, %v4435_v9  ;;  %5842 = vmatprep.subr.bf16.mxu0 %v7502_v32 }
 0x403   :  { %v4209_v39 = vrot.slane %v4208_v14, 1  ;;  %5843 = vmatpush1.bf16.msra.mxu0 %v7500_v60 }
 0x404   :  { %5844 = vmatprep.subr.bf16.mxu0 %v7505_v52 }
 0x405   :  { %v4210_v37 = vmax.f32 %v4208_v14, %v4209_v39  ;;  %7323 = vmatmul.mubr.bf16.gmra.mrb[124].mxu1 %v4464_v5 }
 0x406   :  { %7326 = vmatprep.mubr.msk.bf16.mxu1 %vm7763_vm8, %v12320_v19 }
 0x407   :  { %v4449_v50 = vsel %vm2559_vm15, %v4210_v37, %v4448_v0  ;;  %5845 = vmatpush1.bf16.msra.mxu0 %v7503_v41 }
 0x408   :  { %v4469_v45 = vpack.c.bf16 %v4449_v50, %v4449_v50  ;;  %5846 = vmatprep.subr.bf16.mxu0 %v7508_v22 }
 0x40b   :  { %5847 = vmatpush1.bf16.msra.mxu0 %v7506_v35 }
 0x40c   :  { %5848 = vmatprep.subr.bf16.mxu0 %v7511_v34 }
 0x40d   :  { %7327 = vmatmul.mubr.bf16.gmra.mrb[128].mxu1 %v4469_v45 }
 0x40f   :  { %5849 = vmatpush1.bf16.msra.mxu0 %v7509_v58 }
 0x410   :  { %5850 = vmatprep.subr.bf16.mxu0 %v7514_v6 }
 0x413   :  { %5851 = vmatpush1.bf16.msra.mxu0 %v7512_v17 }
 0x414   :  { %5852 = vmatprep.subr.bf16.mxu0 %v7517_v31 }
 0x417   :  { %5853 = vmatpush1.bf16.msra.mxu0 %v7515_v12 }
 0x418   :  { %5854 = vmatprep.subr.bf16.mxu0 %v7520_v44 }
 0x41b   :  { %5855 = vmatpush1.bf16.msra.mxu0 %v7518_v46 }
 0x41c   :  { %5856 = vmatprep.subr.bf16.mxu0 %v7523_v28 }
 0x41f   :  { %5857 = vmatpush1.bf16.msra.mxu0 %v7521_v40 }
 0x420   :  { %5858 = vmatprep.subr.bf16.mxu0 %v7526_v23 }
 0x423   :  { %5859 = vmatpush1.bf16.msra.mxu0 %v7524_v36 }
 0x424   :  { %5860 = vmatprep.subr.bf16.mxu0 %v7529_v25 }
 0x427   :  { %5861 = vmatpush1.bf16.msra.mxu0 %v7527_v55 }
 0x428   :  { %5862 = vmatprep.subr.bf16.mxu0 %v7532_v54 }
 0x42b   :  { %5863 = vmatpush1.bf16.msra.mxu0 %v7530_v59 }
 0x42c   :  { %5864 = vmatprep.subr.bf16.mxu0 %v7535_v13 }
 0x42f   :  { %5865 = vmatpush1.bf16.msra.mxu0 %v7533_v26 }
 0x430   :  { %5866 = vmatprep.subr.bf16.mxu0 %v7538_v18 }
 0x433   :  { %5867 = vmatpush1.bf16.msra.mxu0 %v7536_v21 }
 0x434   :  { %5868 = vmatprep.subr.bf16.mxu0 %v7541_v29 }
 0x437   :  { %5869 = vmatpush1.bf16.msra.mxu0 %v7539_v16 }
 0x438   :  { %5870 = vmatprep.subr.bf16.mxu0 %v7544_v63 }
 0x43b   :  { %5871 = vmatpush1.bf16.msra.mxu0 %v7542_v42 }
 0x43c   :  { %5872 = vmatprep.subr.bf16.mxu0 %v7547_v48 }
 0x43f   :  { %5873 = vmatpush1.bf16.msra.mxu0 %v7545_v56 }
 0x440   :  { %5885 = vmatprep.subr.bf16.mxu0 %v7550_v20 }
 0x4a8   :  { %v7147_v43 = vpop.f32.mrb[108].mxu1 }
 0x4a9   :  { %v7148_v38 = vpop.f32.mrb[109].mxu1 }
 0x4aa   :  { %v7149_v10 = vadd.f32 %v7148_v38, %v7147_v43  ;;  %v7150_v61 = vpop.f32.mrb[110].mxu1 }
 0x4ab   :  { %v7151_v27 = vpop.f32.mrb[111].mxu1 }
 0x4ac   :  { %v7152_v24 = vadd.f32 %v7151_v27, %v7150_v61  ;;  %v4832_v2 = vadd.f32 %v7149_v10, %v6668_v53 }
 0x4ae   :  { %v4835_v1 = vadd.f32 %v7152_v24, %v6668_v53 }
 0x4b5   :  { %v7181_v57 = vpop.f32.mrb[72].mxu0 }
 0x4b6   :  { %v7182_v8 = vpop.f32.mrb[73].mxu0 }
 0x4b7   :  { %v7183_v51 = vadd.f32 %v7182_v8, %v7181_v57  ;;  %v7184_v11 = vpop.f32.mrb[74].mxu0 }
 0x4b8   :  { %v7185_v4 = vpop.f32.mrb[75].mxu0 }
 0x4b9   :  { %v7186_v62 = vadd.f32 %v7185_v4, %v7184_v11  ;;  %v4888_v47 = vadd.f32 %v7183_v51, %v4832_v2 }
 0x4bb   :  { %v4891_v33 = vadd.f32 %v7186_v62, %v4835_v1  ;;  %v12329_v62 = vld [vmem:[#allocation17_spill] sm:$0xff] }
 0x4bd   :  { %v7153_v3 = vpop.f32.mrb[112].mxu1 }
 0x4be   :  { %v7154_v14 = vpop.f32.mrb[113].mxu1 }
 0x4bf   :  { %v7155_v7 = vadd.f32 %v7154_v14, %v7153_v3  ;;  %v7156_v9 = vpop.f32.mrb[114].mxu1 }
 0x4c0   :  { %v7157_v30 = vpop.f32.mrb[115].mxu1 }
 0x4c1   :  { %v7158_v49 = vadd.f32 %v7157_v30, %v7156_v9  ;;  %v4840_v15 = vadd.f32 %v7155_v7, %v6668_v53 }
 0x4c3   :  { %v4843_v5 = vadd.f32 %v7158_v49, %v6668_v53 }
 0x4c6   :  { %v7187_v39 = vpop.f32.mrb[76].mxu0 }
 0x4c7   :  { %v7188_v0 = vpop.f32.mrb[77].mxu0 }
 0x4c8   :  { %v7189_v37 = vadd.f32 %v7188_v0, %v7187_v39  ;;  %v7190_v50 = vpop.f32.mrb[78].mxu0  ;;  %v7159_v60 = vpop.f32.mrb[116].mxu1 }
 0x4c9   :  { %v7191_v45 = vpop.f32.mrb[79].mxu0  ;;  %v7160_v52 = vpop.f32.mrb[117].mxu1 }
 0x4ca   :  { %v7192_v32 = vadd.f32 %v7191_v45, %v7190_v50  ;;  %v4896_v41 = vadd.f32 %v7189_v37, %v4840_v15  ;;  %v7161_v22 = vadd.f32 %v7160_v52, %v7159_v60  ;;  %v7162_v35 = vpop.f32.mrb[118].mxu1 }
 0x4cb   :  { %v7163_v34 = vpop.f32.mrb[119].mxu1 }
 0x4cc   :  { %v4899_v58 = vadd.f32 %v7192_v32, %v4843_v5  ;;  %v4848_v6 = vadd.f32 %v7161_v22, %v6668_v53 }
 0x4cf   :  { %v7193_v17 = vpop.f32.mrb[80].mxu0 }
 0x4d0   :  { %v7194_v31 = vpop.f32.mrb[81].mxu0  ;;  %v4943_v46 = vpop.f32.mrb[120].mxu1 }
 0x4d1   :  { %v7195_v12 = vadd.f32 %v7194_v31, %v7193_v17  ;;  %v7196_v44 = vpop.f32.mrb[82].mxu0  ;;  %v4944_v40 = vadd.f32 %v4943_v46, %v4888_v47  ;;  %v7320_v23 = vpop.f32.mrb[121].mxu1 }
 0x4d2   :  { %v7197_v28 = vpop.f32.mrb[83].mxu0  ;;  %v4946_v36 = vpop.f32.mrb[122].mxu1 }
 0x4d3   :  { %v4904_v25 = vadd.f32 %v7195_v12, %v4848_v6  ;;  %v4970_v55 = vmin.f32 %v4944_v40, 0.0  ;;  %v4947_v54 = vadd.f32 %v4946_v36, %v4891_v33  ;;  %v7321_v59 = vpop.f32.mrb[123].mxu1  ;;  %vm4965_vm9 = vcmp.gt.f32.partialorder %v4944_v40, 0.0 }
 0x4d5   :  { %v4975_v13 = vmul.f32 1.442695, %v4970_v55  ;;  %v4971_v26 = vmin.f32 %v4947_v54, 0.0  ;;  %vm4966_vm1 = vcmp.gt.f32.partialorder %v4947_v54, 0.0 }
 0x4d7   :  { %7715 = vpow2.f32 %v4975_v13  ;;  %v4977_v18 = vmul.f32 1.442695, %v4971_v26 }
 0x4d8   :  { %v4951_v21 = vpop.f32.mrb[124].mxu1 }
 0x4d9   :  { %7717 = vpow2.f32 %v4977_v18  ;;  %v11412_v29 = vadd.f32 %v4951_v21, %v4896_v41  ;;  %v7324_v16 = vpop.f32.mrb[125].mxu1 }
 0x4da   :  { %v4954_v63 = vpop.f32.mrb[126].mxu1 }
 0x4db   :  { %v11414_v42 = vadd.f32 %v4954_v63, %v4899_v58  ;;  %v7325_v48 = vpop.f32.mrb[127].mxu1  ;;  %v4972_v56 = vmin.f32 %v11412_v29, 0.0  ;;  %vm4967_vm2 = vcmp.gt.f32.partialorder %v11412_v29, 0.0 }
 0x4dd   :  { %v4973_v20 = vmin.f32 %v11414_v42, 0.0  ;;  %v4979_v10 = vmul.f32 1.442695, %v4972_v56  ;;  %vm4968_vm3 = vcmp.gt.f32.partialorder %v11414_v42, 0.0 }
 0x4df   :  { %v4981_v53 = vmul.f32 1.442695, %v4973_v20  ;;  %7719 = vpow2.f32 %v4979_v10 }
 0x4e0   :  { %v4959_v43 = vpop.f32.mrb[128].mxu1 }
 0x4e1   :  { %v7716_v38 = vpop.eup %7715  ;;  %v11418_v61 = vadd.f32 %v4959_v43, %v4904_v25  ;;  %v7328_v27 = vpop.f32.mrb[129].mxu1  ;;  %7721 = vpow2.f32 %v4981_v53 }
 0x4e2   :  { %v6709_v24 = vadd.f32 -1.0, %v7716_v38  ;;  %v4962_v2 = vpop.f32.mrb[130].mxu1 }
 0x4e3   :  { %v7718_v57 = vpop.eup %7717  ;;  %v4974_v8 = vmin.f32 %v11418_v61, 0.0  ;;  %v7329_v1 = vpop.f32.mrb[131].mxu1  ;;  %vm4969_vm4 = vcmp.gt.f32.partialorder %v11418_v61, 0.0 }
 0x4e4   :  { %v4990_v51 = vsel %vm4965_vm9, %v4944_v40, %v6709_v24  ;;  %v6710_v11 = vadd.f32 -1.0, %v7718_v57 }
 0x4e5   :  { %v5000_v4 = vcombine.high %v4990_v51, %v4990_v51  ;;  %v5007_v47 = vrot.slane %v4990_v51, %v12329_v62  ;;  %v4983_v33 = vmul.f32 1.442695, %v4974_v8 }
 0x4e6   :  { %v4991_v3 = vsel %vm4966_vm1, %v4947_v54, %v6710_v11 }
 0x4e7   :  { %v5014_v14 = vrot.slane %v5000_v4, %v12329_v62  ;;  %v5015_v7 = vcombine.high %v5007_v47, %v5007_v47  ;;  %v5105_v9 = vsel %vm1814_vm5, %v5007_v47, -inf  ;;  %v5017_v30 = vcombine.high %v4991_v3, %v4991_v3 }
 0x4e8   :  { %v5106_v49 = vrot.slane %v5105_v9, 4  ;;  %v5024_v15 = vrot.slane %v4991_v3, %v12329_v62  ;;  %7723 = vpow2.f32 %v4983_v33 }
 0x4e9   :  { %v5016_v39 = vcombine.high %v5014_v14, %v5014_v14  ;;  %v5112_v0 = vsel %vm1814_vm5, %v5015_v7, -inf  ;;  %v5119_v5 = vsel %vm1814_vm5, %v5014_v14, -inf  ;;  %v5031_v37 = vrot.slane %v5017_v30, %v12329_v62  ;;  %v7720_v25 = vpop.eup %7719 }
 0x4ea   :  { %v5107_v50 = vmax.f32 %v5105_v9, %v5106_v49  ;;  %v5113_v45 = vrot.slane %v5112_v0, 4  ;;  %v5120_v60 = vrot.slane %v5119_v5, 4  ;;  %v5032_v32 = vcombine.high %v5024_v15, %v5024_v15 }
 0x4eb   :  { %v5126_v52 = vsel %vm1814_vm5, %v5016_v39, -inf  ;;  %v5033_v41 = vcombine.high %v5031_v37, %v5031_v37  ;;  %v5133_v22 = vsel %vm1814_vm5, %v5024_v15, -inf  ;;  %v5147_v35 = vsel %vm1814_vm5, %v5031_v37, -inf  ;;  %v7722_v26 = vpop.eup %7721 }
 0x4ec   :  { %v5108_v34 = vrot.slane %v5107_v50, 2  ;;  %v5114_v58 = vmax.f32 %v5112_v0, %v5113_v45  ;;  %v5121_v6 = vmax.f32 %v5119_v5, %v5120_v60  ;;  %v5127_v17 = vrot.slane %v5126_v52, 4 }
 0x4ed   :  { %v5134_v31 = vrot.slane %v5133_v22, 4  ;;  %v5140_v12 = vsel %vm1814_vm5, %v5032_v32, -inf  ;;  %v5148_v44 = vrot.slane %v5147_v35, 4  ;;  %v5154_v46 = vsel %vm1814_vm5, %v5033_v41, -inf }
 0x4ee   :  { %v5109_v28 = vmax.f32 %v5107_v50, %v5108_v34  ;;  %v5115_v40 = vrot.slane %v5114_v58, 2  ;;  %v5122_v23 = vrot.slane %v5121_v6, 2  ;;  %v5128_v36 = vmax.f32 %v5126_v52, %v5127_v17 }
 0x4ef   :  { %v5135_v55 = vmax.f32 %v5133_v22, %v5134_v31  ;;  %v5141_v54 = vrot.slane %v5140_v12, 4  ;;  %v5149_v59 = vmax.f32 %v5147_v35, %v5148_v44  ;;  %v5155_v13 = vrot.slane %v5154_v46, 4 }
 0x4f0   :  { %v5110_v18 = vrot.slane %v5109_v28, 1  ;;  %v5116_v21 = vmax.f32 %v5114_v58, %v5115_v40  ;;  %v5123_v16 = vmax.f32 %v5121_v6, %v5122_v23  ;;  %v5129_v63 = vrot.slane %v5128_v36, 2 }
 0x4f1   :  { %v5136_v48 = vrot.slane %v5135_v55, 2  ;;  %v5142_v56 = vmax.f32 %v5140_v12, %v5141_v54  ;;  %v5150_v20 = vrot.slane %v5149_v59, 2  ;;  %v5156_v43 = vmax.f32 %v5154_v46, %v5155_v13 }
 0x4f2   :  { %v7724_v38 = vpop.eup %7723  ;;  %v5111_v10 = vmax.f32 %v5109_v28, %v5110_v18  ;;  %v5117_v27 = vrot.slane %v5116_v21, 1  ;;  %v5124_v24 = vrot.slane %v5123_v16, 1  ;;  %v5130_v53 = vmax.f32 %v5128_v36, %v5129_v63 }
 0x4f3   :  { %v5137_v2 = vmax.f32 %v5135_v55, %v5136_v48  ;;  %v5143_v57 = vrot.slane %v5142_v56, 2  ;;  %v5151_v8 = vmax.f32 %v5149_v59, %v5150_v20  ;;  %v5157_v1 = vrot.slane %v5156_v43, 2 }
 0x4f4   :  { %v5118_v51 = vmax.f32 %v5116_v21, %v5117_v27  ;;  %v5125_v11 = vmax.f32 %v5123_v16, %v5124_v24  ;;  %v5131_v4 = vrot.slane %v5130_v53, 1  ;;  %v6711_v47 = vadd.f32 -1.0, %v7720_v25 }
 0x4f5   :  { %v5138_v33 = vrot.slane %v5137_v2, 1  ;;  %v5144_v3 = vmax.f32 %v5142_v56, %v5143_v57  ;;  %v5152_v14 = vrot.slane %v5151_v8, 1  ;;  %v5158_v7 = vmax.f32 %v5156_v43, %v5157_v1 }
 0x4f6   :  { %v11436_v9 = vmax.f32 %v5130_v53, %v5131_v4  ;;  %v5261_v30 = vsel %vm2547_vm7, %v5118_v51, %v5111_v10  ;;  %v4992_v49 = vsel %vm4967_vm2, %v11412_v29, %v6711_v47  ;;  %v6712_v15 = vadd.f32 -1.0, %v7722_v26 }
 0x4f7   :  { %v5262_v39 = vsel %vm2549_vm10, %v5125_v11, %v5261_v30  ;;  %v11443_v0 = vmax.f32 %v5137_v2, %v5138_v33  ;;  %v5145_v5 = vrot.slane %v5144_v3, 1  ;;  %v11445_v37 = vmax.f32 %v5151_v8, %v5152_v14 }
 0x4f8   :  { %v11449_v50 = vsel %vm2551_vm11, %v11436_v9, %v5262_v39  ;;  %v11453_v45 = vsel %vm2547_vm7, %v11436_v9, %v5125_v11  ;;  %v5159_v60 = vrot.slane %v5158_v7, 1  ;;  %v5034_v32 = vcombine.high %v4992_v49, %v4992_v49 }
 0x4f9   :  { %v11455_v52 = vmax.f32 %v5144_v3, %v5145_v5  ;;  %v5041_v29 = vrot.slane %v4992_v49, %v12329_v62  ;;  %v4993_v41 = vsel %vm4968_vm3, %v11414_v42, %v6712_v15  ;;  %v6713_v22 = vadd.f32 -1.0, %v7724_v38 }
 0x4fa   :  { %v11461_v35 = vmax.f32 %v5158_v7, %v5159_v60  ;;  %v5048_v34 = vrot.slane %v5034_v32, %v12329_v62  ;;  %v5051_v58 = vcombine.high %v4993_v41, %v4993_v41  ;;  %v5058_v6 = vrot.slane %v4993_v41, %v12329_v62 }
 0x4fb   :  { %v5049_v17 = vcombine.high %v5041_v29, %v5041_v29  ;;  %v5161_v31 = vsel %vm1814_vm5, %v5041_v29, -inf  ;;  %v4994_v12 = vsel %vm4969_vm4, %v11418_v61, %v6713_v22  ;;  %v11470_v44 = vsel %vm2547_vm7, %v5125_v11, %v5118_v51 }
 0x4fc   :  { %v5050_v46 = vcombine.high %v5048_v34, %v5048_v34  ;;  %v5162_v42 = vrot.slane %v5161_v31, 4  ;;  %v5175_v28 = vsel %vm1814_vm5, %v5048_v34, -inf  ;;  %v5065_v40 = vrot.slane %v5051_v58, %v12329_v62 }
 0x4fd   :  { %v5168_v23 = vsel %vm1814_vm5, %v5049_v17, -inf  ;;  %v5176_v36 = vrot.slane %v5175_v28, 4  ;;  %v5066_v25 = vcombine.high %v5058_v6, %v5058_v6  ;;  %v5189_v55 = vsel %vm1814_vm5, %v5058_v6, -inf }
 0x4fe   :  { %v5163_v54 = vmax.f32 %v5161_v31, %v5162_v42  ;;  %v5169_v59 = vrot.slane %v5168_v23, 4  ;;  %v5182_v13 = vsel %vm1814_vm5, %v5050_v46, -inf  ;;  %v5067_v61 = vcombine.high %v5065_v40, %v5065_v40 }
 0x4ff   :  { %v5177_v26 = vmax.f32 %v5175_v28, %v5176_v36  ;;  %v5183_v18 = vrot.slane %v5182_v13, 4  ;;  %v5190_v21 = vrot.slane %v5189_v55, 4  ;;  %v5196_v16 = vsel %vm1814_vm5, %v5066_v25, -inf }
 0x500   :  { %v5164_v63 = vrot.slane %v5163_v54, 2  ;;  %v5170_v48 = vmax.f32 %v5168_v23, %v5169_v59  ;;  %v5197_v56 = vrot.slane %v5196_v16, 4  ;;  %v5203_v20 = vsel %vm1814_vm5, %v5065_v40, -inf }
 0x501   :  { %v5178_v43 = vrot.slane %v5177_v26, 2  ;;  %v5184_v38 = vmax.f32 %v5182_v13, %v5183_v18  ;;  %v5191_v10 = vmax.f32 %v5189_v55, %v5190_v21  ;;  %v5204_v27 = vrot.slane %v5203_v20, 4 }
 0x502   :  { %v5165_v24 = vmax.f32 %v5163_v54, %v5164_v63  ;;  %v5171_v53 = vrot.slane %v5170_v48, 2  ;;  %v5198_v2 = vmax.f32 %v5196_v16, %v5197_v56  ;;  %v5210_v57 = vsel %vm1814_vm5, %v5067_v61, -inf }
 0x503   :  { %v5179_v8 = vmax.f32 %v5177_v26, %v5178_v43  ;;  %v5185_v1 = vrot.slane %v5184_v38, 2  ;;  %v5192_v51 = vrot.slane %v5191_v10, 2  ;;  %v5205_v11 = vmax.f32 %v5203_v20, %v5204_v27 }
 0x504   :  { %v5166_v4 = vrot.slane %v5165_v24, 1  ;;  %v5172_v47 = vmax.f32 %v5170_v48, %v5171_v53  ;;  %v5199_v33 = vrot.slane %v5198_v2, 2  ;;  %v5211_v3 = vrot.slane %v5210_v57, 4 }
 0x505   :  { %v5180_v14 = vrot.slane %v5179_v8, 1  ;;  %v5186_v7 = vmax.f32 %v5184_v38, %v5185_v1  ;;  %v5193_v30 = vmax.f32 %v5191_v10, %v5192_v51  ;;  %v5206_v49 = vrot.slane %v5205_v11, 2 }
 0x506   :  { %v11480_v15 = vmax.f32 %v5165_v24, %v5166_v4  ;;  %v5173_v39 = vrot.slane %v5172_v47, 1  ;;  %v5200_v5 = vmax.f32 %v5198_v2, %v5199_v33  ;;  %v5212_v60 = vmax.f32 %v5210_v57, %v5211_v3 }
 0x507   :  { %v11482_v32 = vmax.f32 %v5179_v8, %v5180_v14  ;;  %v5187_v29 = vrot.slane %v5186_v7, 1  ;;  %v5194_v41 = vrot.slane %v5193_v30, 1  ;;  %v5207_v22 = vmax.f32 %v5205_v11, %v5206_v49 }
 0x508   :  { %v11484_v34 = vmax.f32 %v5172_v47, %v5173_v39  ;;  %v5201_v58 = vrot.slane %v5200_v5, 1  ;;  %v5213_v6 = vrot.slane %v5212_v60, 2  ;;  %v5068_v17 = vcombine.high %v4994_v12, %v4994_v12 }
 0x509   :  { %v11486_v31 = vmax.f32 %v5186_v7, %v5187_v29  ;;  %v11488_v46 = vmax.f32 %v5193_v30, %v5194_v41  ;;  %v5208_v42 = vrot.slane %v5207_v22, 1  ;;  %v5075_v28 = vrot.slane %v4994_v12, %v12329_v62 }
 0x50a   :  { %v5268_v40 = vsel %vm2547_vm7, %v11484_v34, %v11480_v15  ;;  %v11494_v23 = vmax.f32 %v5200_v5, %v5201_v58  ;;  %v5214_v36 = vmax.f32 %v5212_v60, %v5213_v6  ;;  %v5082_v25 = vrot.slane %v5068_v17, %v12329_v62 }
 0x50b   :  { %v11497_v55 = vmax.f32 %v5207_v22, %v5208_v42  ;;  %v5083_v54 = vcombine.high %v5075_v28, %v5075_v28  ;;  %v5217_v59 = vsel %vm1814_vm5, %v5075_v28, -inf  ;;  %v5279_v13 = vsel %vm2549_vm10, %v11436_v9, %v11470_v44 }
 0x50c   :  { %v5215_v61 = vrot.slane %v5214_v36, 1  ;;  %v5084_v12 = vcombine.high %v5082_v25, %v5082_v25  ;;  %v5218_v26 = vrot.slane %v5217_v59, 4  ;;  %v5231_v18 = vsel %vm1814_vm5, %v5082_v25, -inf }
 0x50d   :  { %v5224_v21 = vsel %vm1814_vm5, %v5083_v54, -inf  ;;  %v5232_v16 = vrot.slane %v5231_v18, 4  ;;  %v5280_v63 = vsel %vm2551_vm11, %v11443_v0, %v5279_v13  ;;  %v5285_v48 = vsel %vm2547_vm7, %v11482_v32, %v11484_v34 }
 0x50e   :  { %v11510_v56 = vmax.f32 %v5214_v36, %v5215_v61  ;;  %v5219_v20 = vmax.f32 %v5217_v59, %v5218_v26  ;;  %v5225_v43 = vrot.slane %v5224_v21, 4  ;;  %v5238_v44 = vsel %vm1814_vm5, %v5084_v12, -inf }
 0x50f   :  { %v5233_v38 = vmax.f32 %v5231_v18, %v5232_v16  ;;  %v5239_v10 = vrot.slane %v5238_v44, 4  ;;  %v5281_v27 = vsel %vm2553_vm12, %v11455_v52, %v5280_v63  ;;  %v5286_v24 = vsel %vm2549_vm10, %v11486_v31, %v5285_v48  ;;  %v7548_v18 = vld [vmem:[%s11938_s7 + $0x100] ss:$8 sps:$4 sm:$0xff]  }
 0x510   :  { %v5220_v53 = vrot.slane %v5219_v20, 2  ;;  %v5226_v2 = vmax.f32 %v5224_v21, %v5225_v43  ;;  %v5282_v57 = vsel %vm2555_vm13, %v11445_v37, %v5281_v27  ;;  %v5287_v8 = vsel %vm2551_vm11, %v11488_v46, %v5286_v24  ;;  %v7553_v43 = vld [vmem:[%s11938_s7 + $0x114] ss:$8 sps:$4 sm:$0xff]  }
 0x511   :  { %v5234_v1 = vrot.slane %v5233_v38, 2  ;;  %v5240_v51 = vmax.f32 %v5238_v44, %v5239_v10  ;;  %v5283_v11 = vsel %vm2557_vm14, %v11461_v35, %v5282_v57  ;;  %v5288_v4 = vsel %vm2553_vm12, %v11494_v23, %v5287_v8 }
 0x512   :  { %v5221_v47 = vmax.f32 %v5219_v20, %v5220_v53  ;;  %v5227_v33 = vrot.slane %v5226_v2, 2  ;;  %v5284_v3 = vsel %vm2559_vm15, %v11480_v15, %v5283_v11  ;;  %v5289_v14 = vsel %vm2555_vm13, %v11497_v55, %v5288_v4  ;;  %v7551_v11 = vld [vmem:[%s11938_s7 + $0x110] ss:$8 sps:$4 sm:$0xff]  }
 0x513   :  { %v5241_v7 = vrot.slane %v5240_v51, 2  ;;  %v5290_v30 = vsel %vm2557_vm14, %v11510_v56, %v5289_v14  ;;  %v5264_v49 = vsel %vm2553_vm12, %v11443_v0, %v11449_v50  ;;  %v5269_v39 = vsel %vm2549_vm10, %v11482_v32, %v5268_v40 }
 0x514   :  { %v5222_v5 = vrot.slane %v5221_v47, 1  ;;  %v5228_v60 = vmax.f32 %v5226_v2, %v5227_v33  ;;  %v5265_v29 = vsel %vm2555_vm13, %v11455_v52, %v5264_v49  ;;  %v5270_v41 = vsel %vm2551_vm11, %v11486_v31, %v5269_v39 }
 0x515   :  { %v5266_v22 = vsel %vm2557_vm14, %v11445_v37, %v5265_v29  ;;  %v5271_v58 = vsel %vm2553_vm12, %v11488_v46, %v5270_v41  ;;  %v5235_v6 = vmax.f32 %v5233_v38, %v5234_v1  ;;  %v5312_v50 = vsel %vm2547_vm7, %v11443_v0, %v11436_v9 }
 0x516   :  { %v11547_v17 = vmax.f32 %v5221_v47, %v5222_v5  ;;  %v5267_v42 = vsel %vm2559_vm15, %v11461_v35, %v5266_v22  ;;  %v5272_v28 = vsel %vm2555_vm13, %v11494_v23, %v5271_v58  ;;  %v5229_v40 = vrot.slane %v5228_v60, 1 }
 0x517   :  { %v5273_v36 = vsel %vm2557_vm14, %v11497_v55, %v5272_v28  ;;  %v5236_v25 = vrot.slane %v5235_v6, 1  ;;  %v5313_v54 = vsel %vm2549_vm10, %v11455_v52, %v5312_v50  ;;  %v5319_v9 = vsel %vm2547_vm7, %v11488_v46, %v11486_v31 }
 0x518   :  { %v5291_v59 = vsel %vm2559_vm15, %v11547_v17, %v5290_v30  ;;  %v5274_v13 = vsel %vm2559_vm15, %v11510_v56, %v5273_v36  ;;  %v5230_v61 = vmax.f32 %v5228_v60, %v5229_v40  ;;  %v5314_v12 = vsel %vm2551_vm11, %v11445_v37, %v5313_v54  ;;  %v7563_v54 = vld [vmem:[%s11938_s7 + $0x150] ss:$8 sps:$4 sm:$0xff]  }
 0x519   :  { %v5346_v26 = vpack.c.bf16 %v5291_v59, %v5284_v3  ;;  %v5345_v21 = vpack.c.bf16 %v5274_v13, %v5267_v42  ;;  %v5237_v16 = vmax.f32 %v5235_v6, %v5236_v25  ;;  %v5315_v63 = vsel %vm2553_vm12, %v11461_v35, %v5314_v12  ;;  %v7556_v3 = vld [vmem:[%s11938_s7 + $0x124] ss:$8 sps:$4 sm:$0xff]   ;;  %v7565_v25 = vld [vmem:[%s11938_s7 + $0x154] ss:$8 sps:$4 sm:$0xff]   ;;  %v7566_v59 = vld [vmem:[%s11938_s7 + $0x160] ss:$8 sps:$4 sm:$0xff]  }
 0x51a   :  { %v5316_v48 = vsel %vm2555_vm13, %v11480_v15, %v5315_v63  ;;  %v5320_v20 = vsel %vm2549_vm10, %v11494_v23, %v5319_v9  ;;  %v5296_v44 = vsel %vm2549_vm10, %v11443_v0, %v11453_v45  ;;  %v5302_v38 = vsel %vm2547_vm7, %v11486_v31, %v11482_v32  ;;  %v7568_v9 = vld [vmem:[%s11938_s7 + $0x164] ss:$8 sps:$4 sm:$0xff]   ;;  %v7571_v13 = vld [vmem:[%s11938_s7 + $0x174] ss:$8 sps:$4 sm:$0xff]   ;;  %v7578_v63 = vld [vmem:[%s11938_s7 + $0x1a0] ss:$8 sps:$4 sm:$0xff]  }
 0x51b   :  { %5874 = vmatprep.mubr.bf16.mxu0 %v5346_v26  ;;  %v5317_v10 = vsel %vm2557_vm14, %v11484_v34, %v5316_v48  ;;  %v5321_v27 = vsel %vm2551_vm11, %v11497_v55, %v5320_v20  ;;  %v5297_v24 = vsel %vm2551_vm11, %v11455_v52, %v5296_v44  ;;  %v5303_v53 = vsel %vm2549_vm10, %v11488_v46, %v5302_v38  ;;  %v7574_v12 = vld [vmem:[%s11938_s7 + $0x184] ss:$8 sps:$4 sm:$0xff]   ;;  %v7572_v26 = vld [vmem:[%s11938_s7 + $0x180] ss:$8 sps:$4 sm:$0xff]   ;;  %v7583_v48 = vld [vmem:[%s11938_s7 + $0x1b4] ss:$8 sps:$4 sm:$0xff]  }
 0x51c   :  { %5875 = vmatmul.mubr.bf16.vlgmr.msra.gmra.mrb[84].mxu0 %v5345_v21  ;;  %v5318_v45 = vsel %vm2559_vm15, %v11482_v32, %v5317_v10  ;;  %v5322_v2 = vsel %vm2553_vm12, %v11510_v56, %v5321_v27  ;;  %v5298_v57 = vsel %vm2553_vm12, %v11445_v37, %v5297_v24  ;;  %v5304_v8 = vsel %vm2551_vm11, %v11494_v23, %v5303_v53  ;;  %v7575_v21 = vld [vmem:[%s11938_s7 + $0x190] ss:$8 sps:$4 sm:$0xff]   ;;  %v7584_v44 = vld [vmem:[%s11938_s7 + $0x1c0] ss:$8 sps:$4 sm:$0xff]   ;;  %v7589_v38 = vld [vmem:[%s11938_s7 + $0x1d4] ss:$8 sps:$4 sm:$0xff]  }
 0x51d   :  { %5886 = vmatpush1.bf16.msra.mxu0 %v7548_v18  ;;  %v5323_v1 = vsel %vm2555_vm13, %v11547_v17, %v5322_v2  ;;  %v5299_v4 = vsel %vm2555_vm13, %v11461_v35, %v5298_v57  ;;  %v5305_v47 = vsel %vm2553_vm12, %v11497_v55, %v5304_v8  ;;  %v5242_v49 = vmax.f32 %v5240_v51, %v5241_v7  ;;  %v7554_v7 = vld [vmem:[%s11938_s7 + $0x120] ss:$8 sps:$4 sm:$0xff]   ;;  %v7577_v18 = vld [vmem:[%s11938_s7 + $0x194] ss:$8 sps:$4 sm:$0xff]   ;;  %v7581_v20 = vld [vmem:[%s11938_s7 + $0x1b0] ss:$8 sps:$4 sm:$0xff]  }
 0x51e   :  { %v5324_v33 = vsel %vm2557_vm14, %v5230_v61, %v5323_v1  ;;  %5887 = vmatprep.subr.bf16.mxu0 %v7553_v43  ;;  %v5300_v14 = vsel %vm2557_vm14, %v11480_v15, %v5299_v4  ;;  %v5306_v30 = vsel %vm2555_vm13, %v11510_v56, %v5305_v47  ;;  %v5329_v29 = vsel %vm2547_vm7, %v11455_v52, %v11443_v0  ;;  %v7586_v43 = vld [vmem:[%s11938_s7 + $0x1c4] ss:$8 sps:$4 sm:$0xff]   ;;  %v7587_v10 = vld [vmem:[%s11938_s7 + $0x1d0] ss:$8 sps:$4 sm:$0xff]   ;;  %v7590_v24 = vld [vmem:[%s11938_s7 + $0x1e0] ss:$8 sps:$4 sm:$0xff]  }
 0x51f   :  { %v5325_v39 = vsel %vm2559_vm15, %v5237_v16, %v5324_v33  ;;  %v11620_v5 = vsel %vm2559_vm15, %v11484_v34, %v5300_v14  ;;  %v5307_v60 = vsel %vm2557_vm14, %v11547_v17, %v5306_v30  ;;  %v5243_v58 = vrot.slane %v5242_v49, 1  ;;  %v7592_v27 = vld [vmem:[%s11938_s7 + $0x1e4] ss:$8 sps:$4 sm:$0xff]   ;;  %v7595_v53 = vld [vmem:[%s11938_s7 + $0x1f4] ss:$8 sps:$4 sm:$0xff]  }
 0x520   :  { %v5348_v41 = vpack.c.bf16 %v5325_v39, %v5318_v45  ;;  %v11628_v22 = vsel %vm2559_vm15, %v5230_v61, %v5307_v60  ;;  %v5330_v51 = vsel %vm2549_vm10, %v11445_v37, %v5329_v29  ;;  %v5336_v0 = vsel %vm2547_vm7, %v11494_v23, %v11488_v46  ;;  %v7559_v37 = vld [vmem:[%s11938_s7 + $0x134] ss:$8 sps:$4 sm:$0xff]   ;;  %v7593_v45 = vld [vmem:[%s11938_s7 + $0x1f0] ss:$8 sps:$4 sm:$0xff]   ;;  %v7598_v2 = vld [vmem:[%s11938_s7 + $0x204] ss:$8 sps:$4 sm:$0xff]  }
 0x521   :  { %5888 = vmatpush1.bf16.msra.mxu0 %v7551_v11  ;;  %v5347_v6 = vpack.c.bf16 %v11628_v22, %v11620_v5  ;;  %v5331_v50 = vsel %vm2551_vm11, %v11461_v35, %v5330_v51  ;;  %v5337_v42 = vsel %vm2549_vm10, %v11497_v55, %v5336_v0  ;;  %v5244_v28 = vmax.f32 %v5242_v49, %v5243_v58  ;;  %v7596_v57 = vld [vmem:[%s11938_s7 + $0x200] ss:$8 sps:$4 sm:$0xff]   ;;  %v7601_v8 = vld [vmem:[%s11938_s7 + $0x214] ss:$8 sps:$4 sm:$0xff]   ;;  %v7599_v1 = vld [vmem:[%s11938_s7 + $0x210] ss:$8 sps:$4 sm:$0xff]  }
 0x522   :  { %5917 = vmatprep.mubr.bf16.mxu0 %v5348_v41  ;;  %5889 = vmatprep.subr.bf16.mxu0 %v7556_v3  ;;  %v5332_v52 = vsel %vm2553_vm12, %v11480_v15, %v5331_v50  ;;  %v5338_v40 = vsel %vm2551_vm11, %v11510_v56, %v5337_v42  ;;  %v7557_v15 = vld [vmem:[%s11938_s7 + $0x130] ss:$8 sps:$4 sm:$0xff]   ;;  %v7562_v56 = vld [vmem:[%s11938_s7 + $0x144] ss:$8 sps:$4 sm:$0xff]   ;;  %v7764_v11 = vmov 0  }
 0x523   :  { %v5333_v35 = vsel %vm2555_vm13, %v11484_v34, %v5332_v52  ;;  %v5339_v23 = vsel %vm2553_vm12, %v11547_v17, %v5338_v40  ;;  %v7604_v4 = vld [vmem:[%s11938_s7 + $0x224] ss:$8 sps:$4 sm:$0xff]   ;;  %v7602_v47 = vld [vmem:[%s11938_s7 + $0x220] ss:$8 sps:$4 sm:$0xff]   ;;  %v7607_v33 = vld [vmem:[%s11938_s7 + $0x234] ss:$8 sps:$4 sm:$0xff]  }
 0x524   :  { %v5334_v46 = vsel %vm2557_vm14, %v11482_v32, %v5333_v35  ;;  %v5340_v34 = vsel %vm2555_vm13, %v5230_v61, %v5339_v23  ;;  %v7569_v61 = vld [vmem:[%s11938_s7 + $0x170] ss:$8 sps:$4 sm:$0xff]   ;;  %v7610_v14 = vld [vmem:[%s11938_s7 + $0x244] ss:$8 sps:$4 sm:$0xff]   ;;  %v7608_v30 = vld [vmem:[%s11938_s7 + $0x240] ss:$8 sps:$4 sm:$0xff]  }
 0x525   :  { %5890 = vmatpush1.bf16.msra.mxu0 %v7554_v7  ;;  %v11662_v55 = vsel %vm2559_vm15, %v11486_v31, %v5334_v46  ;;  %v5341_v32 = vsel %vm2557_vm14, %v5237_v16, %v5340_v34  ;;  %v7560_v31 = vld [vmem:[%s11938_s7 + $0x140] ss:$8 sps:$4 sm:$0xff]   ;;  %v7580_v16 = vld [vmem:[%s11938_s7 + $0x1a4] ss:$8 sps:$4 sm:$0xff]   ;;  %v7605_v3 = vld [vmem:[%s11938_s7 + $0x230] ss:$8 sps:$4 sm:$0xff]  }
 0x526   :  { %5891 = vmatprep.subr.bf16.mxu0 %v7559_v37  ;;  %v11670_v17 = vsel %vm2559_vm15, %v5244_v28, %v5341_v32  ;;  %v7613_v49 = vld [vmem:[%s11938_s7 + $0x254] ss:$8 sps:$4 sm:$0xff]   ;;  %v7611_v39 = vld [vmem:[%s11938_s7 + $0x250] ss:$8 sps:$4 sm:$0xff]   ;;  %v7616_v5 = vld [vmem:[%s11938_s7 + $0x264] ss:$8 sps:$4 sm:$0xff]  }
 0x527   :  { %v5349_v36 = vpack.c.bf16 %v11670_v17, %v11662_v55  ;;  %v7614_v60 = vld [vmem:[%s11938_s7 + $0x260] ss:$8 sps:$4 sm:$0xff]   ;;  %v7619_v29 = vld [vmem:[%s11938_s7 + $0x274] ss:$8 sps:$4 sm:$0xff]   ;;  %v7617_v41 = vld [vmem:[%s11938_s7 + $0x270] ss:$8 sps:$4 sm:$0xff]  }
 0x528   :  { %v7620_v22 = vld [vmem:[%s11940_s9 + $0x40] sm:$0xff]   ;;  %v7622_v51 = vld [vmem:[%s11940_s9 + $0x48] sm:$0xff]   ;;  %v7625_v50 = vld [vmem:[%s11940_s9 + $0x10] sm:$0xff]  }
 0x529   :  { %5892 = vmatpush1.bf16.msra.mxu0 %v7557_v15  ;;  %v7621_v58 = vld [vmem:[%s11940_s9] sm:$0xff]   ;;  %7210 = vmatprep.subr.bf16.mxu1 %v7620_v22  ;;  %v7623_v7 = vld [vmem:[%s11940_s9 + $0x8] sm:$0xff]   ;;  %v7626_v0 = vld [vmem:[%s11940_s9 + $0x58] sm:$0xff]  }
 0x52a   :  { %5893 = vmatprep.subr.bf16.mxu0 %v7562_v56  ;;  %7211 = vmatpush3.bf16.msra.mxu1 %v7621_v58  ;;  %v7627_v37 = vld [vmem:[%s11940_s9 + $0x18] sm:$0xff]   ;;  %v7628_v52 = vld [vmem:[%s11940_s9 + $0x60] sm:$0xff]   ;;  %v7630_v28 = vld [vmem:[%s11940_s9 + $0x68] sm:$0xff]  }
 0x52b   :  { %7212 = vmatprep.subr.bf16.mxu1 %v7622_v51  ;;  %v7629_v42 = vld [vmem:[%s11940_s9 + $0x20] sm:$0xff]   ;;  %v7631_v35 = vld [vmem:[%s11940_s9 + $0x28] sm:$0xff]   ;;  %v7632_v40 = vld [vmem:[%s11940_s9 + $0x70] sm:$0xff]  }
 0x52c   :  { %v7633_v46 = vld [vmem:[%s11940_s9 + $0x30] sm:$0xff]   ;;  %v7634_v23 = vld [vmem:[%s11940_s9 + $0x78] sm:$0xff]   ;;  %v5430_v56 = vld [vmem:[%s11939_s8] sm:$0x3] }
 0x52d   :  { %5894 = vmatpush1.bf16.msra.mxu0 %v7560_v31  ;;  %v7635_v15 = vld [vmem:[%s11940_s9 + $0x38] sm:$0xff]  }
 0x52e   :  { %5895 = vmatprep.subr.bf16.mxu0 %v7565_v25  ;;  %7213 = vmatpush3.bf16.msra.mxu1 %v7623_v7  ;;  %v12330_v55 = vld [vmem:[#allocation16_spill] sm:$0xff] }
 0x52f   :  { %v5434_v34 = vsub.s32 0, %v12330_v55  ;;  %v5438_v32 = vsub.s32 1, %v12330_v55 }
 0x531   :  { %5896 = vmatpush1.bf16.msra.mxu0 %v7563_v54  ;;  %v5435_v17 = vrot.slane %v5430_v56, %v5434_v34 }
 0x532   :  { %5897 = vmatprep.subr.bf16.mxu0 %v7568_v9 }
 0x535   :  { %5898 = vmatpush1.bf16.msra.mxu0 %v7566_v59 }
 0x536   :  { %5899 = vmatprep.subr.bf16.mxu0 %v7571_v13 }
 0x539   :  { %5900 = vmatpush1.bf16.msra.mxu0 %v7569_v61 }
 0x53a   :  { %5901 = vmatprep.subr.bf16.mxu0 %v7574_v12 }
 0x53d   :  { %5902 = vmatpush1.bf16.msra.mxu0 %v7572_v26 }
 0x53e   :  { %5903 = vmatprep.subr.bf16.mxu0 %v7577_v18 }
 0x541   :  { %5904 = vmatpush1.bf16.msra.mxu0 %v7575_v21 }
 0x542   :  { %5905 = vmatprep.subr.bf16.mxu0 %v7580_v16 }
 0x545   :  { %5906 = vmatpush1.bf16.msra.mxu0 %v7578_v63 }
 0x546   :  { %5907 = vmatprep.subr.bf16.mxu0 %v7583_v48 }
 0x549   :  { %5908 = vmatpush1.bf16.msra.mxu0 %v7581_v20 }
 0x54a   :  { %5909 = vmatprep.subr.bf16.mxu0 %v7586_v43 }
 0x54d   :  { %5910 = vmatpush1.bf16.msra.mxu0 %v7584_v44 }
 0x54e   :  { %5911 = vmatprep.subr.bf16.mxu0 %v7589_v38 }
 0x551   :  { %5912 = vmatpush1.bf16.msra.mxu0 %v7587_v10 }
 0x552   :  { %5913 = vmatprep.subr.bf16.mxu0 %v7592_v27 }
 0x555   :  { %5914 = vmatpush1.bf16.msra.mxu0 %v7590_v24 }
 0x556   :  { %5915 = vmatprep.subr.bf16.mxu0 %v7595_v53 }
 0x559   :  { %5916 = vmatpush1.bf16.msra.mxu0 %v7593_v45 }
 0x55a   :  { %5928 = vmatprep.subr.bf16.mxu0 %v7598_v2 }
 0x55c   :  { %5918 = vmatmul.mubr.bf16.vlgmr.msra.gmra.mrb[84].mxu0 %v5347_v6  ;;  %v7624_v6 = vld [vmem:[%s11940_s9 + $0x50] sm:$0xff]  }
 0x55d   :  { %5929 = vmatpush1.bf16.msra.mxu0 %v7596_v57  ;;  %5960 = vmatprep.mubr.bf16.mxu0 %v7764_v11 }
 0x55e   :  { %5930 = vmatprep.subr.bf16.mxu0 %v7601_v8  ;;  %7214 = vmatprep.subr.bf16.mxu1 %v7624_v6 }
 0x55f   :  { %7215 = vmatpush3.bf16.msra.mxu1 %v7625_v50 }
 0x560   :  { %7216 = vmatprep.subr.bf16.mxu1 %v7626_v0 }
 0x561   :  { %5931 = vmatpush1.bf16.msra.mxu0 %v7599_v1 }
 0x562   :  { %5932 = vmatprep.subr.bf16.mxu0 %v7604_v4 }
 0x563   :  { %7217 = vmatpush3.bf16.msra.mxu1 %v7627_v37 }
 0x564   :  { %7218 = vmatprep.subr.bf16.mxu1 %v7628_v52 }
 0x565   :  { %5933 = vmatpush1.bf16.msra.mxu0 %v7602_v47 }
 0x566   :  { %5934 = vmatprep.subr.bf16.mxu0 %v7607_v33 }
 0x567   :  { %7219 = vmatpush3.bf16.msra.mxu1 %v7629_v42 }
 0x568   :  { %7220 = vmatprep.subr.bf16.mxu1 %v7630_v28 }
 0x569   :  { %5935 = vmatpush1.bf16.msra.mxu0 %v7605_v3 }
 0x56a   :  { %5936 = vmatprep.subr.bf16.mxu0 %v7610_v14 }
 0x56b   :  { %7221 = vmatpush3.bf16.msra.mxu1 %v7631_v35 }
 0x56c   :  { %7222 = vmatprep.subr.bf16.mxu1 %v7632_v40 }
 0x56d   :  { %5937 = vmatpush1.bf16.msra.mxu0 %v7608_v30 }
 0x56e   :  { %5938 = vmatprep.subr.bf16.mxu0 %v7613_v49 }
 0x56f   :  { %7223 = vmatpush3.bf16.msra.mxu1 %v7633_v46 }
 0x570   :  { %7224 = vmatprep.subr.bf16.mxu1 %v7634_v23 }
 0x571   :  { %5939 = vmatpush1.bf16.msra.mxu0 %v7611_v39 }
 0x572   :  { %5940 = vmatprep.subr.bf16.mxu0 %v7616_v5 }
 0x573   :  { %7225 = vmatpush3.bf16.msra.mxu1 %v7635_v15 }
 0x574   :  { %7330 = vmatprep.subr.mxu1 %v12320_v19 }
 0x575   :  { %5941 = vmatpush1.bf16.msra.mxu0 %v7614_v60 }
 0x576   :  { %5942 = vmatprep.subr.bf16.mxu0 %v7619_v29 }
 0x579   :  { %5943 = vmatpush1.bf16.msra.mxu0 %v7617_v41 }
 0x57c   :  { %5961 = vmatmul.mubr.bf16.vlgmr.msra.gmra.mrb[84].mxu0 %v5349_v36  ;;  %v5439_v36 = vrot.slane %v5430_v56, %v5438_v32 }
 0x64f   :  { %v5962_v31 = vpop.f32.mrb[84].mxu0 }
 0x650   :  { %v7351_v25 = vadd.f32 %v5962_v31, %v5435_v17  ;;  %v5964_v54 = vpop.f32.mrb[85].mxu0 }
 0x651   :  { %v7352_v9 = vadd.f32 %v5964_v54, %v5439_v36  ;;  %v5966_v59 = vpop.f32.mrb[86].mxu0 }
 0x652   :  { %v5975_v13 = vmin.f32 %v7351_v25, 0.0  ;;  %v7353_v61 = vadd.f32 %v5966_v59, %v5435_v17  ;;  %v5968_v12 = vpop.f32.mrb[87].mxu0  ;;  %vm5971_vm15 = vcmp.gt.f32.partialorder %v7351_v25, 0.0 }
 0x653   :  { %v5976_v26 = vmin.f32 %v7352_v9, 0.0  ;;  %v7354_v18 = vadd.f32 %v5968_v12, %v5439_v36  ;;  %vm5972_vm6 = vcmp.gt.f32.partialorder %v7352_v9, 0.0 }
 0x654   :  { %v5979_v21 = vmul.f32 1.442695, %v5975_v13  ;;  %v5977_v16 = vmin.f32 %v7353_v61, 0.0  ;;  %vm5973_vm9 = vcmp.gt.f32.partialorder %v7353_v61, 0.0 }
 0x655   :  { %v5981_v63 = vmul.f32 1.442695, %v5976_v26  ;;  %v5978_v48 = vmin.f32 %v7354_v18, 0.0  ;;  %vm5974_vm1 = vcmp.gt.f32.partialorder %v7354_v18, 0.0 }
 0x656   :  { %7725 = vpow2.f32 %v5979_v21  ;;  %v5983_v20 = vmul.f32 1.442695, %v5977_v16 }
 0x657   :  { %7727 = vpow2.f32 %v5981_v63  ;;  %v5985_v43 = vmul.f32 1.442695, %v5978_v48 }
 0x658   :  { %7729 = vpow2.f32 %v5983_v20 }
 0x659   :  { %7731 = vpow2.f32 %v5985_v43 }
 0x660   :  { %v7726_v44 = vpop.eup %7725 }
 0x661   :  { %v7728_v38 = vpop.eup %7727  ;;  %v6794_v10 = vadd.f32 -1.0, %v7726_v44 }
 0x662   :  { %v7730_v27 = vpop.eup %7729  ;;  %v6795_v24 = vadd.f32 -1.0, %v7728_v38 }
 0x663   :  { %v7732_v53 = vpop.eup %7731  ;;  %v5991_v45 = vsel %vm5971_vm15, %v7351_v25, %v6794_v10  ;;  %v6796_v2 = vadd.f32 -1.0, %v7730_v27 }
 0x664   :  { %v5992_v57 = vsel %vm5972_vm6, %v7352_v9, %v6795_v24  ;;  %v6797_v8 = vadd.f32 -1.0, %v7732_v53 }
 0x665   :  { %v5999_v1 = vcombine.low %v5991_v45, %v5992_v57  ;;  %v6000_v11 = vcombine.high %v5991_v45, %v5992_v57  ;;  %v5993_v4 = vsel %vm5973_vm9, %v7353_v61, %v6796_v2 }
 0x666   :  { %v5994_v47 = vsel %vm5974_vm1, %v7354_v18, %v6797_v8 }
 0x667   :  { %v6007_v33 = vrot.slane %v5999_v1, %v12329_v62  ;;  %v6014_v3 = vrot.slane %v6000_v11, %v12329_v62  ;;  %v6017_v14 = vcombine.low %v5993_v4, %v5994_v47  ;;  %v6018_v30 = vcombine.high %v5993_v4, %v5994_v47 }
 0x669   :  { %v6015_v49 = vcombine.high %v6007_v33, %v6007_v33  ;;  %v6016_v39 = vcombine.high %v6014_v3, %v6014_v3  ;;  %v6040_v5 = vrot.slane %v6007_v33, %v12329_v62  ;;  %v6056_v60 = vrot.slane %v6014_v3, %v12329_v62 }
 0x66a   :  { %v11856_v29 = vrot.slane %v6017_v14, %v12329_v62  ;;  %v11859_v41 = vrot.slane %v6018_v30, %v12329_v62 }
 0x66b   :  { %v6041_v22 = vcombine.high %v6040_v5, %v6040_v5  ;;  %v6048_v58 = vrot.slane %v6015_v49, %v12329_v62  ;;  %v6057_v51 = vcombine.high %v6056_v60, %v6056_v60  ;;  %v6064_v7 = vrot.slane %v6016_v39, %v12329_v62 }
 0x66c   :  { %v6104_v6 = vsel %vm1814_vm5, %v6040_v5, -inf  ;;  %v6132_v50 = vsel %vm1814_vm5, %v6056_v60, -inf  ;;  %v6033_v0 = vcombine.high %v11856_v29, %v11856_v29  ;;  %v11869_v37 = vrot.slane %v11856_v29, %v12329_v62 }
 0x66d   :  { %v6049_v52 = vcombine.high %v6048_v58, %v6048_v58  ;;  %v6065_v42 = vcombine.high %v6064_v7, %v6064_v7  ;;  %v6105_v28 = vrot.slane %v6104_v6, 4  ;;  %v6111_v35 = vsel %vm1814_vm5, %v6041_v22, -inf }
 0x66e   :  { %v6112_v40 = vrot.slane %v6111_v35, 4  ;;  %v6118_v46 = vsel %vm1814_vm5, %v6048_v58, -inf  ;;  %v6133_v23 = vrot.slane %v6132_v50, 4  ;;  %v6139_v15 = vsel %vm1814_vm5, %v6057_v51, -inf }
 0x66f   :  { %v6106_v55 = vmax.f32 %v6104_v6, %v6105_v28  ;;  %v6119_v34 = vrot.slane %v6118_v46, 4  ;;  %v6125_v56 = vsel %vm1814_vm5, %v6049_v52, -inf  ;;  %v6140_v32 = vrot.slane %v6139_v15, 4 }
 0x670   :  { %v6113_v17 = vmax.f32 %v6111_v35, %v6112_v40  ;;  %v6126_v36 = vrot.slane %v6125_v56, 4  ;;  %v6134_v31 = vmax.f32 %v6132_v50, %v6133_v23  ;;  %v6146_v25 = vsel %vm1814_vm5, %v6064_v7, -inf }
 0x671   :  { %v6107_v54 = vrot.slane %v6106_v55, 2  ;;  %v6120_v9 = vmax.f32 %v6118_v46, %v6119_v34  ;;  %v6141_v59 = vmax.f32 %v6139_v15, %v6140_v32  ;;  %v6147_v13 = vrot.slane %v6146_v25, 4 }
 0x672   :  { %v6114_v61 = vrot.slane %v6113_v17, 2  ;;  %v6127_v12 = vmax.f32 %v6125_v56, %v6126_v36  ;;  %v6135_v26 = vrot.slane %v6134_v31, 2  ;;  %v6153_v18 = vsel %vm1814_vm5, %v6065_v42, -inf }
 0x673   :  { %v6108_v21 = vmax.f32 %v6106_v55, %v6107_v54  ;;  %v6121_v16 = vrot.slane %v6120_v9, 2  ;;  %v6142_v63 = vrot.slane %v6141_v59, 2  ;;  %v6148_v48 = vmax.f32 %v6146_v25, %v6147_v13 }
 0x674   :  { %v6115_v20 = vmax.f32 %v6113_v17, %v6114_v61  ;;  %v6128_v43 = vrot.slane %v6127_v12, 2  ;;  %v6136_v44 = vmax.f32 %v6134_v31, %v6135_v26  ;;  %v6154_v38 = vrot.slane %v6153_v18, 4 }
 0x675   :  { %v6109_v10 = vrot.slane %v6108_v21, 1  ;;  %v6122_v27 = vmax.f32 %v6120_v9, %v6121_v16  ;;  %v6143_v24 = vmax.f32 %v6141_v59, %v6142_v63  ;;  %v6149_v53 = vrot.slane %v6148_v48, 2 }
 0x676   :  { %v6116_v45 = vrot.slane %v6115_v20, 1  ;;  %v6129_v2 = vmax.f32 %v6127_v12, %v6128_v43  ;;  %v6137_v57 = vrot.slane %v6136_v44, 1  ;;  %v6155_v8 = vmax.f32 %v6153_v18, %v6154_v38 }
 0x677   :  { %v6110_v1 = vmax.f32 %v6108_v21, %v6109_v10  ;;  %v6123_v11 = vrot.slane %v6122_v27, 1  ;;  %v6150_v4 = vmax.f32 %v6148_v48, %v6149_v53  ;;  %v6144_v14 = vrot.slane %v6143_v24, 1 }
 0x678   :  { %v11877_v47 = vmax.f32 %v6115_v20, %v6116_v45  ;;  %v6130_v33 = vrot.slane %v6129_v2, 1  ;;  %v6138_v3 = vmax.f32 %v6136_v44, %v6137_v57  ;;  %v6073_v5 = vcombine.high %v11869_v37, %v11869_v37 }
 0x679   :  { %v6124_v30 = vmax.f32 %v6122_v27, %v6123_v11  ;;  %v6151_v49 = vrot.slane %v6150_v4, 1  ;;  %v6202_v39 = vpack.c.bf16 %v6110_v1, %v6110_v1  ;;  %v6156_v60 = vrot.slane %v6155_v8, 2 }
 0x67a   :  { %v6206_v29 = vpack.c.bf16 %v6138_v3, %v6138_v3  ;;  %v6080_v22 = vrot.slane %v6033_v0, %v12329_v62  ;;  %v6088_v58 = vrot.slane %v11859_v41, %v12329_v62  ;;  %v6203_v7 = vpack.c.bf16 %v11877_v47, %v11877_v47 }
 0x67b   :  { %v6152_v51 = vmax.f32 %v6150_v4, %v6151_v49  ;;  %v6204_v6 = vpack.c.bf16 %v6124_v30, %v6124_v30  ;;  %v6160_v50 = vsel %vm1814_vm5, %v11869_v37, -inf  ;;  %v6262_v52 = vunpack.c.l.b16 %v6202_v39 }
 0x67c   :  { %v11888_v42 = vunpack.c.l.b16 %v6206_v29  ;;  %v6081_v28 = vcombine.high %v6080_v22, %v6080_v22  ;;  %v6161_v35 = vrot.slane %v6160_v50, 4  ;;  %v6089_v46 = vcombine.high %v6088_v58, %v6088_v58 }
 0x67d   :  { %v6208_v40 = vpack.c.bf16 %v6152_v51, %v6152_v51  ;;  %v6167_v0 = vsel %vm1814_vm5, %v6073_v5, -inf  ;;  %v6174_v23 = vsel %vm1814_vm5, %v6080_v22, -inf  ;;  %v6264_v34 = vunpack.c.l.b16 %v6204_v6 }
 0x67e   :  { %v6162_v62 = vmax.f32 %v6160_v50, %v6161_v35  ;;  %v6168_v41 = vrot.slane %v6167_v0, 4  ;;  %v6175_v15 = vrot.slane %v6174_v23, 4  ;;  %v6181_v55 = vsel %vm1814_vm5, %v6081_v28, -inf }
 0x67f   :  { %v6268_v56 = vunpack.c.l.b16 %v6208_v40  ;;  %v6182_v32 = vrot.slane %v6181_v55, 4  ;;  %v6188_v37 = vsel %vm1814_vm5, %v6088_v58, -inf  ;;  %v6195_v54 = vsel %vm1814_vm5, %v6089_v46, -inf }
 0x680   :  { %v6163_v17 = vrot.slane %v6162_v62, 2  ;;  %v6169_v36 = vmax.f32 %v6167_v0, %v6168_v41  ;;  %v6176_v31 = vmax.f32 %v6174_v23, %v6175_v15  ;;  %v6189_v25 = vrot.slane %v6188_v37, 4 }
 0x681   :  { %v6131_v9 = vmax.f32 %v6129_v2, %v6130_v33  ;;  %v6145_v59 = vmax.f32 %v6143_v24, %v6144_v14  ;;  %v6157_v13 = vmax.f32 %v6155_v8, %v6156_v60  ;;  %v6196_v21 = vrot.slane %v6195_v54, 4 }
 0x682   :  { %v6164_v61 = vmax.f32 %v6162_v62, %v6163_v17  ;;  %v6170_v12 = vrot.slane %v6169_v36, 2  ;;  %v6177_v26 = vrot.slane %v6176_v31, 2  ;;  %v6190_v18 = vmax.f32 %v6188_v37, %v6189_v25 }
 0x683   :  { %v6158_v16 = vrot.slane %v6157_v13, 1  ;;  %v6183_v63 = vmax.f32 %v6181_v55, %v6182_v32  ;;  %v6205_v48 = vpack.c.bf16 %v6131_v9, %v6131_v9  ;;  %v6197_v53 = vmax.f32 %v6195_v54, %v6196_v21 }
 0x684   :  { %v6165_v20 = vrot.slane %v6164_v61, 1  ;;  %v6178_v43 = vmax.f32 %v6176_v31, %v6177_v26  ;;  %v6191_v44 = vrot.slane %v6190_v18, 2  ;;  %v6171_v38 = vmax.f32 %v6169_v36, %v6170_v12 }
 0x685   :  { %v6159_v10 = vmax.f32 %v6157_v13, %v6158_v16  ;;  %v6184_v27 = vrot.slane %v6183_v63, 2  ;;  %v6207_v45 = vpack.c.bf16 %v6145_v59, %v6145_v59  ;;  %v6276_v1 = vsel %vm2547_vm7, %v6264_v34, %v6262_v52  ;;  %v6814_v16 = vld [vmem:[%s11941_s10] ss:$0 sm:$0xff] }
 0x686   :  { %v6166_v57 = vmax.f32 %v6164_v61, %v6165_v20  ;;  %v6179_v2 = vrot.slane %v6178_v43, 1  ;;  %v6192_v24 = vmax.f32 %v6190_v18, %v6191_v44  ;;  %v6172_v8 = vrot.slane %v6171_v38, 1  ;;  %v6428_v18 = vld [vmem:[%s11942_s11] sm:$0x3]  ;;  %s7765_s11 = smov [#allocation2]  }
 0x687   :  { %v6185_v11 = vmax.f32 %v6183_v63, %v6184_v27  ;;  %v6198_v4 = vrot.slane %v6197_v53, 2  ;;  %v6209_v47 = vpack.c.bf16 %v6159_v10, %v6159_v10  ;;  %v6263_v30 = vunpack.c.l.b16 %v6203_v7  ;;  %s6532_s23 = sshll.u32 %s7765_s11, 4  ;;  %s6533_s23 = int_to_ptr.vmem [resolvable:$true] %s6532_s23 }
 0x688   :  { %v6180_v33 = vmax.f32 %v6178_v43, %v6179_v2  ;;  %v6193_v3 = vrot.slane %v6192_v24, 1  ;;  %v6173_v14 = vmax.f32 %v6171_v38, %v6172_v8  ;;  %v6210_v49 = vpack.c.bf16 %v6166_v57, %v6166_v57  ;;  %s7737_s10 = scalar_lea.vmem %s6533_s23, 32  ;;  %p7742_p1 = scmp.lt.s32.totalorder %s6533_s23, %s6533_s23 }
 0x689   :  { %v6186_v39 = vrot.slane %v6185_v11, 1  ;;  %v6199_v5 = vmax.f32 %v6197_v53, %v6198_v4  ;;  %v6265_v60 = vunpack.c.l.b16 %v6205_v48  ;;  %v6267_v58 = vunpack.c.l.b16 %v6207_v45  ;;  %p7738_p0 = scmp.ne.s32.totalorder %s6533_s23, %s7737_s10  ;;  %p7743_p2 = scmp.lt.s32.totalorder %s7737_s10, %s7737_s10 }
 0x68a   :  { %v6194_v29 = vmax.f32 %v6192_v24, %v6193_v3  ;;  %v6211_v22 = vpack.c.bf16 %v6173_v14, %v6173_v14  ;;  %v6269_v51 = vunpack.c.l.b16 %v6209_v47  ;;  %v6212_v52 = vpack.c.bf16 %v6180_v33, %v6180_v33 }
 0x68b   :  { %v6187_v6 = vmax.f32 %v6185_v11, %v6186_v39  ;;  %v6200_v50 = vrot.slane %v6199_v5, 1  ;;  %v6282_v28 = vsel %vm2547_vm7, %v6265_v60, %v6263_v30  ;;  %v6277_v7 = vsel %vm2549_vm10, %v11888_v42, %v6276_v1  ;;  %p7744_p3 = por %p7743_p2, %p7742_p1 }
 0x68c   :  { %v6271_v35 = vunpack.c.l.b16 %v6211_v22  ;;  %v6283_v40 = vsel %vm2549_vm10, %v6267_v58, %v6282_v28  ;;  %v6214_v46 = vpack.c.bf16 %v6194_v29, %v6194_v29  ;;  %v6270_v0 = vunpack.c.l.b16 %v6210_v49 }
 0x68d   :  { %v6201_v23 = vmax.f32 %v6199_v5, %v6200_v50  ;;  %v6213_v62 = vpack.c.bf16 %v6187_v6, %v6187_v6  ;;  %v6284_v41 = vsel %vm2551_vm11, %v6269_v51, %v6283_v40  ;;  %v6272_v55 = vunpack.c.l.b16 %v6212_v52  ;;  %p7745_p4 = pnand %p7744_p3, %p7738_p0 }
 0x68e   :  { %v6285_v15 = vsel %vm2553_vm12, %v6271_v35, %v6284_v41  ;;  %v6278_v34 = vsel %vm2551_vm11, %v6268_v56, %v6277_v7  ;;  %v6274_v17 = vunpack.c.l.b16 %v6214_v46  ;;  %vm6436_vm7 = vcmask 56320  }
 0x68f   :  { %v6215_v32 = vpack.c.bf16 %v6201_v23, %v6201_v23  ;;  %v6273_v37 = vunpack.c.l.b16 %v6213_v62  ;;  %v6279_v36 = vsel %vm2553_vm12, %v6270_v0, %v6278_v34 }
 0x690   :  { %v6280_v31 = vsel %vm2555_vm13, %v6272_v55, %v6279_v36 }
 0x691   :  { %v6275_v25 = vunpack.c.l.b16 %v6215_v32  ;;  %v6286_v42 = vsel %vm2555_vm13, %v6273_v37, %v6285_v15  ;;  %v6281_v54 = vsel %vm2557_vm14, %v6274_v17, %v6280_v31 }
 0x692   :  { %v6288_v13 = vpack.c.b16 %v6281_v54, %v6281_v54 }
 0x693   :  { %v6287_v9 = vsel %vm2557_vm14, %v6275_v25, %v6286_v42 }
 0x694   :  { %v6289_v59 = vpack.c.b16 %v6287_v9, %v6287_v9 }
 0x696   :  { %6420 = vmatprep.mubr.bf16.mxu1 %v6289_v59 }
 0x697   :  { %6421 = vmatmul.mubr.bf16.vlgmr.msra.gmra.mrb[132].mxu1 %v6288_v13 }
 0x698   :  { %7332 = vmatprep.mubr.msk.f32.mxu1 %vm7763_vm8, %v12320_v19 }
 0x76a   :  { %v7226_v56 = vpop.f32.mrb[132].mxu1 }
 0x76b   :  { %v7227_v61 = vpop.f32.mrb[133].mxu1 }
 0x76c   :  { %v7228_v12 = vadd.f32 %v7227_v61, %v7226_v56  ;;  %v7229_v26 = vpop.f32.mrb[134].mxu1 }
 0x76d   :  { %v7230_v21 = vpop.f32.mrb[135].mxu1 }
 0x76e   :  { %7331 = vmatpush3.msk.msra.mxu1 %vm115_vm0, %v7228_v12 }
 0x76f   :  { %7333 = vmatmul.mubr.msk.f32.vlgmr.msra.gmra.mrb[136].mxu1 %vm6436_vm7, %v6428_v18 }
 0x842   :  { %v6509_v63 = vpop.f32.mrb[136].mxu1 }
 0x843   :  { %v6510_v48 = vadd.f32 %v6814_v16, %v6509_v63  ;;  %v7334_v19 = vpop.f32.mrb[137].mxu1 }
 0x845   :  { %v6513_v20 = vsel %vm1814_vm5, %v6510_v48, -inf }
 0x846   :  { %6514 = vmax.xlane.f32.xlu0 %v6513_v20 }
 0x8d3   :  { %v6515_v43 = vpop.xlane.xlu0 %6514 }
 0x8d4   :  { %v6516_v44 = vsub.f32 %v6510_v48, %v6515_v43 }
 0x8d6   :  { %v6517_v38 = vmul.f32 1.442695, %v6516_v44 }
 0x8d8   :  { %7733 = vpow2.f32 %v6517_v38 }
 0x8e2   :  { %v7734_v10 = vpop.eup %7733 }
 0x8e3   :  { %v6519_v27 = vsel %vm1814_vm5, %v7734_v10, 0.0 }
 0x8e4   :  { %6520 = vadd.xlane.f32.xlu0 %v6519_v27 }
 0x971   :  { %v6521_v53 = vpop.xlane.xlu0 %6520 }
 0x972   :  { %7735 = vlog2.f32 %v6521_v53 }
 0x97c   :  { %v7736_v45 = vpop.eup %7735 }
 0x97d   :  { %v6523_v57 = vmul.f32 0.6931472, %v7736_v45 }
 0x97f   :  { %v6524_v2 = vsub.f32 %v6516_v44, %v6523_v57 }
 0x981   :  { %6525 = vst [vmem:[#allocation2] sm:$0x3] %v6524_v2 }
 0x982   :  { %7748 = shalt.err (!%p7745_p4)
}
 0x983   :  { %s7749_s25 = scalar_lea.hbm %s11943_s12, 32 }
 0x984   :  { %p7750_p5 = scmp.ne.s32.totalorder %s11943_s12, %s7749_s25  ;;  %p7753_p6 = scmp.lt.u32.totalorder %s7749_s25, %s11943_s12 }
 0x986   :  { %p7755_p7 = pnand %p7753_p6, %p7750_p5 }
 0x988   :  { %7758 = shalt.err (!%p7755_p7)
}
 0x989   :  { %6535 = dma.vmem_to_hbm [thread:$0]  %s6533_s23, 32, %s11943_s12, [#allocation3]  }
 0x98a   :  { %7759 = dma.done.wait [#allocation3], 32  }
 0x98b   :  { %7760 = vsyncadd [#allocation3], 4294967264 }
 0x98c   :  { %6539 = vsyncpa [#allocation3], 1 }

</bundles_post_ra>
